<compile_context>
chip_gen: v5e
topology: v5e:2x2
jax: 0.10.0
libtpu: 0.0.40
codegen_flags: <defaults>
</compile_context>

<pallas_src>
import jax
import jax.numpy as jnp
from jax.experimental import pallas as pl
from jax.experimental.pallas import tpu as pltpu


def _fused_kernel(x_ref, res_ref, w1_ref, b1_ref, w2_ref, b2_ref, o_ref):
    # x_ref:   [1, C_in,  M]   f32   (stride-2 sub-sampled input, M = Ho*Wo)
    # res_ref: [1, C_mid, M]   f32   (residual x425)
    # w1_ref:  [C_mid, C_in]   bf16  (conv1 weight with BN1 scale folded in)
    # b1_ref:  [C_mid, 1]      f32   (folded BN1 bias)
    # w2_ref:  [C_out, C_mid]  bf16  (conv2 weight with BN2 scale folded in)
    # b2_ref:  [C_out, 1]      f32   (folded BN2 bias)
    # o_ref:   [1, C_out, M]   f32
    x = x_ref[0]                                            # [C_in, M] f32

    # conv1 (1x1) as channel matmul on the MXU, bf16 operands, f32 accumulate.
    y = jnp.dot(w1_ref[...], x.astype(jnp.bfloat16),
                preferred_element_type=jnp.float32)         # [C_mid, M]
    y = y + b1_ref[...]                                     # BN1 (scale in w1)
    y = y + res_ref[0]                                      # residual add
    y = jnp.maximum(y, 0.0)                                 # ReLU (f32 epilogue)

    # conv2 (1x1) as channel matmul.
    z = jnp.dot(w2_ref[...], y.astype(jnp.bfloat16),
                preferred_element_type=jnp.float32)         # [C_out, M]
    z = z + b2_ref[...]                                     # BN2 (scale in w2)
    o_ref[0] = z.astype(o_ref.dtype)


def _fold_bn(gamma, beta, mean, var, eps=1e-5):
    scale = gamma / jnp.sqrt(var + eps)
    bias = beta - mean * scale
    return scale, bias


def prepare_params(params, eps=1e-5):
    """One-time weight prep: fold BN scales into conv weights, cast to bf16."""
    c_mid, c_in = params["w1"].shape[0], params["w1"].shape[1]
    c_out = params["w2"].shape[0]
    s1, b1 = _fold_bn(params["g1"], params["be1"], params["m1"], params["v1"], eps)
    s2, b2 = _fold_bn(params["g2"], params["be2"], params["m2"], params["v2"], eps)
    w1s = (params["w1"].reshape(c_mid, c_in) * s1[:, None]).astype(jnp.bfloat16)
    w2s = (params["w2"].reshape(c_out, c_mid) * s2[:, None]).astype(jnp.bfloat16)
    return {
        "w1s": w1s,
        "b1": b1.reshape(c_mid, 1).astype(jnp.float32),
        "w2s": w2s,
        "b2": b2.reshape(c_out, 1).astype(jnp.float32),
    }


@jax.jit
def fused_forward(x409, x425, prepped):
    """x409: [N, 336, 14, 14] NCHW, x425: [N, 888, 7, 7] NCHW -> [N, 888, 7, 7]."""
    w1s, b1 = prepped["w1s"], prepped["b1"]
    w2s, b2 = prepped["w2s"], prepped["b2"]

    N, C_in, H, W = x409.shape
    C_mid = w1s.shape[0]
    C_out = w2s.shape[0]

    # 1x1 conv, stride 2: keep every other spatial location (cheap XLA slice).
    xs = x409[:, :, ::2, ::2]                      # [N, C_in, Ho, Wo]
    Ho, Wo = xs.shape[2], xs.shape[3]
    M = Ho * Wo

    # Channel-major flat matrices; these reshapes are metadata-only (no data
    # movement), so no NCHW<->NHWC transposes are required anywhere.
    x_mat = xs.reshape(N, C_in, M).astype(jnp.float32)
    res_mat = x425.reshape(N, C_mid, M).astype(jnp.float32)

    out_mat = pl.pallas_call(
        _fused_kernel,
        out_shape=jax.ShapeDtypeStruct((N, C_out, M), jnp.float32),
        grid=(N,),
        in_specs=[
            pl.BlockSpec((1, C_in, M), lambda n: (n, 0, 0)),
            pl.BlockSpec((1, C_mid, M), lambda n: (n, 0, 0)),
            pl.BlockSpec((C_mid, C_in), lambda n: (0, 0)),   # resident weights
            pl.BlockSpec((C_mid, 1), lambda n: (0, 0)),
            pl.BlockSpec((C_out, C_mid), lambda n: (0, 0)),  # resident weights
            pl.BlockSpec((C_out, 1), lambda n: (0, 0)),
        ],
        out_specs=pl.BlockSpec((1, C_out, M), lambda n: (n, 0, 0)),
        compiler_params=pltpu.CompilerParams(
            dimension_semantics=("parallel",),
            vmem_limit_bytes=32 * 1024 * 1024,
        ),
    )(x_mat, res_mat, w1s, b1, w2s, b2)

    # Free reshape back to NCHW spatial dims.
    return out_mat.reshape(N, C_out, Ho, Wo)


def reference_forward(x409, x425, params):
    """Pure-JAX reference (NHWC code path, same bf16-weight / f32-accumulate
    numerics as the kernel) for correctness check."""
    c_mid, c_in = params["w1"].shape[0], params["w1"].shape[1]
    c_out = params["w2"].shape[0]
    s1, b1 = _fold_bn(params["g1"], params["be1"], params["m1"], params["v1"])
    s2, b2 = _fold_bn(params["g2"], params["be2"], params["m2"], params["v2"])
    w1 = (params["w1"].reshape(c_mid, c_in) * s1[:, None]).astype(jnp.bfloat16)
    w2 = (params["w2"].reshape(c_out, c_mid) * s2[:, None]).astype(jnp.bfloat16)

    xs = x409[:, :, ::2, ::2]
    N, C, Ho, Wo = xs.shape
    x_mat = jnp.transpose(xs, (0, 2, 3, 1)).reshape(-1, C).astype(jnp.bfloat16)
    y = jnp.dot(x_mat, w1.T, preferred_element_type=jnp.float32) + b1[None, :]
    r = jnp.transpose(x425, (0, 2, 3, 1)).reshape(-1, c_mid)
    y = jnp.maximum(y + r, 0.0)
    z = jnp.dot(y.astype(jnp.bfloat16), w2.T,
                preferred_element_type=jnp.float32) + b2[None, :]
    return z.reshape(N, Ho, Wo, c_out).transpose(0, 3, 1, 2).astype(jnp.float32)


def make_params(key):
    keys = jax.random.split(key, 10)
    p = {}
    p["w1"] = jax.random.normal(keys[0], (888, 336, 1, 1), jnp.float32) * 0.05
    p["w2"] = jax.random.normal(keys[1], (888, 888, 1, 1), jnp.float32) * 0.03
    p["g1"] = 0.5 + jax.random.uniform(keys[2], (888,), jnp.float32)
    p["be1"] = jax.random.normal(keys[3], (888,), jnp.float32) * 0.1
    p["m1"] = jax.random.normal(keys[4], (888,), jnp.float32) * 0.1
    p["v1"] = 0.5 + jax.random.uniform(keys[5], (888,), jnp.float32)
    p["g2"] = 0.5 + jax.random.uniform(keys[6], (888,), jnp.float32)
    p["be2"] = jax.random.normal(keys[7], (888,), jnp.float32) * 0.1
    p["m2"] = jax.random.normal(keys[8], (888,), jnp.float32) * 0.1
    p["v2"] = 0.5 + jax.random.uniform(keys[9], (888,), jnp.float32)
    return p


if __name__ == "__main__":
    key = jax.random.PRNGKey(0)
    k1, k2, kp = jax.random.split(key, 3)

    # Shapes implied by the module's forward.
    x409 = jax.random.normal(k1, (1, 336, 14, 14), jnp.float32)
    x425 = jax.random.normal(k2, (1, 888, 7, 7), jnp.float32)
    params = make_params(kp)

    prepped = prepare_params(params)          # one-time weight packing

    out = fused_forward(x409, x425, prepped)
    out = jax.block_until_ready(out)

    ref = reference_forward(x409, x425, params)
    assert out.shape == (1, 888, 7, 7), out.shape
    assert jnp.allclose(out, ref, atol=2e-3, rtol=2e-3), "mismatch vs reference"

    print("KERNEL_OK")
</pallas_src>

<mosaic_0001>
module attributes {stable_mosaic.version = 11 : i64} {
  func.func @_fused_kernel(%arg0: i32, %arg1: memref<1x336x49xf32, #tpu.memory_space<vmem>>, %arg2: memref<1x888x49xf32, #tpu.memory_space<vmem>>, %arg3: memref<888x336xbf16, #tpu.memory_space<vmem>>, %arg4: memref<888x1xf32, #tpu.memory_space<vmem>>, %arg5: memref<888x888xbf16, #tpu.memory_space<vmem>>, %arg6: memref<888x1xf32, #tpu.memory_space<vmem>>, %arg7: memref<1x888x49xf32, #tpu.memory_space<vmem>>) attributes {dimension_semantics = [#tpu.dimension_semantics<parallel>], iteration_bounds = array<i64: 1>, scalar_prefetch = 0 : i64, scratch_operands = 0 : i64, tpu.core_type = #tpu.core_type<tc>, window_params = [{transform_indices = @transform_0, window_bounds = array<i64: 1, 336, 49>}, {transform_indices = @transform_1, window_bounds = array<i64: 1, 888, 49>}, {pipeline_mode = #tpu.pipeline_mode<synchronous>, transform_indices = @transform_2, window_bounds = array<i64: 888, 336>}, {pipeline_mode = #tpu.pipeline_mode<synchronous>, transform_indices = @transform_3, window_bounds = array<i64: 888, 1>}, {pipeline_mode = #tpu.pipeline_mode<synchronous>, transform_indices = @transform_4, window_bounds = array<i64: 888, 888>}, {pipeline_mode = #tpu.pipeline_mode<synchronous>, transform_indices = @transform_5, window_bounds = array<i64: 888, 1>}, {transform_indices = @transform_6, window_bounds = array<i64: 1, 888, 49>}]} {
    %c0 = arith.constant 0 : index
    %c0_0 = arith.constant 0 : index
    %c0_1 = arith.constant 0 : index
    %0 = vector.load %arg1[%c0, %c0_0, %c0_1] : memref<1x336x49xf32, #tpu.memory_space<vmem>>, vector<1x336x49xf32>
    %1 = vector.shape_cast %0 : vector<1x336x49xf32> to vector<336x49xf32>
    %c0_2 = arith.constant 0 : index
    %c0_3 = arith.constant 0 : index
    %2 = vector.load %arg3[%c0_2, %c0_3] : memref<888x336xbf16, #tpu.memory_space<vmem>>, vector<888x336xbf16>
    %3 = arith.truncf %1 : vector<336x49xf32> to vector<336x49xbf16>
    %cst = arith.constant dense<0.000000e+00> : vector<888x49xf32>
    %4 = tpu.matmul %2, %3, %cst {dimension_numbers = #tpu.dot_dimension_numbers<[1], [0], [0], [1], [0, 0, 1, 1], [], []>} : vector<888x336xbf16>, vector<336x49xbf16>, vector<888x49xf32> -> vector<888x49xf32>
    %c0_4 = arith.constant 0 : index
    %c0_5 = arith.constant 0 : index
    %5 = vector.load %arg4[%c0_4, %c0_5] : memref<888x1xf32, #tpu.memory_space<vmem>>, vector<888x1xf32>
    %6 = vector.broadcast %5 : vector<888x1xf32> to vector<888x49xf32>
    %7 = arith.addf %4, %6 : vector<888x49xf32>
    %c0_6 = arith.constant 0 : index
    %c0_7 = arith.constant 0 : index
    %c0_8 = arith.constant 0 : index
    %8 = vector.load %arg2[%c0_6, %c0_7, %c0_8] : memref<1x888x49xf32, #tpu.memory_space<vmem>>, vector<1x888x49xf32>
    %9 = vector.shape_cast %8 : vector<1x888x49xf32> to vector<888x49xf32>
    %10 = arith.addf %7, %9 : vector<888x49xf32>
    %cst_9 = arith.constant 0.000000e+00 : f32
    %11 = vector.broadcast %cst_9 : f32 to vector<888x49xf32>
    %12 = arith.maximumf %10, %11 : vector<888x49xf32>
    %c0_10 = arith.constant 0 : index
    %c0_11 = arith.constant 0 : index
    %13 = vector.load %arg5[%c0_10, %c0_11] : memref<888x888xbf16, #tpu.memory_space<vmem>>, vector<888x888xbf16>
    %14 = arith.truncf %12 : vector<888x49xf32> to vector<888x49xbf16>
    %cst_12 = arith.constant dense<0.000000e+00> : vector<888x49xf32>
    %15 = tpu.matmul %13, %14, %cst_12 {dimension_numbers = #tpu.dot_dimension_numbers<[1], [0], [0], [1], [0, 0, 1, 1], [], []>} : vector<888x888xbf16>, vector<888x49xbf16>, vector<888x49xf32> -> vector<888x49xf32>
    %c0_13 = arith.constant 0 : index
    %c0_14 = arith.constant 0 : index
    %16 = vector.load %arg6[%c0_13, %c0_14] : memref<888x1xf32, #tpu.memory_space<vmem>>, vector<888x1xf32>
    %17 = vector.broadcast %16 : vector<888x1xf32> to vector<888x49xf32>
    %18 = arith.addf %15, %17 : vector<888x49xf32>
    %c0_15 = arith.constant 0 : index
    %c0_16 = arith.constant 0 : index
    %c0_17 = arith.constant 0 : index
    %19 = vector.load %arg7[%c0_15, %c0_16, %c0_17] : memref<1x888x49xf32, #tpu.memory_space<vmem>>, vector<1x888x49xf32>
    %20 = vector.shape_cast %19 : vector<1x888x49xf32> to vector<888x49xf32>
    %21 = vector.shape_cast %18 : vector<888x49xf32> to vector<1x888x49xf32>
    tpu.vector_store %arg7[%c0_15, %c0_16, %c0_17], %21 {strides = array<i32>} : memref<1x888x49xf32, #tpu.memory_space<vmem>>, vector<1x888x49xf32>,
    return
  }
  func.func @transform_0(%arg0: i32) -> (i32, i32, i32) {
    %c0_i32 = arith.constant 0 : i32
    %c0_i32_0 = arith.constant 0 : i32
    %c0_i32_1 = arith.constant 0 : i32
    return %arg0, %c0_i32, %c0_i32_0 : i32, i32, i32
  }
  func.func @transform_1(%arg0: i32) -> (i32, i32, i32) {
    %c0_i32 = arith.constant 0 : i32
    %c0_i32_0 = arith.constant 0 : i32
    %c0_i32_1 = arith.constant 0 : i32
    return %arg0, %c0_i32, %c0_i32_0 : i32, i32, i32
  }
  func.func @transform_2(%arg0: i32) -> (i32, i32) {
    %c0_i32 = arith.constant 0 : i32
    %c0_i32_0 = arith.constant 0 : i32
    %c0_i32_1 = arith.constant 0 : i32
    return %c0_i32, %c0_i32_0 : i32, i32
  }
  func.func @transform_3(%arg0: i32) -> (i32, i32) {
    %c0_i32 = arith.constant 0 : i32
    %c0_i32_0 = arith.constant 0 : i32
    %c0_i32_1 = arith.constant 0 : i32
    return %c0_i32, %c0_i32_0 : i32, i32
  }
  func.func @transform_4(%arg0: i32) -> (i32, i32) {
    %c0_i32 = arith.constant 0 : i32
    %c0_i32_0 = arith.constant 0 : i32
    %c0_i32_1 = arith.constant 0 : i32
    return %c0_i32, %c0_i32_0 : i32, i32
  }
  func.func @transform_5(%arg0: i32) -> (i32, i32) {
    %c0_i32 = arith.constant 0 : i32
    %c0_i32_0 = arith.constant 0 : i32
    %c0_i32_1 = arith.constant 0 : i32
    return %c0_i32, %c0_i32_0 : i32, i32
  }
  func.func @transform_6(%arg0: i32) -> (i32, i32, i32) {
    %c0_i32 = arith.constant 0 : i32
    %c0_i32_0 = arith.constant 0 : i32
    %c0_i32_1 = arith.constant 0 : i32
    return %arg0, %c0_i32, %c0_i32_0 : i32, i32, i32
  }
}

</mosaic_0001>

<bundles_post_ra>
// kernel: fused_forward.1
= control target key start
LH: loop header
LB: loop body
LE: loop exit
PB: predicated region body
PF: predicated region fallthrough
CT: control target
= control target key end

     0   :  { %v11477_v0 = vmov 0   ;;  %vm1810_vm0 = vcmask 654336   ;;  %vm6460_vm1 = vcmask 1043456   ;;  %vm6291_vm2 = vcmask 982016   ;;  %s19598_s3 = inlined_call_operand.vmem [shape: f32[888,1], index: 3, kind: input, shape index: {}]   ;;  %s19599_s0 = inlined_call_operand.vmem [shape: f32[1,336,49], index: 0, kind: input, shape index: {}]   ;;  %s19600_s2 = inlined_call_operand.vmem [shape: bf16[888,336], index: 2, kind: input, shape index: {}]   ;;  %s19601_s5 = inlined_call_operand.vmem [shape: f32[888,1], index: 5, kind: input, shape index: {}]   ;;  %s19602_s1 = inlined_call_operand.vmem [shape: f32[1,888,49], index: 1, kind: input, shape index: {}]   ;;  %s19603_s4 = inlined_call_operand.vmem [shape: bf16[888,888], index: 4, kind: input, shape index: {}]   ;;  %s19604_s6 = inlined_call_operand.vmem [shape: f32[1,888,49], index: 6, kind: output, shape index: {}]  }
   0x1   :  { %11474 = vset.pattern.permute.xlu2 %v11477_v0  ;;  %11473 = vset.pattern.permute.xlu1 %v11477_v0  ;;  %v339_v1 = vld [vmem:[%s19598_s3 + $0xf0] sm:$0xff]  ;;  %v321_v3 = vld [vmem:[%s19598_s3 + $0x60] sm:$0xff]  ;;  %v39_v5 = vld [vmem:[%s19599_s0 + $0x78] sm:$0xff]  ;;  %vm8480_vm3 = vcmask 400384  }
   0x2   :  { %v323_v2 = vld [vmem:[%s19598_s3 + $0x70] sm:$0xff]  ;;  %11472 = vset.pattern.permute.xlu0 %v11477_v0  ;;  %572 = vperm.xlu1 %11473, %v339_v1   ;;  %v36_v6 = vld [vmem:[%s19599_s0 + $0x60] sm:$0xff]  ;;  %v37_v8 = vld [vmem:[%s19599_s0 + $0x68] sm:$0xff] }
   0x3   :  { %v38_v4 = vld [vmem:[%s19599_s0 + $0x70] sm:$0xff]  ;;  %492 = vperm.xlu0 %11472, %v323_v2   ;;  %482 = vperm.xlu2 %11474, %v321_v3   ;;  %v294_v9 = vpack.c.bf16 %v37_v8, %v36_v6  ;;  %v35_v11 = vld [vmem:[%s19599_s0 + $0x58] sm:$0xff]  ;;  %v322_v14 = vld [vmem:[%s19598_s3 + $0x68] sm:$0xff] }
   0x4   :  { %v295_v7 = vpack.c.bf16 %v39_v5, %v38_v4  ;;  %v34_v10 = vld [vmem:[%s19599_s0 + $0x50] sm:$0xff]  ;;  %v340_v12 = vld [vmem:[%s19598_s3 + $0xf8] sm:$0xff]  ;;  %v32_v16 = vld [vmem:[%s19599_s0 + $0x40] sm:$0xff] }
   0x5   :  { %v324_v13 = vld [vmem:[%s19598_s3 + $0x78] sm:$0xff]  ;;  %v293_v15 = vpack.c.bf16 %v35_v11, %v34_v10  ;;  %v33_v17 = vld [vmem:[%s19599_s0 + $0x48] sm:$0xff]  ;;  %v30_v19 = vld [vmem:[%s19599_s0 + $0x30] sm:$0xff] }
   0x6   :  { %11458 = vmatpush.bf16.msra.mxu1 %v295_v7  ;;  %1979 = vmatpush.bf16.msra.mxu0 %v295_v7  ;;  %v292_v18 = vpack.c.bf16 %v33_v17, %v32_v16  ;;  %v31_v20 = vld [vmem:[%s19599_s0 + $0x38] sm:$0xff]  ;;  %v338_v21 = vld [vmem:[%s19598_s3 + $0xe8] sm:$0xff]  ;;  %v337_v22 = vld [vmem:[%s19598_s3 + $0xe0] sm:$0xff] }
   0x7   :  { %v355_v23 = vld [vmem:[%s19598_s3 + $0x170] sm:$0xff]  ;;  %v291_v24 = vpack.c.bf16 %v31_v20, %v30_v19  ;;  %v28_v25 = vld [vmem:[%s19599_s0 + $0x20] sm:$0xff]  ;;  %v29_v26 = vld [vmem:[%s19599_s0 + $0x28] sm:$0xff] }
   0x8   :  { %v290_v27 = vpack.c.bf16 %v29_v26, %v28_v25  ;;  %v26_v28 = vld [vmem:[%s19599_s0 + $0x10] sm:$0xff]  ;;  %v27_v29 = vld [vmem:[%s19599_s0 + $0x18] sm:$0xff]  ;;  %v24_v34 = vld [vmem:[%s19599_s0] sm:$0xff] }
   0x9   :  { %v319_v30 = vld [vmem:[%s19598_s3 + $0x50] sm:$0xff]  ;;  %v356_v31 = vld [vmem:[%s19598_s3 + $0x178] sm:$0xff]  ;;  %v289_v33 = vpack.c.bf16 %v27_v29, %v26_v28  ;;  %v25_v35 = vld [vmem:[%s19599_s0 + $0x8] sm:$0xff] }
   0xa   :  { %11459 = vmatpush.bf16.msra.mxu1 %v294_v9  ;;  %1980 = vmatpush.bf16.msra.mxu0 %v294_v9  ;;  %v320_v32 = vld [vmem:[%s19598_s3 + $0x58] sm:$0xff]  ;;  %v288_v36 = vpack.c.bf16 %v25_v35, %v24_v34  ;;  %v8934_v37 = vld [vmem:[%s19600_s2 + $0x2a0] sm:$0xf]  ;;  %v10993_v38 = vld [vmem:[%s19600_s2 + $0x2a8] sm:$0xf0] }
   0xb   :  { %577 = vperm.xlu1 %11473, %v340_v12   ;;  %497 = vperm.xlu0 %11472, %v324_v13   ;;  %v336_v39 = vld [vmem:[%s19598_s3 + $0xd8] sm:$0xff]  ;;  %v335_v40 = vld [vmem:[%s19598_s3 + $0xd0] sm:$0xff]  ;;  %v353_v41 = vld [vmem:[%s19598_s3 + $0x160] sm:$0xff]  ;;  %v8935_v42 = vor.u32 %v10993_v38, %v8934_v37 }
   0xc   :  { %487 = vperm.xlu2 %11474, %v322_v14   ;;  %v317_v43 = vld [vmem:[%s19598_s3 + $0x40] sm:$0xff]  ;;  %v354_v44 = vld [vmem:[%s19598_s3 + $0x168] sm:$0xff]  ;;  %v8946_v46 = vld [vmem:[%s19600_s2 + $0x2b8] sm:$0xf] }
   0xd   :  { %v318_v45 = vld [vmem:[%s19598_s3 + $0x48] sm:$0xff]  ;;  %v10996_v47 = vld [vmem:[%s19600_s2 + $0x2c0] sm:$0xf0]  ;;  %v351_v50 = vld [vmem:[%s19598_s3 + $0x150] sm:$0xff] }
   0xe   :  { %11460 = vmatpush.bf16.msra.mxu1 %v293_v15  ;;  %1981 = vmatpush.bf16.msra.mxu0 %v293_v15  ;;  %v334_v48 = vld [vmem:[%s19598_s3 + $0xc8] sm:$0xff]  ;;  %v333_v49 = vld [vmem:[%s19598_s3 + $0xc0] sm:$0xff]  ;;  %v8947_v51 = vor.u32 %v10996_v47, %v8946_v46  ;;  %v315_v52 = vld [vmem:[%s19598_s3 + $0x30] sm:$0xff] }
   0xf   :  { %v352_v53 = vld [vmem:[%s19598_s3 + $0x158] sm:$0xff]  ;;  %v8958_v55 = vld [vmem:[%s19600_s2 + $0x2d0] sm:$0xf]  ;;  %v349_v59 = vld [vmem:[%s19598_s3 + $0x140] sm:$0xff] }
  0x10   :  { %v316_v54 = vld [vmem:[%s19598_s3 + $0x38] sm:$0xff]  ;;  %v331_v58 = vld [vmem:[%s19598_s3 + $0xb0] sm:$0xff]  ;;  %v313_v61 = vld [vmem:[%s19598_s3 + $0x20] sm:$0xff] }
  0x11   :  { %v10999_v56 = vld [vmem:[%s19600_s2 + $0x2d8] sm:$0xf0]  ;;  %v350_v62 = vld [vmem:[%s19598_s3 + $0x148] sm:$0xff]  ;;  %v11002_v1 = vld [vmem:[%s19600_s2 + $0x2f0] sm:$0xf0] }
  0x12   :  { %11461 = vmatpush.bf16.msra.mxu1 %v292_v18  ;;  %1982 = vmatpush.bf16.msra.mxu0 %v292_v18  ;;  %v332_v57 = vld [vmem:[%s19598_s3 + $0xb8] sm:$0xff]  ;;  %v8959_v60 = vor.u32 %v10999_v56, %v8958_v55  ;;  %v314_v63 = vld [vmem:[%s19598_s3 + $0x28] sm:$0xff]  ;;  %v329_v3 = vld [vmem:[%s19598_s3 + $0xa0] sm:$0xff] }
  0x13   :  { %567 = vperm.xlu1 %11473, %v338_v21   ;;  %562 = vperm.xlu0 %11472, %v337_v22   ;;  %v8970_v0 = vld [vmem:[%s19600_s2 + $0x2e8] sm:$0xf]  ;;  %v347_v4 = vld [vmem:[%s19598_s3 + $0x130] sm:$0xff]  ;;  %v348_v7 = vld [vmem:[%s19598_s3 + $0x138] sm:$0xff] }
  0x14   :  { %652 = vperm.xlu2 %11474, %v355_v23   ;;  %v330_v2 = vld [vmem:[%s19598_s3 + $0xa8] sm:$0xff]  ;;  %v8971_v5 = vor.u32 %v11002_v1, %v8970_v0  ;;  %v311_v6 = vld [vmem:[%s19598_s3 + $0x10] sm:$0xff]  ;;  %v312_v8 = vld [vmem:[%s19598_s3 + $0x18] sm:$0xff] }
  0x15   :  { %v8982_v10 = vld [vmem:[%s19600_s2 + $0x300] sm:$0xf]  ;;  %v11005_v11 = vld [vmem:[%s19600_s2 + $0x308] sm:$0xf0]  ;;  %v328_v12 = vld [vmem:[%s19598_s3 + $0x98] sm:$0xff] }
  0x16   :  { %11462 = vmatpush.bf16.msra.mxu1 %v291_v24  ;;  %1983 = vmatpush.bf16.msra.mxu0 %v291_v24  ;;  %v327_v13 = vld [vmem:[%s19598_s3 + $0x90] sm:$0xff]  ;;  %v345_v14 = vld [vmem:[%s19598_s3 + $0x120] sm:$0xff]  ;;  %v8983_v15 = vor.u32 %v11005_v11, %v8982_v10  ;;  %v346_v18 = vld [vmem:[%s19598_s3 + $0x128] sm:$0xff] }
  0x17   :  { %v309_v17 = vld [vmem:[%s19598_s3] sm:$0xff]  ;;  %v310_v19 = vld [vmem:[%s19598_s3 + $0x8] sm:$0xff]  ;;  %v8994_v21 = vld [vmem:[%s19600_s2 + $0x318] sm:$0xf] }
  0x18   :  { %v11008_v22 = vld [vmem:[%s19600_s2 + $0x320] sm:$0xf0]  ;;  %v326_v23 = vld [vmem:[%s19598_s3 + $0x88] sm:$0xff]  ;;  %v343_v25 = vld [vmem:[%s19598_s3 + $0x110] sm:$0xff] }
  0x19   :  { %v325_v24 = vld [vmem:[%s19598_s3 + $0x80] sm:$0xff]  ;;  %v8995_v26 = vor.u32 %v11008_v22, %v8994_v21  ;;  %v11011_v37 = vld [vmem:[%s19600_s2 + $0x338] sm:$0xf0]  ;;  %v386_v47 = vld [vmem:[%s19598_s3 + $0x268] sm:$0xff] }
  0x1a   :  { %11463 = vmatpush.bf16.msra.mxu1 %v290_v27  ;;  %1984 = vmatpush.bf16.msra.mxu0 %v290_v27  ;;  %v388_v38 = vld [vmem:[%s19598_s3 + $0x278] sm:$0xff]  ;;  %v371_v55 = vld [vmem:[%s19598_s3 + $0x1f0] sm:$0xff] }
  0x1b   :  { %472 = vperm.xlu1 %11473, %v319_v30   ;;  %657 = vperm.xlu0 %11472, %v356_v31   ;;  %v341_v30 = vld [vmem:[%s19598_s3 + $0x100] sm:$0xff]  ;;  %v344_v31 = vld [vmem:[%s19598_s3 + $0x118] sm:$0xff] }
  0x1c   :  { %477 = vperm.xlu2 %11474, %v320_v32   ;;  %v342_v32 = vld [vmem:[%s19598_s3 + $0x108] sm:$0xff]  ;;  %v404_v46 = vld [vmem:[%s19598_s3 + $0x2f8] sm:$0xff] }
  0x1d   :  { %v9042_v22 = vld [vmem:[%s19600_s2 + $0x378] sm:$0xf] }
  0x1e   :  { %11464 = vmatpush.bf16.msra.mxu1 %v289_v33  ;;  %1985 = vmatpush.bf16.msra.mxu0 %v289_v33 }
  0x22   :  { %11465 = vmatpush.bf16.msra.mxu1 %v288_v36  ;;  %1986 = vmatpush.bf16.msra.mxu0 %v288_v36  ;;  %v9006_v36 = vld [vmem:[%s19600_s2 + $0x330] sm:$0xf] }
  0x23   :  { %557 = vperm.xlu1 %11473, %v336_v39   ;;  %552 = vperm.xlu0 %11472, %v335_v40   ;;  %v387_v39 = vld [vmem:[%s19598_s3 + $0x270] sm:$0xff] }
  0x24   :  { %642 = vperm.xlu2 %11474, %v353_v41   ;;  %v403_v40 = vld [vmem:[%s19598_s3 + $0x2f0] sm:$0xff]  ;;  %v9007_v41 = vor.u32 %v11011_v37, %v9006_v36 }
  0x25   :  { %2127 = vmatmul.bf16.vlgmr.msra.gmra.mxu1 %v8935_v42 }
  0x2b   :  { %462 = vperm.xlu1 %11473, %v317_v43   ;;  %647 = vperm.xlu0 %11472, %v354_v44  }
  0x2c   :  { %467 = vperm.xlu2 %11474, %v318_v45   ;;  %v385_v45 = vld [vmem:[%s19598_s3 + $0x260] sm:$0xff] }
  0x33   :  { %547 = vperm.xlu1 %11473, %v334_v48   ;;  %542 = vperm.xlu0 %11472, %v333_v49  }
  0x34   :  { %632 = vperm.xlu2 %11474, %v351_v50  }
  0x35   :  { %2132 = vmatmul.bf16.gmra.mxu1 %v8947_v51  ;;  %v9018_v51 = vld [vmem:[%s19600_s2 + $0x348] sm:$0xf] }
  0x3b   :  { %452 = vperm.xlu1 %11473, %v315_v52   ;;  %637 = vperm.xlu0 %11472, %v352_v53   ;;  %v11014_v52 = vld [vmem:[%s19600_s2 + $0x350] sm:$0xf0]  ;;  %v402_v53 = vld [vmem:[%s19598_s3 + $0x2e8] sm:$0xff] }
  0x3c   :  { %457 = vperm.xlu2 %11474, %v316_v54   ;;  %v401_v54 = vld [vmem:[%s19598_s3 + $0x2e0] sm:$0xff]  ;;  %v9019_v56 = vor.u32 %v11014_v52, %v9018_v51  ;;  %v9054_v51 = vld [vmem:[%s19600_s2 + $0x390] sm:$0xf]  ;;  %v11023_v52 = vld [vmem:[%s19600_s2 + $0x398] sm:$0xf0] }
  0x43   :  { %537 = vperm.xlu1 %11473, %v332_v57   ;;  %532 = vperm.xlu0 %11472, %v331_v58  }
  0x44   :  { %622 = vperm.xlu2 %11474, %v349_v59  }
  0x45   :  { %2137 = vmatmul.bf16.gmra.mxu1 %v8959_v60  ;;  %v419_v60 = vld [vmem:[%s19598_s3 + $0x370] sm:$0xff] }
  0x4b   :  { %442 = vperm.xlu1 %11473, %v313_v61   ;;  %627 = vperm.xlu0 %11472, %v350_v62   ;;  %v372_v61 = vld [vmem:[%s19598_s3 + $0x1f8] sm:$0xff]  ;;  %v383_v62 = vld [vmem:[%s19598_s3 + $0x250] sm:$0xff] }
  0x4c   :  { %447 = vperm.xlu2 %11474, %v314_v63  }
  0x53   :  { %527 = vperm.xlu1 %11473, %v330_v2   ;;  %522 = vperm.xlu0 %11472, %v329_v3   ;;  %v9030_v2 = vld [vmem:[%s19600_s2 + $0x360] sm:$0xf]  ;;  %v11017_v3 = vld [vmem:[%s19600_s2 + $0x368] sm:$0xf0] }
  0x54   :  { %612 = vperm.xlu2 %11474, %v347_v4   ;;  %v399_v4 = vld [vmem:[%s19598_s3 + $0x2d0] sm:$0xff] }
  0x55   :  { %2142 = vmatmul.bf16.gmra.mxu1 %v8971_v5  ;;  %v384_v5 = vld [vmem:[%s19598_s3 + $0x258] sm:$0xff] }
  0x5b   :  { %432 = vperm.xlu1 %11473, %v311_v6   ;;  %617 = vperm.xlu0 %11472, %v348_v7   ;;  %v400_v6 = vld [vmem:[%s19598_s3 + $0x2d8] sm:$0xff]  ;;  %v9031_v7 = vor.u32 %v11017_v3, %v9030_v2 }
  0x5c   :  { %437 = vperm.xlu2 %11474, %v312_v8   ;;  %v380_v3 = vld [vmem:[%s19598_s3 + $0x238] sm:$0xff] }
  0x5d   :  { %v11693_v9 = vpop.permute.xlu2 %482 }
  0x63   :  { %517 = vperm.xlu1 %11473, %v328_v12   ;;  %512 = vperm.xlu0 %11472, %v327_v13   ;;  %v370_v13 = vld [vmem:[%s19598_s3 + $0x1e8] sm:$0xff] }
  0x64   :  { %602 = vperm.xlu2 %11474, %v345_v14   ;;  %v369_v14 = vld [vmem:[%s19598_s3 + $0x1e0] sm:$0xff] }
  0x65   :  { %2147 = vmatmul.bf16.gmra.mxu1 %v8983_v15  ;;  %v417_v15 = vld [vmem:[%s19598_s3 + $0x360] sm:$0xff] }
  0x66   :  { %v11710_v16 = vpop.permute.xlu2 %487 }
  0x6b   :  { %422 = vperm.xlu1 %11473, %v309_v17   ;;  %607 = vperm.xlu0 %11472, %v346_v18  }
  0x6c   :  { %427 = vperm.xlu2 %11474, %v310_v19  }
  0x6e   :  { %v11721_v20 = vpop.permute.xlu2 %652 }
  0x6f   :  { %19605 = vst [vmem:[#allocation2_spill] sm:$0xff] %v11721_v20 }
  0x73   :  { %507 = vperm.xlu1 %11473, %v326_v23   ;;  %502 = vperm.xlu0 %11472, %v325_v24   ;;  %v11020_v23 = vld [vmem:[%s19600_s2 + $0x380] sm:$0xf0] }
  0x74   :  { %592 = vperm.xlu2 %11474, %v343_v25   ;;  %v11738_v27 = vpop.permute.xlu1 %572  ;;  %v381_v24 = vld [vmem:[%s19598_s3 + $0x240] sm:$0xff]  ;;  %v418_v25 = vld [vmem:[%s19598_s3 + $0x368] sm:$0xff] }
  0x75   :  { %2152 = vmatmul.bf16.gmra.mxu1 %v8995_v26  ;;  %19606 = vst [vmem:[#allocation3_spill] sm:$0xff] %v11738_v27  ;;  %v11740_v28 = vpop.permute.xlu0 %492  ;;  %v382_v26 = vld [vmem:[%s19598_s3 + $0x248] sm:$0xff] }
  0x76   :  { %v11742_v29 = vpop.permute.xlu2 %477 }
  0x7b   :  { %582 = vperm.xlu1 %11473, %v341_v30   ;;  %597 = vperm.xlu0 %11472, %v344_v31   ;;  %v9043_v30 = vor.u32 %v11020_v23, %v9042_v22  ;;  %v11026_v22 = vld [vmem:[%s19600_s2 + $0x3b0] sm:$0xf0]  ;;  %v365_v23 = vld [vmem:[%s19598_s3 + $0x1c0] sm:$0xff] }
  0x7c   :  { %587 = vperm.xlu2 %11474, %v342_v32  }
  0x7d   :  { %v11753_v33 = vpop.permute.xlu1 %577  ;;  %v11755_v34 = vpop.permute.xlu0 %497 }
  0x7e   :  { %19607 = vst [vmem:[#allocation4_spill] sm:$0xff] %v11753_v33  ;;  %v11757_v35 = vpop.permute.xlu2 %642 }
  0x7f   :  { %19608 = vst [vmem:[#allocation5_spill] sm:$0xff] %v11757_v35  ;;  %v3684_v35 = vld [vmem:[%s19601_s5 + $0x40] sm:$0xff] }
  0x83   :  { %817 = vperm.xlu1 %11473, %v388_v38   ;;  %812 = vperm.xlu0 %11472, %v387_v39   ;;  %v398_v38 = vld [vmem:[%s19598_s3 + $0x2c8] sm:$0xff]  ;;  %v397_v39 = vld [vmem:[%s19598_s3 + $0x2c0] sm:$0xff] }
  0x84   :  { %892 = vperm.xlu2 %11474, %v403_v40   ;;  %v367_v40 = vld [vmem:[%s19598_s3 + $0x1d0] sm:$0xff] }
  0x85   :  { %2157 = vmatmul.bf16.gmra.mxu1 %v9007_v41  ;;  %v11774_v42 = vpop.permute.xlu1 %567  ;;  %v11776_v43 = vpop.permute.xlu0 %562 }
  0x86   :  { %19609 = vst [vmem:[#allocation6_spill] sm:$0xff] %v11774_v42  ;;  %v11778_v44 = vpop.permute.xlu2 %467 }
  0x87   :  { %19610 = vst [vmem:[#allocation7_spill] sm:$0xff] %v11776_v43 }
  0x8b   :  { %802 = vperm.xlu1 %11473, %v385_v45   ;;  %897 = vperm.xlu0 %11472, %v404_v46  }
  0x8c   :  { %807 = vperm.xlu2 %11474, %v386_v47  }
  0x8d   :  { %v11789_v48 = vpop.permute.xlu1 %472  ;;  %v11791_v49 = vpop.permute.xlu0 %657 }
  0x8e   :  { %19611 = vst [vmem:[#allocation8_spill] sm:$0xff] %v11791_v49  ;;  %v11793_v50 = vpop.permute.xlu2 %632 }
  0x8f   :  { %19612 = vst [vmem:[#allocation9_spill] sm:$0xff] %v11793_v50 }
  0x93   :  { %887 = vperm.xlu1 %11473, %v402_v53   ;;  %882 = vperm.xlu0 %11472, %v401_v54   ;;  %v415_v53 = vld [vmem:[%s19598_s3 + $0x350] sm:$0xff]  ;;  %v368_v54 = vld [vmem:[%s19598_s3 + $0x1d8] sm:$0xff] }
  0x94   :  { %732 = vperm.xlu2 %11474, %v371_v55   ;;  %v416_v55 = vld [vmem:[%s19598_s3 + $0x358] sm:$0xff] }
  0x95   :  { %2162 = vmatmul.bf16.gmra.mxu1 %v9019_v56  ;;  %v11810_v57 = vpop.permute.xlu1 %557  ;;  %v11812_v58 = vpop.permute.xlu0 %552  ;;  %v9055_v56 = vor.u32 %v11023_v52, %v9054_v51  ;;  %v414_v51 = vld [vmem:[%s19598_s3 + $0x348] sm:$0xff]  ;;  %v413_v52 = vld [vmem:[%s19598_s3 + $0x340] sm:$0xff] }
  0x96   :  { %19613 = vst [vmem:[#allocation10_spill] sm:$0xff] %v11810_v57  ;;  %v11814_v59 = vpop.permute.xlu2 %457 }
  0x97   :  { %19614 = vst [vmem:[#allocation11_spill] sm:$0xff] %v11812_v58  ;;  %v10949_v58 = vld [vmem:[%s19600_s2 + $0x148] sm:$0xf0] }
  0x9b   :  { %972 = vperm.xlu1 %11473, %v419_v60   ;;  %737 = vperm.xlu0 %11472, %v372_v61  }
  0x9c   :  { %792 = vperm.xlu2 %11474, %v383_v62  }
  0x9d   :  { %v11825_v63 = vpop.permute.xlu1 %462  ;;  %v11827_v0 = vpop.permute.xlu0 %647 }
  0x9e   :  { %19615 = vst [vmem:[#allocation12_spill] sm:$0xff] %v11827_v0  ;;  %v11829_v1 = vpop.permute.xlu2 %622 }
  0x9f   :  { %19616 = vst [vmem:[#allocation13_spill] sm:$0xff] %v11829_v1  ;;  %v9134_v1 = vld [vmem:[%s19600_s2 + $0x428] sm:$0xf] }
  0xa2   :  { %v11846_v8 = vpop.f32.mrf.mxu1 }
  0xa3   :  { %19617 = vst [vmem:[#allocation14_spill] sm:$0xff] %v11846_v8  ;;  %872 = vperm.xlu1 %11473, %v399_v4   ;;  %797 = vperm.xlu0 %11472, %v384_v5   ;;  %v379_v4 = vld [vmem:[%s19598_s3 + $0x230] sm:$0xff] }
  0xa4   :  { %877 = vperm.xlu2 %11474, %v400_v6   ;;  %v395_v5 = vld [vmem:[%s19598_s3 + $0x2b0] sm:$0xff] }
  0xa5   :  { %2167 = vmatmul.bf16.gmra.mxu1 %v9031_v7  ;;  %v11848_v10 = vpop.permute.xlu1 %547  ;;  %v11850_v11 = vpop.permute.xlu0 %542 }
  0xa6   :  { %19618 = vst [vmem:[#allocation15_spill] sm:$0xff] %v11848_v10  ;;  %v11852_v12 = vpop.permute.xlu2 %447  ;;  %v3714_v10 = vld [vmem:[%s19601_s5 + $0x130] sm:$0xff] }
  0xa7   :  { %19619 = vst [vmem:[#allocation16_spill] sm:$0xff] %v11850_v11 }
  0xaa   :  { %v11863_v17 = vpop.f32.mrf.mxu1 }
  0xab   :  { %19620 = vst [vmem:[#allocation17_spill] sm:$0xff] %v11863_v17  ;;  %727 = vperm.xlu1 %11473, %v370_v13   ;;  %722 = vperm.xlu0 %11472, %v369_v14  }
  0xac   :  { %962 = vperm.xlu2 %11474, %v417_v15   ;;  %v9066_v15 = vld [vmem:[%s19600_s2 + $0x3a8] sm:$0xf] }
  0xad   :  { %v11865_v18 = vpop.permute.xlu1 %452  ;;  %v11867_v19 = vpop.permute.xlu0 %637 }
  0xae   :  { %19621 = vst [vmem:[#allocation18_spill] sm:$0xff] %v11867_v19  ;;  %v11869_v21 = vpop.permute.xlu2 %612 }
  0xaf   :  { %19622 = vst [vmem:[#allocation19_spill] sm:$0xff] %v11869_v21 }
  0xb2   :  { %v11886_v31 = vpop.f32.mrf.mxu1 }
  0xb3   :  { %19623 = vst [vmem:[#allocation20_spill] sm:$0xff] %v11886_v31  ;;  %782 = vperm.xlu1 %11473, %v381_v24   ;;  %967 = vperm.xlu0 %11472, %v418_v25   ;;  %v396_v24 = vld [vmem:[%s19598_s3 + $0x2b8] sm:$0xff]  ;;  %v366_v25 = vld [vmem:[%s19598_s3 + $0x1c8] sm:$0xff] }
  0xb4   :  { %787 = vperm.xlu2 %11474, %v382_v26   ;;  %v9067_v26 = vor.u32 %v11026_v22, %v9066_v15  ;;  %v393_v15 = vld [vmem:[%s19598_s3 + $0x2a0] sm:$0xff]  ;;  %v378_v22 = vld [vmem:[%s19598_s3 + $0x228] sm:$0xff] }
  0xb5   :  { %2172 = vmatmul.bf16.gmra.mxu1 %v9043_v30  ;;  %v11888_v32 = vpop.permute.xlu1 %537  ;;  %v11890_v36 = vpop.permute.xlu0 %532 }
  0xb6   :  { %19624 = vst [vmem:[#allocation21_spill] sm:$0xff] %v11888_v32  ;;  %v11892_v37 = vpop.permute.xlu2 %437  ;;  %v3726_v32 = vld [vmem:[%s19601_s5 + $0x190] sm:$0xff] }
  0xb7   :  { %19625 = vst [vmem:[#allocation22_spill] sm:$0xff] %v11890_v36 }
  0xba   :  { %v11903_v41 = vpop.f32.mrf.mxu1 }
  0xbb   :  { %19626 = vst [vmem:[#allocation23_spill] sm:$0xff] %v11903_v41  ;;  %867 = vperm.xlu1 %11473, %v398_v38   ;;  %862 = vperm.xlu0 %11472, %v397_v39  }
  0xbc   :  { %712 = vperm.xlu2 %11474, %v367_v40  }
  0xbd   :  { %v11905_v45 = vpop.permute.xlu1 %442  ;;  %v11907_v46 = vpop.permute.xlu0 %627 }
  0xbe   :  { %19627 = vst [vmem:[#allocation24_spill] sm:$0xff] %v11907_v46  ;;  %v11909_v47 = vpop.permute.xlu2 %602  ;;  %v3678_v46 = vld [vmem:[%s19601_s5 + $0x10] sm:$0xff] }
  0xbf   :  { %19628 = vst [vmem:[#allocation25_spill] sm:$0xff] %v11909_v47 }
  0xc2   :  { %v11926_v60 = vpop.f32.mrf.mxu1 }
  0xc3   :  { %19629 = vst [vmem:[#allocation26_spill] sm:$0xff] %v11926_v60  ;;  %952 = vperm.xlu1 %11473, %v415_v53   ;;  %717 = vperm.xlu0 %11472, %v368_v54   ;;  %v377_v53 = vld [vmem:[%s19598_s3 + $0x220] sm:$0xff]  ;;  %v392_v60 = vld [vmem:[%s19598_s3 + $0x298] sm:$0xff] }
  0xc4   :  { %957 = vperm.xlu2 %11474, %v416_v55  }
  0xc5   :  { %2177 = vmatmul.bf16.gmra.mxu1 %v9055_v56  ;;  %v11928_v61 = vpop.permute.xlu1 %527  ;;  %v11930_v62 = vpop.permute.xlu0 %522 }
  0xc6   :  { %v11932_v2 = vpop.permute.xlu2 %427 }
  0xca   :  { %v11943_v6 = vpop.f32.mrf.mxu1 }
  0xcb   :  { %19630 = vst [vmem:[#allocation27_spill] sm:$0xff] %v11943_v6  ;;  %777 = vperm.xlu1 %11473, %v380_v3   ;;  %772 = vperm.xlu0 %11472, %v379_v4   ;;  %v9078_v4 = vld [vmem:[%s19600_s2 + $0x3c0] sm:$0xf] }
  0xcc   :  { %852 = vperm.xlu2 %11474, %v395_v5   ;;  %v11029_v5 = vld [vmem:[%s19600_s2 + $0x3c8] sm:$0xf0]  ;;  %v9126_v6 = vld [vmem:[%s19600_s2 + $0x420] sm:$0xf] }
  0xcd   :  { %v11945_v7 = vpop.permute.xlu1 %432  ;;  %v11947_v13 = vpop.permute.xlu0 %617 }
  0xce   :  { %19631 = vst [vmem:[#allocation28_spill] sm:$0xff] %v11947_v13  ;;  %v11949_v14 = vpop.permute.xlu2 %592 }
  0xcf   :  { %19632 = vst [vmem:[#allocation29_spill] sm:$0xff] %v11949_v14 }
  0xd2   :  { %v11966_v30 = vpop.f32.mrf.mxu1 }
  0xd3   :  { %19633 = vst [vmem:[#allocation30_spill] sm:$0xff] %v11966_v30  ;;  %702 = vperm.xlu1 %11473, %v365_v23   ;;  %857 = vperm.xlu0 %11472, %v396_v24   ;;  %v394_v23 = vld [vmem:[%s19598_s3 + $0x2a8] sm:$0xff]  ;;  %v9079_v24 = vor.u32 %v11029_v5, %v9078_v4  ;;  %v363_v4 = vld [vmem:[%s19598_s3 + $0x1b0] sm:$0xff] }
  0xd4   :  { %707 = vperm.xlu2 %11474, %v366_v25   ;;  %v411_v5 = vld [vmem:[%s19598_s3 + $0x330] sm:$0xff] }
  0xd5   :  { %2182 = vmatmul.bf16.gmra.mxu1 %v9067_v26  ;;  %v11968_v38 = vpop.permute.xlu1 %517  ;;  %v11970_v39 = vpop.permute.xlu0 %512 }
  0xd6   :  { %v11972_v40 = vpop.permute.xlu2 %587 }
  0xd7   :  { %19634 = vst [vmem:[#allocation31_spill] sm:$0xff] %v11972_v40  ;;  %v9158_v40 = vld [vmem:[%s19600_s2 + $0x458] sm:$0xf] }
  0xda   :  { %v11983_v54 = vpop.f32.mrf.mxu1 }
  0xdb   :  { %19635 = vst [vmem:[#allocation32_spill] sm:$0xff] %v11983_v54  ;;  %947 = vperm.xlu1 %11473, %v414_v51   ;;  %942 = vperm.xlu0 %11472, %v413_v52  }
  0xdc   :  { %762 = vperm.xlu2 %11474, %v377_v53   ;;  %v364_v53 = vld [vmem:[%s19598_s3 + $0x1b8] sm:$0xff] }
  0xdd   :  { %v11985_v55 = vpop.permute.xlu1 %422  ;;  %v11987_v56 = vpop.permute.xlu0 %607 }
  0xde   :  { %19636 = vst [vmem:[#allocation33_spill] sm:$0xff] %v11987_v56  ;;  %v11989_v3 = vpop.permute.xlu2 %892  ;;  %v10940_v56 = vld [vmem:[%s19600_s2 + $0x100] sm:$0xf0] }
  0xdf   :  { %19637 = vst [vmem:[#allocation34_spill] sm:$0xff] %v11989_v3  ;;  %v9090_v3 = vld [vmem:[%s19600_s2 + $0x3d8] sm:$0xf] }
  0xe2   :  { %v12006_v25 = vpop.f32.mrf.mxu1 }
  0xe3   :  { %19638 = vst [vmem:[#allocation35_spill] sm:$0xff] %v12006_v25  ;;  %842 = vperm.xlu1 %11473, %v393_v15   ;;  %767 = vperm.xlu0 %11472, %v378_v22  }
  0xe4   :  { %847 = vperm.xlu2 %11474, %v394_v23  }
  0xe5   :  { %2187 = vmatmul.bf16.gmra.mxu1 %v9079_v24  ;;  %v12008_v26 = vpop.permute.xlu1 %507  ;;  %v12010_v51 = vpop.permute.xlu0 %502 }
  0xe6   :  { %v12012_v52 = vpop.permute.xlu2 %807 }
  0xe7   :  { %19639 = vst [vmem:[#allocation36_spill] sm:$0xff] %v12012_v52  ;;  %v11032_v52 = vld [vmem:[%s19600_s2 + $0x3e0] sm:$0xf0] }
  0xea   :  { %v12023_v15 = vpop.f32.mrf.mxu1 }
  0xeb   :  { %19640 = vst [vmem:[#allocation37_spill] sm:$0xff] %v12023_v15  ;;  %697 = vperm.xlu1 %11473, %v364_v53   ;;  %692 = vperm.xlu0 %11472, %v363_v4   ;;  %v375_v53 = vld [vmem:[%s19598_s3 + $0x210] sm:$0xff]  ;;  %v412_v4 = vld [vmem:[%s19598_s3 + $0x338] sm:$0xff]  ;;  %v9091_v15 = vor.u32 %v11032_v52, %v9090_v3  ;;  %v361_v52 = vld [vmem:[%s19598_s3 + $0x1a0] sm:$0xff] }
  0xec   :  { %932 = vperm.xlu2 %11474, %v411_v5   ;;  %v376_v5 = vld [vmem:[%s19598_s3 + $0x218] sm:$0xff]  ;;  %v391_v3 = vld [vmem:[%s19598_s3 + $0x290] sm:$0xff] }
  0xed   :  { %v12025_v22 = vpop.permute.xlu1 %582  ;;  %v12027_v23 = vpop.permute.xlu0 %597 }
  0xee   :  { %19641 = vst [vmem:[#allocation38_spill] sm:$0xff] %v12025_v22  ;;  %v12029_v24 = vpop.permute.xlu2 %732 }
  0xef   :  { %19642 = vst [vmem:[#allocation39_spill] sm:$0xff] %v12027_v23  ;;  %v3708_v23 = vld [vmem:[%s19601_s5 + $0x100] sm:$0xff] }
  0xf0   :  { %19643 = vst [vmem:[#allocation40_spill] sm:$0xff] %v12029_v24  ;;  %v8598_v24 = vld [vmem:[%s19600_s2] sm:$0xf] }
  0xf2   :  { %v12046_v25 = vpop.f32.mrf.mxu1 }
  0xf3   :  { %19644 = vst [vmem:[#allocation41_spill] sm:$0xff] %v12046_v25  ;;  %752 = vperm.xlu1 %11473, %v375_v53   ;;  %937 = vperm.xlu0 %11472, %v412_v4   ;;  %v374_v25 = vld [vmem:[%s19598_s3 + $0x208] sm:$0xff] }
  0xf4   :  { %757 = vperm.xlu2 %11474, %v376_v5  }
  0xf5   :  { %2192 = vmatmul.bf16.gmra.mxu1 %v9091_v15  ;;  %v12048_v31 = vpop.permute.xlu1 %817  ;;  %v12050_v41 = vpop.permute.xlu0 %812 }
  0xf6   :  { %19645 = vst [vmem:[#allocation42_spill] sm:$0xff] %v12048_v31  ;;  %v12052_v54 = vpop.permute.xlu2 %792  ;;  %v9102_v31 = vld [vmem:[%s19600_s2 + $0x3f0] sm:$0xf] }
  0xf7   :  { %19646 = vst [vmem:[#allocation43_spill] sm:$0xff] %v12050_v41  ;;  %v11035_v41 = vld [vmem:[%s19600_s2 + $0x3f8] sm:$0xf0] }
  0xf8   :  { %19647 = vst [vmem:[#allocation44_spill] sm:$0xff] %v12052_v54 }
  0xfa   :  { %v12063_v53 = vpop.f32.mrf.mxu1 }
  0xfb   :  { %19648 = vst [vmem:[#allocation45_spill] sm:$0xff] %v12063_v53  ;;  %837 = vperm.xlu1 %11473, %v392_v60   ;;  %832 = vperm.xlu0 %11472, %v391_v3   ;;  %v409_v60 = vld [vmem:[%s19598_s3 + $0x320] sm:$0xff]  ;;  %v362_v3 = vld [vmem:[%s19598_s3 + $0x1a8] sm:$0xff] }
  0xfc   :  { %682 = vperm.xlu2 %11474, %v361_v52   ;;  %v410_v52 = vld [vmem:[%s19598_s3 + $0x328] sm:$0xff] }
  0xfd   :  { %v12065_v15 = vpop.permute.xlu1 %802  ;;  %v12067_v4 = vpop.permute.xlu0 %897 }
  0xfe   :  { %19649 = vst [vmem:[#allocation46_spill] sm:$0xff] %v12065_v15  ;;  %v12069_v5 = vpop.permute.xlu2 %877 }
  0xff   :  { %19650 = vst [vmem:[#allocation47_spill] sm:$0xff] %v12067_v4  ;;  %v9103_v4 = vor.u32 %v11035_v41, %v9102_v31  ;;  %v373_v31 = vld [vmem:[%s19598_s3 + $0x200] sm:$0xff] }
 0x100   :  { %19651 = vst [vmem:[#allocation48_spill] sm:$0xff] %v12069_v5  ;;  %v389_v41 = vld [vmem:[%s19598_s3 + $0x280] sm:$0xff] }
 0x102   :  { %v12086_v5 = vpop.f32.mrf.mxu1 }
 0x103   :  { %922 = vperm.xlu1 %11473, %v409_v60   ;;  %687 = vperm.xlu0 %11472, %v362_v3  }
 0x104   :  { %927 = vperm.xlu2 %11474, %v410_v52  }
 0x105   :  { %2197 = vmatmul.bf16.gmra.mxu1 %v9103_v4  ;;  %v12088_v15 = vpop.permute.xlu1 %887  ;;  %v12090_v54 = vpop.permute.xlu0 %882 }
 0x106   :  { %19652 = vst [vmem:[#allocation49_spill] sm:$0xff] %v12088_v15  ;;  %v12092_v53 = vpop.permute.xlu2 %962  ;;  %v11038_v15 = vld [vmem:[%s19600_s2 + $0x410] sm:$0xf0] }
 0x107   :  { %19653 = vst [vmem:[#allocation50_spill] sm:$0xff] %v12090_v54 }
 0x108   :  { %19654 = vst [vmem:[#allocation51_spill] sm:$0xff] %v12092_v53  ;;  %v9114_v53 = vld [vmem:[%s19600_s2 + $0x408] sm:$0xf] }
 0x10a   :  { %v12103_v60 = vpop.f32.mrf.mxu1 }
 0x10b   :  { %19655 = vst [vmem:[#allocation52_spill] sm:$0xff] %v12103_v60  ;;  %747 = vperm.xlu1 %11473, %v374_v25   ;;  %742 = vperm.xlu0 %11472, %v373_v31   ;;  %v390_v25 = vld [vmem:[%s19598_s3 + $0x288] sm:$0xff]  ;;  %v9115_v31 = vor.u32 %v11038_v15, %v9114_v53 }
 0x10c   :  { %822 = vperm.xlu2 %11474, %v389_v41   ;;  %v11041_v15 = vld [vmem:[%s19600_s2 + $0x428] sm:$0xf0] }
 0x10d   :  { %v12105_v4 = vpop.permute.xlu1 %972  ;;  %v12107_v3 = vpop.permute.xlu0 %737 }
 0x10e   :  { %19656 = vst [vmem:[#allocation53_spill] sm:$0xff] %v12105_v4  ;;  %v12109_v52 = vpop.permute.xlu2 %787 }
 0x10f   :  { %19657 = vst [vmem:[#allocation54_spill] sm:$0xff] %v12107_v3 }
 0x110   :  { %19658 = vst [vmem:[#allocation55_spill] sm:$0xff] %v12109_v52 }
 0x112   :  { %v12120_v41 = vpop.f32.mrf.mxu1 }
 0x113   :  { %827 = vperm.xlu0 %11472, %v390_v25   ;;  %v64_v25 = vld [vmem:[%s19599_s0 + $0x140] sm:$0xff] }
 0x115   :  { %2202 = vmatmul.bf16.gmra.mxu1 %v9115_v31  ;;  %v12122_v4 = vpop.permute.xlu1 %872  ;;  %v12124_v54 = vpop.permute.xlu0 %797  ;;  %v65_v31 = vld [vmem:[%s19599_s0 + $0x148] sm:$0xff] }
 0x116   :  { %19659 = vst [vmem:[#allocation56_spill] sm:$0xff] %v12122_v4  ;;  %v12126_v52 = vpop.permute.xlu2 %712  ;;  %v308_v4 = vpack.c.bf16 %v65_v31, %v64_v25 }
 0x117   :  { %19660 = vst [vmem:[#allocation57_spill] sm:$0xff] %v12124_v54  ;;  %v9127_v54 = vor.u32 %v11041_v15, %v9126_v6  ;;  %v10909_v6 = vld [vmem:[%s19600_s2 + $0x8] sm:$0xf0] }
 0x118   :  { %19661 = vst [vmem:[#allocation58_spill] sm:$0xff] %v12126_v52  ;;  %11466 = vmatpush.bf16.msra.mxu3 %v308_v4  ;;  %2558 = vmatpush.bf16.msra.mxu2 %v308_v4  ;;  %v8599_v15 = vor.u32 %v10909_v6, %v8598_v24  ;;  %v58_v24 = vld [vmem:[%s19599_s0 + $0x110] sm:$0xff]  ;;  %v59_v6 = vld [vmem:[%s19599_s0 + $0x118] sm:$0xff] }
 0x11a   :  { %v12128_v60 = vpop.f32.mrf.mxu1  ;;  %1987 = vmatmul.bf16.vlgmr.msra.gmra.mxu0 %v8599_v15 }
 0x11d   :  { %v12130_v3 = vpop.permute.xlu1 %727  ;;  %v12135_v30 = vpop.permute.xlu0 %722 }
 0x11e   :  { %19662 = vst [vmem:[#allocation59_spill] sm:$0xff] %v12130_v3  ;;  %v12137_v53 = vpop.permute.xlu2 %957 }
 0x11f   :  { %19663 = vst [vmem:[#allocation60_spill] sm:$0xff] %v12135_v30  ;;  %v63_v30 = vld [vmem:[%s19599_s0 + $0x138] sm:$0xff] }
 0x120   :  { %19664 = vst [vmem:[#allocation61_spill] sm:$0xff] %v12137_v53  ;;  %v62_v53 = vld [vmem:[%s19599_s0 + $0x130] sm:$0xff] }
 0x121   :  { %v307_v3 = vpack.c.bf16 %v63_v30, %v62_v53  ;;  %v60_v30 = vld [vmem:[%s19599_s0 + $0x120] sm:$0xff]  ;;  %v61_v53 = vld [vmem:[%s19599_s0 + $0x128] sm:$0xff] }
 0x122   :  { %v12148_v52 = vpop.f32.mrf.mxu1 }
 0x123   :  { %19665 = vst [vmem:[#allocation62_spill] sm:$0xff] %v12148_v52  ;;  %11467 = vmatpush.bf16.msra.mxu3 %v307_v3  ;;  %2559 = vmatpush.bf16.msra.mxu2 %v307_v3  ;;  %v306_v52 = vpack.c.bf16 %v61_v53, %v60_v30  ;;  %v9138_v3 = vld [vmem:[%s19600_s2 + $0x438] sm:$0xf]  ;;  %v11044_v53 = vld [vmem:[%s19600_s2 + $0x440] sm:$0xf0] }
 0x125   :  { %2207 = vmatmul.bf16.gmra.mxu1 %v9127_v54  ;;  %v12162_v4 = vpop.permute.xlu1 %782  ;;  %v12164_v25 = vpop.permute.xlu0 %967 }
 0x126   :  { %19666 = vst [vmem:[#allocation63_spill] sm:$0xff] %v12162_v4  ;;  %v12166_v31 = vpop.permute.xlu2 %852 }
 0x127   :  { %19667 = vst [vmem:[#allocation64_spill] sm:$0xff] %v12164_v25  ;;  %11468 = vmatpush.bf16.msra.mxu3 %v306_v52  ;;  %2560 = vmatpush.bf16.msra.mxu2 %v306_v52  ;;  %v305_v25 = vpack.c.bf16 %v59_v6, %v58_v24  ;;  %v56_v52 = vld [vmem:[%s19599_s0 + $0x100] sm:$0xff]  ;;  %v57_v24 = vld [vmem:[%s19599_s0 + $0x108] sm:$0xff] }
 0x128   :  { %19668 = vst [vmem:[#allocation65_spill] sm:$0xff] %v12166_v31  ;;  %v304_v6 = vpack.c.bf16 %v57_v24, %v56_v52 }
 0x12a   :  { %v12174_v54 = vpop.f32.mrf.mxu1 }
 0x12b   :  { %19669 = vst [vmem:[#allocation66_spill] sm:$0xff] %v12174_v54  ;;  %11469 = vmatpush.bf16.msra.mxu3 %v305_v25  ;;  %2561 = vmatpush.bf16.msra.mxu2 %v305_v25  ;;  %v10997_v54 = vld [vmem:[%s19600_s2 + $0x2c8] sm:$0xf0]  ;;  %v8610_v25 = vld [vmem:[%s19600_s2 + $0x18] sm:$0xf] }
 0x12d   :  { %v12182_v31 = vpop.permute.xlu1 %867  ;;  %v12187_v15 = vpop.permute.xlu0 %862 }
 0x12e   :  { %19670 = vst [vmem:[#allocation67_spill] sm:$0xff] %v12182_v31  ;;  %v12189_v30 = vpop.permute.xlu2 %707  ;;  %v9139_v31 = vor.u32 %v11044_v53, %v9138_v3  ;;  %v10912_v3 = vld [vmem:[%s19600_s2 + $0x20] sm:$0xf0] }
 0x12f   :  { %19671 = vst [vmem:[#allocation68_spill] sm:$0xff] %v12187_v15  ;;  %v8954_v15 = vld [vmem:[%s19600_s2 + $0x2c0] sm:$0xf]  ;;  %11470 = vmatpush.bf16.msra.mxu3 %v304_v6  ;;  %2562 = vmatpush.bf16.msra.mxu2 %v304_v6  ;;  %v8611_v52 = vor.u32 %v10912_v3, %v8610_v25  ;;  %v11000_v3 = vld [vmem:[%s19600_s2 + $0x2e0] sm:$0xf0] }
 0x130   :  { %19672 = vst [vmem:[#allocation69_spill] sm:$0xff] %v12189_v30  ;;  %v8955_v17 = vor.u32 %v10997_v54, %v8954_v15 }
 0x131   :  { %1992 = vmatmul.bf16.gmra.mxu0 %v8611_v52 }
 0x132   :  { %v12206_v4 = vpop.f32.mrf.mxu1  ;;  %9285 = vmatmul.msk.bf16.vlgmr.msra.gmra.mxu3 %vm1810_vm0, %v8955_v17  ;;  %v11047_v17 = vld [vmem:[%s19600_s2 + $0x458] sm:$0xf0] }
 0x133   :  { %19673 = vst [vmem:[#allocation70_spill] sm:$0xff] %v12206_v4 }
 0x135   :  { %2212 = vmatmul.bf16.gmra.mxu1 %v9139_v31  ;;  %v12214_v53 = vpop.permute.xlu1 %952  ;;  %v12217_v24 = vpop.permute.xlu0 %717  ;;  %v9150_v31 = vld [vmem:[%s19600_s2 + $0x450] sm:$0xf] }
 0x136   :  { %19674 = vst [vmem:[#allocation71_spill] sm:$0xff] %v12214_v53  ;;  %v763_v4 = vpop.permute.xlu2 %762  ;;  %v9151_v25 = vor.u32 %v11047_v17, %v9150_v31  ;;  %v8622_v53 = vld [vmem:[%s19600_s2 + $0x30] sm:$0xf]  ;;  %v408_v17 = vld [vmem:[%s19598_s3 + $0x318] sm:$0xff] }
 0x137   :  { %19675 = vst [vmem:[#allocation72_spill] sm:$0xff] %v12217_v24  ;;  %v12220_v54 = vadd.f32 %v12086_v5, %v763_v4  ;;  %v359_v5 = vld [vmem:[%s19598_s3 + $0x190] sm:$0xff]  ;;  %v8658_v24 = vld [vmem:[%s19600_s2 + $0x78] sm:$0xf] }
 0x138   :  { %672 = vperm.xlu1 %11473, %v359_v5  }
 0x139   :  { %19676 = vst [vmem:[#allocation73_spill] sm:$0xff] %v12220_v54 }
 0x13a   :  { %v12222_v15 = vpop.f32.mrf.mxu1 }
 0x13b   :  { %19677 = vst [vmem:[#allocation74_spill] sm:$0xff] %v12222_v15 }
 0x13d   :  { %v778_v6 = vpop.permute.xlu1 %777  ;;  %v773_v30 = vpop.permute.xlu0 %772 }
 0x13e   :  { %v12225_v8 = vadd.f32 %v12128_v60, %v778_v6  ;;  %v12237_v4 = vadd.f32 %v12120_v41, %v773_v30  ;;  %v8966_v60 = vld [vmem:[%s19600_s2 + $0x2d8] sm:$0xf]  ;;  %v10915_v41 = vld [vmem:[%s19600_s2 + $0x38] sm:$0xf0] }
 0x13f   :  { %v8967_v6 = vor.u32 %v11000_v3, %v8966_v60  ;;  %v8623_v30 = vor.u32 %v10915_v41, %v8622_v53  ;;  %v11050_v53 = vld [vmem:[%s19600_s2 + $0x470] sm:$0xf0] }
 0x140   :  { %19678 = vst [vmem:[#allocation75_spill] sm:$0xff] %v12225_v8  ;;  %917 = vperm.xlu1 %11473, %v408_v17   ;;  %v11003_v17 = vld [vmem:[%s19600_s2 + $0x2f8] sm:$0xf0] }
 0x141   :  { %19679 = vst [vmem:[#allocation76_spill] sm:$0xff] %v12237_v4  ;;  %1997 = vmatmul.bf16.gmra.mxu0 %v8623_v30  ;;  %v8978_v30 = vld [vmem:[%s19600_s2 + $0x2f0] sm:$0xf]  ;;  %v8646_v4 = vld [vmem:[%s19600_s2 + $0x60] sm:$0xf] }
 0x142   :  { %v12245_v52 = vpop.f32.mrf.mxu1  ;;  %9286 = vmatmul.msk.bf16.gmra.mxu3 %vm1810_vm0, %v8967_v6  ;;  %v405_v6 = vld [vmem:[%s19598_s3 + $0x300] sm:$0xff] }
 0x143   :  { %19680 = vst [vmem:[#allocation77_spill] sm:$0xff] %v12245_v52  ;;  %v8634_v52 = vld [vmem:[%s19600_s2 + $0x48] sm:$0xf] }
 0x145   :  { %2217 = vmatmul.bf16.gmra.mxu1 %v9151_v25  ;;  %v12254_v31 = vpop.permute.xlu0 %857  ;;  %v12259_v5 = vpop.permute.xlu1 %702  ;;  %v9162_v25 = vld [vmem:[%s19600_s2 + $0x468] sm:$0xf] }
 0x146   :  { %19681 = vst [vmem:[#allocation78_spill] sm:$0xff] %v12254_v31  ;;  %v9163_v41 = vor.u32 %v11050_v53, %v9162_v25  ;;  %v10918_v25 = vld [vmem:[%s19600_s2 + $0x50] sm:$0xf0] }
 0x147   :  { %19682 = vst [vmem:[#allocation79_spill] sm:$0xff] %v12259_v5  ;;  %v8635_v53 = vor.u32 %v10918_v25, %v8634_v52  ;;  %v407_v52 = vld [vmem:[%s19598_s3 + $0x310] sm:$0xff]  ;;  %v8990_v25 = vld [vmem:[%s19600_s2 + $0x308] sm:$0xf] }
 0x148   :  { %902 = vperm.xlu1 %11473, %v405_v6   ;;  %912 = vperm.xlu0 %11472, %v407_v52   ;;  %v10921_v52 = vld [vmem:[%s19600_s2 + $0x68] sm:$0xf0] }
 0x14a   :  { %v12261_v60 = vpop.f32.mrf.mxu1 }
 0x14b   :  { %19683 = vst [vmem:[#allocation80_spill] sm:$0xff] %v12261_v60  ;;  %v8979_v60 = vor.u32 %v11003_v17, %v8978_v30  ;;  %v9174_v30 = vld [vmem:[%s19600_s2 + $0x480] sm:$0xf]  ;;  %v11053_v17 = vld [vmem:[%s19600_s2 + $0x488] sm:$0xf0] }
 0x14d   :  { %v12263_v3 = vpop.permute.xlu0 %942 }
 0x14e   :  { %19684 = vst [vmem:[#allocation81_spill] sm:$0xff] %v12263_v3  ;;  %v12280_v3 = vpop.permute.xlu1 %947 }
 0x14f   :  { %19685 = vst [vmem:[#allocation82_spill] sm:$0xff] %v12280_v3 }
 0x151   :  { %2002 = vmatmul.bf16.gmra.mxu0 %v8635_v53  ;;  %v11006_v53 = vld [vmem:[%s19600_s2 + $0x310] sm:$0xf0] }
 0x152   :  { %v12282_v31 = vpop.f32.mrf.mxu1  ;;  %9287 = vmatmul.msk.bf16.gmra.mxu3 %vm1810_vm0, %v8979_v60  ;;  %v360_v60 = vld [vmem:[%s19598_s3 + $0x198] sm:$0xff]  ;;  %v8991_v8 = vor.u32 %v11006_v53, %v8990_v25 }
 0x153   :  { %19686 = vst [vmem:[#allocation83_spill] sm:$0xff] %v12282_v31  ;;  %677 = vperm.xlu2 %11474, %v360_v60   ;;  %v357_v60 = vld [vmem:[%s19598_s3 + $0x180] sm:$0xff] }
 0x155   :  { %2222 = vmatmul.bf16.gmra.mxu1 %v9163_v41  ;;  %v12291_v6 = vpop.permute.xlu0 %767  ;;  %v9175_v41 = vor.u32 %v11053_v17, %v9174_v30  ;;  %v8647_v30 = vor.u32 %v10921_v52, %v8646_v4  ;;  %v11056_v4 = vld [vmem:[%s19600_s2 + $0x4a0] sm:$0xf0] }
 0x156   :  { %19687 = vst [vmem:[#allocation84_spill] sm:$0xff] %v12291_v6  ;;  %v843_v3 = vpop.permute.xlu1 %842 }
 0x15a   :  { %v12293_v15 = vpop.f32.mrf.mxu1 }
 0x15b   :  { %19688 = vst [vmem:[#allocation85_spill] sm:$0xff] %v12293_v15  ;;  %662 = vperm.xlu2 %11474, %v357_v60   ;;  %v11009_v60 = vld [vmem:[%s19600_s2 + $0x328] sm:$0xf0] }
 0x15d   :  { %v12295_v31 = vpop.permute.xlu0 %692 }
 0x15e   :  { %19689 = vst [vmem:[#allocation86_spill] sm:$0xff] %v12295_v31  ;;  %v12324_v17 = vpop.permute.xlu1 %697  ;;  %v8730_v31 = vld [vmem:[%s19600_s2 + $0x108] sm:$0xf] }
 0x15f   :  { %19691 = vst [vmem:[#allocation88_spill] sm:$0xff] %v12324_v17 }
 0x161   :  { %2007 = vmatmul.bf16.gmra.mxu0 %v8647_v30  ;;  %v9002_v30 = vld [vmem:[%s19600_s2 + $0x320] sm:$0xf] }
 0x162   :  { %v12315_v15 = vpop.f32.mrf.mxu1  ;;  %9288 = vmatmul.msk.bf16.gmra.mxu3 %vm1810_vm0, %v8991_v8  ;;  %v9186_v8 = vld [vmem:[%s19600_s2 + $0x498] sm:$0xf]  ;;  %v9003_v6 = vor.u32 %v11009_v60, %v9002_v30 }
 0x163   :  { %19690 = vst [vmem:[#allocation87_spill] sm:$0xff] %v12315_v15  ;;  %v406_v15 = vld [vmem:[%s19598_s3 + $0x308] sm:$0xff]  ;;  %v9187_v52 = vor.u32 %v11056_v4, %v9186_v8 }
 0x164   :  { %907 = vperm.xlu2 %11474, %v406_v15   ;;  %v10924_v15 = vld [vmem:[%s19600_s2 + $0x80] sm:$0xf0] }
 0x165   :  { %2227 = vmatmul.bf16.gmra.mxu1 %v9175_v41  ;;  %v12329_v25 = vpop.permute.xlu0 %937  ;;  %v8659_v8 = vor.u32 %v10924_v15, %v8658_v24  ;;  %v11012_v24 = vld [vmem:[%s19600_s2 + $0x340] sm:$0xf0]  ;;  %v8670_v15 = vld [vmem:[%s19600_s2 + $0x90] sm:$0xf] }
 0x166   :  { %19692 = vst [vmem:[#allocation89_spill] sm:$0xff] %v12329_v25  ;;  %v12342_v41 = vpop.permute.xlu1 %752 }
 0x167   :  { %19694 = vst [vmem:[#allocation91_spill] sm:$0xff] %v12342_v41 }
 0x16a   :  { %v12331_v53 = vpop.f32.mrf.mxu1 }
 0x16b   :  { %19693 = vst [vmem:[#allocation90_spill] sm:$0xff] %v12331_v53 }
 0x16c   :  { %3799 = vperm.xlu2 %11474, %v3678_v46   ;;  %v3691_v46 = vld [vmem:[%s19601_s5 + $0x78] sm:$0xff] }
 0x16d   :  { %v833_v25 = vpop.permute.xlu0 %832 }
 0x16e   :  { %v838_v4 = vpop.permute.xlu1 %837 }
 0x171   :  { %2012 = vmatmul.bf16.gmra.mxu0 %v8659_v8  ;;  %v10927_v8 = vld [vmem:[%s19600_s2 + $0x98] sm:$0xf0] }
 0x172   :  { %v2193_v53 = vpop.f32.mrf.mxu1  ;;  %9289 = vmatmul.msk.bf16.gmra.mxu3 %vm1810_vm0, %v9003_v6 }
 0x173   :  { %v12350_v54 = vadd.f32 %v2193_v53, %v833_v25  ;;  %v9198_v25 = vld [vmem:[%s19600_s2 + $0x4b0] sm:$0xf]  ;;  %v11059_v53 = vld [vmem:[%s19600_s2 + $0x4b8] sm:$0xf0] }
 0x174   :  { %v9199_v30 = vor.u32 %v11059_v53, %v9198_v25  ;;  %v11062_v53 = vld [vmem:[%s19600_s2 + $0x4d0] sm:$0xf0] }
 0x175   :  { %19695 = vst [vmem:[#allocation92_spill] sm:$0xff] %v12350_v54  ;;  %2232 = vmatmul.bf16.gmra.mxu1 %v9187_v52  ;;  %v9014_v52 = vld [vmem:[%s19600_s2 + $0x338] sm:$0xf] }
 0x17a   :  { %v2195_v41 = vpop.f32.mrf.mxu1 }
 0x17b   :  { %v12359_v5 = vadd.f32 %v2195_v41, %v838_v4  ;;  %v9015_v41 = vor.u32 %v11012_v24, %v9014_v52  ;;  %v8671_v4 = vor.u32 %v10927_v8, %v8670_v15  ;;  %v8606_v24 = vld [vmem:[%s19600_s2 + $0x8] sm:$0xf]  ;;  %v11015_v8 = vld [vmem:[%s19600_s2 + $0x358] sm:$0xf0] }
 0x17d   :  { %19696 = vst [vmem:[#allocation93_spill] sm:$0xff] %v12359_v5 }
 0x181   :  { %2017 = vmatmul.bf16.gmra.mxu0 %v8671_v4 }
 0x182   :  { %v2198_v6 = vpop.f32.mrf.mxu1  ;;  %9290 = vmatmul.msk.bf16.gmra.mxu3 %vm1810_vm0, %v9015_v41 }
 0x183   :  { %v12373_v60 = vadd.f32 %v2198_v6, %v843_v3  ;;  %v9210_v3 = vld [vmem:[%s19600_s2 + $0x4c8] sm:$0xf]  ;;  %v9026_v6 = vld [vmem:[%s19600_s2 + $0x350] sm:$0xf] }
 0x184   :  { %v9211_v52 = vor.u32 %v11062_v53, %v9210_v3  ;;  %v9027_v4 = vor.u32 %v11015_v8, %v9026_v6  ;;  %v8682_v3 = vld [vmem:[%s19600_s2 + $0xa8] sm:$0xf]  ;;  %v10930_v53 = vld [vmem:[%s19600_s2 + $0xb0] sm:$0xf0]  ;;  %v11065_v6 = vld [vmem:[%s19600_s2 + $0x4e8] sm:$0xf0] }
 0x185   :  { %19697 = vst [vmem:[#allocation94_spill] sm:$0xff] %v12373_v60  ;;  %2237 = vmatmul.bf16.gmra.mxu1 %v9199_v30  ;;  %v10910_v30 = vld [vmem:[%s19600_s2 + $0x10] sm:$0xf0]  ;;  %v8618_v8 = vld [vmem:[%s19600_s2 + $0x20] sm:$0xf] }
 0x186   :  { %v8607_v15 = vor.u32 %v10910_v30, %v8606_v24  ;;  %v9222_v30 = vld [vmem:[%s19600_s2 + $0x4e0] sm:$0xf] }
 0x188   :  { %9256 = vmatmul.msk.bf16.vlgmr.msra.gmra.mxu2 %vm1810_vm0, %v8607_v15  ;;  %v9223_v15 = vor.u32 %v11065_v6, %v9222_v30  ;;  %v54_v6 = vld [vmem:[%s19599_s0 + $0xf0] sm:$0xff] }
 0x18a   :  { %v12382_v25 = vpop.f32.mrf.mxu1 }
 0x18b   :  { %19698 = vst [vmem:[#allocation95_spill] sm:$0xff] %v12382_v25 }
 0x192   :  { %v12399_v41 = vpop.f32.mrf.mxu1  ;;  %9291 = vmatmul.msk.bf16.gmra.mxu3 %vm1810_vm0, %v9027_v4 }
 0x193   :  { %19699 = vst [vmem:[#allocation96_spill] sm:$0xff] %v12399_v41  ;;  %v8683_v41 = vor.u32 %v10930_v53, %v8682_v3  ;;  %v11018_v53 = vld [vmem:[%s19600_s2 + $0x370] sm:$0xf0] }
 0x195   :  { %2242 = vmatmul.bf16.gmra.mxu1 %v9211_v52  ;;  %2022 = vmatmul.bf16.gmra.mxu0 %v8683_v41  ;;  %v10913_v52 = vld [vmem:[%s19600_s2 + $0x28] sm:$0xf0]  ;;  %v9038_v41 = vld [vmem:[%s19600_s2 + $0x368] sm:$0xf] }
 0x196   :  { %v8619_v3 = vor.u32 %v10913_v52, %v8618_v8  ;;  %v9039_v30 = vor.u32 %v11018_v53, %v9038_v41  ;;  %v8694_v8 = vld [vmem:[%s19600_s2 + $0xc0] sm:$0xf]  ;;  %v10933_v52 = vld [vmem:[%s19600_s2 + $0xc8] sm:$0xf0] }
 0x197   :  { %v12441_v60 = vpop.f32.mrf.mxu0  ;;  %v8695_v41 = vor.u32 %v10933_v52, %v8694_v8  ;;  %v9234_v52 = vld [vmem:[%s19600_s2 + $0x4f8] sm:$0xf] }
 0x198   :  { %9257 = vmatmul.msk.bf16.gmra.mxu2 %vm1810_vm0, %v8619_v3  ;;  %v52_v3 = vld [vmem:[%s19599_s0 + $0xe0] sm:$0xff] }
 0x19a   :  { %v12412_v24 = vpop.f32.mrf.mxu1 }
 0x19b   :  { %19700 = vst [vmem:[#allocation97_spill] sm:$0xff] %v12412_v24  ;;  %v55_v24 = vld [vmem:[%s19599_s0 + $0xf8] sm:$0xff] }
 0x19c   :  { %v303_v25 = vpack.c.bf16 %v55_v24, %v54_v6  ;;  %v53_v24 = vld [vmem:[%s19599_s0 + $0xe8] sm:$0xff] }
 0x19d   :  { %v302_v53 = vpack.c.bf16 %v53_v24, %v52_v3  ;;  %v48_v3 = vld [vmem:[%s19599_s0 + $0xc0] sm:$0xff]  ;;  %v49_v24 = vld [vmem:[%s19599_s0 + $0xc8] sm:$0xff] }
 0x19e   :  { %2267 = vmatpush.bf16.msrb.mxu1 %v303_v25  ;;  %v51_v25 = vld [vmem:[%s19599_s0 + $0xd8] sm:$0xff] }
 0x19f   :  { %v12464_v8 = vpop.f32.mrf.mxu0 }
 0x1a2   :  { %v12429_v4 = vpop.f32.mrf.mxu1  ;;  %9292 = vmatmul.msk.bf16.gmra.mxu3 %vm1810_vm0, %v9039_v30  ;;  %2268 = vmatpush.bf16.msrb.mxu1 %v302_v53  ;;  %v300_v53 = vpack.c.bf16 %v49_v24, %v48_v3  ;;  %v46_v3 = vld [vmem:[%s19599_s0 + $0xb0] sm:$0xff]  ;;  %v47_v24 = vld [vmem:[%s19599_s0 + $0xb8] sm:$0xff] }
 0x1a3   :  { %19701 = vst [vmem:[#allocation98_spill] sm:$0xff] %v12429_v4  ;;  %v299_v54 = vpack.c.bf16 %v47_v24, %v46_v3 }
 0x1a5   :  { %2247 = vmatmul.bf16.gmra.mxu1 %v9223_v15  ;;  %2027 = vmatmul.bf16.gmra.mxu0 %v8695_v41  ;;  %v50_v15 = vld [vmem:[%s19599_s0 + $0xd0] sm:$0xff]  ;;  %v11068_v41 = vld [vmem:[%s19600_s2 + $0x500] sm:$0xf0] }
 0x1a6   :  { %v301_v30 = vpack.c.bf16 %v51_v25, %v50_v15  ;;  %v9235_v15 = vor.u32 %v11068_v41, %v9234_v52  ;;  %v8630_v25 = vld [vmem:[%s19600_s2 + $0x38] sm:$0xf]  ;;  %v11021_v52 = vld [vmem:[%s19600_s2 + $0x388] sm:$0xf0] }
 0x1a8   :  { %2269 = vmatpush.bf16.msrb.mxu1 %v301_v30  ;;  %v9050_v30 = vld [vmem:[%s19600_s2 + $0x380] sm:$0xf] }
 0x1a9   :  { %v9051_v41 = vor.u32 %v11021_v52, %v9050_v30  ;;  %v44_v30 = vld [vmem:[%s19599_s0 + $0xa0] sm:$0xff] }
 0x1aa   :  { %v12456_v6 = vpop.f32.mrf.mxu1 }
 0x1ab   :  { %19702 = vst [vmem:[#allocation99_spill] sm:$0xff] %v12456_v6  ;;  %v10916_v6 = vld [vmem:[%s19600_s2 + $0x40] sm:$0xf0] }
 0x1ac   :  { %2270 = vmatpush.bf16.msrb.mxu1 %v300_v53  ;;  %v8631_v5 = vor.u32 %v10916_v6, %v8630_v25  ;;  %v8706_v6 = vld [vmem:[%s19600_s2 + $0xd8] sm:$0xf]  ;;  %v10936_v53 = vld [vmem:[%s19600_s2 + $0xe0] sm:$0xf0] }
 0x1ad   :  { %v8707_v25 = vor.u32 %v10936_v53, %v8706_v6  ;;  %v358_v6 = vld [vmem:[%s19598_s3 + $0x188] sm:$0xff]  ;;  %v9246_v53 = vld [vmem:[%s19600_s2 + $0x510] sm:$0xf] }
 0x1ae   :  { %9258 = vmatmul.msk.bf16.gmra.mxu2 %vm1810_vm0, %v8631_v5  ;;  %v45_v5 = vld [vmem:[%s19599_s0 + $0xa8] sm:$0xff]  ;;  %v12512_v52 = vpop.f32.mrf.mxu0  ;;  %667 = vperm.xlu0 %11472, %v358_v6   ;;  %v9062_v6 = vld [vmem:[%s19600_s2 + $0x398] sm:$0xf] }
 0x1af   :  { %v298_v24 = vpack.c.bf16 %v45_v5, %v44_v30  ;;  %v40_v30 = vld [vmem:[%s19599_s0 + $0x80] sm:$0xff]  ;;  %v41_v5 = vld [vmem:[%s19599_s0 + $0x88] sm:$0xff] }
 0x1b0   :  { %2271 = vmatpush.bf16.msrb.mxu1 %v299_v54  ;;  %v42_v54 = vld [vmem:[%s19599_s0 + $0x90] sm:$0xff] }
 0x1b2   :  { %v12487_v4 = vpop.f32.mrf.mxu1  ;;  %9293 = vmatmul.msk.bf16.gmra.mxu3 %vm1810_vm0, %v9051_v41 }
 0x1b3   :  { %19703 = vst [vmem:[#allocation100_spill] sm:$0xff] %v12487_v4 }
 0x1b4   :  { %2272 = vmatpush.bf16.msrb.mxu1 %v298_v24 }
 0x1b5   :  { %2252 = vmatmul.bf16.gmra.mxu1 %v9235_v15  ;;  %2032 = vmatmul.bf16.gmra.mxu0 %v8707_v25  ;;  %v12514_v3 = vpop.f32.mrf.mxu3  ;;  %v43_v15 = vld [vmem:[%s19599_s0 + $0x98] sm:$0xff] }
 0x1b6   :  { %19704 = vst [vmem:[#allocation101_spill] sm:$0xff] %v12514_v3  ;;  %v297_v41 = vpack.c.bf16 %v43_v15, %v42_v54  ;;  %v11071_v25 = vld [vmem:[%s19600_s2 + $0x518] sm:$0xf0]  ;;  %v296_v54 = vpack.c.bf16 %v41_v5, %v40_v30  ;;  %v12550_v3 = vpop.f32.mrf.mxu0  ;;  %v8718_v30 = vld [vmem:[%s19600_s2 + $0xf0] sm:$0xf] }
 0x1b7   :  { %v9247_v15 = vor.u32 %v11071_v25, %v9246_v53  ;;  %v11024_v53 = vld [vmem:[%s19600_s2 + $0x3a0] sm:$0xf0]  ;;  %v10939_v5 = vld [vmem:[%s19600_s2 + $0xf8] sm:$0xf0] }
 0x1b8   :  { %2273 = vmatpush.bf16.msrb.mxu1 %v297_v41  ;;  %v10919_v41 = vld [vmem:[%s19600_s2 + $0x58] sm:$0xf0]  ;;  %v9063_v25 = vor.u32 %v11024_v53, %v9062_v6 }
 0x1ba   :  { %v12516_v4 = vpop.f32.mrf.mxu1 }
 0x1bb   :  { %19705 = vst [vmem:[#allocation102_spill] sm:$0xff] %v12516_v4  ;;  %v8642_v4 = vld [vmem:[%s19600_s2 + $0x50] sm:$0xf] }
 0x1bc   :  { %2274 = vmatpush.bf16.msrb.mxu1 %v296_v54  ;;  %v8719_v54 = vor.u32 %v10939_v5, %v8718_v30  ;;  %v3679_v30 = vld [vmem:[%s19601_s5 + $0x18] sm:$0xff] }
 0x1bd   :  { %v12539_v24 = vpop.f32.mrf.mxu3 }
 0x1be   :  { %19706 = vst [vmem:[#allocation103_spill] sm:$0xff] %v12539_v24  ;;  %v8643_v24 = vor.u32 %v10919_v41, %v8642_v4  ;;  %v3676_v4 = vld [vmem:[%s19601_s5] sm:$0xff]  ;;  %v12578_v53 = vpop.f32.mrf.mxu0 }
 0x1bf   :  { %3789 = vperm.xlu0 %11472, %v3676_v4   ;;  %v8654_v4 = vld [vmem:[%s19600_s2 + $0x68] sm:$0xf] }
 0x1c0   :  { %9259 = vmatmul.msk.bf16.gmra.mxu2 %vm1810_vm0, %v8643_v24  ;;  %v3677_v24 = vld [vmem:[%s19601_s5 + $0x8] sm:$0xff] }
 0x1c1   :  { %3794 = vperm.xlu1 %11473, %v3677_v24   ;;  %v9074_v24 = vld [vmem:[%s19600_s2 + $0x3b0] sm:$0xf] }
 0x1c2   :  { %v12552_v17 = vpop.f32.mrf.mxu1  ;;  %9294 = vmatmul.msk.bf16.gmra.mxu3 %vm1810_vm0, %v9063_v25 }
 0x1c3   :  { %19707 = vst [vmem:[#allocation104_spill] sm:$0xff] %v12552_v17 }
 0x1c5   :  { %2257 = vmatmul.bf16.gmra.mxu1 %v9247_v15  ;;  %2037 = vmatmul.bf16.gmra.mxu0 %v8719_v54  ;;  %v12568_v41 = vpop.f32.mrf.mxu3  ;;  %v286_v15 = vld [vmem:[%s19600_s2 + $0x528] sm:$0xff] }
 0x1c6   :  { %19708 = vst [vmem:[#allocation105_spill] sm:$0xff] %v12568_v41  ;;  %v1527_v25 = vunpack.c.l.b16 %v286_v15  ;;  %v3680_v41 = vld [vmem:[%s19601_s5 + $0x20] sm:$0xff] }
 0x1c7   :  { %3804 = vperm.xlu0 %11472, %v3679_v30   ;;  %v11027_v30 = vld [vmem:[%s19600_s2 + $0x3b8] sm:$0xf0] }
 0x1c8   :  { %v1695_v54 = vpack.c.b16 %v1527_v25, %v1527_v25  ;;  %v9075_v25 = vor.u32 %v11027_v30, %v9074_v24  ;;  %v3682_v30 = vld [vmem:[%s19601_s5 + $0x30] sm:$0xff] }
 0x1c9   :  { %3809 = vperm.xlu1 %11473, %v3680_v41   ;;  %v3683_v41 = vld [vmem:[%s19601_s5 + $0x38] sm:$0xff] }
 0x1ca   :  { %v12573_v6 = vpop.f32.mrf.mxu1 }
 0x1cb   :  { %19709 = vst [vmem:[#allocation106_spill] sm:$0xff] %v12573_v6  ;;  %v10922_v6 = vld [vmem:[%s19600_s2 + $0x70] sm:$0xf0] }
 0x1cc   :  { %v8655_v17 = vor.u32 %v10922_v6, %v8654_v4  ;;  %v10942_v6 = vld [vmem:[%s19600_s2 + $0x110] sm:$0xf0]  ;;  %v12612_v4 = vpop.f32.mrf.mxu0 }
 0x1cd   :  { %v12583_v5 = vpop.f32.mrf.mxu3  ;;  %v8731_v24 = vor.u32 %v10942_v6, %v8730_v31  ;;  %v8600_v6 = vld [vmem:[%s19600_s2 + $0xc] sm:$0xf0] }
 0x1ce   :  { %19710 = vst [vmem:[#allocation107_spill] sm:$0xff] %v12583_v5  ;;  %v12602_v5 = vpop.permute.xlu0 %687 }
 0x1cf   :  { %19712 = vst [vmem:[#allocation109_spill] sm:$0xff] %v12602_v5  ;;  %3819 = vperm.xlu0 %11472, %v3682_v30  }
 0x1d0   :  { %9260 = vmatmul.msk.bf16.gmra.mxu2 %vm1810_vm0, %v8655_v17 }
 0x1d1   :  { %3824 = vperm.xlu1 %11473, %v3683_v41  }
 0x1d2   :  { %v12594_v15 = vpop.f32.mrf.mxu1  ;;  %9295 = vmatmul.msk.bf16.gmra.mxu3 %vm1810_vm0, %v9075_v25  ;;  %v10908_v25 = vld [vmem:[%s19600_s2 + $0x4] sm:$0xf] }
 0x1d3   :  { %19711 = vst [vmem:[#allocation108_spill] sm:$0xff] %v12594_v15  ;;  %v8603_v41 = vor.u32 %v10908_v25, %v8600_v6  ;;  %v3686_v6 = vld [vmem:[%s19601_s5 + $0x50] sm:$0xff] }
 0x1d5   :  { %2262 = vmatmul.bf16.gmra.mxu1 %v1695_v54  ;;  %2042 = vmatmul.bf16.gmra.mxu0 %v8731_v24  ;;  %v12617_v17 = vpop.f32.mrf.mxu3  ;;  %v3685_v54 = vld [vmem:[%s19601_s5 + $0x48] sm:$0xff]  ;;  %v12635_v24 = vpop.f32.mrf.mxu0 }
 0x1d6   :  { %19713 = vst [vmem:[#allocation110_spill] sm:$0xff] %v12617_v17  ;;  %v12627_v31 = vpop.permute.xlu0 %742  ;;  %v9086_v17 = vld [vmem:[%s19600_s2 + $0x3c8] sm:$0xf] }
 0x1d7   :  { %19715 = vst [vmem:[#allocation112_spill] sm:$0xff] %v12627_v31  ;;  %3834 = vperm.xlu0 %11472, %v3685_v54   ;;  %v10925_v31 = vld [vmem:[%s19600_s2 + $0x88] sm:$0xf0] }
 0x1d9   :  { %3839 = vperm.xlu1 %11473, %v3686_v6  }
 0x1da   :  { %v12622_v15 = vpop.f32.mrf.mxu1 }
 0x1db   :  { %19714 = vst [vmem:[#allocation111_spill] sm:$0xff] %v12622_v15  ;;  %v8666_v15 = vld [vmem:[%s19600_s2 + $0x80] sm:$0xf] }
 0x1dc   :  { %v8667_v54 = vor.u32 %v10925_v31, %v8666_v15  ;;  %v8742_v15 = vld [vmem:[%s19600_s2 + $0x120] sm:$0xf]  ;;  %v10945_v31 = vld [vmem:[%s19600_s2 + $0x128] sm:$0xf0] }
 0x1dd   :  { %v12637_v30 = vpop.f32.mrf.mxu3 }
 0x1de   :  { %19716 = vst [vmem:[#allocation113_spill] sm:$0xff] %v12637_v30  ;;  %v11030_v30 = vld [vmem:[%s19600_s2 + $0x3d0] sm:$0xf0] }
 0x1df   :  { %v9087_v25 = vor.u32 %v11030_v30, %v9086_v17  ;;  %v8743_v17 = vor.u32 %v10945_v31, %v8742_v15  ;;  %v3688_v30 = vld [vmem:[%s19601_s5 + $0x60] sm:$0xff]  ;;  %v10911_v15 = vld [vmem:[%s19600_s2 + $0x1c] sm:$0xf]  ;;  %v8612_v31 = vld [vmem:[%s19600_s2 + $0x24] sm:$0xf0] }
 0x1e0   :  { %9261 = vmatmul.msk.bf16.gmra.mxu2 %vm1810_vm0, %v8667_v54  ;;  %3849 = vperm.xlu0 %11472, %v3688_v30   ;;  %v12670_v54 = vpop.permute.xlu0 %827 }
 0x1e1   :  { %19718 = vst [vmem:[#allocation115_spill] sm:$0xff] %v12670_v54  ;;  %v10928_v54 = vld [vmem:[%s19600_s2 + $0xa0] sm:$0xf0] }
 0x1e2   :  { %v12648_v5 = vpop.f32.mrf.mxu1  ;;  %9296 = vmatmul.msk.bf16.gmra.mxu3 %vm1810_vm0, %v9087_v25  ;;  %v3681_v25 = vld [vmem:[%s19601_s5 + $0x28] sm:$0xff] }
 0x1e3   :  { %19717 = vst [vmem:[#allocation114_spill] sm:$0xff] %v12648_v5  ;;  %v12674_v5 = vpop.f32.mrf.mxu0  ;;  %3814 = vperm.xlu2 %11474, %v3681_v25   ;;  %v11033_v25 = vld [vmem:[%s19600_s2 + $0x3e8] sm:$0xf0] }
 0x1e5   :  { %2275 = vmatmul.bf16.vlgmr.msrb.gmra.mxu1 %v8603_v41  ;;  %2047 = vmatmul.bf16.gmra.mxu0 %v8743_v17  ;;  %v12672_v6 = vpop.f32.mrf.mxu3  ;;  %v3689_v41 = vld [vmem:[%s19601_s5 + $0x68] sm:$0xff] }
 0x1e6   :  { %19719 = vst [vmem:[#allocation116_spill] sm:$0xff] %v12672_v6  ;;  %3854 = vperm.xlu1 %11473, %v3689_v41   ;;  %v8678_v41 = vld [vmem:[%s19600_s2 + $0x98] sm:$0xf]  ;;  %v9098_v6 = vld [vmem:[%s19600_s2 + $0x3e0] sm:$0xf] }
 0x1e7   :  { %v8679_v19 = vor.u32 %v10928_v54, %v8678_v41  ;;  %v8754_v54 = vld [vmem:[%s19600_s2 + $0x138] sm:$0xf] }
 0x1e8   :  { %3864 = vperm.xlu0 %11472, %v3691_v46   ;;  %v913_v17 = vpop.permute.xlu0 %912 }
 0x1ea   :  { %v12679_v50 = vpop.f32.mrf.mxu1 }
 0x1eb   :  { %19720 = vst [vmem:[#allocation117_spill] sm:$0xff] %v12679_v50  ;;  %v8615_v50 = vor.u32 %v10911_v15, %v8612_v31  ;;  %v9099_v15 = vor.u32 %v11033_v25, %v9098_v6  ;;  %v12709_v31 = vpop.f32.mrf.mxu0  ;;  %3829 = vperm.xlu2 %11474, %v3684_v35   ;;  %v3697_v35 = vld [vmem:[%s19601_s5 + $0xa8] sm:$0xff] }
 0x1ed   :  { %v12693_v30 = vpop.f32.mrf.mxu3 }
 0x1ee   :  { %19721 = vst [vmem:[#allocation118_spill] sm:$0xff] %v12693_v30  ;;  %v3692_v30 = vld [vmem:[%s19601_s5 + $0x80] sm:$0xff] }
 0x1ef   :  { %3869 = vperm.xlu1 %11473, %v3692_v30   ;;  %v3695_v30 = vld [vmem:[%s19601_s5 + $0x98] sm:$0xff] }
 0x1f0   :  { %9262 = vmatmul.msk.bf16.gmra.mxu2 %vm1810_vm0, %v8679_v19 }
 0x1f2   :  { %v2233_v49 = vpop.f32.mrf.mxu1  ;;  %9297 = vmatmul.msk.bf16.gmra.mxu3 %vm1810_vm0, %v9099_v15  ;;  %v10914_v15 = vld [vmem:[%s19600_s2 + $0x34] sm:$0xf] }
 0x1f3   :  { %v12707_v46 = vadd.f32 %v2233_v49, %v913_v17  ;;  %v10948_v49 = vld [vmem:[%s19600_s2 + $0x140] sm:$0xf0]  ;;  %v3694_v17 = vld [vmem:[%s19601_s5 + $0x90] sm:$0xff]  ;;  %v12738_v25 = vpop.f32.mrf.mxu0 }
 0x1f4   :  { %v8755_v6 = vor.u32 %v10948_v49, %v8754_v54  ;;  %3879 = vperm.xlu0 %11472, %v3694_v17   ;;  %v8624_v54 = vld [vmem:[%s19600_s2 + $0x3c] sm:$0xf0]  ;;  %v8690_v17 = vld [vmem:[%s19600_s2 + $0xb0] sm:$0xf] }
 0x1f5   :  { %19722 = vst [vmem:[#allocation119_spill] sm:$0xff] %v12707_v46  ;;  %2280 = vmatmul.bf16.gmra.mxu1 %v8615_v50  ;;  %v12728_v19 = vpop.f32.mrf.mxu3  ;;  %v3687_v50 = vld [vmem:[%s19601_s5 + $0x58] sm:$0xff] }
 0x1f6   :  { %2052 = vmatmul.bf16.gmra.mxu0 %v8755_v6  ;;  %19723 = vst [vmem:[#allocation120_spill] sm:$0xff] %v12728_v19  ;;  %3844 = vperm.xlu2 %11474, %v3687_v50   ;;  %v8627_v6 = vor.u32 %v10914_v15, %v8624_v54  ;;  %v11036_v50 = vld [vmem:[%s19600_s2 + $0x400] sm:$0xf0]  ;;  %v3698_v15 = vld [vmem:[%s19601_s5 + $0xb0] sm:$0xff] }
 0x1f7   :  { %3884 = vperm.xlu1 %11473, %v3695_v30   ;;  %v10931_v30 = vld [vmem:[%s19600_s2 + $0xb8] sm:$0xf0]  ;;  %v3690_v54 = vld [vmem:[%s19601_s5 + $0x70] sm:$0xff] }
 0x1f8   :  { %v8691_v19 = vor.u32 %v10931_v30, %v8690_v17  ;;  %v8766_v17 = vld [vmem:[%s19600_s2 + $0x150] sm:$0xf]  ;;  %v10951_v30 = vld [vmem:[%s19600_s2 + $0x158] sm:$0xf0] }
 0x1fa   :  { %v12733_v41 = vpop.f32.mrf.mxu1 }
 0x1fb   :  { %19724 = vst [vmem:[#allocation121_spill] sm:$0xff] %v12733_v41  ;;  %v9110_v41 = vld [vmem:[%s19600_s2 + $0x3f8] sm:$0xf] }
 0x1fc   :  { %3894 = vperm.xlu0 %11472, %v3697_v35   ;;  %v9111_v35 = vor.u32 %v11036_v50, %v9110_v41  ;;  %v8767_v41 = vor.u32 %v10951_v30, %v8766_v17  ;;  %v3700_v50 = vld [vmem:[%s19601_s5 + $0xc0] sm:$0xff]  ;;  %v8636_v17 = vld [vmem:[%s19600_s2 + $0x54] sm:$0xf0] }
 0x1fd   :  { %v12749_v49 = vpop.f32.mrf.mxu3 }
 0x1fe   :  { %19725 = vst [vmem:[#allocation122_spill] sm:$0xff] %v12749_v49  ;;  %3859 = vperm.xlu2 %11474, %v3690_v54   ;;  %v10917_v54 = vld [vmem:[%s19600_s2 + $0x4c] sm:$0xf] }
 0x1ff   :  { %3899 = vperm.xlu1 %11473, %v3698_v15  }
 0x200   :  { %9263 = vmatmul.msk.bf16.gmra.mxu2 %vm1810_vm0, %v8691_v19  ;;  %v12782_v19 = vpop.f32.mrf.mxu0 }
 0x202   :  { %v12760_v46 = vpop.f32.mrf.mxu1  ;;  %9298 = vmatmul.msk.bf16.gmra.mxu3 %vm1810_vm0, %v9111_v35  ;;  %v3703_v35 = vld [vmem:[%s19601_s5 + $0xd8] sm:$0xff] }
 0x203   :  { %19726 = vst [vmem:[#allocation123_spill] sm:$0xff] %v12760_v46  ;;  %v3701_v46 = vld [vmem:[%s19601_s5 + $0xc8] sm:$0xff] }
 0x204   :  { %3909 = vperm.xlu0 %11472, %v3700_v50   ;;  %v10934_v50 = vld [vmem:[%s19600_s2 + $0xd0] sm:$0xf0] }
 0x205   :  { %2285 = vmatmul.bf16.gmra.mxu1 %v8627_v6  ;;  %v12784_v15 = vpop.f32.mrf.mxu3  ;;  %v3693_v6 = vld [vmem:[%s19601_s5 + $0x88] sm:$0xff] }
 0x206   :  { %2057 = vmatmul.bf16.gmra.mxu0 %v8767_v41  ;;  %19727 = vst [vmem:[#allocation124_spill] sm:$0xff] %v12784_v15  ;;  %3874 = vperm.xlu2 %11474, %v3693_v6   ;;  %v8639_v41 = vor.u32 %v10917_v54, %v8636_v17  ;;  %v3704_v17 = vld [vmem:[%s19601_s5 + $0xe0] sm:$0xff] }
 0x207   :  { %3914 = vperm.xlu1 %11473, %v3701_v46   ;;  %v8702_v46 = vld [vmem:[%s19600_s2 + $0xc8] sm:$0xf] }
 0x208   :  { %v12814_v15 = vpop.f32.mrf.mxu0  ;;  %v8703_v6 = vor.u32 %v10934_v50, %v8702_v46  ;;  %v8778_v46 = vld [vmem:[%s19600_s2 + $0x168] sm:$0xf]  ;;  %v10954_v50 = vld [vmem:[%s19600_s2 + $0x170] sm:$0xf0] }
 0x20a   :  { %v12789_v49 = vpop.f32.mrf.mxu1 }
 0x20b   :  { %19728 = vst [vmem:[#allocation125_spill] sm:$0xff] %v12789_v49  ;;  %v9122_v49 = vld [vmem:[%s19600_s2 + $0x410] sm:$0xf] }
 0x20c   :  { %3924 = vperm.xlu0 %11472, %v3703_v35   ;;  %v11039_v35 = vld [vmem:[%s19600_s2 + $0x418] sm:$0xf0] }
 0x20d   :  { %v12803_v30 = vpop.f32.mrf.mxu3  ;;  %v9123_v54 = vor.u32 %v11039_v35, %v9122_v49  ;;  %v8779_v49 = vor.u32 %v10954_v50, %v8778_v46  ;;  %v3706_v35 = vld [vmem:[%s19601_s5 + $0xf0] sm:$0xff]  ;;  %v10920_v46 = vld [vmem:[%s19600_s2 + $0x64] sm:$0xf] }
 0x20e   :  { %19729 = vst [vmem:[#allocation126_spill] sm:$0xff] %v12803_v30  ;;  %v3696_v30 = vld [vmem:[%s19601_s5 + $0xa0] sm:$0xff]  ;;  %v8648_v50 = vld [vmem:[%s19600_s2 + $0x6c] sm:$0xf0] }
 0x20f   :  { %3929 = vperm.xlu1 %11473, %v3704_v17   ;;  %3889 = vperm.xlu2 %11474, %v3696_v30   ;;  %v3709_v30 = vld [vmem:[%s19601_s5 + $0x108] sm:$0xff] }
 0x210   :  { %9264 = vmatmul.msk.bf16.gmra.mxu2 %vm1810_vm0, %v8703_v6  ;;  %v12838_v6 = vpop.f32.mrf.mxu2 }
 0x212   :  { %v12816_v0 = vpop.f32.mrf.mxu1  ;;  %9299 = vmatmul.msk.bf16.gmra.mxu3 %vm1810_vm0, %v9123_v54  ;;  %v3699_v54 = vld [vmem:[%s19601_s5 + $0xb8] sm:$0xff] }
 0x213   :  { %19730 = vst [vmem:[#allocation127_spill] sm:$0xff] %v12816_v0  ;;  %v3707_v0 = vld [vmem:[%s19601_s5 + $0xf8] sm:$0xff] }
 0x214   :  { %3939 = vperm.xlu0 %11472, %v3706_v35  }
 0x215   :  { %2290 = vmatmul.bf16.gmra.mxu1 %v8639_v41  ;;  %v12840_v17 = vpop.f32.mrf.mxu3  ;;  %v12847_v41 = vpop.f32.mrf.mxu0 }
 0x216   :  { %2062 = vmatmul.bf16.gmra.mxu0 %v8779_v49  ;;  %19731 = vst [vmem:[#allocation128_spill] sm:$0xff] %v12840_v17  ;;  %v10937_v17 = vld [vmem:[%s19600_s2 + $0xe8] sm:$0xf0] }
 0x217   :  { %3944 = vperm.xlu1 %11473, %v3707_v0   ;;  %3904 = vperm.xlu2 %11474, %v3699_v54   ;;  %v8714_v0 = vld [vmem:[%s19600_s2 + $0xe0] sm:$0xf] }
 0x218   :  { %v12861_v49 = vpop.f32.mrf.mxu2  ;;  %v8715_v54 = vor.u32 %v10937_v17, %v8714_v0  ;;  %v8790_v17 = vld [vmem:[%s19600_s2 + $0x180] sm:$0xf]  ;;  %v10957_v0 = vld [vmem:[%s19600_s2 + $0x188] sm:$0xf0] }
 0x21a   :  { %v12845_v20 = vpop.f32.mrf.mxu1 }
 0x21b   :  { %19732 = vst [vmem:[#allocation129_spill] sm:$0xff] %v12845_v20  ;;  %v8651_v20 = vor.u32 %v10920_v46, %v8648_v50  ;;  %v3710_v50 = vld [vmem:[%s19601_s5 + $0x110] sm:$0xff] }
 0x21c   :  { %3954 = vperm.xlu0 %11472, %v3709_v30   ;;  %v11042_v30 = vld [vmem:[%s19600_s2 + $0x430] sm:$0xf0] }
 0x21d   :  { %v12863_v35 = vpop.f32.mrf.mxu3  ;;  %v9135_v46 = vor.u32 %v11042_v30, %v9134_v1  ;;  %v12893_v1 = vpop.f32.mrf.mxu0  ;;  %v8791_v30 = vor.u32 %v10957_v0, %v8790_v17  ;;  %v8660_v17 = vld [vmem:[%s19600_s2 + $0x84] sm:$0xf0] }
 0x21e   :  { %19733 = vst [vmem:[#allocation130_spill] sm:$0xff] %v12863_v35  ;;  %v3702_v35 = vld [vmem:[%s19601_s5 + $0xd0] sm:$0xff] }
 0x21f   :  { %3959 = vperm.xlu1 %11473, %v3710_v50   ;;  %3919 = vperm.xlu2 %11474, %v3702_v35   ;;  %v10923_v35 = vld [vmem:[%s19600_s2 + $0x7c] sm:$0xf] }
 0x220   :  { %9265 = vmatmul.msk.bf16.gmra.mxu2 %vm1810_vm0, %v8715_v54  ;;  %v12898_v54 = vpop.f32.mrf.mxu2 }
 0x222   :  { %v12874_v13 = vpop.f32.mrf.mxu1  ;;  %9300 = vmatmul.msk.bf16.gmra.mxu3 %vm1810_vm0, %v9135_v46  ;;  %v3705_v46 = vld [vmem:[%s19601_s5 + $0xe8] sm:$0xff] }
 0x223   :  { %19734 = vst [vmem:[#allocation131_spill] sm:$0xff] %v12874_v13  ;;  %v3712_v13 = vld [vmem:[%s19601_s5 + $0x120] sm:$0xff] }
 0x224   :  { %3969 = vperm.xlu0 %11472, %v3712_v13   ;;  %v3715_v13 = vld [vmem:[%s19601_s5 + $0x138] sm:$0xff] }
 0x225   :  { %2295 = vmatmul.bf16.gmra.mxu1 %v8651_v20  ;;  %v12900_v50 = vpop.f32.mrf.mxu3  ;;  %v3713_v20 = vld [vmem:[%s19601_s5 + $0x128] sm:$0xff] }
 0x226   :  { %2067 = vmatmul.bf16.gmra.mxu0 %v8791_v30  ;;  %19735 = vst [vmem:[#allocation132_spill] sm:$0xff] %v12900_v50  ;;  %v12921_v30 = vpop.f32.mrf.mxu0  ;;  %v8726_v50 = vld [vmem:[%s19600_s2 + $0xf8] sm:$0xf] }
 0x227   :  { %3974 = vperm.xlu1 %11473, %v3713_v20   ;;  %3934 = vperm.xlu2 %11474, %v3705_v46   ;;  %v8663_v20 = vor.u32 %v10923_v35, %v8660_v17  ;;  %v8727_v47 = vor.u32 %v10940_v56, %v8726_v50  ;;  %v3716_v17 = vld [vmem:[%s19601_s5 + $0x140] sm:$0xff]  ;;  %v8802_v56 = vld [vmem:[%s19600_s2 + $0x198] sm:$0xf] }
 0x228   :  { %v12919_v0 = vpop.f32.mrf.mxu2  ;;  %v10960_v50 = vld [vmem:[%s19600_s2 + $0x1a0] sm:$0xf0] }
 0x22a   :  { %v12905_v21 = vpop.f32.mrf.mxu1 }
 0x22b   :  { %19736 = vst [vmem:[#allocation133_spill] sm:$0xff] %v12905_v21 }
 0x22c   :  { %3984 = vperm.xlu0 %11472, %v3715_v13   ;;  %v9146_v13 = vld [vmem:[%s19600_s2 + $0x440] sm:$0xf] }
 0x22d   :  { %v12923_v21 = vpop.f32.mrf.mxu3 }
 0x22e   :  { %19737 = vst [vmem:[#allocation134_spill] sm:$0xff] %v12923_v21  ;;  %v11045_v21 = vld [vmem:[%s19600_s2 + $0x448] sm:$0xf0] }
 0x22f   :  { %v9147_v35 = vor.u32 %v11045_v21, %v9146_v13  ;;  %3989 = vperm.xlu1 %11473, %v3716_v17   ;;  %v8803_v21 = vor.u32 %v10960_v50, %v8802_v56  ;;  %v3718_v13 = vld [vmem:[%s19601_s5 + $0x150] sm:$0xff]  ;;  %3949 = vperm.xlu2 %11474, %v3708_v23   ;;  %v3721_v23 = vld [vmem:[%s19601_s5 + $0x168] sm:$0xff]  ;;  %v8672_v50 = vld [vmem:[%s19600_s2 + $0x9c] sm:$0xf0] }
 0x230   :  { %9266 = vmatmul.msk.bf16.gmra.mxu2 %vm1810_vm0, %v8727_v47  ;;  %v10926_v56 = vld [vmem:[%s19600_s2 + $0x94] sm:$0xf] }
 0x231   :  { %v12956_v47 = vpop.f32.mrf.mxu2 }
 0x232   :  { %v12934_v46 = vpop.f32.mrf.mxu1  ;;  %9301 = vmatmul.msk.bf16.gmra.mxu3 %vm1810_vm0, %v9147_v35  ;;  %v3711_v35 = vld [vmem:[%s19601_s5 + $0x118] sm:$0xff] }
 0x233   :  { %19738 = vst [vmem:[#allocation135_spill] sm:$0xff] %v12934_v46  ;;  %v12960_v46 = vpop.f32.mrf.mxu0 }
 0x234   :  { %3999 = vperm.xlu0 %11472, %v3718_v13  }
 0x235   :  { %2300 = vmatmul.bf16.gmra.mxu1 %v8663_v20  ;;  %v12958_v17 = vpop.f32.mrf.mxu3  ;;  %v3719_v20 = vld [vmem:[%s19601_s5 + $0x158] sm:$0xff] }
 0x236   :  { %2072 = vmatmul.bf16.gmra.mxu0 %v8803_v21  ;;  %19739 = vst [vmem:[#allocation136_spill] sm:$0xff] %v12958_v17  ;;  %v10943_v17 = vld [vmem:[%s19600_s2 + $0x118] sm:$0xf0] }
 0x237   :  { %4004 = vperm.xlu1 %11473, %v3719_v20   ;;  %3964 = vperm.xlu2 %11474, %v3711_v35   ;;  %v8738_v20 = vld [vmem:[%s19600_s2 + $0x110] sm:$0xf] }
 0x238   :  { %v8739_v35 = vor.u32 %v10943_v17, %v8738_v20  ;;  %v8814_v17 = vld [vmem:[%s19600_s2 + $0x1b0] sm:$0xf] }
 0x239   :  { %v12979_v21 = vpop.f32.mrf.mxu2 }
 0x23a   :  { %v12965_v14 = vpop.f32.mrf.mxu1 }
 0x23b   :  { %19740 = vst [vmem:[#allocation137_spill] sm:$0xff] %v12965_v14  ;;  %v8675_v14 = vor.u32 %v10926_v56, %v8672_v50  ;;  %v12997_v50 = vpop.f32.mrf.mxu0 }
 0x23c   :  { %4014 = vperm.xlu0 %11472, %v3721_v23   ;;  %v11048_v23 = vld [vmem:[%s19600_s2 + $0x460] sm:$0xf0] }
 0x23d   :  { %v12981_v13 = vpop.f32.mrf.mxu3  ;;  %v9159_v56 = vor.u32 %v11048_v23, %v9158_v40  ;;  %v10963_v40 = vld [vmem:[%s19600_s2 + $0x1b8] sm:$0xf0]  ;;  %v3724_v23 = vld [vmem:[%s19601_s5 + $0x180] sm:$0xff] }
 0x23e   :  { %19741 = vst [vmem:[#allocation138_spill] sm:$0xff] %v12981_v13  ;;  %v3722_v13 = vld [vmem:[%s19601_s5 + $0x170] sm:$0xff]  ;;  %v8815_v20 = vor.u32 %v10963_v40, %v8814_v17  ;;  %v8684_v17 = vld [vmem:[%s19600_s2 + $0xb4] sm:$0xf0] }
 0x23f   :  { %4019 = vperm.xlu1 %11473, %v3722_v13   ;;  %3979 = vperm.xlu2 %11474, %v3714_v10   ;;  %v10929_v10 = vld [vmem:[%s19600_s2 + $0xac] sm:$0xf] }
 0x240   :  { %9267 = vmatmul.msk.bf16.gmra.mxu2 %vm1810_vm0, %v8739_v35 }
 0x242   :  { %v12992_v22 = vpop.f32.mrf.mxu1  ;;  %9302 = vmatmul.msk.bf16.gmra.mxu3 %vm1810_vm0, %v9159_v56 }
 0x243   :  { %19742 = vst [vmem:[#allocation139_spill] sm:$0xff] %v12992_v22  ;;  %v13016_v35 = vpop.f32.mrf.mxu2  ;;  %v3725_v22 = vld [vmem:[%s19601_s5 + $0x188] sm:$0xff]  ;;  %v13028_v56 = vpop.f32.mrf.mxu0 }
 0x244   :  { %4029 = vperm.xlu0 %11472, %v3724_v23  }
 0x245   :  { %2305 = vmatmul.bf16.gmra.mxu1 %v8675_v14  ;;  %v13018_v13 = vpop.f32.mrf.mxu3  ;;  %v3717_v14 = vld [vmem:[%s19601_s5 + $0x148] sm:$0xff] }
 0x246   :  { %2077 = vmatmul.bf16.gmra.mxu0 %v8815_v20  ;;  %19743 = vst [vmem:[#allocation140_spill] sm:$0xff] %v13018_v13  ;;  %v3727_v20 = vld [vmem:[%s19601_s5 + $0x198] sm:$0xff]  ;;  %v10946_v13 = vld [vmem:[%s19600_s2 + $0x130] sm:$0xf0] }
 0x247   :  { %4034 = vperm.xlu1 %11473, %v3725_v22   ;;  %3994 = vperm.xlu2 %11474, %v3717_v14   ;;  %v8687_v22 = vor.u32 %v10929_v10, %v8684_v17  ;;  %v9170_v14 = vld [vmem:[%s19600_s2 + $0x470] sm:$0xf]  ;;  %v3728_v17 = vld [vmem:[%s19601_s5 + $0x1a0] sm:$0xff] }
 0x24a   :  { %v13023_v11 = vpop.f32.mrf.mxu1 }
 0x24b   :  { %19744 = vst [vmem:[#allocation141_spill] sm:$0xff] %v13023_v11  ;;  %v13036_v40 = vpop.f32.mrf.mxu2  ;;  %v8750_v11 = vld [vmem:[%s19600_s2 + $0x128] sm:$0xf] }
 0x24c   :  { %4044 = vperm.xlu0 %11472, %v3727_v20   ;;  %v8751_v57 = vor.u32 %v10946_v13, %v8750_v11  ;;  %v11051_v20 = vld [vmem:[%s19600_s2 + $0x478] sm:$0xf0]  ;;  %v8826_v11 = vld [vmem:[%s19600_s2 + $0x1c8] sm:$0xf]  ;;  %v10966_v13 = vld [vmem:[%s19600_s2 + $0x1d0] sm:$0xf0] }
 0x24d   :  { %v13041_v23 = vpop.f32.mrf.mxu3  ;;  %v9171_v10 = vor.u32 %v11051_v20, %v9170_v14  ;;  %v13073_v20 = vpop.f32.mrf.mxu0 }
 0x24e   :  { %19745 = vst [vmem:[#allocation142_spill] sm:$0xff] %v13041_v23  ;;  %v3720_v23 = vld [vmem:[%s19601_s5 + $0x160] sm:$0xff] }
 0x24f   :  { %4049 = vperm.xlu1 %11473, %v3728_v17   ;;  %4009 = vperm.xlu2 %11474, %v3720_v23   ;;  %v3731_v17 = vld [vmem:[%s19601_s5 + $0x1b8] sm:$0xff] }
 0x250   :  { %9268 = vmatmul.msk.bf16.gmra.mxu2 %vm1810_vm0, %v8751_v57  ;;  %v3730_v57 = vld [vmem:[%s19601_s5 + $0x1b0] sm:$0xff]  ;;  %v3723_v23 = vld [vmem:[%s19601_s5 + $0x178] sm:$0xff] }
 0x252   :  { %v13052_v33 = vpop.f32.mrf.mxu1  ;;  %9303 = vmatmul.msk.bf16.gmra.mxu3 %vm1810_vm0, %v9171_v10 }
 0x253   :  { %19746 = vst [vmem:[#allocation143_spill] sm:$0xff] %v13052_v33  ;;  %v13071_v14 = vpop.f32.mrf.mxu2  ;;  %v8827_v33 = vor.u32 %v10966_v13, %v8826_v11  ;;  %v10932_v11 = vld [vmem:[%s19600_s2 + $0xc4] sm:$0xf]  ;;  %v8696_v13 = vld [vmem:[%s19600_s2 + $0xcc] sm:$0xf0] }
 0x254   :  { %4059 = vperm.xlu0 %11472, %v3730_v57   ;;  %v3733_v57 = vld [vmem:[%s19601_s5 + $0x1c8] sm:$0xff] }
 0x255   :  { %2310 = vmatmul.bf16.gmra.mxu1 %v8687_v22  ;;  %v13078_v22 = vpop.f32.mrf.mxu3  ;;  %v13108_v42 = vpop.f32.mrf.mxu0 }
 0x256   :  { %19747 = vst [vmem:[#allocation144_spill] sm:$0xff] %v13078_v22  ;;  %2082 = vmatmul.bf16.gmra.mxu0 %v8827_v33  ;;  %v8699_v22 = vor.u32 %v10932_v11, %v8696_v13  ;;  %v11054_v11 = vld [vmem:[%s19600_s2 + $0x490] sm:$0xf0]  ;;  %v1989_v13 = vadd.f32 %v12441_v60, %v11985_v55  ;;  %v10969_v55 = vld [vmem:[%s19600_s2 + $0x1e8] sm:$0xf0] }
 0x257   :  { %4064 = vperm.xlu1 %11473, %v3731_v17   ;;  %4024 = vperm.xlu2 %11474, %v3723_v23   ;;  %v8762_v17 = vld [vmem:[%s19600_s2 + $0x140] sm:$0xf]  ;;  %v9182_v23 = vld [vmem:[%s19600_s2 + $0x488] sm:$0xf] }
 0x258   :  { %v8763_v27 = vor.u32 %v10949_v58, %v8762_v17  ;;  %v8838_v58 = vld [vmem:[%s19600_s2 + $0x1e0] sm:$0xf] }
 0x25a   :  { %v2265_v10 = vpop.f32.mrf.mxu1 }
 0x25b   :  { %v13092_v33 = vpop.f32.mrf.mxu2 }
 0x25c   :  { %4074 = vperm.xlu0 %11472, %v3733_v57   ;;  %v9183_v57 = vor.u32 %v11054_v11, %v9182_v23  ;;  %v8839_v23 = vor.u32 %v10969_v55, %v8838_v58  ;;  %v10935_v58 = vld [vmem:[%s19600_s2 + $0xdc] sm:$0xf]  ;;  %v8708_v55 = vld [vmem:[%s19600_s2 + $0xe4] sm:$0xf0] }
 0x25d   :  { %v13097_v10 = vpop.f32.mrf.mxu3 }
 0x25e   :  { %19748 = vst [vmem:[#allocation145_spill] sm:$0xff] %v13097_v10  ;;  %v3734_v10 = vld [vmem:[%s19601_s5 + $0x1d0] sm:$0xff] }
 0x25f   :  { %4079 = vperm.xlu1 %11473, %v3734_v10   ;;  %4039 = vperm.xlu2 %11474, %v3726_v32   ;;  %v1991_v10 = vadd.f32 %v12464_v8, %v11932_v2  ;;  %v13139_v32 = vpop.f32.mrf.mxu0  ;;  %v2843_v2 = vld [vmem:[%s19602_s1] sm:$0xff]  ;;  %v2844_v8 = vld [vmem:[%s19602_s1 + $0x8] sm:$0xff] }
 0x260   :  { %9269 = vmatmul.msk.bf16.gmra.mxu2 %vm1810_vm0, %v8763_v27  ;;  %v3736_v27 = vld [vmem:[%s19601_s5 + $0x1e0] sm:$0xff] }
 0x262   :  { %v2276_v43 = vpop.f32.mrf.mxu1  ;;  %9304 = vmatmul.msk.bf16.gmra.mxu3 %vm1810_vm0, %v9183_v57 }
 0x263   :  { %v2277_v60 = vadd.f32 %v2276_v43, %v1989_v13  ;;  %v13129_v17 = vpop.f32.mrf.mxu2  ;;  %v3737_v43 = vld [vmem:[%s19601_s5 + $0x1e8] sm:$0xff] }
 0x264   :  { %4089 = vperm.xlu0 %11472, %v3736_v27   ;;  %v3729_v13 = vld [vmem:[%s19601_s5 + $0x1a8] sm:$0xff] }
 0x265   :  { %2315 = vmatmul.bf16.gmra.mxu1 %v8699_v22  ;;  %v13134_v22 = vpop.f32.mrf.mxu3  ;;  %v2565_v57 = vadd.f32 %v12838_v6, %v2277_v60 }
 0x266   :  { %19749 = vst [vmem:[#allocation146_spill] sm:$0xff] %v13134_v22  ;;  %2087 = vmatmul.bf16.gmra.mxu0 %v8839_v23  ;;  %v3732_v22 = vld [vmem:[%s19601_s5 + $0x1c0] sm:$0xff] }
 0x267   :  { %4094 = vperm.xlu1 %11473, %v3737_v43   ;;  %4054 = vperm.xlu2 %11474, %v3729_v13   ;;  %v2954_v23 = vadd.f32 %v2843_v2, %v2565_v57  ;;  %v10952_v43 = vld [vmem:[%s19600_s2 + $0x160] sm:$0xf0]  ;;  %v9194_v57 = vld [vmem:[%s19600_s2 + $0x4a0] sm:$0xf] }
 0x26a   :  { %v2278_v11 = vpop.f32.mrf.mxu1 }
 0x26b   :  { %v2279_v36 = vadd.f32 %v2278_v11, %v1991_v10  ;;  %v13160_v60 = vpop.f32.mrf.mxu2  ;;  %v3739_v10 = vld [vmem:[%s19601_s5 + $0x1f8] sm:$0xff] }
 0x26c   :  { %4104 = vperm.xlu0 %11472, %v3739_v10  }
 0x26d   :  { %v2567_v6 = vadd.f32 %v12861_v49, %v2279_v36  ;;  %v13165_v11 = vpop.f32.mrf.mxu3  ;;  %v8711_v36 = vor.u32 %v10935_v58, %v8708_v55  ;;  %v8774_v49 = vld [vmem:[%s19600_s2 + $0x158] sm:$0xf]  ;;  %v3065_v55 = vmax.f32 %v2954_v23, 0.0  ;;  %v10972_v23 = vld [vmem:[%s19600_s2 + $0x200] sm:$0xf0] }
 0x26e   :  { %19750 = vst [vmem:[#allocation147_spill] sm:$0xff] %v13165_v11  ;;  %v8775_v2 = vor.u32 %v10952_v43, %v8774_v49  ;;  %v3740_v11 = vld [vmem:[%s19601_s5 + $0x200] sm:$0xff]  ;;  %v13189_v49 = vpop.f32.mrf.mxu0 }
 0x26f   :  { %v2955_v27 = vadd.f32 %v2844_v8, %v2567_v6  ;;  %v11057_v8 = vld [vmem:[%s19600_s2 + $0x4a8] sm:$0xf0]  ;;  %v1994_v6 = vadd.f32 %v12512_v52, %v11945_v7  ;;  %4109 = vperm.xlu1 %11473, %v3740_v11   ;;  %v8850_v52 = vld [vmem:[%s19600_s2 + $0x1f8] sm:$0xf]  ;;  %4069 = vperm.xlu2 %11474, %v3732_v22  }
 0x270   :  { %v9195_v58 = vor.u32 %v11057_v8, %v9194_v57  ;;  %9270 = vmatmul.msk.bf16.gmra.mxu2 %vm1810_vm0, %v8775_v2  ;;  %v8851_v11 = vor.u32 %v10972_v23, %v8850_v52  ;;  %v1996_v2 = vadd.f32 %v12550_v3, %v11892_v37  ;;  %v3743_v22 = vld [vmem:[%s19601_s5 + $0x218] sm:$0xff] }
 0x271   :  { %v3066_v10 = vmax.f32 %v2955_v27, 0.0  ;;  %v2846_v37 = vld [vmem:[%s19602_s1 + $0x18] sm:$0xff] }
 0x272   :  { %v2281_v13 = vpop.f32.mrf.mxu1  ;;  %9305 = vmatmul.msk.bf16.gmra.mxu3 %vm1810_vm0, %v9195_v58 }
 0x273   :  { %v13191_v7 = vpack.c.bf16 %v3066_v10, %v3065_v55  ;;  %v2282_v27 = vadd.f32 %v2281_v13, %v1994_v6  ;;  %v13199_v43 = vpop.f32.mrf.mxu2  ;;  %v3735_v13 = vld [vmem:[%s19601_s5 + $0x1d8] sm:$0xff]  ;;  %v2845_v6 = vld [vmem:[%s19602_s1 + $0x10] sm:$0xff]  ;;  %v8720_v10 = vld [vmem:[%s19600_s2 + $0xfc] sm:$0xf0] }
 0x275   :  { %2320 = vmatmul.bf16.gmra.mxu1 %v8711_v36  ;;  %v3742_v36 = vld [vmem:[%s19601_s5 + $0x210] sm:$0xff]  ;;  %v13204_v57 = vpop.f32.mrf.mxu3  ;;  %v2570_v58 = vadd.f32 %v12898_v54, %v2282_v27 }
 0x276   :  { %19751 = vst [vmem:[#allocation148_spill] sm:$0xff] %v13204_v57  ;;  %4119 = vperm.xlu0 %11472, %v3742_v36   ;;  %2092 = vmatmul.bf16.gmra.mxu0 %v8851_v11  ;;  %v10938_v54 = vld [vmem:[%s19600_s2 + $0xf4] sm:$0xf]  ;;  %v13230_v23 = vpop.f32.mrf.mxu0  ;;  %v3745_v36 = vld [vmem:[%s19601_s5 + $0x228] sm:$0xff] }
 0x277   :  { %4124 = vperm.xlu1 %11473, %v3743_v22   ;;  %4084 = vperm.xlu2 %11474, %v3735_v13   ;;  %v2956_v27 = vadd.f32 %v2845_v6, %v2570_v58  ;;  %v9206_v58 = vld [vmem:[%s19600_s2 + $0x4b8] sm:$0xf]  ;;  %v11060_v6 = vld [vmem:[%s19600_s2 + $0x4c0] sm:$0xf0] }
 0x27a   :  { %v2283_v8 = vpop.f32.mrf.mxu1 }
 0x27b   :  { %v2284_v55 = vadd.f32 %v2283_v8, %v1996_v2  ;;  %v13228_v52 = vpop.f32.mrf.mxu2  ;;  %v8723_v2 = vor.u32 %v10938_v54, %v8720_v10  ;;  %v8786_v8 = vld [vmem:[%s19600_s2 + $0x170] sm:$0xf]  ;;  %v3067_v54 = vmax.f32 %v2956_v27, 0.0 }
 0x27d   :  { %v2572_v3 = vadd.f32 %v12919_v0, %v2284_v55  ;;  %v13235_v0 = vpop.f32.mrf.mxu3  ;;  %v10955_v55 = vld [vmem:[%s19600_s2 + $0x178] sm:$0xf0] }
 0x27e   :  { %19752 = vst [vmem:[#allocation149_spill] sm:$0xff] %v13235_v0  ;;  %4134 = vperm.xlu0 %11472, %v3745_v36   ;;  %v8787_v13 = vor.u32 %v10955_v55, %v8786_v8  ;;  %v3746_v36 = vld [vmem:[%s19601_s5 + $0x230] sm:$0xff] }
 0x27f   :  { %v2957_v11 = vadd.f32 %v2846_v37, %v2572_v3  ;;  %v1999_v37 = vadd.f32 %v12578_v53, %v11905_v45  ;;  %v9207_v3 = vor.u32 %v11060_v6, %v9206_v58  ;;  %v3738_v0 = vld [vmem:[%s19601_s5 + $0x1f0] sm:$0xff]  ;;  %4139 = vperm.xlu1 %11473, %v3746_v36   ;;  %v10975_v53 = vld [vmem:[%s19600_s2 + $0x218] sm:$0xf0]  ;;  %v13276_v6 = vpop.f32.mrf.mxu0  ;;  %v8732_v36 = vld [vmem:[%s19600_s2 + $0x114] sm:$0xf0] }
 0x280   :  { %9271 = vmatmul.msk.bf16.gmra.mxu2 %vm1810_vm0, %v8787_v13  ;;  %v8862_v45 = vld [vmem:[%s19600_s2 + $0x210] sm:$0xf]  ;;  %4099 = vperm.xlu2 %11474, %v3738_v0   ;;  %v2001_v13 = vadd.f32 %v12612_v4, %v11852_v12  ;;  %19754 = vst [vmem:[#allocation151_spill] sm:$0xff] %v13276_v6  ;;  %v2848_v12 = vld [vmem:[%s19602_s1 + $0x28] sm:$0xff] }
 0x281   :  { %v3068_v10 = vmax.f32 %v2957_v11, 0.0  ;;  %v8863_v55 = vor.u32 %v10975_v53, %v8862_v45 }
 0x282   :  { %v2286_v22 = vpop.f32.mrf.mxu1  ;;  %9306 = vmatmul.msk.bf16.gmra.mxu3 %vm1810_vm0, %v9207_v3 }
 0x283   :  { %v13259_v8 = vpack.c.bf16 %v3068_v10, %v3067_v54  ;;  %v2287_v27 = vadd.f32 %v2286_v22, %v1999_v37  ;;  %v13267_v11 = vpop.f32.mrf.mxu2  ;;  %v3749_v37 = vld [vmem:[%s19601_s5 + $0x248] sm:$0xff]  ;;  %v2847_v10 = vld [vmem:[%s19602_s1 + $0x20] sm:$0xff] }
 0x284   :  { %v3741_v54 = vld [vmem:[%s19601_s5 + $0x208] sm:$0xff] }
 0x285   :  { %2325 = vmatmul.bf16.gmra.mxu1 %v8723_v2  ;;  %v3748_v2 = vld [vmem:[%s19601_s5 + $0x240] sm:$0xff]  ;;  %v13272_v58 = vpop.f32.mrf.mxu3  ;;  %v2575_v0 = vadd.f32 %v12956_v47, %v2287_v27  ;;  %v10941_v47 = vld [vmem:[%s19600_s2 + $0x10c] sm:$0xf] }
 0x286   :  { %19753 = vst [vmem:[#allocation150_spill] sm:$0xff] %v13272_v58  ;;  %4149 = vperm.xlu0 %11472, %v3748_v2   ;;  %2097 = vmatmul.bf16.gmra.mxu0 %v8863_v55  ;;  %v3751_v55 = vld [vmem:[%s19601_s5 + $0x258] sm:$0xff] }
 0x287   :  { %4154 = vperm.xlu1 %11473, %v3749_v37   ;;  %v2958_v53 = vadd.f32 %v2847_v10, %v2575_v0  ;;  %v9218_v0 = vld [vmem:[%s19600_s2 + $0x4d0] sm:$0xf]  ;;  %v2004_v10 = vadd.f32 %v12635_v24, %v11865_v18  ;;  %v8874_v24 = vld [vmem:[%s19600_s2 + $0x228] sm:$0xf]  ;;  %v3767_v58 = vld [vmem:[%s19601_s5 + $0x2d8] sm:$0xff] }
 0x288   :  { %4114 = vperm.xlu2 %11474, %v3741_v54   ;;  %v11063_v54 = vld [vmem:[%s19600_s2 + $0x4d8] sm:$0xf0] }
 0x28a   :  { %v2288_v3 = vpop.f32.mrf.mxu1 }
 0x28b   :  { %v2289_v22 = vadd.f32 %v2288_v3, %v2001_v13  ;;  %v13298_v45 = vpop.f32.mrf.mxu2  ;;  %v8798_v13 = vld [vmem:[%s19600_s2 + $0x188] sm:$0xf]  ;;  %v10958_v3 = vld [vmem:[%s19600_s2 + $0x190] sm:$0xf0] }
 0x28c   :  { %v8799_v37 = vor.u32 %v10958_v3, %v8798_v13  ;;  %v3744_v13 = vld [vmem:[%s19601_s5 + $0x220] sm:$0xff] }
 0x28d   :  { %v2577_v4 = vadd.f32 %v12979_v21, %v2289_v22  ;;  %v13303_v2 = vpop.f32.mrf.mxu3  ;;  %v8735_v21 = vor.u32 %v10941_v47, %v8732_v36  ;;  %v13319_v36 = vpop.f32.mrf.mxu0 }
 0x28e   :  { %19755 = vst [vmem:[#allocation152_spill] sm:$0xff] %v13303_v2  ;;  %4164 = vperm.xlu0 %11472, %v3751_v55   ;;  %v3752_v55 = vld [vmem:[%s19601_s5 + $0x260] sm:$0xff] }
 0x28f   :  { %v2959_v27 = vadd.f32 %v2848_v12, %v2577_v4  ;;  %v9219_v12 = vor.u32 %v11063_v54, %v9218_v0  ;;  %v3069_v4 = vmax.f32 %v2958_v53, 0.0  ;;  %19756 = vst [vmem:[#allocation153_spill] sm:$0xff] %v13319_v36  ;;  %4169 = vperm.xlu1 %11473, %v3752_v55   ;;  %v10978_v53 = vld [vmem:[%s19600_s2 + $0x230] sm:$0xf0]  ;;  %v2006_v54 = vadd.f32 %v12674_v5, %v11814_v59  ;;  %v2850_v59 = vld [vmem:[%s19602_s1 + $0x38] sm:$0xff] }
 0x290   :  { %9272 = vmatmul.msk.bf16.gmra.mxu2 %vm1810_vm0, %v8799_v37  ;;  %4129 = vperm.xlu2 %11474, %v3744_v13   ;;  %v8875_v0 = vor.u32 %v10978_v53, %v8874_v24  ;;  %v2849_v55 = vld [vmem:[%s19602_s1 + $0x30] sm:$0xff]  ;;  %v10944_v13 = vld [vmem:[%s19600_s2 + $0x124] sm:$0xf] }
 0x291   :  { %v3070_v47 = vmax.f32 %v2959_v27, 0.0  ;;  %v8744_v24 = vld [vmem:[%s19600_s2 + $0x12c] sm:$0xf0] }
 0x292   :  { %v2291_v22 = vpop.f32.mrf.mxu1  ;;  %9307 = vmatmul.msk.bf16.gmra.mxu3 %vm1810_vm0, %v9219_v12 }
 0x293   :  { %v13329_v18 = vpack.c.bf16 %v3070_v47, %v3069_v4  ;;  %v2292_v27 = vadd.f32 %v2291_v22, %v2004_v10  ;;  %v13337_v3 = vpop.f32.mrf.mxu2  ;;  %v3755_v22 = vld [vmem:[%s19601_s5 + $0x278] sm:$0xff] }
 0x294   :  { %v3747_v10 = vld [vmem:[%s19601_s5 + $0x238] sm:$0xff] }
 0x295   :  { %2330 = vmatmul.bf16.gmra.mxu1 %v8735_v21  ;;  %v3754_v21 = vld [vmem:[%s19601_s5 + $0x270] sm:$0xff]  ;;  %v13342_v37 = vpop.f32.mrf.mxu3  ;;  %v2580_v4 = vadd.f32 %v13016_v35, %v2292_v27  ;;  %v13360_v35 = vpop.f32.mrf.mxu0 }
 0x296   :  { %19757 = vst [vmem:[#allocation154_spill] sm:$0xff] %v13342_v37  ;;  %4179 = vperm.xlu0 %11472, %v3754_v21   ;;  %2102 = vmatmul.bf16.gmra.mxu0 %v8875_v0  ;;  %v3757_v21 = vld [vmem:[%s19601_s5 + $0x288] sm:$0xff] }
 0x297   :  { %4184 = vperm.xlu1 %11473, %v3755_v22   ;;  %19758 = vst [vmem:[#allocation155_spill] sm:$0xff] %v13360_v35  ;;  %v2960_v27 = vadd.f32 %v2849_v55, %v2580_v4  ;;  %v9230_v4 = vld [vmem:[%s19600_s2 + $0x4e8] sm:$0xf]  ;;  %v11066_v55 = vld [vmem:[%s19600_s2 + $0x4f0] sm:$0xf0] }
 0x298   :  { %4144 = vperm.xlu2 %11474, %v3747_v10   ;;  %v10967_v35 = vld [vmem:[%s19600_s2 + $0x1d8] sm:$0xf0] }
 0x29a   :  { %v2293_v12 = vpop.f32.mrf.mxu1 }
 0x29b   :  { %v2294_v47 = vadd.f32 %v2293_v12, %v2006_v54  ;;  %v13368_v53 = vpop.f32.mrf.mxu2  ;;  %v8747_v54 = vor.u32 %v10944_v13, %v8744_v24  ;;  %v8810_v12 = vld [vmem:[%s19600_s2 + $0x1a0] sm:$0xf]  ;;  %v3758_v24 = vld [vmem:[%s19601_s5 + $0x290] sm:$0xff] }
 0x29d   :  { %v2582_v5 = vadd.f32 %v13036_v40, %v2294_v47  ;;  %v13373_v40 = vpop.f32.mrf.mxu3  ;;  %v10961_v47 = vld [vmem:[%s19600_s2 + $0x1a8] sm:$0xf0] }
 0x29e   :  { %19759 = vst [vmem:[#allocation156_spill] sm:$0xff] %v13373_v40  ;;  %4194 = vperm.xlu0 %11472, %v3757_v21   ;;  %v8811_v10 = vor.u32 %v10961_v47, %v8810_v12  ;;  %v3750_v21 = vld [vmem:[%s19601_s5 + $0x250] sm:$0xff] }
 0x29f   :  { %v2961_v0 = vadd.f32 %v2850_v59, %v2582_v5  ;;  %v9231_v59 = vor.u32 %v11066_v55, %v9230_v4  ;;  %v3071_v5 = vmax.f32 %v2960_v27, 0.0  ;;  %4199 = vperm.xlu1 %11473, %v3758_v24   ;;  %v8886_v27 = vld [vmem:[%s19600_s2 + $0x240] sm:$0xf]  ;;  %v13407_v4 = vpop.f32.mrf.mxu0  ;;  %v10947_v24 = vld [vmem:[%s19600_s2 + $0x13c] sm:$0xf] }
 0x2a0   :  { %9273 = vmatmul.msk.bf16.gmra.mxu2 %vm1810_vm0, %v8811_v10  ;;  %4159 = vperm.xlu2 %11474, %v3750_v21   ;;  %19760 = vst [vmem:[#allocation157_spill] sm:$0xff] %v13407_v4  ;;  %v8756_v21 = vld [vmem:[%s19600_s2 + $0x144] sm:$0xf0] }
 0x2a1   :  { %v3072_v13 = vmax.f32 %v2961_v0, 0.0  ;;  %v10981_v0 = vld [vmem:[%s19600_s2 + $0x248] sm:$0xf0] }
 0x2a2   :  { %v13384_v22 = vpop.f32.mrf.mxu1  ;;  %9308 = vmatmul.msk.bf16.gmra.mxu3 %vm1810_vm0, %v9231_v59  ;;  %v8887_v10 = vor.u32 %v10981_v0, %v8886_v27  ;;  %v3763_v0 = vld [vmem:[%s19601_s5 + $0x2b8] sm:$0xff] }
 0x2a3   :  { %v13397_v12 = vpack.c.bf16 %v3072_v13, %v3071_v5  ;;  %v13405_v47 = vpop.f32.mrf.mxu2  ;;  %v3761_v5 = vld [vmem:[%s19601_s5 + $0x2a8] sm:$0xff] }
 0x2a4   :  { %v3753_v13 = vld [vmem:[%s19601_s5 + $0x268] sm:$0xff] }
 0x2a5   :  { %2335 = vmatmul.bf16.gmra.mxu1 %v8747_v54  ;;  %v3760_v54 = vld [vmem:[%s19601_s5 + $0x2a0] sm:$0xff]  ;;  %v13412_v55 = vpop.f32.mrf.mxu3 }
 0x2a6   :  { %19761 = vst [vmem:[#allocation158_spill] sm:$0xff] %v13412_v55  ;;  %4209 = vperm.xlu0 %11472, %v3760_v54   ;;  %2107 = vmatmul.bf16.gmra.mxu0 %v8887_v10  ;;  %v8759_v54 = vor.u32 %v10947_v24, %v8756_v21  ;;  %v10964_v55 = vld [vmem:[%s19600_s2 + $0x1c0] sm:$0xf0]  ;;  %v11069_v24 = vld [vmem:[%s19600_s2 + $0x508] sm:$0xf0] }
 0x2a7   :  { %4214 = vperm.xlu1 %11473, %v3761_v5   ;;  %v8822_v5 = vld [vmem:[%s19600_s2 + $0x1b8] sm:$0xf]  ;;  %v13444_v40 = vpop.f32.mrf.mxu0 }
 0x2a8   :  { %4174 = vperm.xlu2 %11474, %v3753_v13   ;;  %v9242_v13 = vld [vmem:[%s19600_s2 + $0x500] sm:$0xf]  ;;  %19763 = vst [vmem:[#allocation160_spill] sm:$0xff] %v13444_v40  ;;  %v8823_v2 = vor.u32 %v10964_v55, %v8822_v5  ;;  %v8898_v55 = vld [vmem:[%s19600_s2 + $0x258] sm:$0xf] }
 0x2a9   :  { %v9243_v21 = vor.u32 %v11069_v24, %v9242_v13  ;;  %v10984_v5 = vld [vmem:[%s19600_s2 + $0x260] sm:$0xf0] }
 0x2aa   :  { %v13414_v59 = vpop.f32.mrf.mxu1  ;;  %v8899_v24 = vor.u32 %v10984_v5, %v8898_v55  ;;  %v10950_v55 = vld [vmem:[%s19600_s2 + $0x154] sm:$0xf]  ;;  %v8768_v5 = vld [vmem:[%s19600_s2 + $0x15c] sm:$0xf0] }
 0x2ab   :  { %v13428_v27 = vpop.f32.mrf.mxu2  ;;  %v8771_v57 = vor.u32 %v10950_v55, %v8768_v5  ;;  %v3770_v55 = vld [vmem:[%s19601_s5 + $0x2f0] sm:$0xff] }
 0x2ac   :  { %v3762_v5 = vld [vmem:[%s19601_s5 + $0x2b0] sm:$0xff] }
 0x2ad   :  { %v13433_v10 = vpop.f32.mrf.mxu3 }
 0x2ae   :  { %19762 = vst [vmem:[#allocation159_spill] sm:$0xff] %v13433_v10  ;;  %4224 = vperm.xlu0 %11472, %v3763_v0   ;;  %v3764_v0 = vld [vmem:[%s19601_s5 + $0x2c0] sm:$0xff] }
 0x2af   :  { %v3756_v10 = vld [vmem:[%s19601_s5 + $0x280] sm:$0xff]  ;;  %4229 = vperm.xlu1 %11473, %v3764_v0  }
 0x2b0   :  { %9274 = vmatmul.msk.bf16.gmra.mxu2 %vm1810_vm0, %v8823_v2  ;;  %4189 = vperm.xlu2 %11474, %v3756_v10   ;;  %v3766_v2 = vld [vmem:[%s19601_s5 + $0x2d0] sm:$0xff]  ;;  %v3759_v10 = vld [vmem:[%s19601_s5 + $0x298] sm:$0xff] }
 0x2b2   :  { %v13446_v37 = vpop.f32.mrf.mxu1  ;;  %9309 = vmatmul.msk.bf16.gmra.mxu3 %vm1810_vm0, %v9243_v21  ;;  %v13474_v21 = vpop.f32.mrf.mxu0 }
 0x2b3   :  { %v13465_v13 = vpop.f32.mrf.mxu2  ;;  %19765 = vst [vmem:[#allocation162_spill] sm:$0xff] %v13474_v21 }
 0x2b5   :  { %2340 = vmatmul.bf16.gmra.mxu1 %v8759_v54  ;;  %v13470_v0 = vpop.f32.mrf.mxu3 }
 0x2b6   :  { %19764 = vst [vmem:[#allocation161_spill] sm:$0xff] %v13470_v0  ;;  %4239 = vperm.xlu0 %11472, %v3766_v2   ;;  %2112 = vmatmul.bf16.gmra.mxu0 %v8899_v24  ;;  %v3769_v2 = vld [vmem:[%s19601_s5 + $0x2e8] sm:$0xff] }
 0x2b7   :  { %4244 = vperm.xlu1 %11473, %v3767_v58   ;;  %v8834_v58 = vld [vmem:[%s19600_s2 + $0x1d0] sm:$0xf] }
 0x2b8   :  { %4204 = vperm.xlu2 %11474, %v3759_v10   ;;  %v9254_v10 = vld [vmem:[%s19600_s2 + $0x518] sm:$0xf]  ;;  %v8835_v40 = vor.u32 %v10967_v35, %v8834_v58  ;;  %v10987_v58 = vld [vmem:[%s19600_s2 + $0x278] sm:$0xf0] }
 0x2ba   :  { %v13472_v54 = vpop.f32.mrf.mxu1  ;;  %v13515_v35 = vpop.f32.mrf.mxu0 }
 0x2bb   :  { %v13488_v24 = vpop.f32.mrf.mxu2  ;;  %19767 = vst [vmem:[#allocation164_spill] sm:$0xff] %v13515_v35 }
 0x2bd   :  { %v13493_v0 = vpop.f32.mrf.mxu3 }
 0x2be   :  { %19766 = vst [vmem:[#allocation163_spill] sm:$0xff] %v13493_v0  ;;  %4254 = vperm.xlu0 %11472, %v3769_v2   ;;  %v11072_v0 = vld [vmem:[%s19600_s2 + $0x520] sm:$0xf0] }
 0x2bf   :  { %v9255_v2 = vor.u32 %v11072_v0, %v9254_v10  ;;  %4259 = vperm.xlu1 %11473, %v3770_v55   ;;  %v8910_v0 = vld [vmem:[%s19600_s2 + $0x270] sm:$0xf]  ;;  %v3773_v55 = vld [vmem:[%s19601_s5 + $0x308] sm:$0xff] }
 0x2c0   :  { %9275 = vmatmul.msk.bf16.gmra.mxu2 %vm1810_vm0, %v8835_v40  ;;  %4219 = vperm.xlu2 %11474, %v3762_v5   ;;  %v8911_v4 = vor.u32 %v10987_v58, %v8910_v0  ;;  %v3765_v5 = vld [vmem:[%s19601_s5 + $0x2c8] sm:$0xff]  ;;  %v8780_v58 = vld [vmem:[%s19600_s2 + $0x174] sm:$0xf0] }
 0x2c1   :  { %v10953_v0 = vld [vmem:[%s19600_s2 + $0x16c] sm:$0xf] }
 0x2c2   :  { %v2306_v36 = vpop.f32.mrf.mxu1  ;;  %9310 = vmatmul.msk.bf16.gmra.mxu3 %vm1810_vm0, %v9255_v2  ;;  %v8783_v21 = vor.u32 %v10953_v0, %v8780_v58  ;;  %v3768_v0 = vld [vmem:[%s19601_s5 + $0x2e0] sm:$0xff]  ;;  %v2021_v58 = vadd.f32 %v12893_v1, %v11710_v16  ;;  %v3778_v16 = vld [vmem:[%s19601_s5 + $0x330] sm:$0xff] }
 0x2c3   :  { %v13523_v10 = vpop.f32.mrf.mxu2 }
 0x2c4   :  { %19768 = vst [vmem:[#allocation165_spill] sm:$0xff] %v13523_v10  ;;  %v287_v10 = vld [vmem:[%s19600_s2 + $0x530] sm:$0xf] }
 0x2c5   :  { %2345 = vmatmul.bf16.gmra.mxu1 %v8771_v57  ;;  %v3772_v57 = vld [vmem:[%s19601_s5 + $0x300] sm:$0xff]  ;;  %v13528_v40 = vpop.f32.mrf.mxu3  ;;  %v1529_v6 = vunpack.c.l.b16 %v287_v10  ;;  %v2019_v10 = vadd.f32 %v12847_v41, %v11693_v9  ;;  %v2014_v41 = vadd.f32 %v12782_v19, %v11789_v48  ;;  %v2857_v48 = vld [vmem:[%s19602_s1 + $0x70] sm:$0xff] }
 0x2c6   :  { %19769 = vst [vmem:[#allocation166_spill] sm:$0xff] %v13528_v40  ;;  %4269 = vperm.xlu0 %11472, %v3772_v57   ;;  %2117 = vmatmul.bf16.gmra.mxu0 %v8911_v4  ;;  %v13544_v57 = vpop.f32.mrf.mxu0  ;;  %v3775_v40 = vld [vmem:[%s19601_s5 + $0x318] sm:$0xff] }
 0x2c7   :  { %4274 = vperm.xlu1 %11473, %v3773_v55   ;;  %19771 = vst [vmem:[#allocation168_spill] sm:$0xff] %v13544_v57  ;;  %v2024_v55 = vadd.f32 %v12921_v30, %v11740_v28  ;;  %v8846_v57 = vld [vmem:[%s19600_s2 + $0x1e8] sm:$0xf]  ;;  %v1697_v30 = vpack.c.b16 %v1529_v6, %v1529_v6 }
 0x2c8   :  { %4234 = vperm.xlu2 %11474, %v3765_v5   ;;  %v8922_v6 = vld [vmem:[%s19600_s2 + $0x288] sm:$0xf] }
 0x2ca   :  { %v2308_v2 = vpop.f32.mrf.mxu1 }
 0x2cb   :  { %v13542_v4 = vpop.f32.mrf.mxu2 }
 0x2cc   :  { %19770 = vst [vmem:[#allocation167_spill] sm:$0xff] %v13542_v4  ;;  %v10970_v4 = vld [vmem:[%s19600_s2 + $0x1f0] sm:$0xf0] }
 0x2cd   :  { %v13549_v35 = vpop.f32.mrf.mxu3  ;;  %v8847_v28 = vor.u32 %v10970_v4, %v8846_v57  ;;  %v10990_v4 = vld [vmem:[%s19600_s2 + $0x290] sm:$0xf0]  ;;  %v2309_v57 = vadd.f32 %v2308_v2, %v2021_v58  ;;  %v2026_v2 = vadd.f32 %v12960_v46, %v11755_v34  ;;  %v2009_v34 = vadd.f32 %v12709_v31, %v11825_v63  ;;  %v2858_v46 = vld [vmem:[%s19602_s1 + $0x78] sm:$0xff] }
 0x2ce   :  { %19772 = vst [vmem:[#allocation169_spill] sm:$0xff] %v13549_v35  ;;  %4284 = vperm.xlu0 %11472, %v3775_v40   ;;  %v3776_v40 = vld [vmem:[%s19601_s5 + $0x320] sm:$0xff]  ;;  %v8923_v9 = vor.u32 %v10990_v4, %v8922_v6  ;;  %v3781_v4 = vld [vmem:[%s19601_s5 + $0x348] sm:$0xff] }
 0x2cf   :  { %4289 = vperm.xlu1 %11473, %v3776_v40  }
 0x2d0   :  { %9276 = vmatmul.msk.bf16.gmra.mxu2 %vm1810_vm0, %v8847_v28  ;;  %4249 = vperm.xlu2 %11474, %v3768_v0   ;;  %v13594_v28 = vpop.f32.mrf.mxu0  ;;  %v2597_v0 = vadd.f32 %v13228_v52, %v2309_v57  ;;  %v3771_v52 = vld [vmem:[%s19601_s5 + $0x2f8] sm:$0xff]  ;;  %v2297_v57 = vadd.f32 %v13384_v22, %v2009_v34  ;;  %v2853_v22 = vld [vmem:[%s19602_s1 + $0x50] sm:$0xff] }
 0x2d2   :  { %v2311_v5 = vpop.f32.mrf.mxu1  ;;  %9311 = vmatmul.msk.bf16.gmra.mxu3 %vm1810_vm0, %v1697_v30 }
 0x2d3   :  { %v2312_v35 = vadd.f32 %v2311_v5, %v2024_v55  ;;  %v13580_v40 = vpop.f32.mrf.mxu2  ;;  %v2307_v55 = vadd.f32 %v2306_v36, %v2019_v10  ;;  %v2011_v36 = vadd.f32 %v12738_v25, %v11778_v44  ;;  %v2855_v10 = vld [vmem:[%s19602_s1 + $0x60] sm:$0xff] }
 0x2d5   :  { %2350 = vmatmul.bf16.gmra.mxu1 %v8783_v21  ;;  %v13587_v1 = vpop.f32.mrf.mxu3  ;;  %v2016_v21 = vadd.f32 %v12814_v15, %v11742_v29  ;;  %v2600_v5 = vadd.f32 %v13267_v11, %v2312_v35  ;;  %v3779_v29 = vld [vmem:[%s19601_s5 + $0x338] sm:$0xff]  ;;  %v2302_v15 = vadd.f32 %v13446_v37, %v2014_v41  ;;  %v2856_v11 = vld [vmem:[%s19602_s1 + $0x68] sm:$0xff]  ;;  %v2595_v63 = vadd.f32 %v13199_v43, %v2307_v55  ;;  %v8792_v35 = vld [vmem:[%s19600_s2 + $0x18c] sm:$0xf0] }
 0x2d6   :  { %19773 = vst [vmem:[#allocation170_spill] sm:$0xff] %v13587_v1  ;;  %4299 = vperm.xlu0 %11472, %v3778_v16   ;;  %2122 = vmatmul.bf16.gmra.mxu0 %v8923_v9  ;;  %v2299_v6 = vadd.f32 %v13414_v59, %v2011_v36  ;;  %v2967_v43 = vadd.f32 %v2856_v11, %v2597_v0  ;;  %v2852_v0 = vld [vmem:[%s19602_s1 + $0x48] sm:$0xff]  ;;  %v3774_v11 = vld [vmem:[%s19601_s5 + $0x310] sm:$0xff] }
 0x2d7   :  { %v2304_v19 = vadd.f32 %v13472_v54, %v2016_v21  ;;  %4304 = vperm.xlu1 %11473, %v3779_v29   ;;  %v2968_v37 = vadd.f32 %v2857_v48, %v2600_v5  ;;  %v10956_v54 = vld [vmem:[%s19600_s2 + $0x184] sm:$0xf]  ;;  %v2590_v9 = vadd.f32 %v13129_v17, %v2302_v15  ;;  %v2029_v16 = vadd.f32 %v12997_v50, %v12010_v51  ;;  %v8858_v48 = vld [vmem:[%s19600_s2 + $0x200] sm:$0xf] }
 0x2d8   :  { %4264 = vperm.xlu2 %11474, %v3771_v52   ;;  %v8795_v41 = vor.u32 %v10956_v54, %v8792_v35  ;;  %v2966_v55 = vadd.f32 %v2855_v10, %v2595_v63  ;;  %v2587_v17 = vadd.f32 %v13092_v33, %v2299_v6  ;;  %v3078_v51 = vmax.f32 %v2967_v43, 0.0  ;;  %v2851_v52 = vld [vmem:[%s19602_s1 + $0x40] sm:$0xff] }
 0x2d9   :  { %v2592_v44 = vadd.f32 %v13160_v60, %v2304_v19  ;;  %v2854_v60 = vld [vmem:[%s19602_s1 + $0x58] sm:$0xff]  ;;  %v3079_v21 = vmax.f32 %v2968_v37, 0.0  ;;  %v10973_v19 = vld [vmem:[%s19600_s2 + $0x208] sm:$0xf0]  ;;  %v2585_v29 = vadd.f32 %v13071_v14, %v2297_v57  ;;  %v2964_v15 = vadd.f32 %v2853_v22, %v2590_v9  ;;  %v3784_v37 = vld [vmem:[%s19601_s5 + $0x360] sm:$0xff] }
 0x2da   :  { %v2313_v30 = vpop.f32.mrf.mxu1  ;;  %v3077_v33 = vmax.f32 %v2966_v55, 0.0  ;;  %v2963_v63 = vadd.f32 %v2852_v0, %v2587_v17  ;;  %v2031_v35 = vadd.f32 %v13028_v56, %v12008_v26  ;;  %v2859_v43 = vld [vmem:[%s19602_s1 + $0x80] sm:$0xff]  ;;  %v2860_v26 = vld [vmem:[%s19602_s1 + $0x88] sm:$0xff] }
 0x2db   :  { %v2314_v58 = vadd.f32 %v2313_v30, %v2026_v2  ;;  %v2965_v50 = vadd.f32 %v2854_v60, %v2592_v44  ;;  %v3075_v6 = vmax.f32 %v2964_v15, 0.0  ;;  %v2962_v44 = vadd.f32 %v2851_v52, %v2585_v29  ;;  %v3777_v56 = vld [vmem:[%s19601_s5 + $0x328] sm:$0xff]  ;;  %v10976_v0 = vld [vmem:[%s19600_s2 + $0x220] sm:$0xf0] }
 0x2dc   :  { %v3626_v14 = vpack.c.bf16 %v3078_v51, %v3077_v33  ;;  %v3074_v9 = vmax.f32 %v2963_v63, 0.0  ;;  %v2036_v15 = vadd.f32 %v13108_v42, %v11968_v38  ;;  %v9314_v38 = vld [vmem:[%s19603_s4] sm:$0xf]  ;;  %v10962_v63 = vld [vmem:[%s19600_s2 + $0x1b4] sm:$0xf] }
 0x2dd   :  { %v2602_v31 = vadd.f32 %v13298_v45, %v2314_v58  ;;  %v13631_v45 = vpop.f32.mrf.mxu2  ;;  %v13643_v59 = vpop.f32.mrf.mxu3  ;;  %v8859_v58 = vor.u32 %v10973_v19, %v8858_v48  ;;  %v3076_v36 = vmax.f32 %v2965_v50, 0.0  ;;  %v3073_v60 = vmax.f32 %v2962_v44, 0.0  ;;  %v8870_v19 = vld [vmem:[%s19600_s2 + $0x218] sm:$0xf] }
 0x2de   :  { %19774 = vst [vmem:[#allocation171_spill] sm:$0xff] %v13643_v59  ;;  %4314 = vperm.xlu0 %11472, %v3781_v4   ;;  %v8871_v29 = vor.u32 %v10976_v0, %v8870_v19  ;;  %v19781_v19 = vld [vmem:[#allocation22_spill] sm:$0xff]  ;;  %v19825_v59 = vld [vmem:[#allocation5_spill] sm:$0xff] }
 0x2df   :  { %v2969_v25 = vadd.f32 %v2858_v46, %v2602_v31  ;;  %v3782_v46 = vld [vmem:[%s19601_s5 + $0x350] sm:$0xff]  ;;  %v3625_v57 = vpack.c.bf16 %v3076_v36, %v3075_v6  ;;  %v3624_v55 = vpack.c.bf16 %v3074_v9, %v3073_v60  ;;  %v3783_v36 = vld [vmem:[%s19601_s5 + $0x358] sm:$0xff]  ;;  %v2039_v6 = vadd.f32 %v13139_v32, %v11930_v62 }
 0x2e0   :  { %9277 = vmatmul.msk.bf16.gmra.mxu2 %vm1810_vm0, %v8859_v58  ;;  %4319 = vperm.xlu1 %11473, %v3782_v46   ;;  %v10979_v9 = vld [vmem:[%s19600_s2 + $0x238] sm:$0xf0]  ;;  %v3786_v62 = vld [vmem:[%s19601_s5 + $0x370] sm:$0xff]  ;;  %v2044_v0 = vadd.f32 %v13230_v23, %v19781_v19  ;;  %v11097_v19 = vld [vmem:[%s19603_s4 + $0xc0] sm:$0xf0] }
 0x2e1   :  { %v3080_v2 = vmax.f32 %v2969_v25, 0.0  ;;  %4279 = vperm.xlu2 %11474, %v3774_v11  }
 0x2e2   :  { %v2316_v5 = vpop.f32.mrf.mxu1 }
 0x2e3   :  { %v3627_v30 = vpack.c.bf16 %v3080_v2, %v3079_v21  ;;  %v2317_v34 = vadd.f32 %v2316_v5, %v2029_v16  ;;  %v3785_v16 = vld [vmem:[%s19601_s5 + $0x368] sm:$0xff]  ;;  %v10959_v21 = vld [vmem:[%s19600_s2 + $0x19c] sm:$0xf] }
 0x2e4   :  { %v8804_v2 = vld [vmem:[%s19600_s2 + $0x1a4] sm:$0xf0] }
 0x2e5   :  { %2355 = vmatmul.bf16.gmra.mxu1 %v8795_v41  ;;  %6464 = vmatpush.bf16.msrb.mxu3 %v3627_v30  ;;  %v13669_v31 = vpop.f32.mrf.mxu2  ;;  %v13674_v54 = vpop.f32.mrf.mxu3  ;;  %v2605_v10 = vadd.f32 %v13337_v3, %v2317_v34  ;;  %v8807_v30 = vor.u32 %v10959_v21, %v8804_v2  ;;  %v2863_v21 = vld [vmem:[%s19602_s1 + $0xa0] sm:$0xff] }
 0x2e6   :  { %19775 = vst [vmem:[#allocation172_spill] sm:$0xff] %v13674_v54  ;;  %4329 = vperm.xlu0 %11472, %v3784_v37   ;;  %v8816_v37 = vld [vmem:[%s19600_s2 + $0x1bc] sm:$0xf0] }
 0x2e7   :  { %v2970_v41 = vadd.f32 %v2859_v43, %v2605_v10  ;;  %v8819_v44 = vor.u32 %v10962_v63, %v8816_v37 }
 0x2e8   :  { %4334 = vperm.xlu1 %11473, %v3785_v16  }
 0x2e9   :  { %6465 = vmatpush.bf16.msrb.mxu3 %v3626_v14  ;;  %4294 = vperm.xlu2 %11474, %v3777_v56   ;;  %v3081_v51 = vmax.f32 %v2970_v41, 0.0  ;;  %v2862_v14 = vld [vmem:[%s19602_s1 + $0x98] sm:$0xff] }
 0x2ea   :  { %v2318_v25 = vpop.f32.mrf.mxu1 }
 0x2eb   :  { %v2319_v4 = vadd.f32 %v2318_v25, %v2031_v35 }
 0x2ed   :  { %v2607_v3 = vadd.f32 %v13368_v53, %v2319_v4  ;;  %6466 = vmatpush.bf16.msrb.mxu3 %v3625_v57  ;;  %v13698_v5 = vpop.f32.mrf.mxu2  ;;  %v13700_v17 = vpop.f32.mrf.mxu3  ;;  %v2034_v53 = vadd.f32 %v13073_v20, %v11970_v39  ;;  %v3780_v39 = vld [vmem:[%s19601_s5 + $0x340] sm:$0xff]  ;;  %v8882_v57 = vld [vmem:[%s19600_s2 + $0x230] sm:$0xf] }
 0x2ee   :  { %19776 = vst [vmem:[#allocation173_spill] sm:$0xff] %v13700_v17 }
 0x2ef   :  { %v2971_v22 = vadd.f32 %v2860_v26, %v2607_v3  ;;  %v8883_v26 = vor.u32 %v10979_v9, %v8882_v57  ;;  %v2041_v3 = vadd.f32 %v13189_v49, %v11928_v61  ;;  %v11083_v61 = vld [vmem:[%s19603_s4 + $0x50] sm:$0xf0]  ;;  %v10968_v9 = vld [vmem:[%s19600_s2 + $0x1e4] sm:$0xf] }
 0x2f0   :  { %9278 = vmatmul.msk.bf16.gmra.mxu2 %vm1810_vm0, %v8871_v29 }
 0x2f1   :  { %6467 = vmatpush.bf16.msrb.mxu3 %v3624_v55  ;;  %v3082_v50 = vmax.f32 %v2971_v22, 0.0  ;;  %4309 = vperm.xlu2 %11474, %v3780_v39   ;;  %v2864_v55 = vld [vmem:[%s19602_s1 + $0xa8] sm:$0xff] }
 0x2f2   :  { %v2321_v48 = vpop.f32.mrf.mxu1 }
 0x2f3   :  { %v13710_v58 = vpack.c.bf16 %v3082_v50, %v3081_v51  ;;  %v2322_v34 = vadd.f32 %v2321_v48, %v2034_v53  ;;  %v9342_v53 = vld [vmem:[%s19603_s4 + $0x38] sm:$0xf] }
 0x2f4   :  { %v9343_v50 = vor.u32 %v11083_v61, %v9342_v53  ;;  %v10985_v53 = vld [vmem:[%s19600_s2 + $0x268] sm:$0xf0] }
 0x2f5   :  { %2360 = vmatmul.bf16.gmra.mxu1 %v8807_v30  ;;  %6468 = vmatpush.bf16.msrb.mxu3 %v13397_v12  ;;  %v13717_v20 = vpop.f32.mrf.mxu2  ;;  %v13719_v33 = vpop.f32.mrf.mxu3  ;;  %v2610_v46 = vadd.f32 %v13405_v47, %v2322_v34  ;;  %v2861_v12 = vld [vmem:[%s19602_s1 + $0x90] sm:$0xff]  ;;  %v8828_v30 = vld [vmem:[%s19600_s2 + $0x1d4] sm:$0xf0] }
 0x2f6   :  { %19777 = vst [vmem:[#allocation174_spill] sm:$0xff] %v13719_v33 }
 0x2f7   :  { %v2972_v47 = vadd.f32 %v2861_v12, %v2610_v46  ;;  %v8894_v46 = vld [vmem:[%s19600_s2 + $0x248] sm:$0xf] }
 0x2f9   :  { %6469 = vmatpush.bf16.msrb.mxu3 %v13329_v18  ;;  %v11076_v18 = vld [vmem:[%s19603_s4 + $0x18] sm:$0xf0]  ;;  %4324 = vperm.xlu2 %11474, %v3783_v36   ;;  %v3083_v25 = vmax.f32 %v2972_v47, 0.0 }
 0x2fa   :  { %v2323_v11 = vpop.f32.mrf.mxu1  ;;  %v9315_v35 = vor.u32 %v11076_v18, %v9314_v38  ;;  %v19784_v38 = vld [vmem:[#allocation151_spill] sm:$0xff]  ;;  %v19785_v47 = vld [vmem:[#allocation165_spill] sm:$0xff] }
 0x2fb   :  { %v2324_v52 = vadd.f32 %v2323_v11, %v2036_v15  ;;  %v10982_v11 = vld [vmem:[%s19600_s2 + $0x250] sm:$0xf0] }
 0x2fd   :  { %v2612_v42 = vadd.f32 %v13428_v27, %v2324_v52  ;;  %6470 = vmatpush.bf16.msrb.mxu3 %v13259_v8  ;;  %v13748_v27 = vpop.f32.mrf.mxu2  ;;  %v13750_v10 = vpop.f32.mrf.mxu3  ;;  %v8895_v52 = vor.u32 %v10982_v11, %v8894_v46 }
 0x2fe   :  { %19778 = vst [vmem:[#allocation175_spill] sm:$0xff] %v13750_v10  ;;  %v19824_v10 = vld [vmem:[#allocation12_spill] sm:$0xff] }
 0x2ff   :  { %v2973_v8 = vadd.f32 %v2862_v14, %v2612_v42  ;;  %v19783_v42 = vld [vmem:[#allocation21_spill] sm:$0xff] }
 0x300   :  { %9279 = vmatmul.msk.bf16.gmra.mxu2 %vm1810_vm0, %v8883_v26  ;;  %v2046_v18 = vadd.f32 %v19784_v38, %v19783_v42  ;;  %v8840_v26 = vld [vmem:[%s19600_s2 + $0x1ec] sm:$0xf0]  ;;  %v10988_v42 = vld [vmem:[%s19600_s2 + $0x280] sm:$0xf0] }
 0x301   :  { %6471 = vmatpush.bf16.msrb.mxu3 %v13191_v7  ;;  %v3084_v43 = vmax.f32 %v2973_v8, 0.0  ;;  %4339 = vperm.xlu2 %11474, %v3786_v62   ;;  %v2865_v8 = vld [vmem:[%s19602_s1 + $0xb0] sm:$0xff] }
 0x302   :  { %v2326_v4 = vpop.f32.mrf.mxu1 }
 0x303   :  { %v13761_v16 = vpack.c.bf16 %v3084_v43, %v3083_v25  ;;  %v2327_v56 = vadd.f32 %v2326_v4, %v2039_v6  ;;  %v2866_v6 = vld [vmem:[%s19602_s1 + $0xb8] sm:$0xff]  ;;  %v9370_v43 = vld [vmem:[%s19603_s4 + $0x70] sm:$0xf]  ;;  %v11090_v4 = vld [vmem:[%s19603_s4 + $0x88] sm:$0xf0] }
 0x304   :  { %6472 = vmatmul.bf16.vlgmr.msrb.gmra.mxu3 %v9315_v35 }
 0x305   :  { %2365 = vmatmul.bf16.gmra.mxu1 %v8819_v44  ;;  %v13767_v32 = vpop.f32.mrf.mxu2  ;;  %v13769_v7 = vpop.f32.mrf.mxu3  ;;  %v2615_v60 = vadd.f32 %v13465_v13, %v2327_v56  ;;  %v10965_v13 = vld [vmem:[%s19600_s2 + $0x1cc] sm:$0xf] }
 0x306   :  { %19779 = vst [vmem:[#allocation176_spill] sm:$0xff] %v13769_v7  ;;  %v8831_v29 = vor.u32 %v10965_v13, %v8828_v30  ;;  %v19786_v44 = vld [vmem:[#allocation167_spill] sm:$0xff] }
 0x307   :  { %v2974_v49 = vadd.f32 %v2863_v21, %v2615_v60 }
 0x309   :  { %v3085_v34 = vmax.f32 %v2974_v49, 0.0 }
 0x30a   :  { %v2328_v41 = vpop.f32.mrf.mxu1 }
 0x30b   :  { %v2329_v2 = vadd.f32 %v2328_v41, %v2041_v3  ;;  %v9371_v3 = vor.u32 %v11090_v4, %v9370_v43  ;;  %v8843_v41 = vor.u32 %v10968_v9, %v8840_v26  ;;  %v8930_v26 = vld [vmem:[%s19600_s2 + $0x290] sm:$0xf] }
 0x30d   :  { %v2617_v22 = vadd.f32 %v13488_v24, %v2329_v2  ;;  %v13793_v51 = vpop.f32.mrf.mxu2  ;;  %v13795_v48 = vpop.f32.mrf.mxu3 }
 0x30e   :  { %19780 = vst [vmem:[#allocation177_spill] sm:$0xff] %v13795_v48  ;;  %v19823_v48 = vld [vmem:[#allocation2_spill] sm:$0xff] }
 0x30f   :  { %v2975_v24 = vadd.f32 %v2864_v55, %v2617_v22  ;;  %v8906_v22 = vld [vmem:[%s19600_s2 + $0x260] sm:$0xf] }
 0x310   :  { %9280 = vmatmul.msk.bf16.gmra.mxu2 %vm1810_vm0, %v8895_v52  ;;  %v8907_v49 = vor.u32 %v10985_v53, %v8906_v22  ;;  %v9454_v53 = vld [vmem:[%s19603_s4 + $0x118] sm:$0xf] }
 0x311   :  { %v3086_v39 = vmax.f32 %v2975_v24, 0.0 }
 0x312   :  { %v2331_v15 = vpop.f32.mrf.mxu1 }
 0x313   :  { %v13805_v12 = vpack.c.bf16 %v3086_v39, %v3085_v34  ;;  %v2332_v14 = vadd.f32 %v2331_v15, %v2044_v0  ;;  %v10971_v0 = vld [vmem:[%s19600_s2 + $0x1fc] sm:$0xf]  ;;  %v13869_v15 = vpop.f32.mrf.mxu0 }
 0x314   :  { %6477 = vmatmul.bf16.gmra.mxu3 %v9343_v50  ;;  %v9398_v50 = vld [vmem:[%s19603_s4 + $0xa8] sm:$0xf] }
 0x315   :  { %2370 = vmatmul.bf16.gmra.mxu1 %v8831_v29  ;;  %v13808_v23 = vpop.f32.mrf.mxu2  ;;  %v13810_v36 = vpop.f32.mrf.mxu3  ;;  %v2620_v63 = vadd.f32 %v19785_v47, %v2332_v14  ;;  %v8852_v29 = vld [vmem:[%s19600_s2 + $0x204] sm:$0xf0]  ;;  %v9399_v39 = vor.u32 %v11097_v19, %v9398_v50  ;;  %v8918_v14 = vld [vmem:[%s19600_s2 + $0x278] sm:$0xf]  ;;  %v10977_v19 = vld [vmem:[%s19600_s2 + $0x22c] sm:$0xf] }
 0x316   :  { %19782 = vst [vmem:[#allocation22_spill] sm:$0xff] %v13810_v36  ;;  %v8855_v11 = vor.u32 %v10971_v0, %v8852_v29  ;;  %v8919_v38 = vor.u32 %v10988_v42, %v8918_v14  ;;  %v8876_v0 = vld [vmem:[%s19600_s2 + $0x234] sm:$0xf0]  ;;  %v19794_v14 = vld [vmem:[#allocation3_spill] sm:$0xff]  ;;  %v19795_v42 = vld [vmem:[#allocation168_spill] sm:$0xff] }
 0x317   :  { %v2976_v57 = vadd.f32 %v2865_v8, %v2620_v63  ;;  %v9426_v8 = vld [vmem:[%s19603_s4 + $0xe0] sm:$0xf] }
 0x319   :  { %v3087_v21 = vmax.f32 %v2976_v57, 0.0 }
 0x31a   :  { %v2333_v37 = vpop.f32.mrf.mxu1 }
 0x31b   :  { %v2334_v35 = vadd.f32 %v2333_v37, %v2046_v18  ;;  %v13886_v37 = vpop.f32.mrf.mxu0 }
 0x31d   :  { %v2622_v25 = vadd.f32 %v19786_v44, %v2334_v35  ;;  %v13834_v56 = vpop.f32.mrf.mxu2  ;;  %v13836_v60 = vpop.f32.mrf.mxu3  ;;  %v11104_v35 = vld [vmem:[%s19603_s4 + $0xf8] sm:$0xf0]  ;;  %v8864_v44 = vld [vmem:[%s19600_s2 + $0x21c] sm:$0xf0] }
 0x31e   :  { %19787 = vst [vmem:[#allocation21_spill] sm:$0xff] %v13836_v60  ;;  %v9427_v43 = vor.u32 %v11104_v35, %v9426_v8  ;;  %v8879_v8 = vor.u32 %v10977_v19, %v8876_v0  ;;  %v19800_v0 = vld [vmem:[#allocation11_spill] sm:$0xff] }
 0x31f   :  { %v2977_v62 = vadd.f32 %v2866_v6, %v2622_v25  ;;  %v10974_v6 = vld [vmem:[%s19600_s2 + $0x214] sm:$0xf] }
 0x320   :  { %9281 = vmatmul.msk.bf16.gmra.mxu2 %vm1810_vm0, %v8907_v49  ;;  %v8867_v57 = vor.u32 %v10974_v6, %v8864_v44  ;;  %v11111_v49 = vld [vmem:[%s19603_s4 + $0x130] sm:$0xf0]  ;;  %v8942_v6 = vld [vmem:[%s19600_s2 + $0x2a8] sm:$0xf] }
 0x321   :  { %v3088_v2 = vmax.f32 %v2977_v62, 0.0  ;;  %v10991_v62 = vld [vmem:[%s19600_s2 + $0x298] sm:$0xf0]  ;;  %v10994_v44 = vld [vmem:[%s19600_s2 + $0x2b0] sm:$0xf0] }
 0x322   :  { %v13838_v55 = vpop.f32.mrf.mxu1 }
 0x323   :  { %v13846_v61 = vpack.c.bf16 %v3088_v2, %v3087_v21 }
 0x324   :  { %6482 = vmatmul.bf16.gmra.mxu3 %v9371_v3  ;;  %v13910_v3 = vpop.f32.mrf.mxu0 }
 0x325   :  { %2375 = vmatmul.bf16.gmra.mxu1 %v8843_v41  ;;  %v13849_v13 = vpop.f32.mrf.mxu2  ;;  %v13851_v30 = vpop.f32.mrf.mxu3  ;;  %v8931_v41 = vor.u32 %v10991_v62, %v8930_v26  ;;  %v19797_v26 = vld [vmem:[#allocation162_spill] sm:$0xff] }
 0x326   :  { %19788 = vst [vmem:[#allocation151_spill] sm:$0xff] %v13851_v30 }
 0x32a   :  { %v13853_v24 = vpop.f32.mrf.mxu1 }
 0x32c   :  { %v13923_v50 = vpop.f32.mrf.mxu0 }
 0x32d   :  { %v13867_v34 = vpop.f32.mrf.mxu2  ;;  %v13871_v46 = vpop.f32.mrf.mxu3 }
 0x32e   :  { %19789 = vst [vmem:[#allocation165_spill] sm:$0xff] %v13871_v46 }
 0x330   :  { %9282 = vmatmul.msk.bf16.gmra.mxu2 %vm1810_vm0, %v8919_v38  ;;  %v2064_v38 = vadd.f32 %v19795_v42, %v19794_v14  ;;  %v19801_v14 = vld [vmem:[#allocation157_spill] sm:$0xff] }
 0x331   :  { %v2054_v42 = vadd.f32 %v19801_v14, %v19800_v0 }
 0x332   :  { %v13873_v52 = vpop.f32.mrf.mxu1 }
 0x334   :  { %6487 = vmatmul.bf16.gmra.mxu3 %v9399_v39  ;;  %v9455_v39 = vor.u32 %v11111_v49, %v9454_v53  ;;  %v19799_v53 = vld [vmem:[#allocation164_spill] sm:$0xff] }
 0x335   :  { %2380 = vmatmul.bf16.gmra.mxu1 %v8855_v11  ;;  %v13882_v18 = vpop.f32.mrf.mxu2  ;;  %v13884_v47 = vpop.f32.mrf.mxu3 }
 0x336   :  { %19790 = vst [vmem:[#allocation167_spill] sm:$0xff] %v13884_v47  ;;  %v19803_v47 = vld [vmem:[#allocation160_spill] sm:$0xff] }
 0x33a   :  { %v2343_v63 = vpop.f32.mrf.mxu1 }
 0x33d   :  { %v13900_v25 = vpop.f32.mrf.mxu2  ;;  %v13902_v4 = vpop.f32.mrf.mxu3 }
 0x33e   :  { %19791 = vst [vmem:[#allocation178_spill] sm:$0xff] %v13902_v4  ;;  %v19802_v4 = vld [vmem:[#allocation10_spill] sm:$0xff] }
 0x340   :  { %9283 = vmatmul.msk.bf16.gmra.mxu2 %vm1810_vm0, %v8931_v41  ;;  %v19798_v41 = vld [vmem:[#allocation6_spill] sm:$0xff] }
 0x341   :  { %v2061_v49 = vadd.f32 %v19799_v53, %v19798_v41 }
 0x342   :  { %v2346_v9 = vpop.f32.mrf.mxu1 }
 0x344   :  { %6492 = vmatmul.bf16.gmra.mxu3 %v9427_v43  ;;  %v8943_v43 = vor.u32 %v10994_v44, %v8942_v6  ;;  %v19804_v6 = vld [vmem:[#allocation4_spill] sm:$0xff] }
 0x345   :  { %2385 = vmatmul.bf16.gmra.mxu1 %v8867_v57  ;;  %v13913_v21 = vpop.f32.mrf.mxu2  ;;  %v13915_v2 = vpop.f32.mrf.mxu3  ;;  %v19796_v57 = vld [vmem:[#allocation7_spill] sm:$0xff]  ;;  %v2066_v44 = vadd.f32 %v13594_v28, %v19804_v6  ;;  %v2342_v28 = vadd.f32 %v13873_v52, %v2054_v42  ;;  %v10980_v42 = vld [vmem:[%s19600_s2 + $0x244] sm:$0xf] }
 0x346   :  { %19792 = vst [vmem:[#allocation179_spill] sm:$0xff] %v13915_v2  ;;  %v2059_v62 = vadd.f32 %v19797_v26, %v19796_v57  ;;  %v13950_v2 = vpop.f32.mrf.mxu0  ;;  %v11118_v52 = vld [vmem:[%s19603_s4 + $0x168] sm:$0xf0] }
 0x348   :  { %v2347_v57 = vadd.f32 %v2346_v9, %v2059_v62  ;;  %v2872_v9 = vld [vmem:[%s19602_s1 + $0xe8] sm:$0xff] }
 0x349   :  { %v19809_v62 = vld [vmem:[#allocation155_spill] sm:$0xff] }
 0x34a   :  { %v2348_v22 = vpop.f32.mrf.mxu1 }
 0x34b   :  { %v2349_v19 = vadd.f32 %v2348_v22, %v2061_v49  ;;  %v2873_v22 = vld [vmem:[%s19602_s1 + $0xf0] sm:$0xff] }
 0x34d   :  { %v13931_v29 = vpop.f32.mrf.mxu2  ;;  %v13933_v11 = vpop.f32.mrf.mxu3 }
 0x34e   :  { %19793 = vst [vmem:[#allocation180_spill] sm:$0xff] %v13933_v11 }
 0x350   :  { %9284 = vmatmul.msk.bf16.gmra.mxu2 %vm1810_vm0, %v8943_v43  ;;  %v2637_v43 = vadd.f32 %v13748_v27, %v2349_v19  ;;  %v9482_v19 = vld [vmem:[%s19603_s4 + $0x150] sm:$0xf] }
 0x352   :  { %v2351_v35 = vpop.f32.mrf.mxu1 }
 0x353   :  { %v2352_v11 = vadd.f32 %v2351_v35, %v2064_v38 }
 0x354   :  { %6497 = vmatmul.bf16.gmra.mxu3 %v9455_v39  ;;  %v2056_v39 = vadd.f32 %v19803_v47, %v19802_v4  ;;  %v19806_v47 = vld [vmem:[#allocation16_spill] sm:$0xff]  ;;  %v19807_v4 = vld [vmem:[#allocation153_spill] sm:$0xff] }
 0x355   :  { %2390 = vmatmul.bf16.gmra.mxu1 %v8879_v8  ;;  %v2640_v26 = vadd.f32 %v13767_v32, %v2352_v11  ;;  %v13957_v41 = vpop.f32.mrf.mxu2  ;;  %v13959_v38 = vpop.f32.mrf.mxu3  ;;  %v2049_v49 = vadd.f32 %v19807_v4, %v19806_v47  ;;  %v2874_v32 = vld [vmem:[%s19602_s1 + $0xf8] sm:$0xff]  ;;  %v19808_v11 = vld [vmem:[#allocation15_spill] sm:$0xff]  ;;  %v9483_v47 = vor.u32 %v11118_v52, %v9482_v19  ;;  %v2867_v52 = vld [vmem:[%s19602_s1 + $0xc0] sm:$0xff] }
 0x356   :  { %19805 = vst [vmem:[#allocation3_spill] sm:$0xff] %v13959_v38  ;;  %v2344_v35 = vadd.f32 %v2343_v63, %v2056_v39  ;;  %v2051_v0 = vadd.f32 %v19809_v62, %v19808_v11  ;;  %v2635_v63 = vadd.f32 %v13717_v20, %v2347_v57  ;;  %v8888_v39 = vld [vmem:[%s19600_s2 + $0x24c] sm:$0xf0]  ;;  %v2871_v20 = vld [vmem:[%s19602_s1 + $0xe0] sm:$0xff]  ;;  %v2983_v57 = vadd.f32 %v2872_v9, %v2637_v43  ;;  %v2870_v4 = vld [vmem:[%s19602_s1 + $0xd8] sm:$0xff]  ;;  %v14004_v43 = vpop.f32.mrf.mxu0 }
 0x357   :  { %v2984_v14 = vadd.f32 %v2873_v22, %v2640_v26  ;;  %v2337_v26 = vadd.f32 %v13838_v55, %v2049_v49  ;;  %v19810_v22 = vld [vmem:[#allocation38_spill] sm:$0xff]  ;;  %v8891_v11 = vor.u32 %v10980_v42, %v8888_v39  ;;  %v19811_v42 = vld [vmem:[#allocation31_spill] sm:$0xff] }
 0x358   :  { %v2632_v6 = vadd.f32 %v13698_v5, %v2344_v35  ;;  %v3094_v49 = vmax.f32 %v2983_v57, 0.0  ;;  %v2071_v39 = vadd.f32 %v13886_v37, %v19811_v42  ;;  %v2875_v57 = vld [vmem:[%s19602_s1 + $0x100] sm:$0xff]  ;;  %v2876_v37 = vld [vmem:[%s19602_s1 + $0x108] sm:$0xff]  ;;  %v2877_v42 = vld [vmem:[%s19602_s1 + $0x110] sm:$0xff] }
 0x359   :  { %v3095_v62 = vmax.f32 %v2984_v14, 0.0  ;;  %v2625_v9 = vadd.f32 %v13580_v40, %v2337_v26 }
 0x35a   :  { %v2353_v8 = vpop.f32.mrf.mxu1 }
 0x35b   :  { %v2354_v53 = vadd.f32 %v2353_v8, %v2066_v44  ;;  %v2630_v8 = vadd.f32 %v13669_v31, %v2342_v28  ;;  %v2869_v31 = vld [vmem:[%s19602_s1 + $0xd0] sm:$0xff]  ;;  %v2981_v28 = vadd.f32 %v2870_v4, %v2632_v6  ;;  %v2978_v40 = vadd.f32 %v2867_v52, %v2625_v9  ;;  %v9510_v4 = vld [vmem:[%s19603_s4 + $0x188] sm:$0xf] }
 0x35d   :  { %v2642_v27 = vadd.f32 %v13793_v51, %v2354_v53  ;;  %v2339_v51 = vadd.f32 %v13853_v24, %v2051_v0  ;;  %v2069_v53 = vadd.f32 %v13869_v15, %v19810_v22  ;;  %v2982_v24 = vadd.f32 %v2871_v20, %v2635_v63  ;;  %v14002_v0 = vpop.f32.mrf.mxu2  ;;  %v2841_v5 = vpop.f32.mrf.mxu3 }
 0x35e   :  { %v2980_v19 = vadd.f32 %v2869_v31, %v2630_v8  ;;  %v8900_v5 = vld [vmem:[%s19600_s2 + $0x264] sm:$0xf0] }
 0x35f   :  { %v2985_v44 = vadd.f32 %v2874_v32, %v2642_v27  ;;  %v2627_v55 = vadd.f32 %v13631_v45, %v2339_v51  ;;  %v2868_v32 = vld [vmem:[%s19602_s1 + $0xc8] sm:$0xff]  ;;  %v3093_v27 = vmax.f32 %v2982_v24, 0.0  ;;  %v10983_v24 = vld [vmem:[%s19600_s2 + $0x25c] sm:$0xf] }
 0x360   :  { %v3091_v51 = vmax.f32 %v2980_v19, 0.0 }
 0x361   :  { %v3096_v38 = vmax.f32 %v2985_v44, 0.0  ;;  %v3634_v45 = vpack.c.bf16 %v3094_v49, %v3093_v27  ;;  %v2979_v14 = vadd.f32 %v2868_v32, %v2627_v55  ;;  %v19812_v55 = vld [vmem:[#allocation29_spill] sm:$0xff]  ;;  %v8903_v49 = vor.u32 %v10983_v24, %v8900_v5 }
 0x362   :  { %v2356_v35 = vpop.f32.mrf.mxu1 }
 0x363   :  { %v3635_v15 = vpack.c.bf16 %v3096_v38, %v3095_v62  ;;  %v2357_v63 = vadd.f32 %v2356_v35, %v2069_v53  ;;  %v3092_v38 = vmax.f32 %v2981_v28, 0.0  ;;  %v3090_v22 = vmax.f32 %v2979_v14, 0.0  ;;  %v14025_v53 = vpop.f32.mrf.mxu0 }
 0x364   :  { %6502 = vmatmul.bf16.gmra.mxu3 %v9483_v47  ;;  %v3089_v47 = vmax.f32 %v2978_v40, 0.0  ;;  %v9316_v40 = vld [vmem:[%s19603_s4 + $0x1c] sm:$0xf0] }
 0x365   :  { %2395 = vmatmul.bf16.gmra.mxu1 %v8891_v11  ;;  %6752 = vmatpush.bf16.msrb.mxu2 %v3635_v15  ;;  %v2645_v20 = vadd.f32 %v13808_v23, %v2357_v63  ;;  %v14020_v6 = vpop.f32.mrf.mxu2  ;;  %v3633_v8 = vpack.c.bf16 %v3092_v38, %v3091_v51  ;;  %v11125_v11 = vld [vmem:[%s19603_s4 + $0x1a0] sm:$0xf0]  ;;  %v2074_v15 = vadd.f32 %v13910_v3, %v19812_v55 }
 0x366   :  { %v9511_v31 = vor.u32 %v11125_v11, %v9510_v4  ;;  %v11073_v51 = vld [vmem:[%s19603_s4 + $0x4] sm:$0xf]  ;;  %v19814_v11 = vld [vmem:[#allocation25_spill] sm:$0xff] }
 0x367   :  { %v2986_v62 = vadd.f32 %v2875_v57, %v2645_v20  ;;  %v10986_v57 = vld [vmem:[%s19600_s2 + $0x274] sm:$0xf] }
 0x369   :  { %6753 = vmatpush.bf16.msrb.mxu2 %v3634_v45  ;;  %v3097_v32 = vmax.f32 %v2986_v62, 0.0  ;;  %v19813_v45 = vld [vmem:[#allocation39_spill] sm:$0xff]  ;;  %v2079_v62 = vadd.f32 %v13950_v2, %v19814_v11  ;;  %v2879_v2 = vld [vmem:[%s19602_s1 + $0x120] sm:$0xff]  ;;  %v14142_v11 = vpop.permute.xlu2 %847 }
 0x36a   :  { %v2358_v44 = vpop.f32.mrf.mxu1  ;;  %v2076_v38 = vadd.f32 %v13923_v50, %v19813_v45  ;;  %v2878_v50 = vld [vmem:[%s19602_s1 + $0x118] sm:$0xff]  ;;  %19818 = vst [vmem:[#allocation168_spill] sm:$0xff] %v14142_v11 }
 0x36b   :  { %v2359_v26 = vadd.f32 %v2358_v44, %v2071_v39  ;;  %v14050_v52 = vpop.f32.mrf.mxu0  ;;  %v9344_v45 = vld [vmem:[%s19603_s4 + $0x54] sm:$0xf0] }
 0x36d   :  { %v2647_v23 = vadd.f32 %v13834_v56, %v2359_v26  ;;  %6754 = vmatpush.bf16.msrb.mxu2 %v3633_v8  ;;  %v3632_v56 = vpack.c.bf16 %v3090_v22, %v3089_v47  ;;  %v14045_v28 = vpop.f32.mrf.mxu2  ;;  %v9319_v22 = vor.u32 %v11073_v51, %v9316_v40 }
 0x36f   :  { %v2987_v35 = vadd.f32 %v2876_v37, %v2647_v23 }
 0x371   :  { %6755 = vmatpush.bf16.msrb.mxu2 %v3632_v56  ;;  %v3098_v9 = vmax.f32 %v2987_v35, 0.0 }
 0x372   :  { %v2361_v63 = vpop.f32.mrf.mxu1 }
 0x373   :  { %v14047_v27 = vpack.c.bf16 %v3098_v9, %v3097_v32  ;;  %v2362_v19 = vadd.f32 %v2361_v63, %v2074_v15  ;;  %v14084_v26 = vpop.f32.mrf.mxu0  ;;  %v9566_v9 = vld [vmem:[%s19603_s4 + $0x1f8] sm:$0xf]  ;;  %v2880_v63 = vld [vmem:[%s19602_s1 + $0x128] sm:$0xff] }
 0x374   :  { %6507 = vmatmul.bf16.gmra.mxu3 %v9511_v31  ;;  %v19815_v31 = vld [vmem:[#allocation33_spill] sm:$0xff] }
 0x375   :  { %2400 = vmatmul.bf16.gmra.mxu1 %v8903_v49  ;;  %6756 = vmatpush.bf16.msrb.mxu2 %v13846_v61  ;;  %v2650_v3 = vadd.f32 %v13849_v13, %v2362_v19  ;;  %v14059_v20 = vpop.f32.mrf.mxu2  ;;  %v9538_v61 = vld [vmem:[%s19603_s4 + $0x1c0] sm:$0xf]  ;;  %v11080_v19 = vld [vmem:[%s19603_s4 + $0x3c] sm:$0xf] }
 0x377   :  { %v2988_v44 = vadd.f32 %v2877_v42, %v2650_v3  ;;  %v10989_v3 = vld [vmem:[%s19600_s2 + $0x28c] sm:$0xf] }
 0x379   :  { %6757 = vmatpush.bf16.msrb.mxu2 %v13805_v12  ;;  %v11132_v12 = vld [vmem:[%s19603_s4 + $0x1d8] sm:$0xf0]  ;;  %v3099_v23 = vmax.f32 %v2988_v44, 0.0  ;;  %v19816_v44 = vld [vmem:[#allocation19_spill] sm:$0xff] }
 0x37a   :  { %v2363_v14 = vpop.f32.mrf.mxu1  ;;  %v9539_v8 = vor.u32 %v11132_v12, %v9538_v61 }
 0x37b   :  { %v2364_v39 = vadd.f32 %v2363_v14, %v2076_v38  ;;  %v14098_v15 = vpop.f32.mrf.mxu0 }
 0x37d   :  { %v2652_v13 = vadd.f32 %v13867_v34, %v2364_v39  ;;  %6758 = vmatpush.bf16.msrb.mxu2 %v13761_v16  ;;  %v8912_v16 = vld [vmem:[%s19600_s2 + $0x27c] sm:$0xf0]  ;;  %v14091_v56 = vpop.f32.mrf.mxu2 }
 0x37e   :  { %v8915_v37 = vor.u32 %v10986_v57, %v8912_v16  ;;  %v2084_v57 = vadd.f32 %v14025_v53, %v19816_v44 }
 0x37f   :  { %v2989_v34 = vadd.f32 %v2878_v50, %v2652_v13  ;;  %v9347_v50 = vor.u32 %v11080_v19, %v9344_v45  ;;  %v19819_v45 = vld [vmem:[#allocation13_spill] sm:$0xff] }
 0x381   :  { %6759 = vmatpush.bf16.msrb.mxu2 %v13710_v58  ;;  %v3100_v47 = vmax.f32 %v2989_v34, 0.0  ;;  %v2081_v58 = vadd.f32 %v14004_v43, %v19815_v31  ;;  %v9594_v31 = vld [vmem:[%s19603_s4 + $0x230] sm:$0xf] }
 0x382   :  { %v2366_v4 = vpop.f32.mrf.mxu1 }
 0x383   :  { %v14089_v24 = vpack.c.bf16 %v3100_v47, %v3099_v23  ;;  %v2367_v5 = vadd.f32 %v2366_v4, %v2079_v62  ;;  %v14133_v34 = vpop.f32.mrf.mxu0  ;;  %v2881_v62 = vld [vmem:[%s19602_s1 + $0x130] sm:$0xff] }
 0x384   :  { %6512 = vmatmul.bf16.gmra.mxu3 %v9539_v8  ;;  %6760 = vmatmul.bf16.vlgmr.msrb.gmra.mxu2 %v9319_v22 }
 0x385   :  { %2405 = vmatmul.bf16.gmra.mxu1 %v8915_v37  ;;  %v2655_v55 = vadd.f32 %v13882_v18, %v2367_v5  ;;  %v11139_v18 = vld [vmem:[%s19603_s4 + $0x210] sm:$0xf0]  ;;  %v14127_v42 = vpop.f32.mrf.mxu2 }
 0x386   :  { %v9567_v61 = vor.u32 %v11139_v18, %v9566_v9  ;;  %v19817_v37 = vld [vmem:[#allocation28_spill] sm:$0xff]  ;;  %v10992_v9 = vld [vmem:[%s19600_s2 + $0x2a4] sm:$0xf] }
 0x387   :  { %v14093_v35 = vpop.f32.mrf.mxu3  ;;  %v2990_v38 = vadd.f32 %v2879_v2, %v2655_v55  ;;  %v2086_v23 = vadd.f32 %v14050_v52, %v19817_v37  ;;  %v2882_v52 = vld [vmem:[%s19602_s1 + $0x138] sm:$0xff]  ;;  %v11087_v55 = vld [vmem:[%s19603_s4 + $0x74] sm:$0xf]  ;;  %v11094_v37 = vld [vmem:[%s19603_s4 + $0xac] sm:$0xf] }
 0x389   :  { %v3101_v12 = vmax.f32 %v2990_v38, 0.0  ;;  %v2089_v38 = vadd.f32 %v14084_v26, %v19819_v45  ;;  %v11160_v45 = vld [vmem:[%s19603_s4 + $0x2b8] sm:$0xf0] }
 0x38a   :  { %v2368_v49 = vpop.f32.mrf.mxu1 }
 0x38b   :  { %v2369_v32 = vadd.f32 %v2368_v49, %v2081_v58  ;;  %v11146_v58 = vld [vmem:[%s19603_s4 + $0x248] sm:$0xf0]  ;;  %v9372_v49 = vld [vmem:[%s19603_s4 + $0x8c] sm:$0xf0] }
 0x38c   :  { %v9595_v18 = vor.u32 %v11146_v58, %v9594_v31  ;;  %v9375_v19 = vor.u32 %v11087_v55, %v9372_v49 }
 0x38d   :  { %v2657_v43 = vadd.f32 %v13900_v25, %v2369_v32  ;;  %v8924_v25 = vld [vmem:[%s19600_s2 + $0x294] sm:$0xf0]  ;;  %v14140_v4 = vpop.f32.mrf.mxu2  ;;  %v14163_v32 = vpop.f32.mrf.mxu0 }
 0x38e   :  { %v8927_v13 = vor.u32 %v10989_v3, %v8924_v25 }
 0x38f   :  { %v14125_v14 = vpop.f32.mrf.mxu3  ;;  %v2991_v39 = vadd.f32 %v2880_v63, %v2657_v43 }
 0x391   :  { %v3102_v51 = vmax.f32 %v2991_v39, 0.0 }
 0x392   :  { %v2371_v40 = vpop.f32.mrf.mxu1 }
 0x393   :  { %v14131_v16 = vpack.c.bf16 %v3102_v51, %v3101_v12  ;;  %v2372_v8 = vadd.f32 %v2371_v40, %v2084_v57  ;;  %v14181_v51 = vpop.permute.xlu2 %932  ;;  %v9622_v57 = vld [vmem:[%s19603_s4 + $0x268] sm:$0xf] }
 0x394   :  { %6517 = vmatmul.bf16.gmra.mxu3 %v9567_v61  ;;  %6765 = vmatmul.bf16.gmra.mxu2 %v9347_v50  ;;  %19820 = vst [vmem:[#allocation7_spill] sm:$0xff] %v14181_v51 }
 0x395   :  { %2410 = vmatmul.bf16.gmra.mxu1 %v8927_v13  ;;  %v2660_v47 = vadd.f32 %v13913_v21, %v2372_v8  ;;  %v14177_v13 = vpop.f32.mrf.mxu2  ;;  %v14185_v44 = vpop.f32.mrf.mxu0  ;;  %v11153_v8 = vld [vmem:[%s19603_s4 + $0x280] sm:$0xf0] }
 0x396   :  { %v2099_v1 = vadd.f32 %v14185_v44, %v19825_v59  ;;  %v2889_v59 = vld [vmem:[%s19602_s1 + $0x170] sm:$0xff] }
 0x397   :  { %v14135_v22 = vpop.f32.mrf.mxu3  ;;  %v2992_v2 = vadd.f32 %v2881_v62, %v2660_v47  ;;  %v10995_v62 = vld [vmem:[%s19600_s2 + $0x2bc] sm:$0xf] }
 0x399   :  { %v3103_v25 = vmax.f32 %v2992_v2, 0.0 }
 0x39a   :  { %v2373_v53 = vpop.f32.mrf.mxu1 }
 0x39b   :  { %v2374_v5 = vadd.f32 %v2373_v53, %v2086_v23  ;;  %v9400_v23 = vld [vmem:[%s19603_s4 + $0xc4] sm:$0xf0]  ;;  %v14203_v53 = vpop.permute.xlu2 %757 }
 0x39d   :  { %v2662_v21 = vadd.f32 %v13931_v29, %v2374_v5  ;;  %v8936_v29 = vld [vmem:[%s19600_s2 + $0x2ac] sm:$0xf0]  ;;  %v14201_v47 = vpop.f32.mrf.mxu2  ;;  %v8948_v5 = vld [vmem:[%s19600_s2 + $0x2c4] sm:$0xf0]  ;;  %v2100_v55 = vpop.f32.mrf.mxu0 }
 0x39e   :  { %v8939_v3 = vor.u32 %v10992_v9, %v8936_v29  ;;  %v8951_v58 = vor.u32 %v10995_v62, %v8948_v5  ;;  %v2101_v33 = vadd.f32 %v2100_v55, %v19824_v10  ;;  %v19829_v55 = vld [vmem:[#allocation24_spill] sm:$0xff] }
 0x39f   :  { %v14171_v63 = vpop.f32.mrf.mxu3  ;;  %v2993_v43 = vadd.f32 %v2882_v52, %v2662_v21  ;;  %v9623_v52 = vor.u32 %v11153_v8, %v9622_v57  ;;  %v9403_v21 = vor.u32 %v11094_v37, %v9400_v23 }
 0x3a1   :  { %v3104_v39 = vmax.f32 %v2993_v43, 0.0 }
 0x3a2   :  { %v2376_v61 = vpop.f32.mrf.mxu1 }
 0x3a3   :  { %v14175_v50 = vadd.f32 %v2376_v61, %v2089_v38  ;;  %v14179_v12 = vpack.c.bf16 %v3104_v39, %v3103_v25  ;;  %v14219_v29 = vpop.permute.xlu2 %682  ;;  %v11101_v38 = vld [vmem:[%s19603_s4 + $0xe4] sm:$0xf]  ;;  %v10998_v25 = vld [vmem:[%s19600_s2 + $0x2d4] sm:$0xf]  ;;  %v8960_v39 = vld [vmem:[%s19600_s2 + $0x2dc] sm:$0xf0] }
 0x3a4   :  { %6522 = vmatmul.bf16.gmra.mxu3 %v9595_v18  ;;  %6770 = vmatmul.bf16.gmra.mxu2 %v9375_v19  ;;  %v9650_v19 = vld [vmem:[%s19603_s4 + $0x2a0] sm:$0xf]  ;;  %v8963_v37 = vor.u32 %v10998_v25, %v8960_v39  ;;  %v11001_v25 = vld [vmem:[%s19600_s2 + $0x2ec] sm:$0xf]  ;;  %v8972_v39 = vld [vmem:[%s19600_s2 + $0x2f4] sm:$0xf0] }
 0x3a5   :  { %2415 = vmatmul.bf16.gmra.mxu1 %v8939_v3  ;;  %v14217_v9 = vpop.f32.mrf.mxu2  ;;  %v2103_v18 = vpop.f32.mrf.mxu0  ;;  %v9428_v3 = vld [vmem:[%s19603_s4 + $0xfc] sm:$0xf0]  ;;  %v9651_v57 = vor.u32 %v11160_v45, %v9650_v19  ;;  %v9678_v19 = vld [vmem:[%s19603_s4 + $0x2d8] sm:$0xf]  ;;  %v11167_v45 = vld [vmem:[%s19603_s4 + $0x2f0] sm:$0xf0]  ;;  %v8975_v36 = vor.u32 %v11001_v25, %v8972_v39 }
 0x3a6   :  { %v9431_v8 = vor.u32 %v11101_v38, %v9428_v3  ;;  %v11108_v38 = vld [vmem:[%s19603_s4 + $0x11c] sm:$0xf]  ;;  %v9456_v3 = vld [vmem:[%s19603_s4 + $0x134] sm:$0xf0]  ;;  %v2104_v7 = vadd.f32 %v2103_v18, %v19823_v48  ;;  %v19827_v48 = vld [vmem:[#allocation8_spill] sm:$0xff] }
 0x3a7   :  { %v14183_v40 = vpop.f32.mrf.mxu3  ;;  %v9459_v60 = vor.u32 %v11108_v38, %v9456_v3  ;;  %v19828_v25 = vld [vmem:[#allocation9_spill] sm:$0xff]  ;;  %v8984_v39 = vld [vmem:[%s19600_s2 + $0x30c] sm:$0xf0] }
 0x3a8   :  { %v2094_v10 = vadd.f32 %v14133_v34, %v19828_v25  ;;  %v2888_v34 = vld [vmem:[%s19602_s1 + $0x168] sm:$0xff] }
 0x3aa   :  { %v14187_v26 = vpop.f32.mrf.mxu1 }
 0x3ab   :  { %v14243_v62 = vpop.permute.xlu2 %927 }
 0x3ac   :  { %19821 = vst [vmem:[#allocation162_spill] sm:$0xff] %v14243_v62 }
 0x3ad   :  { %v14241_v23 = vpop.f32.mrf.mxu2 }
 0x3af   :  { %v14211_v31 = vpop.f32.mrf.mxu3 }
 0x3b2   :  { %v14213_v49 = vpop.f32.mrf.mxu1 }
 0x3b3   :  { %v14249_v30 = vpop.permute.xlu2 %822 }
 0x3b4   :  { %6527 = vmatmul.bf16.gmra.mxu3 %v9623_v52  ;;  %6775 = vmatmul.bf16.gmra.mxu2 %v9403_v21  ;;  %v2105_v52 = vpop.f32.mrf.mxu0  ;;  %19822 = vst [vmem:[#allocation6_spill] sm:$0xff] %v14249_v30  ;;  %v2902_v30 = vld [vmem:[%s19602_s1 + $0x1d8] sm:$0xff] }
 0x3b5   :  { %2420 = vmatmul.bf16.gmra.mxu1 %v8951_v58  ;;  %v14247_v46 = vpop.f32.mrf.mxu2  ;;  %v2106_v18 = vadd.f32 %v2105_v52, %v19827_v48  ;;  %v14314_v52 = vpop.permute.xlu1 %922 }
 0x3b6   :  { %19830 = vst [vmem:[#allocation164_spill] sm:$0xff] %v14314_v52 }
 0x3b7   :  { %v14215_v2 = vpop.f32.mrf.mxu3 }
 0x3ba   :  { %v2383_v43 = vpop.f32.mrf.mxu1 }
 0x3bb   :  { %v14272_v62 = vpop.permute.xlu2 %677 }
 0x3bd   :  { %v14275_v54 = vpop.f32.mrf.mxu2 }
 0x3bf   :  { %v14239_v61 = vpop.f32.mrf.mxu3 }
 0x3c2   :  { %v2386_v5 = vpop.f32.mrf.mxu1 }
 0x3c3   :  { %v2387_v3 = vadd.f32 %v2386_v5, %v2099_v1  ;;  %v2382_v1 = vadd.f32 %v14213_v49, %v2094_v10  ;;  %v11115_v49 = vld [vmem:[%s19603_s4 + $0x154] sm:$0xf] }
 0x3c4   :  { %6532 = vmatmul.bf16.gmra.mxu3 %v9651_v57  ;;  %6780 = vmatmul.bf16.gmra.mxu2 %v9431_v8  ;;  %v2108_v8 = vpop.f32.mrf.mxu0 }
 0x3c5   :  { %2425 = vmatmul.bf16.gmra.mxu1 %v8963_v37  ;;  %v9679_v37 = vor.u32 %v11167_v45, %v9678_v19  ;;  %v19826_v45 = vld [vmem:[#allocation18_spill] sm:$0xff] }
 0x3c6   :  { %v2096_v38 = vadd.f32 %v14163_v32, %v19826_v45  ;;  %v2091_v32 = vadd.f32 %v14098_v15, %v19829_v55  ;;  %v11174_v15 = vld [vmem:[%s19603_s4 + $0x328] sm:$0xf0] }
 0x3c7   :  { %v14245_v21 = vpop.f32.mrf.mxu3 }
 0x3ca   :  { %v2388_v58 = vpop.f32.mrf.mxu1 }
 0x3cb   :  { %v2389_v11 = vadd.f32 %v2388_v58, %v2101_v33  ;;  %v2384_v33 = vadd.f32 %v2383_v43, %v2096_v38  ;;  %v9484_v43 = vld [vmem:[%s19603_s4 + $0x16c] sm:$0xf0]  ;;  %v663_v58 = vpop.permute.xlu2 %662 }
 0x3cc   :  { %v9487_v10 = vor.u32 %v11115_v49, %v9484_v43 }
 0x3cd   :  { %v2672_v45 = vadd.f32 %v14045_v28, %v2384_v33 }
 0x3cf   :  { %v14269_v57 = vpop.f32.mrf.mxu3 }
 0x3d2   :  { %v2391_v51 = vpop.f32.mrf.mxu1 }
 0x3d3   :  { %v2392_v17 = vadd.f32 %v2391_v51, %v2104_v7  ;;  %v2110_v7 = vpop.f32.mrf.mxu0  ;;  %v2677_v51 = vadd.f32 %v14091_v56, %v2389_v11  ;;  %v2675_v56 = vadd.f32 %v14059_v20, %v2387_v3  ;;  %v2379_v20 = vadd.f32 %v14187_v26, %v2091_v32 }
 0x3d4   :  { %6537 = vmatmul.bf16.gmra.mxu3 %v9679_v37  ;;  %6785 = vmatmul.bf16.gmra.mxu2 %v9459_v60  ;;  %v2887_v37 = vld [vmem:[%s19602_s1 + $0x160] sm:$0xff]  ;;  %v2670_v3 = vadd.f32 %v14020_v6, %v2382_v1 }
 0x3d5   :  { %2430 = vmatmul.bf16.gmra.mxu1 %v8975_v36  ;;  %v2680_v60 = vadd.f32 %v14127_v42, %v2392_v17  ;;  %v9706_v17 = vld [vmem:[%s19603_s4 + $0x310] sm:$0xf]  ;;  %v2890_v42 = vld [vmem:[%s19602_s1 + $0x178] sm:$0xff]  ;;  %v2999_v26 = vadd.f32 %v2888_v34, %v2677_v51  ;;  %v2998_v32 = vadd.f32 %v2887_v37, %v2675_v56  ;;  %v2667_v28 = vadd.f32 %v14002_v0, %v2379_v20  ;;  %v2884_v56 = vld [vmem:[%s19602_s1 + $0x148] sm:$0xff]  ;;  %v14349_v20 = vpop.permute.xlu1 %747 }
 0x3d6   :  { %v9707_v25 = vor.u32 %v11174_v15, %v9706_v17  ;;  %v2885_v51 = vld [vmem:[%s19602_s1 + $0x150] sm:$0xff]  ;;  %v2665_v17 = vadd.f32 %v13957_v41, %v14175_v50  ;;  %v2883_v15 = vld [vmem:[%s19602_s1 + $0x140] sm:$0xff]  ;;  %v668_v50 = vpop.permute.xlu0 %667 }
 0x3d7   :  { %v14279_v19 = vpop.f32.mrf.mxu3  ;;  %v3000_v5 = vadd.f32 %v2889_v59, %v2680_v60  ;;  %v2109_v60 = vadd.f32 %v2108_v8, %v663_v58  ;;  %v3110_v8 = vmax.f32 %v2999_v26, 0.0  ;;  %v3109_v0 = vmax.f32 %v2998_v32, 0.0  ;;  %v9512_v32 = vld [vmem:[%s19603_s4 + $0x1a4] sm:$0xf0] }
 0x3d8   :  { %v2995_v41 = vadd.f32 %v2884_v56, %v2667_v28  ;;  %v2994_v58 = vadd.f32 %v2883_v15, %v2665_v17 }
 0x3d9   :  { %v3642_v43 = vpack.c.bf16 %v3110_v8, %v3109_v0 }
 0x3da   :  { %v2393_v36 = vpop.f32.mrf.mxu1 }
 0x3db   :  { %v2394_v44 = vadd.f32 %v2393_v36, %v2106_v18  ;;  %v14329_v18 = vpop.f32.mrf.mxu2  ;;  %v2886_v36 = vld [vmem:[%s19602_s1 + $0x158] sm:$0xff]  ;;  %v2113_v34 = vpop.f32.mrf.mxu0 }
 0x3dc   :  { %v2997_v1 = vadd.f32 %v2886_v36, %v2672_v45  ;;  %v3105_v36 = vmax.f32 %v2994_v58, 0.0 }
 0x3dd   :  { %v2682_v11 = vadd.f32 %v14140_v4, %v2394_v44  ;;  %v11004_v4 = vld [vmem:[%s19600_s2 + $0x304] sm:$0xf]  ;;  %v3111_v44 = vmax.f32 %v3000_v5, 0.0  ;;  %v673_v17 = vpop.permute.xlu1 %672 }
 0x3de   :  { %v8987_v59 = vor.u32 %v11004_v4, %v8984_v39  ;;  %v3108_v5 = vmax.f32 %v2997_v1, 0.0  ;;  %v2111_v4 = vadd.f32 %v2110_v7, %v668_v50 }
 0x3df   :  { %v14327_v38 = vpop.f32.mrf.mxu3  ;;  %v3001_v48 = vadd.f32 %v2890_v42, %v2682_v11  ;;  %v2996_v11 = vadd.f32 %v2885_v51, %v2670_v3 }
 0x3e1   :  { %v3112_v55 = vmax.f32 %v3001_v48, 0.0  ;;  %v3107_v37 = vmax.f32 %v2996_v11, 0.0  ;;  %v2891_v48 = vld [vmem:[%s19602_s1 + $0x180] sm:$0xff] }
 0x3e2   :  { %v2396_v33 = vpop.f32.mrf.mxu1 }
 0x3e3   :  { %v2397_v42 = vadd.f32 %v2396_v33, %v2109_v60  ;;  %v3643_v6 = vpack.c.bf16 %v3112_v55, %v3111_v44  ;;  %v14352_v45 = vpop.f32.mrf.mxu2  ;;  %v3641_v60 = vpack.c.bf16 %v3108_v5, %v3107_v37  ;;  %v11181_v44 = vld [vmem:[%s19603_s4 + $0x360] sm:$0xf0]  ;;  %v11122_v55 = vld [vmem:[%s19603_s4 + $0x18c] sm:$0xf]  ;;  %v2115_v28 = vpop.f32.mrf.mxu0  ;;  %v11007_v33 = vld [vmem:[%s19600_s2 + $0x31c] sm:$0xf] }
 0x3e4   :  { %6542 = vmatmul.bf16.gmra.mxu3 %v9707_v25  ;;  %6790 = vmatmul.bf16.gmra.mxu2 %v9487_v10  ;;  %v3106_v25 = vmax.f32 %v2995_v41, 0.0  ;;  %v2892_v10 = vld [vmem:[%s19602_s1 + $0x188] sm:$0xff]  ;;  %v9515_v1 = vor.u32 %v11122_v55, %v9512_v32 }
 0x3e5   :  { %2435 = vmatmul.bf16.gmra.mxu1 %v8987_v59  ;;  %7040 = vmatpush.bf16.msrb.mxu0 %v3643_v6  ;;  %v2685_v39 = vadd.f32 %v14177_v13, %v2397_v42  ;;  %v9734_v13 = vld [vmem:[%s19603_s4 + $0x348] sm:$0xf] }
 0x3e6   :  { %v3640_v6 = vpack.c.bf16 %v3106_v25, %v3105_v36  ;;  %v9735_v8 = vor.u32 %v11181_v44, %v9734_v13  ;;  %v9540_v36 = vld [vmem:[%s19603_s4 + $0x1dc] sm:$0xf0]  ;;  %v9322_v13 = vld [vmem:[%s19603_s4 + $0x8] sm:$0xf] }
 0x3e7   :  { %v14347_v49 = vpop.f32.mrf.mxu3  ;;  %v3002_v7 = vadd.f32 %v2891_v48, %v2685_v39  ;;  %v2116_v39 = vadd.f32 %v2115_v28, %v14272_v62  ;;  %v9762_v62 = vld [vmem:[%s19603_s4 + $0x380] sm:$0xf] }
 0x3e9   :  { %7041 = vmatpush.bf16.msrb.mxu0 %v3642_v43  ;;  %v3113_v56 = vmax.f32 %v3002_v7, 0.0  ;;  %v2114_v43 = vadd.f32 %v2113_v34, %v673_v17  ;;  %v2893_v34 = vld [vmem:[%s19602_s1 + $0x190] sm:$0xff]  ;;  %v9008_v7 = vld [vmem:[%s19600_s2 + $0x33c] sm:$0xf0] }
 0x3ea   :  { %v2398_v26 = vpop.f32.mrf.mxu1 }
 0x3eb   :  { %v2399_v3 = vadd.f32 %v2398_v26, %v2111_v4  ;;  %v14381_v5 = vpop.f32.mrf.mxu2  ;;  %v2118_v4 = vpop.f32.mrf.mxu0 }
 0x3ec   :  { %v14394_v26 = vpop.permute.xlu1 %917 }
 0x3ed   :  { %v2687_v59 = vadd.f32 %v14201_v47, %v2399_v3  ;;  %7042 = vmatpush.bf16.msrb.mxu0 %v3641_v60  ;;  %v8996_v47 = vld [vmem:[%s19600_s2 + $0x324] sm:$0xf0]  ;;  %19831 = vst [vmem:[#allocation11_spill] sm:$0xff] %v14394_v26 }
 0x3ee   :  { %v8999_v0 = vor.u32 %v11007_v33, %v8996_v47 }
 0x3ef   :  { %v3003_v51 = vadd.f32 %v2892_v10, %v2687_v59  ;;  %v14379_v42 = vpop.f32.mrf.mxu3  ;;  %v11129_v10 = vld [vmem:[%s19603_s4 + $0x1c4] sm:$0xf] }
 0x3f0   :  { %v9543_v32 = vor.u32 %v11129_v10, %v9540_v36  ;;  %v11136_v10 = vld [vmem:[%s19603_s4 + $0x1fc] sm:$0xf]  ;;  %v9568_v36 = vld [vmem:[%s19603_s4 + $0x214] sm:$0xf0] }
 0x3f1   :  { %7043 = vmatpush.bf16.msrb.mxu0 %v3640_v6  ;;  %v3114_v11 = vmax.f32 %v3003_v51, 0.0 }
 0x3f2   :  { %v2401_v15 = vpop.f32.mrf.mxu1 }
 0x3f3   :  { %v14383_v41 = vpack.c.bf16 %v3114_v11, %v3113_v56  ;;  %v2402_v50 = vadd.f32 %v2401_v15, %v2114_v43  ;;  %v14407_v25 = vpop.f32.mrf.mxu2  ;;  %v2120_v6 = vpop.f32.mrf.mxu0 }
 0x3f4   :  { %6547 = vmatmul.bf16.gmra.mxu3 %v9735_v8  ;;  %6795 = vmatmul.bf16.gmra.mxu2 %v9515_v1  ;;  %v2119_v1 = vadd.f32 %v2118_v4, %v14219_v29  ;;  %v14433_v56 = vpop.permute.xlu1 %902  ;;  %v2895_v4 = vld [vmem:[%s19602_s1 + $0x1a0] sm:$0xff] }
 0x3f5   :  { %2440 = vmatmul.bf16.gmra.mxu1 %v8999_v0  ;;  %7044 = vmatpush.bf16.msrb.mxu0 %v14179_v12  ;;  %v2690_v37 = vadd.f32 %v14217_v9, %v2402_v50  ;;  %v2894_v12 = vld [vmem:[%s19602_s1 + $0x198] sm:$0xff]  ;;  %19832 = vst [vmem:[#allocation157_spill] sm:$0xff] %v14433_v56  ;;  %v3790_v0 = vpop.permute.xlu0 %3789 }
 0x3f6   :  { %v6474_v15 = vadd.f32 %v14093_v35, %v3790_v0  ;;  %v2896_v35 = vld [vmem:[%s19602_s1 + $0x1a8] sm:$0xff]  ;;  %v19835_v0 = vld [vmem:[#allocation86_spill] sm:$0xff] }
 0x3f7   :  { %v14386_v58 = vpop.f32.mrf.mxu3  ;;  %v3004_v9 = vadd.f32 %v2893_v34, %v2690_v37 }
 0x3f9   :  { %7045 = vmatpush.bf16.msrb.mxu0 %v14131_v16  ;;  %v11188_v16 = vld [vmem:[%s19603_s4 + $0x398] sm:$0xf0]  ;;  %v3115_v28 = vmax.f32 %v3004_v9, 0.0 }
 0x3fa   :  { %v2403_v48 = vpop.f32.mrf.mxu1  ;;  %v9763_v55 = vor.u32 %v11188_v16, %v9762_v62  ;;  %v11195_v62 = vld [vmem:[%s19603_s4 + $0x3d0] sm:$0xf0] }
 0x3fb   :  { %v2404_v3 = vadd.f32 %v2403_v48, %v2116_v39  ;;  %v19833_v39 = vld [vmem:[#allocation109_spill] sm:$0xff] }
 0x3fc   :  { %v2121_v37 = vadd.f32 %v2120_v6, %v19833_v39  ;;  %v3795_v16 = vpop.permute.xlu1 %3794 }
 0x3fd   :  { %v2692_v60 = vadd.f32 %v14241_v23, %v2404_v3  ;;  %7046 = vmatpush.bf16.msrb.mxu0 %v14089_v24  ;;  %v11077_v23 = vld [vmem:[%s19603_s4 + $0x20] sm:$0xf0]  ;;  %v11010_v24 = vld [vmem:[%s19600_s2 + $0x334] sm:$0xf]  ;;  %v2123_v3 = vpop.f32.mrf.mxu0 }
 0x3fe   :  { %v9323_v33 = vor.u32 %v11077_v23, %v9322_v13  ;;  %v9011_v47 = vor.u32 %v11010_v24, %v9008_v7  ;;  %v9350_v13 = vld [vmem:[%s19603_s4 + $0x40] sm:$0xf]  ;;  %v6476_v23 = vadd.f32 %v14125_v14, %v3795_v16  ;;  %v11084_v24 = vld [vmem:[%s19603_s4 + $0x58] sm:$0xf0]  ;;  %v9020_v7 = vld [vmem:[%s19600_s2 + $0x354] sm:$0xf0]  ;;  %v9571_v14 = vor.u32 %v11136_v10, %v9568_v36  ;;  %v3805_v36 = vpop.permute.xlu0 %3804 }
 0x3ff   :  { %v3005_v59 = vadd.f32 %v2894_v12, %v2692_v60  ;;  %v14427_v44 = vpop.f32.mrf.mxu3  ;;  %v9790_v12 = vld [vmem:[%s19603_s4 + $0x3b8] sm:$0xf]  ;;  %v11202_v10 = vld [vmem:[%s19603_s4 + $0x408] sm:$0xf0] }
 0x401   :  { %7047 = vmatpush.bf16.msrb.mxu0 %v14047_v27  ;;  %v3116_v51 = vmax.f32 %v3005_v59, 0.0 }
 0x402   :  { %v2406_v8 = vpop.f32.mrf.mxu1 }
 0x403   :  { %v14431_v17 = vpack.c.bf16 %v3116_v51, %v3115_v28  ;;  %v2407_v11 = vadd.f32 %v2406_v8, %v2119_v1  ;;  %v9351_v51 = vor.u32 %v11084_v24, %v9350_v13  ;;  %v9596_v24 = vld [vmem:[%s19603_s4 + $0x24c] sm:$0xf0] }
 0x404   :  { %6552 = vmatmul.bf16.gmra.mxu3 %v9763_v55  ;;  %6800 = vmatmul.bf16.gmra.mxu2 %v9543_v32 }
 0x405   :  { %7048 = vmatmul.bf16.vlgmr.msrb.gmra.mxu0 %v9323_v33  ;;  %2445 = vmatmul.bf16.gmra.mxu1 %v9011_v47  ;;  %v2695_v29 = vadd.f32 %v14247_v46, %v2407_v11  ;;  %v14454_v46 = vpop.permute.xlu2 %907  ;;  %v9791_v33 = vor.u32 %v11195_v62, %v9790_v12  ;;  %v2124_v11 = vadd.f32 %v2123_v3, %v19835_v0  ;;  %v2897_v62 = vld [vmem:[%s19602_s1 + $0x1b0] sm:$0xff] }
 0x406   :  { %19834 = vst [vmem:[#allocation10_spill] sm:$0xff] %v14454_v46 }
 0x407   :  { %v14436_v27 = vpop.f32.mrf.mxu3  ;;  %v6761_v43 = vpop.f32.mrf.mxu2  ;;  %v3006_v9 = vadd.f32 %v2895_v4, %v2695_v29 }
 0x408   :  { %v14438_v50 = vadd.f32 %v6761_v43, %v6474_v15  ;;  %v2125_v29 = vpop.f32.mrf.mxu0 }
 0x409   :  { %v3117_v47 = vmax.f32 %v3006_v9, 0.0 }
 0x40a   :  { %v2408_v34 = vpop.f32.mrf.mxu1 }
 0x40b   :  { %v2409_v48 = vadd.f32 %v2408_v34, %v2121_v37 }
 0x40d   :  { %v2697_v60 = vadd.f32 %v14275_v54, %v2409_v48  ;;  %v11013_v54 = vld [vmem:[%s19600_s2 + $0x34c] sm:$0xf]  ;;  %v3800_v43 = vpop.permute.xlu2 %3799 }
 0x40e   :  { %v9023_v6 = vor.u32 %v11013_v54, %v9020_v7  ;;  %v6479_v37 = vadd.f32 %v14135_v22, %v3800_v43  ;;  %v2898_v22 = vld [vmem:[%s19602_s1 + $0x1b8] sm:$0xff]  ;;  %v6481_v7 = vadd.f32 %v14171_v63, %v3805_v36 }
 0x40f   :  { %v3007_v59 = vadd.f32 %v2896_v35, %v2697_v60  ;;  %v14476_v55 = vpop.f32.mrf.mxu3  ;;  %v6763_v32 = vpop.f32.mrf.mxu2  ;;  %v19836_v35 = vld [vmem:[#allocation88_spill] sm:$0xff]  ;;  %v9378_v54 = vld [vmem:[%s19603_s4 + $0x78] sm:$0xf] }
 0x410   :  { %v14478_v28 = vadd.f32 %v6763_v32, %v6476_v23  ;;  %v2126_v12 = vadd.f32 %v2125_v29, %v19836_v35  ;;  %v9818_v60 = vld [vmem:[%s19603_s4 + $0x3f0] sm:$0xf]  ;;  %v11143_v23 = vld [vmem:[%s19603_s4 + $0x234] sm:$0xf]  ;;  %v3810_v35 = vpop.permute.xlu1 %3809 }
 0x411   :  { %v3118_v8 = vmax.f32 %v3007_v59, 0.0  ;;  %v11091_v59 = vld [vmem:[%s19603_s4 + $0x90] sm:$0xf0]  ;;  %v9032_v32 = vld [vmem:[%s19600_s2 + $0x36c] sm:$0xf0]  ;;  %v9599_v63 = vor.u32 %v11143_v23, %v9596_v24 }
 0x412   :  { %v2411_v1 = vpop.f32.mrf.mxu1  ;;  %v9846_v24 = vld [vmem:[%s19603_s4 + $0x428] sm:$0xf] }
 0x413   :  { %v14481_v15 = vpack.c.bf16 %v3118_v8, %v3117_v47  ;;  %v2412_v39 = vadd.f32 %v2411_v1, %v2124_v11  ;;  %v9379_v1 = vor.u32 %v11091_v59, %v9378_v54  ;;  %v11209_v54 = vld [vmem:[%s19603_s4 + $0x440] sm:$0xf0] }
 0x414   :  { %6557 = vmatmul.bf16.gmra.mxu3 %v9791_v33  ;;  %6805 = vmatmul.bf16.gmra.mxu2 %v9571_v14 }
 0x415   :  { %7053 = vmatmul.bf16.gmra.mxu0 %v9351_v51  ;;  %2450 = vmatmul.bf16.gmra.mxu1 %v9023_v6  ;;  %v2700_v3 = vadd.f32 %v14329_v18, %v2412_v39  ;;  %v9819_v6 = vor.u32 %v11202_v10, %v9818_v60  ;;  %v19837_v39 = vld [vmem:[#allocation79_spill] sm:$0xff]  ;;  %v19840_v60 = vld [vmem:[#allocation17_spill] sm:$0xff] }
 0x417   :  { %v14484_v4 = vpop.f32.mrf.mxu3  ;;  %v6766_v34 = vpop.f32.mrf.mxu2  ;;  %v3008_v18 = vadd.f32 %v2897_v62, %v2700_v3  ;;  %v6484_v3 = vadd.f32 %v14183_v40, %v3810_v35  ;;  %v2900_v40 = vld [vmem:[%s19602_s1 + $0x1c8] sm:$0xff] }
 0x418   :  { %v14486_v48 = vadd.f32 %v6766_v34, %v6479_v37  ;;  %v19838_v37 = vld [vmem:[#allocation14_spill] sm:$0xff] }
 0x419   :  { %v3119_v8 = vmax.f32 %v3008_v18, 0.0  ;;  %v2129_v29 = vadd.f32 %v19838_v37, %v19837_v39  ;;  %v2899_v18 = vld [vmem:[%s19602_s1 + $0x1c0] sm:$0xff] }
 0x41a   :  { %v2413_v16 = vpop.f32.mrf.mxu1 }
 0x41b   :  { %v2414_v9 = vadd.f32 %v2413_v16, %v2126_v12 }
 0x41d   :  { %v2702_v13 = vadd.f32 %v14352_v45, %v2414_v9  ;;  %v11016_v45 = vld [vmem:[%s19600_s2 + $0x364] sm:$0xf] }
 0x41e   :  { %v9035_v0 = vor.u32 %v11016_v45, %v9032_v32  ;;  %v11150_v45 = vld [vmem:[%s19603_s4 + $0x26c] sm:$0xf]  ;;  %v9624_v32 = vld [vmem:[%s19603_s4 + $0x284] sm:$0xf0] }
 0x41f   :  { %v3009_v33 = vadd.f32 %v2898_v22, %v2702_v13  ;;  %v14522_v14 = vpop.f32.mrf.mxu3  ;;  %v6768_v47 = vpop.f32.mrf.mxu2  ;;  %v19839_v22 = vld [vmem:[#allocation69_spill] sm:$0xff] }
 0x420   :  { %v14524_v51 = vadd.f32 %v6768_v47, %v6481_v7  ;;  %v2131_v10 = vadd.f32 %v19840_v60, %v19839_v22  ;;  %v3815_v7 = vpop.permute.xlu2 %3814 }
 0x421   :  { %v3120_v11 = vmax.f32 %v3009_v33, 0.0  ;;  %v9406_v33 = vld [vmem:[%s19603_s4 + $0xb0] sm:$0xf]  ;;  %v6486_v47 = vadd.f32 %v14211_v31, %v3815_v7  ;;  %v9627_v31 = vor.u32 %v11150_v45, %v9624_v32  ;;  %v9056_v45 = vld [vmem:[%s19600_s2 + $0x39c] sm:$0xf0] }
 0x422   :  { %v2416_v43 = vpop.f32.mrf.mxu1 }
 0x423   :  { %v14528_v34 = vpack.c.bf16 %v3120_v11, %v3119_v8  ;;  %v2417_v12 = vadd.f32 %v2416_v43, %v2129_v29  ;;  %v9847_v43 = vor.u32 %v11209_v54, %v9846_v24  ;;  %v9652_v24 = vld [vmem:[%s19603_s4 + $0x2bc] sm:$0xf0]  ;;  %v9434_v54 = vld [vmem:[%s19603_s4 + $0xe8] sm:$0xf] }
 0x424   :  { %6562 = vmatmul.bf16.gmra.mxu3 %v9819_v6  ;;  %6810 = vmatmul.bf16.gmra.mxu2 %v9599_v63  ;;  %v11098_v6 = vld [vmem:[%s19603_s4 + $0xc8] sm:$0xf0]  ;;  %v9044_v63 = vld [vmem:[%s19600_s2 + $0x384] sm:$0xf0] }
 0x425   :  { %7058 = vmatmul.bf16.gmra.mxu0 %v9379_v1  ;;  %2455 = vmatmul.bf16.gmra.mxu1 %v9035_v0  ;;  %v2705_v36 = vadd.f32 %v14381_v5, %v2417_v12  ;;  %v9407_v37 = vor.u32 %v11098_v6, %v9406_v33 }
 0x427   :  { %v14531_v62 = vpop.f32.mrf.mxu3  ;;  %v6771_v16 = vpop.f32.mrf.mxu2  ;;  %v3010_v5 = vadd.f32 %v2899_v18, %v2705_v36 }
 0x428   :  { %v14533_v9 = vadd.f32 %v6771_v16, %v6484_v3  ;;  %v3820_v16 = vpop.permute.xlu0 %3819 }
 0x429   :  { %v3121_v39 = vmax.f32 %v3010_v5, 0.0  ;;  %v6489_v22 = vadd.f32 %v14215_v2, %v3820_v16  ;;  %v11157_v2 = vld [vmem:[%s19603_s4 + $0x2a4] sm:$0xf]  ;;  %v11223_v16 = vld [vmem:[%s19603_s4 + $0x4b0] sm:$0xf0] }
 0x42a   :  { %v2418_v13 = vpop.f32.mrf.mxu1  ;;  %v11105_v5 = vld [vmem:[%s19603_s4 + $0x100] sm:$0xf0] }
 0x42b   :  { %v2419_v23 = vadd.f32 %v2418_v13, %v2131_v10  ;;  %v9874_v13 = vld [vmem:[%s19603_s4 + $0x460] sm:$0xf] }
 0x42d   :  { %v2707_v59 = vadd.f32 %v14407_v25, %v2419_v23  ;;  %v11019_v25 = vld [vmem:[%s19600_s2 + $0x37c] sm:$0xf] }
 0x42e   :  { %v9047_v29 = vor.u32 %v11019_v25, %v9044_v63  ;;  %v11216_v23 = vld [vmem:[%s19603_s4 + $0x478] sm:$0xf0]  ;;  %v9655_v25 = vor.u32 %v11157_v2, %v9652_v24  ;;  %v11025_v2 = vld [vmem:[%s19600_s2 + $0x3ac] sm:$0xf]  ;;  %v9068_v24 = vld [vmem:[%s19600_s2 + $0x3b4] sm:$0xf0] }
 0x42f   :  { %v3011_v8 = vadd.f32 %v2900_v40, %v2707_v59  ;;  %v14570_v1 = vpop.f32.mrf.mxu3  ;;  %v6773_v0 = vpop.f32.mrf.mxu2  ;;  %v11022_v59 = vld [vmem:[%s19600_s2 + $0x394] sm:$0xf]  ;;  %v9875_v6 = vor.u32 %v11216_v23, %v9874_v13  ;;  %v9462_v13 = vld [vmem:[%s19603_s4 + $0x120] sm:$0xf] }
 0x430   :  { %v14572_v11 = vadd.f32 %v6773_v0, %v6486_v47  ;;  %v3825_v40 = vpop.permute.xlu1 %3824  ;;  %v9059_v63 = vor.u32 %v11022_v59, %v9056_v45  ;;  %v3830_v0 = vpop.permute.xlu2 %3829 }
 0x431   :  { %v3122_v35 = vmax.f32 %v3011_v8, 0.0  ;;  %v6491_v7 = vadd.f32 %v14239_v61, %v3825_v40  ;;  %v9435_v61 = vor.u32 %v11105_v5, %v9434_v54  ;;  %v11112_v40 = vld [vmem:[%s19603_s4 + $0x138] sm:$0xf0] }
 0x432   :  { %v14574_v12 = vpop.f32.mrf.mxu1 }
 0x433   :  { %v14576_v3 = vpack.c.bf16 %v3122_v35, %v3121_v39  ;;  %v9902_v35 = vld [vmem:[%s19603_s4 + $0x498] sm:$0xf] }
 0x434   :  { %6567 = vmatmul.bf16.gmra.mxu3 %v9847_v43  ;;  %6815 = vmatmul.bf16.gmra.mxu2 %v9627_v31  ;;  %v6494_v43 = vadd.f32 %v14245_v21, %v3830_v0  ;;  %v9680_v21 = vld [vmem:[%s19603_s4 + $0x2f4] sm:$0xf0]  ;;  %v9903_v59 = vor.u32 %v11223_v16, %v9902_v35  ;;  %v19847_v16 = vld [vmem:[#allocation60_spill] sm:$0xff] }
 0x435   :  { %7063 = vmatmul.bf16.gmra.mxu0 %v9407_v37  ;;  %2460 = vmatmul.bf16.gmra.mxu1 %v9047_v29 }
 0x437   :  { %v14579_v60 = vpop.f32.mrf.mxu3  ;;  %v6776_v10 = vpop.f32.mrf.mxu2 }
 0x438   :  { %v14581_v36 = vadd.f32 %v6776_v10, %v6489_v22  ;;  %v3835_v22 = vpop.permute.xlu0 %3834  ;;  %v11164_v10 = vld [vmem:[%s19603_s4 + $0x2dc] sm:$0xf]  ;;  %v3840_v0 = vpop.permute.xlu1 %3839 }
 0x439   :  { %v6496_v23 = vadd.f32 %v14269_v57, %v3835_v22  ;;  %v9683_v45 = vor.u32 %v11164_v10, %v9680_v21  ;;  %v9463_v57 = vor.u32 %v11112_v40, %v9462_v13  ;;  %v19845_v22 = vld [vmem:[#allocation27_spill] sm:$0xff]  ;;  %v19848_v10 = vld [vmem:[#allocation26_spill] sm:$0xff] }
 0x43a   :  { %v14583_v18 = vpop.f32.mrf.mxu1  ;;  %v2139_v21 = vadd.f32 %v19848_v10, %v19847_v16  ;;  %v3845_v10 = vpop.permute.xlu2 %3844 }
 0x43f   :  { %v14610_v32 = vpop.f32.mrf.mxu3  ;;  %v6778_v33 = vpop.f32.mrf.mxu2 }
 0x440   :  { %v14612_v47 = vadd.f32 %v6778_v33, %v6491_v7  ;;  %v9071_v33 = vor.u32 %v11025_v2, %v9068_v24  ;;  %v19850_v2 = vld [vmem:[#allocation54_spill] sm:$0xff]  ;;  %v19851_v24 = vld [vmem:[#allocation32_spill] sm:$0xff] }
 0x442   :  { %v2426_v8 = vpop.f32.mrf.mxu1 }
 0x444   :  { %6572 = vmatmul.bf16.gmra.mxu3 %v9875_v6  ;;  %6820 = vmatmul.bf16.gmra.mxu2 %v9655_v25  ;;  %v19842_v25 = vld [vmem:[#allocation40_spill] sm:$0xff] }
 0x445   :  { %7068 = vmatmul.bf16.gmra.mxu0 %v9435_v61  ;;  %2465 = vmatmul.bf16.gmra.mxu1 %v9059_v63  ;;  %v19843_v61 = vld [vmem:[#allocation30_spill] sm:$0xff] }
 0x446   :  { %v2144_v63 = vadd.f32 %v19843_v61, %v19842_v25  ;;  %v2427_v61 = vadd.f32 %v2426_v8, %v2139_v21  ;;  %v2906_v8 = vld [vmem:[%s19602_s1 + $0x1f8] sm:$0xff] }
 0x447   :  { %v14615_v31 = vpop.f32.mrf.mxu3  ;;  %v6781_v39 = vpop.f32.mrf.mxu2 }
 0x448   :  { %v14617_v37 = vadd.f32 %v6781_v39, %v6494_v43  ;;  %v19844_v39 = vld [vmem:[#allocation59_spill] sm:$0xff] }
 0x449   :  { %v2141_v52 = vadd.f32 %v19845_v22, %v19844_v39  ;;  %v19855_v39 = vld [vmem:[#allocation58_spill] sm:$0xff]  ;;  %v19856_v22 = vld [vmem:[#allocation20_spill] sm:$0xff] }
 0x44a   :  { %v2428_v29 = vpop.f32.mrf.mxu1 }
 0x44b   :  { %v2429_v13 = vadd.f32 %v2428_v29, %v2141_v52  ;;  %v2904_v52 = vld [vmem:[%s19602_s1 + $0x1e8] sm:$0xff] }
 0x44f   :  { %v14644_v54 = vpop.f32.mrf.mxu3  ;;  %v6783_v7 = vpop.f32.mrf.mxu2 }
 0x450   :  { %19841 = vst [vmem:[#allocation160_spill] sm:$0xff] %v14644_v54  ;;  %v14646_v5 = vadd.f32 %v6783_v7, %v6496_v23  ;;  %v6499_v23 = vadd.f32 %v14279_v19, %v3840_v0  ;;  %v2905_v19 = vld [vmem:[%s19602_s1 + $0x1f0] sm:$0xff] }
 0x452   :  { %v2431_v6 = vpop.f32.mrf.mxu1 }
 0x453   :  { %v2432_v43 = vadd.f32 %v2431_v6, %v2144_v63  ;;  %v19854_v6 = vld [vmem:[#allocation110_spill] sm:$0xff] }
 0x454   :  { %6577 = vmatmul.bf16.gmra.mxu3 %v9903_v59  ;;  %6825 = vmatmul.bf16.gmra.mxu2 %v9683_v45  ;;  %v2146_v59 = vadd.f32 %v19851_v24, %v19850_v2  ;;  %v19852_v45 = vld [vmem:[#allocation72_spill] sm:$0xff]  ;;  %v19858_v2 = vld [vmem:[#allocation113_spill] sm:$0xff] }
 0x455   :  { %7073 = vmatmul.bf16.gmra.mxu0 %v9463_v57  ;;  %2470 = vmatmul.bf16.gmra.mxu1 %v9071_v33  ;;  %v19853_v57 = vld [vmem:[#allocation23_spill] sm:$0xff]  ;;  %v2720_v25 = vadd.f32 %v19854_v6, %v2432_v43  ;;  %v9930_v43 = vld [vmem:[%s19603_s4 + $0x4d0] sm:$0xf]  ;;  %v19859_v6 = vld [vmem:[#allocation105_spill] sm:$0xff] }
 0x456   :  { %v2136_v33 = vadd.f32 %v19853_v57, %v19852_v45  ;;  %v9490_v45 = vld [vmem:[%s19603_s4 + $0x158] sm:$0xf]  ;;  %v6501_v57 = vadd.f32 %v14327_v38, %v3845_v10  ;;  %v19862_v38 = vld [vmem:[#allocation103_spill] sm:$0xff] }
 0x457   :  { %v14653_v7 = vpop.f32.mrf.mxu3  ;;  %v6786_v35 = vpop.f32.mrf.mxu2  ;;  %v3016_v21 = vadd.f32 %v2905_v19, %v2720_v25  ;;  %v2715_v25 = vadd.f32 %v19859_v6, %v2427_v61  ;;  %v11119_v19 = vld [vmem:[%s19603_s4 + $0x170] sm:$0xf0] }
 0x458   :  { %19846 = vst [vmem:[#allocation4_spill] sm:$0xff] %v14653_v7  ;;  %v14657_v40 = vadd.f32 %v6786_v35, %v6499_v23  ;;  %v2424_v0 = vadd.f32 %v14583_v18, %v2136_v33  ;;  %v2134_v23 = vadd.f32 %v19856_v22, %v19855_v39  ;;  %v19857_v35 = vld [vmem:[#allocation107_spill] sm:$0xff]  ;;  %v19860_v39 = vld [vmem:[#allocation112_spill] sm:$0xff]  ;;  %v19863_v7 = vld [vmem:[#allocation101_spill] sm:$0xff] }
 0x459   :  { %v2717_v16 = vadd.f32 %v19857_v35, %v2429_v13  ;;  %v11230_v18 = vld [vmem:[%s19603_s4 + $0x4e8] sm:$0xf0]  ;;  %v11171_v13 = vld [vmem:[%s19603_s4 + $0x314] sm:$0xf] }
 0x45a   :  { %19849 = vst [vmem:[#allocation16_spill] sm:$0xff] %v14657_v40  ;;  %v2433_v63 = vpop.f32.mrf.mxu1  ;;  %v2422_v33 = vadd.f32 %v14574_v12, %v2134_v23  ;;  %v19861_v22 = vld [vmem:[#allocation35_spill] sm:$0xff]  ;;  %v2712_v10 = vadd.f32 %v19862_v38, %v2424_v0  ;;  %v2903_v12 = vld [vmem:[%s19602_s1 + $0x1e0] sm:$0xff]  ;;  %v9931_v46 = vor.u32 %v11230_v18, %v9930_v43  ;;  %v9491_v0 = vor.u32 %v11119_v19, %v9490_v45 }
 0x45b   :  { %v2434_v29 = vadd.f32 %v2433_v63, %v2146_v59  ;;  %v9708_v59 = vld [vmem:[%s19603_s4 + $0x32c] sm:$0xf0]  ;;  %v11028_v63 = vld [vmem:[%s19600_s2 + $0x3c4] sm:$0xf]  ;;  %v2149_v35 = vadd.f32 %v19861_v22, %v19860_v39  ;;  %v3015_v6 = vadd.f32 %v2904_v52, %v2717_v16  ;;  %v3127_v39 = vmax.f32 %v3016_v21, 0.0 }
 0x45c   :  { %v9711_v56 = vor.u32 %v11171_v13, %v9708_v59  ;;  %v2710_v40 = vadd.f32 %v19863_v7, %v2422_v33  ;;  %v3014_v54 = vadd.f32 %v2903_v12, %v2715_v25  ;;  %v2901_v52 = vld [vmem:[%s19602_s1 + $0x1d0] sm:$0xff]  ;;  %v3013_v43 = vadd.f32 %v2902_v30, %v2712_v10  ;;  %v3850_v13 = vpop.permute.xlu0 %3849  ;;  %v19864_v30 = vld [vmem:[#allocation37_spill] sm:$0xff]  ;;  %v9958_v12 = vld [vmem:[%s19603_s4 + $0x508] sm:$0xf] }
 0x45d   :  { %v2722_v24 = vadd.f32 %v19858_v2, %v2434_v29  ;;  %v9080_v29 = vld [vmem:[%s19600_s2 + $0x3cc] sm:$0xf0]  ;;  %v3126_v18 = vmax.f32 %v3015_v6, 0.0  ;;  %v6504_v21 = vadd.f32 %v14347_v49, %v3850_v13  ;;  %v2907_v49 = vld [vmem:[%s19602_s1 + $0x200] sm:$0xff] }
 0x45e   :  { %v9083_v38 = vor.u32 %v11028_v63, %v9080_v29  ;;  %v3012_v59 = vadd.f32 %v2901_v52, %v2710_v40  ;;  %v3125_v45 = vmax.f32 %v3014_v54, 0.0  ;;  %v3124_v19 = vmax.f32 %v3013_v43, 0.0  ;;  %v19866_v6 = vld [vmem:[#allocation118_spill] sm:$0xff]  ;;  %v11126_v52 = vld [vmem:[%s19603_s4 + $0x1a8] sm:$0xf0] }
 0x45f   :  { %v3017_v61 = vadd.f32 %v2906_v8, %v2722_v24  ;;  %v14711_v23 = vpop.f32.mrf.mxu3  ;;  %v6788_v2 = vpop.f32.mrf.mxu2 }
 0x460   :  { %v14713_v26 = vadd.f32 %v6788_v2, %v6501_v57  ;;  %v3650_v25 = vpack.c.bf16 %v3126_v18, %v3125_v45  ;;  %v3123_v29 = vmax.f32 %v3012_v59, 0.0  ;;  %v19868_v59 = vld [vmem:[#allocation41_spill] sm:$0xff] }
 0x461   :  { %v3128_v22 = vmax.f32 %v3017_v61, 0.0  ;;  %v3855_v61 = vpop.permute.xlu1 %3854 }
 0x462   :  { %v2436_v8 = vpop.f32.mrf.mxu1  ;;  %v3649_v10 = vpack.c.bf16 %v3124_v19, %v3123_v29 }
 0x463   :  { %v2437_v16 = vadd.f32 %v2436_v8, %v2149_v35  ;;  %v3651_v24 = vpack.c.bf16 %v3128_v22, %v3127_v39  ;;  %v2908_v35 = vld [vmem:[%s19602_s1 + $0x208] sm:$0xff]  ;;  %v6506_v8 = vadd.f32 %v14379_v42, %v3855_v61  ;;  %v19870_v61 = vld [vmem:[#allocation120_spill] sm:$0xff] }
 0x464   :  { %6582 = vmatmul.bf16.gmra.mxu3 %v9931_v46  ;;  %6830 = vmatmul.bf16.gmra.mxu2 %v9711_v56  ;;  %v2151_v46 = vadd.f32 %v19864_v30, %v14349_v20  ;;  %v19865_v56 = vld [vmem:[#allocation116_spill] sm:$0xff]  ;;  %v11237_v20 = vld [vmem:[%s19603_s4 + $0x520] sm:$0xf0]  ;;  %v11178_v22 = vld [vmem:[%s19603_s4 + $0x34c] sm:$0xf] }
 0x465   :  { %7078 = vmatmul.bf16.gmra.mxu0 %v9491_v0  ;;  %2475 = vmatmul.bf16.gmra.mxu1 %v9083_v38  ;;  %v2725_v63 = vadd.f32 %v19865_v56, %v2437_v16  ;;  %v9736_v0 = vld [vmem:[%s19603_s4 + $0x364] sm:$0xf0]  ;;  %v9518_v38 = vld [vmem:[%s19603_s4 + $0x190] sm:$0xf]  ;;  %v11031_v16 = vld [vmem:[%s19600_s2 + $0x3dc] sm:$0xf] }
 0x466   :  { %7328 = vmatpush.bf16.msra.mxu1 %v3651_v24  ;;  %v9092_v24 = vld [vmem:[%s19600_s2 + $0x3e4] sm:$0xf0]  ;;  %v9519_v30 = vor.u32 %v11126_v52, %v9518_v38 }
 0x467   :  { %v14723_v7 = vpop.f32.mrf.mxu3  ;;  %v6791_v57 = vpop.f32.mrf.mxu2  ;;  %v3018_v2 = vadd.f32 %v2907_v49, %v2725_v63 }
 0x468   :  { %v14725_v33 = vadd.f32 %v6791_v57, %v6504_v21  ;;  %v19867_v21 = vld [vmem:[#allocation91_spill] sm:$0xff]  ;;  %v9959_v57 = vor.u32 %v11237_v20, %v9958_v12 }
 0x469   :  { %v2154_v42 = vadd.f32 %v19868_v59, %v19867_v21  ;;  %v3129_v19 = vmax.f32 %v3018_v2, 0.0  ;;  %v11034_v21 = vld [vmem:[%s19600_s2 + $0x3f4] sm:$0xf]  ;;  %v9104_v59 = vld [vmem:[%s19600_s2 + $0x3fc] sm:$0xf0] }
 0x46a   :  { %7329 = vmatpush.bf16.msra.mxu1 %v3650_v25  ;;  %v2438_v54 = vpop.f32.mrf.mxu1  ;;  %v9739_v25 = vor.u32 %v11178_v22, %v9736_v0  ;;  %v9986_v22 = vld [vmem:[%s19603_s4 + $0x540] sm:$0xf]  ;;  %v3865_v0 = vpop.permute.xlu0 %3864 }
 0x46b   :  { %v2439_v40 = vadd.f32 %v2438_v54, %v2151_v46  ;;  %v9095_v46 = vor.u32 %v11031_v16, %v9092_v24  ;;  %v3860_v54 = vpop.permute.xlu2 %3859  ;;  %v9764_v16 = vld [vmem:[%s19603_s4 + $0x39c] sm:$0xf0]  ;;  %v9546_v24 = vld [vmem:[%s19603_s4 + $0x1c8] sm:$0xf] }
 0x46d   :  { %v2727_v39 = vadd.f32 %v19866_v6, %v2439_v40  ;;  %v6509_v40 = vadd.f32 %v14386_v58, %v3860_v54  ;;  %v2909_v6 = vld [vmem:[%s19602_s1 + $0x210] sm:$0xff] }
 0x46e   :  { %7330 = vmatpush.bf16.msra.mxu1 %v3649_v10 }
 0x46f   :  { %v3019_v43 = vadd.f32 %v2908_v35, %v2727_v39  ;;  %v14762_v18 = vpop.f32.mrf.mxu3  ;;  %v6793_v13 = vpop.f32.mrf.mxu2 }
 0x470   :  { %v14766_v45 = vadd.f32 %v6793_v13, %v6506_v8  ;;  %v19871_v8 = vld [vmem:[#allocation122_spill] sm:$0xff] }
 0x471   :  { %v3130_v56 = vmax.f32 %v3019_v43, 0.0  ;;  %v6511_v43 = vadd.f32 %v14427_v44, %v3865_v0  ;;  %v11133_v13 = vld [vmem:[%s19603_s4 + $0x1e0] sm:$0xf0] }
 0x472   :  { %7331 = vmatpush.bf16.msra.mxu1 %v14576_v3  ;;  %v2441_v63 = vpop.f32.mrf.mxu1  ;;  %v19869_v3 = vld [vmem:[#allocation45_spill] sm:$0xff]  ;;  %v2911_v0 = vld [vmem:[%s19602_s1 + $0x220] sm:$0xff] }
 0x473   :  { %v2442_v29 = vadd.f32 %v2441_v63, %v2154_v42  ;;  %v14769_v49 = vpack.c.bf16 %v3130_v56, %v3129_v19  ;;  %v2156_v20 = vadd.f32 %v19869_v3, %v14203_v53  ;;  %v11244_v53 = vld [vmem:[%s19603_s4 + $0x558] sm:$0xf0]  ;;  %v9107_v56 = vor.u32 %v11034_v21, %v9104_v59  ;;  %v19878_v21 = vld [vmem:[#allocation126_spill] sm:$0xff] }
 0x474   :  { %6587 = vmatmul.bf16.gmra.mxu3 %v9959_v57  ;;  %6835 = vmatmul.bf16.gmra.mxu2 %v9739_v25  ;;  %v9987_v44 = vor.u32 %v11244_v53, %v9986_v22  ;;  %v19876_v22 = vld [vmem:[#allocation124_spill] sm:$0xff] }
 0x475   :  { %7083 = vmatmul.bf16.gmra.mxu0 %v9519_v30  ;;  %2480 = vmatmul.bf16.gmra.mxu1 %v9095_v46  ;;  %v2730_v2 = vadd.f32 %v19870_v61, %v2442_v29  ;;  %v9547_v46 = vor.u32 %v11133_v13, %v9546_v24  ;;  %v3870_v61 = vpop.permute.xlu1 %3869  ;;  %v11251_v24 = vld [vmem:[%s19603_s4 + $0x590] sm:$0xf0] }
 0x476   :  { %7332 = vmatpush.bf16.msra.mxu1 %v14528_v34  ;;  %v2910_v34 = vld [vmem:[%s19602_s1 + $0x218] sm:$0xff] }
 0x477   :  { %v14773_v35 = vpop.f32.mrf.mxu3  ;;  %v6796_v10 = vpop.f32.mrf.mxu2  ;;  %v3020_v38 = vadd.f32 %v2909_v6, %v2730_v2  ;;  %v6514_v2 = vadd.f32 %v14436_v27, %v3870_v61 }
 0x478   :  { %v14775_v12 = vadd.f32 %v6796_v10, %v6509_v40  ;;  %v19873_v10 = vld [vmem:[#allocation73_spill] sm:$0xff] }
 0x479   :  { %v3131_v30 = vmax.f32 %v3020_v38, 0.0 }
 0x47a   :  { %7333 = vmatpush.bf16.msra.mxu1 %v14481_v15  ;;  %v2443_v39 = vpop.f32.mrf.mxu1  ;;  %v11185_v15 = vld [vmem:[%s19603_s4 + $0x384] sm:$0xf] }
 0x47b   :  { %v2444_v58 = vadd.f32 %v2443_v39, %v2156_v20 }
 0x47d   :  { %v2732_v52 = vadd.f32 %v19871_v8, %v2444_v58 }
 0x47e   :  { %7334 = vmatpush.bf16.msra.mxu1 %v14431_v17  ;;  %v9767_v17 = vor.u32 %v11185_v15, %v9764_v16  ;;  %v2912_v15 = vld [vmem:[%s19602_s1 + $0x228] sm:$0xff]  ;;  %v10014_v16 = vld [vmem:[%s19603_s4 + $0x578] sm:$0xf] }
 0x47f   :  { %v3021_v42 = vadd.f32 %v2910_v34, %v2732_v52  ;;  %v14814_v57 = vpop.f32.mrf.mxu3  ;;  %v6798_v25 = vpop.f32.mrf.mxu2  ;;  %v19875_v34 = vld [vmem:[#allocation52_spill] sm:$0xff] }
 0x480   :  { %v14816_v19 = vadd.f32 %v6798_v25, %v6511_v43  ;;  %v3875_v43 = vpop.permute.xlu2 %3874  ;;  %v9574_v25 = vld [vmem:[%s19603_s4 + $0x200] sm:$0xf] }
 0x481   :  { %v3132_v63 = vmax.f32 %v3021_v42, 0.0  ;;  %v9792_v42 = vld [vmem:[%s19603_s4 + $0x3d4] sm:$0xf0] }
 0x482   :  { %v7049_v29 = vpop.f32.mrf.mxu0  ;;  %7335 = vmatpush.bf16.msra.mxu1 %v14383_v41  ;;  %v2446_v54 = vpop.f32.mrf.mxu1  ;;  %v19874_v41 = vld [vmem:[#allocation84_spill] sm:$0xff] }
 0x483   :  { %v14820_v40 = vadd.f32 %v7049_v29, %v14438_v50  ;;  %v2447_v3 = vadd.f32 %v2446_v54, %v19873_v10  ;;  %v14823_v20 = vpack.c.bf16 %v3132_v63, %v3131_v30  ;;  %v2161_v50 = vadd.f32 %v19875_v34, %v19874_v41  ;;  %v11037_v30 = vld [vmem:[%s19600_s2 + $0x40c] sm:$0xf] }
 0x484   :  { %6592 = vmatmul.bf16.gmra.mxu3 %v9987_v44  ;;  %6840 = vmatmul.bf16.gmra.mxu2 %v9767_v17  ;;  %v6516_v44 = vadd.f32 %v14476_v55, %v3875_v43  ;;  %v11140_v17 = vld [vmem:[%s19603_s4 + $0x218] sm:$0xf0]  ;;  %v10015_v10 = vor.u32 %v11251_v24, %v10014_v16  ;;  %v19881_v24 = vld [vmem:[#allocation128_spill] sm:$0xff] }
 0x485   :  { %19872 = vst [vmem:[#allocation153_spill] sm:$0xff] %v14820_v40  ;;  %7088 = vmatmul.bf16.gmra.mxu0 %v9547_v46  ;;  %2485 = vmatmul.bf16.gmra.mxu1 %v9107_v56  ;;  %v2735_v53 = vadd.f32 %v19876_v22, %v2447_v3  ;;  %v9116_v46 = vld [vmem:[%s19600_s2 + $0x414] sm:$0xf0]  ;;  %v9575_v61 = vor.u32 %v11140_v17, %v9574_v25  ;;  %v19880_v22 = vld [vmem:[#allocation76_spill] sm:$0xff]  ;;  %v3885_v17 = vpop.permute.xlu1 %3884 }
 0x486   :  { %v10042_v25 = vld [vmem:[%s19603_s4 + $0x5b0] sm:$0xf] }
 0x487   :  { %v14826_v6 = vpop.f32.mrf.mxu3  ;;  %v6801_v39 = vpop.f32.mrf.mxu2  ;;  %v3022_v13 = vadd.f32 %v2911_v0, %v2735_v53 }
 0x488   :  { %v14828_v58 = vadd.f32 %v6801_v39, %v6514_v2  ;;  %v9119_v2 = vor.u32 %v11037_v30, %v9116_v46  ;;  %v19884_v46 = vld [vmem:[#allocation130_spill] sm:$0xff] }
 0x489   :  { %v3133_v3 = vmax.f32 %v3022_v13, 0.0 }
 0x48a   :  { %v7051_v38 = vpop.f32.mrf.mxu0  ;;  %v2448_v8 = vpop.f32.mrf.mxu1 }
 0x48b   :  { %v14837_v52 = vadd.f32 %v7051_v38, %v14478_v28  ;;  %v2449_v27 = vadd.f32 %v2448_v8, %v2161_v50  ;;  %v11192_v28 = vld [vmem:[%s19603_s4 + $0x3bc] sm:$0xf]  ;;  %v3880_v38 = vpop.permute.xlu0 %3879 }
 0x48c   :  { %v9795_v55 = vor.u32 %v11192_v28, %v9792_v42  ;;  %v6519_v8 = vadd.f32 %v14484_v4, %v3880_v38  ;;  %v19883_v28 = vld [vmem:[#allocation75_spill] sm:$0xff]  ;;  %v2914_v4 = vld [vmem:[%s19602_s1 + $0x238] sm:$0xff] }
 0x48d   :  { %19877 = vst [vmem:[#allocation15_spill] sm:$0xff] %v14837_v52  ;;  %v2737_v59 = vadd.f32 %v19878_v21, %v2449_v27 }
 0x48f   :  { %v3023_v56 = vadd.f32 %v2912_v15, %v2737_v59  ;;  %v14868_v63 = vpop.f32.mrf.mxu3  ;;  %v6803_v29 = vpop.f32.mrf.mxu2 }
 0x490   :  { %v14870_v54 = vadd.f32 %v6803_v29, %v6516_v44  ;;  %v11258_v44 = vld [vmem:[%s19603_s4 + $0x5c8] sm:$0xf0]  ;;  %v9820_v29 = vld [vmem:[%s19603_s4 + $0x40c] sm:$0xf0] }
 0x491   :  { %v3134_v39 = vmax.f32 %v3023_v56, 0.0 }
 0x492   :  { %v7054_v41 = vpop.f32.mrf.mxu0  ;;  %v2451_v34 = vpop.f32.mrf.mxu1 }
 0x493   :  { %v14873_v50 = vadd.f32 %v7054_v41, %v14486_v48  ;;  %v2452_v53 = vadd.f32 %v2451_v34, %v19880_v22  ;;  %v14876_v0 = vpack.c.bf16 %v3134_v39, %v3133_v3  ;;  %v2913_v48 = vld [vmem:[%s19602_s1 + $0x230] sm:$0xff]  ;;  %v19885_v22 = vld [vmem:[#allocation63_spill] sm:$0xff] }
 0x494   :  { %6597 = vmatmul.bf16.gmra.mxu3 %v10015_v10  ;;  %6845 = vmatmul.bf16.gmra.mxu2 %v9795_v55  ;;  %v9602_v10 = vld [vmem:[%s19603_s4 + $0x238] sm:$0xf]  ;;  %v6521_v55 = vadd.f32 %v14522_v14, %v3885_v17  ;;  %v11147_v3 = vld [vmem:[%s19603_s4 + $0x250] sm:$0xf0] }
 0x495   :  { %19879 = vst [vmem:[#allocation155_spill] sm:$0xff] %v14873_v50  ;;  %7093 = vmatmul.bf16.gmra.mxu0 %v9575_v61  ;;  %2490 = vmatmul.bf16.gmra.mxu1 %v9119_v2  ;;  %v2740_v43 = vadd.f32 %v19881_v24, %v2452_v53  ;;  %v11040_v61 = vld [vmem:[%s19600_s2 + $0x424] sm:$0xf]  ;;  %v9128_v2 = vld [vmem:[%s19600_s2 + $0x42c] sm:$0xf0] }
 0x496   :  { %v19886_v53 = vld [vmem:[#allocation62_spill] sm:$0xff]  ;;  %v19912_v50 = vld [vmem:[#allocation16_spill] sm:$0xff] }
 0x497   :  { %v14879_v27 = vpop.f32.mrf.mxu3  ;;  %v6806_v15 = vpop.f32.mrf.mxu2  ;;  %v3024_v30 = vadd.f32 %v2913_v48, %v2740_v43  ;;  %v2169_v38 = vadd.f32 %v19886_v53, %v19885_v22  ;;  %v9603_v43 = vor.u32 %v11147_v3, %v9602_v10  ;;  %v9131_v48 = vor.u32 %v11040_v61, %v9128_v2  ;;  %v2915_v3 = vld [vmem:[%s19602_s1 + $0x240] sm:$0xff]  ;;  %v10070_v22 = vld [vmem:[%s19603_s4 + $0x5e8] sm:$0xf] }
 0x498   :  { %v14881_v16 = vadd.f32 %v6806_v15, %v6519_v8  ;;  %v10043_v8 = vor.u32 %v11258_v44, %v10042_v25  ;;  %v11265_v53 = vld [vmem:[%s19603_s4 + $0x600] sm:$0xf0] }
 0x499   :  { %v3135_v24 = vmax.f32 %v3024_v30, 0.0 }
 0x49a   :  { %v7056_v13 = vpop.f32.mrf.mxu0  ;;  %v2453_v21 = vpop.f32.mrf.mxu1 }
 0x49b   :  { %v14888_v59 = vadd.f32 %v7056_v13, %v14524_v51  ;;  %v2454_v42 = vadd.f32 %v2453_v21, %v19883_v28  ;;  %v11199_v51 = vld [vmem:[%s19603_s4 + $0x3f4] sm:$0xf] }
 0x49c   :  { %v9823_v15 = vor.u32 %v11199_v51, %v9820_v29  ;;  %v19888_v51 = vld [vmem:[#allocation55_spill] sm:$0xff]  ;;  %v19889_v29 = vld [vmem:[#allocation66_spill] sm:$0xff] }
 0x49d   :  { %19882 = vst [vmem:[#allocation38_spill] sm:$0xff] %v14888_v59  ;;  %v2742_v56 = vadd.f32 %v19884_v46, %v2454_v42  ;;  %v3890_v46 = vpop.permute.xlu2 %3889  ;;  %v2171_v10 = vadd.f32 %v19889_v29, %v19888_v51  ;;  %v10071_v29 = vor.u32 %v11265_v53, %v10070_v22 }
 0x49e   :  { %v6524_v25 = vadd.f32 %v14531_v62, %v3890_v46 }
 0x49f   :  { %v3025_v39 = vadd.f32 %v2914_v4, %v2742_v56  ;;  %v14920_v41 = vpop.f32.mrf.mxu3  ;;  %v6808_v34 = vpop.f32.mrf.mxu2 }
 0x4a0   :  { %v14924_v14 = vadd.f32 %v6808_v34, %v6521_v55  ;;  %v2916_v34 = vld [vmem:[%s19602_s1 + $0x248] sm:$0xff] }
 0x4a1   :  { %v3136_v13 = vmax.f32 %v3025_v39, 0.0 }
 0x4a2   :  { %v7059_v21 = vpop.f32.mrf.mxu0  ;;  %v2456_v28 = vpop.f32.mrf.mxu1 }
 0x4a3   :  { %v14927_v42 = vadd.f32 %v7059_v21, %v14533_v9  ;;  %v2457_v4 = vadd.f32 %v2456_v28, %v2169_v38  ;;  %v14929_v17 = vpack.c.bf16 %v3136_v13, %v3135_v24  ;;  %v19890_v9 = vld [vmem:[#allocation132_spill] sm:$0xff]  ;;  %v3895_v38 = vpop.permute.xlu0 %3894  ;;  %v11154_v21 = vld [vmem:[%s19603_s4 + $0x288] sm:$0xf0]  ;;  %v11043_v28 = vld [vmem:[%s19600_s2 + $0x43c] sm:$0xf] }
 0x4a4   :  { %6602 = vmatmul.bf16.gmra.mxu3 %v10043_v8  ;;  %6850 = vmatmul.bf16.gmra.mxu2 %v9823_v15  ;;  %v19892_v15 = vld [vmem:[#allocation134_spill] sm:$0xff]  ;;  %v6526_v13 = vadd.f32 %v14570_v1, %v3895_v38 }
 0x4a5   :  { %19887 = vst [vmem:[#allocation31_spill] sm:$0xff] %v14927_v42  ;;  %7098 = vmatmul.bf16.gmra.mxu0 %v9603_v43  ;;  %2495 = vmatmul.bf16.gmra.mxu1 %v9131_v48  ;;  %v2745_v55 = vadd.f32 %v19890_v9, %v2457_v4  ;;  %v9848_v43 = vld [vmem:[%s19603_s4 + $0x444] sm:$0xf0]  ;;  %v9630_v48 = vld [vmem:[%s19603_s4 + $0x270] sm:$0xf]  ;;  %v19894_v38 = vld [vmem:[#allocation70_spill] sm:$0xff] }
 0x4a6   :  { %v9140_v4 = vld [vmem:[%s19600_s2 + $0x444] sm:$0xf0]  ;;  %v9631_v9 = vor.u32 %v11154_v21, %v9630_v48  ;;  %v19897_v48 = vld [vmem:[#allocation74_spill] sm:$0xff] }
 0x4a7   :  { %v14932_v44 = vpop.f32.mrf.mxu3  ;;  %v6811_v30 = vpop.f32.mrf.mxu2  ;;  %v3026_v8 = vadd.f32 %v2915_v3, %v2745_v55  ;;  %v9143_v55 = vor.u32 %v11043_v28, %v9140_v4  ;;  %v2917_v4 = vld [vmem:[%s19602_s1 + $0x250] sm:$0xff] }
 0x4a8   :  { %v14934_v56 = vadd.f32 %v6811_v30, %v6524_v25 }
 0x4aa   :  { %v7061_v61 = vpop.f32.mrf.mxu0  ;;  %v2458_v2 = vpop.f32.mrf.mxu1 }
 0x4ab   :  { %v14943_v39 = vadd.f32 %v7061_v61, %v14572_v11  ;;  %v2459_v62 = vadd.f32 %v2458_v2, %v2171_v10  ;;  %v11206_v11 = vld [vmem:[%s19603_s4 + $0x42c] sm:$0xf]  ;;  %v3137_v10 = vmax.f32 %v3026_v8, 0.0 }
 0x4ac   :  { %v9851_v1 = vor.u32 %v11206_v11, %v9848_v43  ;;  %v19896_v43 = vld [vmem:[#allocation57_spill] sm:$0xff] }
 0x4ad   :  { %19891 = vst [vmem:[#allocation29_spill] sm:$0xff] %v14943_v39  ;;  %v2747_v24 = vadd.f32 %v19892_v15, %v2459_v62  ;;  %v19893_v62 = vld [vmem:[#allocation44_spill] sm:$0xff]  ;;  %v2176_v21 = vadd.f32 %v19897_v48, %v19896_v43 }
 0x4ae   :  { %v2174_v15 = vadd.f32 %v19894_v38, %v19893_v62  ;;  %v9876_v62 = vld [vmem:[%s19603_s4 + $0x47c] sm:$0xf0]  ;;  %v9658_v38 = vld [vmem:[%s19603_s4 + $0x2a8] sm:$0xf] }
 0x4af   :  { %v3027_v46 = vadd.f32 %v2916_v34, %v2747_v24  ;;  %v14974_v25 = vpop.f32.mrf.mxu3  ;;  %v6813_v30 = vpop.f32.mrf.mxu2 }
 0x4b0   :  { %v14976_v51 = vadd.f32 %v6813_v30, %v6526_v13  ;;  %v3900_v24 = vpop.permute.xlu1 %3899 }
 0x4b1   :  { %v3138_v3 = vmax.f32 %v3027_v46, 0.0  ;;  %v6529_v22 = vadd.f32 %v14579_v60, %v3900_v24  ;;  %v11161_v24 = vld [vmem:[%s19603_s4 + $0x2c0] sm:$0xf0] }
 0x4b2   :  { %v7064_v61 = vpop.f32.mrf.mxu0  ;;  %v2461_v2 = vpop.f32.mrf.mxu1 }
 0x4b3   :  { %v14981_v39 = vadd.f32 %v7064_v61, %v14581_v36  ;;  %v14983_v34 = vpack.c.bf16 %v3138_v3, %v3137_v10  ;;  %v2462_v13 = vadd.f32 %v2461_v2, %v2174_v15  ;;  %v19898_v36 = vld [vmem:[#allocation136_spill] sm:$0xff]  ;;  %v10098_v10 = vld [vmem:[%s19603_s4 + $0x620] sm:$0xf] }
 0x4b4   :  { %6607 = vmatmul.bf16.gmra.mxu3 %v10071_v29  ;;  %6855 = vmatmul.bf16.gmra.mxu2 %v9851_v1  ;;  %v2918_v1 = vld [vmem:[%s19602_s1 + $0x258] sm:$0xff]  ;;  %v19900_v61 = vld [vmem:[#allocation138_spill] sm:$0xff] }
 0x4b5   :  { %19895 = vst [vmem:[#allocation39_spill] sm:$0xff] %v14981_v39  ;;  %7103 = vmatmul.bf16.gmra.mxu0 %v9631_v9  ;;  %2500 = vmatmul.bf16.gmra.mxu1 %v9143_v55  ;;  %v2750_v28 = vadd.f32 %v19898_v36, %v2462_v13  ;;  %v11272_v9 = vld [vmem:[%s19603_s4 + $0x638] sm:$0xf0]  ;;  %v3905_v55 = vpop.permute.xlu2 %3904  ;;  %v11046_v13 = vld [vmem:[%s19600_s2 + $0x454] sm:$0xf] }
 0x4b6   :  { %v6531_v15 = vadd.f32 %v14610_v32, %v3905_v55  ;;  %v10099_v36 = vor.u32 %v11272_v9, %v10098_v10 }
 0x4b7   :  { %v14986_v53 = vpop.f32.mrf.mxu3  ;;  %v6816_v8 = vpop.f32.mrf.mxu2  ;;  %v3028_v3 = vadd.f32 %v2917_v4, %v2750_v28  ;;  %v9659_v4 = vor.u32 %v11161_v24, %v9658_v38 }
 0x4b8   :  { %v14988_v11 = vadd.f32 %v6816_v8, %v6529_v22  ;;  %v9152_v22 = vld [vmem:[%s19600_s2 + $0x45c] sm:$0xf0] }
 0x4b9   :  { %v3139_v28 = vmax.f32 %v3028_v3, 0.0 }
 0x4ba   :  { %v7066_v46 = vpop.f32.mrf.mxu0  ;;  %v2463_v30 = vpop.f32.mrf.mxu1 }
 0x4bb   :  { %v14997_v29 = vadd.f32 %v7066_v46, %v14612_v47  ;;  %v2464_v60 = vadd.f32 %v2463_v30, %v2176_v21  ;;  %v11213_v47 = vld [vmem:[%s19603_s4 + $0x464] sm:$0xf]  ;;  %v9155_v46 = vor.u32 %v11046_v13, %v9152_v22 }
 0x4bc   :  { %v9879_v32 = vor.u32 %v11213_v47, %v9876_v62  ;;  %v19904_v62 = vld [vmem:[#allocation36_spill] sm:$0xff]  ;;  %v2919_v13 = vld [vmem:[%s19602_s1 + $0x260] sm:$0xff] }
 0x4bd   :  { %19899 = vst [vmem:[#allocation25_spill] sm:$0xff] %v14997_v29  ;;  %v2752_v2 = vadd.f32 %v19900_v61, %v2464_v60  ;;  %v19901_v61 = vld [vmem:[#allocation46_spill] sm:$0xff]  ;;  %v19902_v29 = vld [vmem:[#allocation77_spill] sm:$0xff] }
 0x4be   :  { %v2179_v39 = vadd.f32 %v19902_v29, %v19901_v61  ;;  %v19905_v29 = vld [vmem:[#allocation80_spill] sm:$0xff] }
 0x4bf   :  { %v3029_v8 = vadd.f32 %v2918_v1, %v2752_v2  ;;  %v15028_v43 = vpop.f32.mrf.mxu3  ;;  %v6818_v48 = vpop.f32.mrf.mxu2  ;;  %v2181_v38 = vadd.f32 %v19905_v29, %v19904_v62  ;;  %v19909_v61 = vld [vmem:[#allocation160_spill] sm:$0xff] }
 0x4c0   :  { %v15030_v21 = vadd.f32 %v6818_v48, %v6531_v15  ;;  %v3910_v2 = vpop.permute.xlu0 %3909  ;;  %v2920_v48 = vld [vmem:[%s19602_s1 + $0x268] sm:$0xff] }
 0x4c1   :  { %v3140_v30 = vmax.f32 %v3029_v8, 0.0  ;;  %v6534_v10 = vadd.f32 %v14615_v31, %v3910_v2 }
 0x4c2   :  { %v7069_v60 = vpop.f32.mrf.mxu0  ;;  %v2466_v55 = vpop.f32.mrf.mxu1 }
 0x4c3   :  { %v15035_v42 = vadd.f32 %v7069_v60, %v14617_v37  ;;  %v15037_v1 = vpack.c.bf16 %v3140_v30, %v3139_v28  ;;  %v2467_v15 = vadd.f32 %v2466_v55, %v2179_v39  ;;  %v19906_v37 = vld [vmem:[#allocation140_spill] sm:$0xff]  ;;  %v3915_v28 = vpop.permute.xlu1 %3914  ;;  %v9904_v60 = vld [vmem:[%s19603_s4 + $0x4b4] sm:$0xf0]  ;;  %v9686_v55 = vld [vmem:[%s19603_s4 + $0x2e0] sm:$0xf] }
 0x4c4   :  { %6612 = vmatmul.bf16.gmra.mxu3 %v10099_v36  ;;  %6860 = vmatmul.bf16.gmra.mxu2 %v9879_v32  ;;  %v10126_v36 = vld [vmem:[%s19603_s4 + $0x658] sm:$0xf]  ;;  %v11279_v32 = vld [vmem:[%s19603_s4 + $0x670] sm:$0xf0]  ;;  %v6536_v2 = vadd.f32 %v19909_v61, %v3915_v28 }
 0x4c5   :  { %19903 = vst [vmem:[#allocation33_spill] sm:$0xff] %v15035_v42  ;;  %7108 = vmatmul.bf16.gmra.mxu0 %v9659_v4  ;;  %2505 = vmatmul.bf16.gmra.mxu1 %v9155_v46  ;;  %v2755_v24 = vadd.f32 %v19906_v37, %v2467_v15  ;;  %v19908_v46 = vld [vmem:[#allocation142_spill] sm:$0xff]  ;;  %v11168_v15 = vld [vmem:[%s19603_s4 + $0x2f8] sm:$0xf0]  ;;  %v19911_v42 = vld [vmem:[#allocation83_spill] sm:$0xff] }
 0x4c7   :  { %v15040_v9 = vpop.f32.mrf.mxu3  ;;  %v6821_v3 = vpop.f32.mrf.mxu2  ;;  %v3030_v4 = vadd.f32 %v2919_v13, %v2755_v24  ;;  %v10127_v24 = vor.u32 %v11279_v32, %v10126_v36  ;;  %v19914_v36 = vld [vmem:[#allocation4_spill] sm:$0xff] }
 0x4c8   :  { %v15042_v47 = vadd.f32 %v6821_v3, %v6534_v10  ;;  %v11049_v10 = vld [vmem:[%s19600_s2 + $0x46c] sm:$0xf]  ;;  %v9164_v3 = vld [vmem:[%s19600_s2 + $0x474] sm:$0xf0] }
 0x4ca   :  { %v7071_v22 = vpop.f32.mrf.mxu0  ;;  %v2468_v39 = vpop.f32.mrf.mxu1 }
 0x4cb   :  { %v15051_v8 = vadd.f32 %v7071_v22, %v14646_v5  ;;  %v2469_v31 = vadd.f32 %v2468_v39, %v2181_v38  ;;  %v11220_v5 = vld [vmem:[%s19603_s4 + $0x49c] sm:$0xf]  ;;  %v3141_v22 = vmax.f32 %v3030_v4, 0.0  ;;  %v9687_v39 = vor.u32 %v11168_v15, %v9686_v55  ;;  %v19916_v55 = vld [vmem:[#allocation42_spill] sm:$0xff] }
 0x4cc   :  { %v9907_v13 = vor.u32 %v11220_v5, %v9904_v60  ;;  %v19917_v15 = vld [vmem:[#allocation85_spill] sm:$0xff] }
 0x4cd   :  { %19907 = vst [vmem:[#allocation19_spill] sm:$0xff] %v15051_v8  ;;  %v2757_v30 = vadd.f32 %v19908_v46, %v2469_v31  ;;  %v9167_v31 = vor.u32 %v11049_v10, %v9164_v3  ;;  %v19910_v8 = vld [vmem:[#allocation43_spill] sm:$0xff]  ;;  %v2921_v10 = vld [vmem:[%s19602_s1 + $0x270] sm:$0xff] }
 0x4ce   :  { %v2184_v59 = vadd.f32 %v19911_v42, %v19910_v8  ;;  %v2186_v42 = vadd.f32 %v19917_v15, %v19916_v55  ;;  %v19918_v8 = vld [vmem:[#allocation144_spill] sm:$0xff] }
 0x4cf   :  { %v3031_v62 = vadd.f32 %v2920_v48, %v2757_v30  ;;  %v15082_v29 = vpop.f32.mrf.mxu3  ;;  %v6823_v38 = vpop.f32.mrf.mxu2 }
 0x4d0   :  { %v15084_v37 = vadd.f32 %v6823_v38, %v6536_v2  ;;  %v3920_v30 = vpop.permute.xlu2 %3919 }
 0x4d1   :  { %v3142_v28 = vmax.f32 %v3031_v62, 0.0  ;;  %v6539_v32 = vadd.f32 %v19914_v36, %v3920_v30  ;;  %v9714_v30 = vld [vmem:[%s19603_s4 + $0x318] sm:$0xf]  ;;  %v11175_v36 = vld [vmem:[%s19603_s4 + $0x330] sm:$0xf0] }
 0x4d2   :  { %v7074_v46 = vpop.f32.mrf.mxu0  ;;  %v2471_v61 = vpop.f32.mrf.mxu1 }
 0x4d3   :  { %v15089_v52 = vadd.f32 %v7074_v46, %v19912_v50  ;;  %v3658_v48 = vpack.c.bf16 %v3142_v28, %v3141_v22  ;;  %v2472_v2 = vadd.f32 %v2471_v61, %v2184_v59  ;;  %v11286_v22 = vld [vmem:[%s19603_s4 + $0x6a8] sm:$0xf0]  ;;  %v19920_v28 = vld [vmem:[#allocation145_spill] sm:$0xff]  ;;  %v9932_v61 = vld [vmem:[%s19603_s4 + $0x4ec] sm:$0xf0] }
 0x4d4   :  { %6617 = vmatmul.bf16.gmra.mxu3 %v10127_v24  ;;  %6865 = vmatmul.bf16.gmra.mxu2 %v9907_v13  ;;  %v2922_v24 = vld [vmem:[%s19602_s1 + $0x278] sm:$0xff]  ;;  %v10154_v13 = vld [vmem:[%s19603_s4 + $0x690] sm:$0xf] }
 0x4d5   :  { %19913 = vst [vmem:[#allocation28_spill] sm:$0xff] %v15089_v52  ;;  %7113 = vmatmul.bf16.gmra.mxu0 %v9687_v39  ;;  %2510 = vmatmul.bf16.gmra.mxu1 %v9167_v31  ;;  %v2760_v50 = vadd.f32 %v19918_v8, %v2472_v2  ;;  %v3925_v39 = vpop.permute.xlu0 %3924  ;;  %v19922_v8 = vld [vmem:[#allocation6_spill] sm:$0xff] }
 0x4d6   :  { %v6541_v2 = vadd.f32 %v14711_v23, %v3925_v39 }
 0x4d7   :  { %v15092_v4 = vpop.f32.mrf.mxu3  ;;  %v6826_v5 = vpop.f32.mrf.mxu2  ;;  %v3032_v31 = vadd.f32 %v2921_v10, %v2760_v50  ;;  %v19923_v50 = vld [vmem:[#allocation87_spill] sm:$0xff] }
 0x4d8   :  { %19915 = vst [vmem:[#allocation13_spill] sm:$0xff] %v15092_v4  ;;  %v15094_v60 = vadd.f32 %v6826_v5, %v6539_v32  ;;  %v11052_v32 = vld [vmem:[%s19600_s2 + $0x484] sm:$0xf]  ;;  %v9176_v5 = vld [vmem:[%s19600_s2 + $0x48c] sm:$0xf0]  ;;  %v2189_v10 = vadd.f32 %v19923_v50, %v19922_v8 }
 0x4da   :  { %v7076_v3 = vpop.f32.mrf.mxu0  ;;  %v2473_v59 = vpop.f32.mrf.mxu1 }
 0x4db   :  { %v15103_v62 = vadd.f32 %v7076_v3, %v14713_v26  ;;  %v2474_v38 = vadd.f32 %v2473_v59, %v2186_v42  ;;  %v11227_v26 = vld [vmem:[%s19603_s4 + $0x4d4] sm:$0xf]  ;;  %v10155_v3 = vor.u32 %v11286_v22, %v10154_v13 }
 0x4dc   :  { %v9935_v59 = vor.u32 %v11227_v26, %v9932_v61  ;;  %v19925_v26 = vld [vmem:[#allocation115_spill] sm:$0xff]  ;;  %v19926_v61 = vld [vmem:[#allocation90_spill] sm:$0xff] }
 0x4dd   :  { %19919 = vst [vmem:[#allocation2_spill] sm:$0xff] %v15103_v62  ;;  %v2762_v46 = vadd.f32 %v19920_v28, %v2474_v38  ;;  %v3143_v38 = vmax.f32 %v3032_v31, 0.0  ;;  %v9715_v28 = vor.u32 %v11175_v36, %v9714_v30  ;;  %v9179_v62 = vor.u32 %v11052_v32, %v9176_v5  ;;  %v2924_v5 = vld [vmem:[%s19602_s1 + $0x288] sm:$0xff] }
 0x4de   :  { %v2191_v30 = vadd.f32 %v19926_v61, %v19925_v26 }
 0x4df   :  { %v3033_v55 = vadd.f32 %v2922_v24, %v2762_v46  ;;  %v15134_v15 = vpop.f32.mrf.mxu3  ;;  %v6828_v42 = vpop.f32.mrf.mxu2 }
 0x4e0   :  { %19921 = vst [vmem:[#allocation12_spill] sm:$0xff] %v15134_v15  ;;  %v15138_v23 = vadd.f32 %v6828_v42, %v6541_v2  ;;  %v3930_v15 = vpop.permute.xlu1 %3929  ;;  %v3935_v42 = vpop.permute.xlu2 %3934 }
 0x4e1   :  { %v3144_v39 = vmax.f32 %v3033_v55, 0.0  ;;  %v6544_v2 = vadd.f32 %v14723_v7, %v3930_v15  ;;  %v10182_v55 = vld [vmem:[%s19603_s4 + $0x6c8] sm:$0xf]  ;;  %v11293_v15 = vld [vmem:[%s19603_s4 + $0x6e0] sm:$0xf0] }
 0x4e2   :  { %v7079_v52 = vpop.f32.mrf.mxu0  ;;  %v2476_v40 = vpop.f32.mrf.mxu1 }
 0x4e3   :  { %v15141_v4 = vadd.f32 %v7079_v52, %v14725_v33  ;;  %v2477_v24 = vadd.f32 %v2476_v40, %v2189_v10  ;;  %v3659_v46 = vpack.c.bf16 %v3144_v39, %v3143_v38  ;;  %v19927_v33 = vld [vmem:[#allocation146_spill] sm:$0xff]  ;;  %v9960_v10 = vld [vmem:[%s19603_s4 + $0x524] sm:$0xf0]  ;;  %v11182_v38 = vld [vmem:[%s19603_s4 + $0x368] sm:$0xf0] }
 0x4e4   :  { %6622 = vmatmul.bf16.gmra.mxu3 %v10155_v3  ;;  %6870 = vmatmul.bf16.gmra.mxu2 %v9935_v59  ;;  %v2923_v40 = vld [vmem:[%s19602_s1 + $0x280] sm:$0xff]  ;;  %v9742_v3 = vld [vmem:[%s19603_s4 + $0x350] sm:$0xf]  ;;  %v6546_v59 = vadd.f32 %v14762_v18, %v3935_v42  ;;  %v11055_v39 = vld [vmem:[%s19600_s2 + $0x49c] sm:$0xf]  ;;  %v10183_v18 = vor.u32 %v11293_v15, %v10182_v55  ;;  %v3940_v42 = vpop.permute.xlu0 %3939 }
 0x4e5   :  { %19924 = vst [vmem:[#allocation5_spill] sm:$0xff] %v15141_v4  ;;  %7118 = vmatmul.bf16.gmra.mxu0 %v9715_v28  ;;  %2515 = vmatmul.bf16.gmra.mxu1 %v9179_v62  ;;  %v2765_v52 = vadd.f32 %v19927_v33, %v2477_v24  ;;  %v9188_v28 = vld [vmem:[%s19600_s2 + $0x4a4] sm:$0xf0]  ;;  %v9743_v61 = vor.u32 %v11182_v38, %v9742_v3  ;;  %v10210_v38 = vld [vmem:[%s19603_s4 + $0x700] sm:$0xf] }
 0x4e6   :  { %7616 = vmatpush.bf16.msra.mxu3 %v3659_v46  ;;  %v6549_v55 = vadd.f32 %v14773_v35, %v3940_v42  ;;  %v19934_v35 = vld [vmem:[#allocation93_spill] sm:$0xff] }
 0x4e7   :  { %v15144_v13 = vpop.f32.mrf.mxu3  ;;  %v6831_v22 = vpop.f32.mrf.mxu2  ;;  %v3034_v8 = vadd.f32 %v2923_v40, %v2765_v52 }
 0x4e8   :  { %v15146_v31 = vadd.f32 %v6831_v22, %v6544_v2 }
 0x4e9   :  { %v3145_v26 = vmax.f32 %v3034_v8, 0.0 }
 0x4ea   :  { %v7081_v36 = vpop.f32.mrf.mxu0  ;;  %7617 = vmatpush.bf16.msra.mxu3 %v3658_v48  ;;  %v2478_v62 = vpop.f32.mrf.mxu1  ;;  %v19929_v48 = vld [vmem:[#allocation147_spill] sm:$0xff] }
 0x4eb   :  { %v15155_v7 = vadd.f32 %v7081_v36, %v14766_v45  ;;  %v2479_v32 = vadd.f32 %v2478_v62, %v2191_v30  ;;  %v11234_v45 = vld [vmem:[%s19603_s4 + $0x50c] sm:$0xf]  ;;  %v9191_v30 = vor.u32 %v11055_v39, %v9188_v28  ;;  %v19931_v62 = vld [vmem:[#allocation92_spill] sm:$0xff]  ;;  %v11300_v39 = vld [vmem:[%s19603_s4 + $0x718] sm:$0xf0]  ;;  %v3945_v28 = vpop.permute.xlu1 %3944 }
 0x4ed   :  { %19928 = vst [vmem:[#allocation18_spill] sm:$0xff] %v15155_v7  ;;  %v2767_v50 = vadd.f32 %v19929_v48, %v2479_v32 }
 0x4ee   :  { %7618 = vmatpush.bf16.msra.mxu3 %v15037_v1  ;;  %v9963_v1 = vor.u32 %v11234_v45, %v9960_v10 }
 0x4ef   :  { %v3035_v24 = vadd.f32 %v2924_v5, %v2767_v50  ;;  %v15187_v46 = vpop.f32.mrf.mxu3  ;;  %v6833_v2 = vpop.f32.mrf.mxu2  ;;  %v2925_v50 = vld [vmem:[%s19602_s1 + $0x290] sm:$0xff] }
 0x4f0   :  { %v15189_v22 = vadd.f32 %v6833_v2, %v6546_v59  ;;  %v2926_v59 = vld [vmem:[%s19602_s1 + $0x298] sm:$0xff] }
 0x4f1   :  { %v3146_v33 = vmax.f32 %v3035_v24, 0.0  ;;  %v19935_v24 = vld [vmem:[#allocation149_spill] sm:$0xff] }
 0x4f2   :  { %v7084_v52 = vpop.f32.mrf.mxu0  ;;  %7619 = vmatpush.bf16.msra.mxu3 %v14983_v34  ;;  %v2481_v40 = vpop.f32.mrf.mxu1 }
 0x4f3   :  { %v15193_v36 = vadd.f32 %v7084_v52, %v14775_v12  ;;  %v2482_v32 = vadd.f32 %v2481_v40, %v19931_v62  ;;  %v15196_v5 = vpack.c.bf16 %v3146_v33, %v3145_v26  ;;  %v19932_v12 = vld [vmem:[#allocation148_spill] sm:$0xff]  ;;  %v6551_v26 = vadd.f32 %v14814_v57, %v3945_v28  ;;  %v9200_v33 = vld [vmem:[%s19600_s2 + $0x4bc] sm:$0xf0] }
 0x4f4   :  { %6627 = vmatmul.bf16.gmra.mxu3 %v10183_v18  ;;  %6875 = vmatmul.bf16.gmra.mxu2 %v9963_v1  ;;  %v9988_v18 = vld [vmem:[%s19603_s4 + $0x55c] sm:$0xf0]  ;;  %v9770_v1 = vld [vmem:[%s19603_s4 + $0x388] sm:$0xf]  ;;  %v10211_v57 = vor.u32 %v11300_v39, %v10210_v38 }
 0x4f5   :  { %19930 = vst [vmem:[#allocation8_spill] sm:$0xff] %v15193_v36  ;;  %7123 = vmatmul.bf16.gmra.mxu0 %v9743_v61  ;;  %2520 = vmatmul.bf16.gmra.mxu1 %v9191_v30  ;;  %v2770_v48 = vadd.f32 %v19932_v12, %v2482_v32  ;;  %v11189_v61 = vld [vmem:[%s19603_s4 + $0x3a0] sm:$0xf0]  ;;  %v11058_v30 = vld [vmem:[%s19600_s2 + $0x4b4] sm:$0xf] }
 0x4f6   :  { %7620 = vmatpush.bf16.msra.mxu3 %v14929_v17 }
 0x4f7   :  { %v15200_v15 = vpop.f32.mrf.mxu3  ;;  %v6836_v34 = vpop.f32.mrf.mxu2 }
 0x4f8   :  { %v15202_v8 = vadd.f32 %v6836_v34, %v6549_v55  ;;  %v9771_v55 = vor.u32 %v11189_v61, %v9770_v1  ;;  %v9203_v34 = vor.u32 %v11058_v30, %v9200_v33  ;;  %v2928_v30 = vld [vmem:[%s19602_s1 + $0x2a8] sm:$0xff]  ;;  %v10238_v33 = vld [vmem:[%s19603_s4 + $0x738] sm:$0xf] }
 0x4fa   :  { %v7086_v45 = vpop.f32.mrf.mxu0  ;;  %7621 = vmatpush.bf16.msra.mxu3 %v14876_v0  ;;  %v2483_v10 = vpop.f32.mrf.mxu1  ;;  %v3036_v0 = vadd.f32 %v2925_v50, %v2770_v48 }
 0x4fb   :  { %v15210_v3 = vadd.f32 %v7086_v45, %v14816_v19  ;;  %v2484_v17 = vadd.f32 %v2483_v10, %v19934_v35  ;;  %v11241_v19 = vld [vmem:[%s19603_s4 + $0x544] sm:$0xf] }
 0x4fc   :  { %v3147_v42 = vmax.f32 %v3036_v0, 0.0  ;;  %v19937_v10 = vld [vmem:[#allocation94_spill] sm:$0xff] }
 0x4fd   :  { %19933 = vst [vmem:[#allocation9_spill] sm:$0xff] %v15210_v3  ;;  %v2772_v2 = vadd.f32 %v19935_v24, %v2484_v17  ;;  %v19939_v24 = vld [vmem:[#allocation95_spill] sm:$0xff] }
 0x4fe   :  { %7622 = vmatpush.bf16.msra.mxu3 %v14823_v20  ;;  %v9991_v20 = vor.u32 %v11241_v19, %v9988_v18  ;;  %v2927_v18 = vld [vmem:[%s19602_s1 + $0x2a0] sm:$0xff] }
 0x4ff   :  { %v3037_v52 = vadd.f32 %v2926_v59, %v2772_v2  ;;  %v15243_v40 = vpop.f32.mrf.mxu3  ;;  %v6838_v62 = vpop.f32.mrf.mxu2  ;;  %v19940_v2 = vld [vmem:[#allocation150_spill] sm:$0xff] }
 0x500   :  { %v15245_v32 = vadd.f32 %v6838_v62, %v6551_v26  ;;  %v3950_v59 = vpop.permute.xlu2 %3949  ;;  %v3955_v62 = vpop.permute.xlu0 %3954 }
 0x501   :  { %v3148_v12 = vmax.f32 %v3037_v52, 0.0  ;;  %v6554_v38 = vadd.f32 %v14826_v6, %v3950_v59  ;;  %v11307_v52 = vld [vmem:[%s19603_s4 + $0x750] sm:$0xf0] }
 0x502   :  { %v7089_v48 = vpop.f32.mrf.mxu0  ;;  %7623 = vmatpush.bf16.msra.mxu3 %v14769_v49  ;;  %v2486_v50 = vpop.f32.mrf.mxu1  ;;  %v19938_v49 = vld [vmem:[#allocation168_spill] sm:$0xff] }
 0x503   :  { %v15249_v45 = vadd.f32 %v7089_v48, %v14828_v58  ;;  %v2487_v35 = vadd.f32 %v2486_v50, %v19937_v10  ;;  %v15252_v17 = vpack.c.bf16 %v3148_v12, %v3147_v42  ;;  %v2201_v58 = vadd.f32 %v19939_v24, %v19938_v49  ;;  %v11196_v48 = vld [vmem:[%s19603_s4 + $0x3d8] sm:$0xf0]  ;;  %v11061_v50 = vld [vmem:[%s19600_s2 + $0x4cc] sm:$0xf]  ;;  %v9212_v10 = vld [vmem:[%s19600_s2 + $0x4d4] sm:$0xf0] }
 0x504   :  { %6632 = vmatmul.bf16.gmra.mxu3 %v10211_v57  ;;  %6880 = vmatmul.bf16.gmra.mxu2 %v9991_v20  ;;  %v19942_v20 = vld [vmem:[#allocation152_spill] sm:$0xff]  ;;  %v6556_v12 = vadd.f32 %v14868_v63, %v3955_v62 }
 0x505   :  { %19936 = vst [vmem:[#allocation24_spill] sm:$0xff] %v15249_v45  ;;  %7128 = vmatmul.bf16.gmra.mxu0 %v9771_v55  ;;  %2525 = vmatmul.bf16.gmra.mxu1 %v9203_v34  ;;  %v2775_v19 = vadd.f32 %v19940_v2, %v2487_v35  ;;  %v10016_v55 = vld [vmem:[%s19603_s4 + $0x594] sm:$0xf0]  ;;  %v9798_v34 = vld [vmem:[%s19603_s4 + $0x3c0] sm:$0xf]  ;;  %v19944_v49 = vld [vmem:[#allocation96_spill] sm:$0xff] }
 0x507   :  { %v15255_v39 = vpop.f32.mrf.mxu3  ;;  %v6841_v28 = vpop.f32.mrf.mxu2  ;;  %v3038_v57 = vadd.f32 %v2927_v18, %v2775_v19  ;;  %v9799_v18 = vor.u32 %v11196_v48, %v9798_v34  ;;  %v19947_v34 = vld [vmem:[#allocation97_spill] sm:$0xff] }
 0x508   :  { %v15257_v0 = vadd.f32 %v6841_v28, %v6554_v38  ;;  %v19943_v28 = vld [vmem:[#allocation65_spill] sm:$0xff]  ;;  %v3970_v45 = vpop.permute.xlu0 %3969 }
 0x509   :  { %v2204_v24 = vadd.f32 %v19944_v49, %v19943_v28  ;;  %v3149_v19 = vmax.f32 %v3038_v57, 0.0  ;;  %v10266_v28 = vld [vmem:[%s19603_s4 + $0x770] sm:$0xf]  ;;  %v11314_v49 = vld [vmem:[%s19603_s4 + $0x788] sm:$0xf0] }
 0x50a   :  { %v7091_v1 = vpop.f32.mrf.mxu0  ;;  %v2488_v26 = vpop.f32.mrf.mxu1 }
 0x50b   :  { %v15266_v61 = vadd.f32 %v7091_v1, %v14870_v54  ;;  %v2489_v6 = vadd.f32 %v2488_v26, %v2201_v58  ;;  %v11248_v54 = vld [vmem:[%s19603_s4 + $0x57c] sm:$0xf]  ;;  %v10239_v58 = vor.u32 %v11307_v52, %v10238_v33  ;;  %v9215_v1 = vor.u32 %v11061_v50, %v9212_v10  ;;  %v2929_v50 = vld [vmem:[%s19602_s1 + $0x2b0] sm:$0xff] }
 0x50c   :  { %v10019_v2 = vor.u32 %v11248_v54, %v10016_v55  ;;  %v19946_v55 = vld [vmem:[#allocation78_spill] sm:$0xff] }
 0x50d   :  { %19941 = vst [vmem:[#allocation109_spill] sm:$0xff] %v15266_v61  ;;  %v2777_v42 = vadd.f32 %v19942_v20, %v2489_v6  ;;  %v3960_v61 = vpop.permute.xlu1 %3959 }
 0x50e   :  { %v6559_v33 = vadd.f32 %v14879_v27, %v3960_v61  ;;  %v2930_v61 = vld [vmem:[%s19602_s1 + $0x2b8] sm:$0xff] }
 0x50f   :  { %v3039_v35 = vadd.f32 %v2928_v30, %v2777_v42  ;;  %v15297_v59 = vpop.f32.mrf.mxu3  ;;  %v6843_v38 = vpop.f32.mrf.mxu2 }
 0x510   :  { %v15301_v63 = vadd.f32 %v6843_v38, %v6556_v12  ;;  %v2206_v12 = vadd.f32 %v19947_v34, %v19946_v55  ;;  %v19951_v34 = vld [vmem:[#allocation68_spill] sm:$0xff] }
 0x511   :  { %v3150_v26 = vmax.f32 %v3039_v35, 0.0 }
 0x512   :  { %v7094_v6 = vpop.f32.mrf.mxu0  ;;  %v2491_v62 = vpop.f32.mrf.mxu1 }
 0x513   :  { %v15304_v20 = vadd.f32 %v7094_v6, %v14881_v16  ;;  %v2492_v30 = vadd.f32 %v2491_v62, %v2204_v24  ;;  %v15306_v42 = vpack.c.bf16 %v3150_v26, %v3149_v19  ;;  %v19948_v16 = vld [vmem:[#allocation154_spill] sm:$0xff]  ;;  %v3965_v24 = vpop.permute.xlu2 %3964  ;;  %v11203_v6 = vld [vmem:[%s19603_s4 + $0x410] sm:$0xf0] }
 0x514   :  { %6637 = vmatmul.bf16.gmra.mxu3 %v10239_v58  ;;  %6885 = vmatmul.bf16.gmra.mxu2 %v10019_v2  ;;  %v19950_v2 = vld [vmem:[#allocation156_spill] sm:$0xff]  ;;  %v6561_v26 = vadd.f32 %v14920_v41, %v3965_v24  ;;  %v11064_v62 = vld [vmem:[%s19600_s2 + $0x4e4] sm:$0xf] }
 0x515   :  { %19945 = vst [vmem:[#allocation86_spill] sm:$0xff] %v15304_v20  ;;  %7133 = vmatmul.bf16.gmra.mxu0 %v9799_v18  ;;  %2530 = vmatmul.bf16.gmra.mxu1 %v9215_v1  ;;  %v2780_v48 = vadd.f32 %v19948_v16, %v2492_v30  ;;  %v10044_v18 = vld [vmem:[%s19603_s4 + $0x5cc] sm:$0xf0]  ;;  %v9826_v1 = vld [vmem:[%s19603_s4 + $0x3f8] sm:$0xf] }
 0x516   :  { %v9224_v30 = vld [vmem:[%s19600_s2 + $0x4ec] sm:$0xf0] }
 0x517   :  { %v15309_v52 = vpop.f32.mrf.mxu3  ;;  %v6846_v57 = vpop.f32.mrf.mxu2  ;;  %v3040_v58 = vadd.f32 %v2929_v50, %v2780_v48  ;;  %v10267_v48 = vor.u32 %v11314_v49, %v10266_v28  ;;  %v6564_v28 = vadd.f32 %v14932_v44, %v3970_v45  ;;  %v2932_v45 = vld [vmem:[%s19602_s1 + $0x2c8] sm:$0xff] }
 0x518   :  { %v15311_v54 = vadd.f32 %v6846_v57, %v6559_v33 }
 0x51a   :  { %v7096_v10 = vpop.f32.mrf.mxu0  ;;  %v2493_v35 = vpop.f32.mrf.mxu1 }
 0x51b   :  { %v15320_v38 = vadd.f32 %v7096_v10, %v14924_v14  ;;  %v2494_v27 = vadd.f32 %v2493_v35, %v2206_v12  ;;  %v11255_v14 = vld [vmem:[%s19603_s4 + $0x5b4] sm:$0xf]  ;;  %v19952_v12 = vld [vmem:[#allocation98_spill] sm:$0xff]  ;;  %v3151_v10 = vmax.f32 %v3040_v58, 0.0  ;;  %v9827_v35 = vor.u32 %v11203_v6, %v9826_v1  ;;  %v19955_v1 = vld [vmem:[#allocation99_spill] sm:$0xff] }
 0x51c   :  { %v2209_v16 = vadd.f32 %v19952_v12, %v19951_v34  ;;  %v10047_v50 = vor.u32 %v11255_v14, %v10044_v18  ;;  %v19954_v18 = vld [vmem:[#allocation67_spill] sm:$0xff]  ;;  %v11321_v34 = vld [vmem:[%s19603_s4 + $0x7c0] sm:$0xf0]  ;;  %v3975_v12 = vpop.permute.xlu1 %3974 }
 0x51d   :  { %19949 = vst [vmem:[#allocation88_spill] sm:$0xff] %v15320_v38  ;;  %v2782_v19 = vadd.f32 %v19950_v2, %v2494_v27  ;;  %v9227_v27 = vor.u32 %v11064_v62, %v9224_v30 }
 0x51f   :  { %v3041_v33 = vadd.f32 %v2930_v61, %v2782_v19  ;;  %v15351_v57 = vpop.f32.mrf.mxu3  ;;  %v6848_v55 = vpop.f32.mrf.mxu2 }
 0x520   :  { %v15355_v41 = vadd.f32 %v6848_v55, %v6561_v26  ;;  %v2211_v26 = vadd.f32 %v19955_v1, %v19954_v18  ;;  %v10294_v55 = vld [vmem:[%s19603_s4 + $0x7a8] sm:$0xf] }
 0x521   :  { %v3152_v24 = vmax.f32 %v3041_v33, 0.0 }
 0x522   :  { %v7099_v2 = vpop.f32.mrf.mxu0  ;;  %v2496_v38 = vpop.f32.mrf.mxu1 }
 0x523   :  { %v15358_v20 = vadd.f32 %v7099_v2, %v14934_v56  ;;  %v2497_v61 = vadd.f32 %v2496_v38, %v2209_v16  ;;  %v15360_v19 = vpack.c.bf16 %v3152_v24, %v3151_v10  ;;  %v19956_v56 = vld [vmem:[#allocation158_spill] sm:$0xff]  ;;  %v10072_v10 = vld [vmem:[%s19603_s4 + $0x604] sm:$0xf0]  ;;  %v11210_v24 = vld [vmem:[%s19603_s4 + $0x448] sm:$0xf0] }
 0x524   :  { %6642 = vmatmul.bf16.gmra.mxu3 %v10267_v48  ;;  %6890 = vmatmul.bf16.gmra.mxu2 %v10047_v50  ;;  %v2931_v38 = vld [vmem:[%s19602_s1 + $0x2c0] sm:$0xff]  ;;  %v19958_v48 = vld [vmem:[#allocation159_spill] sm:$0xff]  ;;  %v11067_v2 = vld [vmem:[%s19600_s2 + $0x4fc] sm:$0xf] }
 0x525   :  { %19953 = vst [vmem:[#allocation79_spill] sm:$0xff] %v15358_v20  ;;  %7138 = vmatmul.bf16.gmra.mxu0 %v9827_v35  ;;  %2535 = vmatmul.bf16.gmra.mxu1 %v9227_v27  ;;  %v2785_v6 = vadd.f32 %v19956_v56, %v2497_v61  ;;  %v9854_v35 = vld [vmem:[%s19603_s4 + $0x430] sm:$0xf]  ;;  %v6566_v27 = vadd.f32 %v14974_v25, %v3975_v12  ;;  %v9236_v61 = vld [vmem:[%s19600_s2 + $0x504] sm:$0xf0] }
 0x526   :  { %v19959_v12 = vld [vmem:[#allocation56_spill] sm:$0xff] }
 0x527   :  { %v15363_v49 = vpop.f32.mrf.mxu3  ;;  %v6851_v58 = vpop.f32.mrf.mxu2  ;;  %v3042_v16 = vadd.f32 %v2931_v38, %v2785_v6  ;;  %v9855_v6 = vor.u32 %v11210_v24, %v9854_v35  ;;  %v9239_v38 = vor.u32 %v11067_v2, %v9236_v61  ;;  %v19963_v35 = vld [vmem:[#allocation102_spill] sm:$0xff]  ;;  %v2933_v61 = vld [vmem:[%s19602_s1 + $0x2d0] sm:$0xff] }
 0x528   :  { %v15365_v14 = vadd.f32 %v6851_v58, %v6564_v28 }
 0x529   :  { %v3153_v56 = vmax.f32 %v3042_v16, 0.0 }
 0x52a   :  { %v7101_v62 = vpop.f32.mrf.mxu0  ;;  %v2498_v30 = vpop.f32.mrf.mxu1 }
 0x52b   :  { %v15374_v33 = vadd.f32 %v7101_v62, %v14976_v51  ;;  %v2499_v44 = vadd.f32 %v2498_v30, %v2211_v26  ;;  %v11262_v51 = vld [vmem:[%s19603_s4 + $0x5ec] sm:$0xf]  ;;  %v10295_v26 = vor.u32 %v11321_v34, %v10294_v55 }
 0x52c   :  { %v10075_v25 = vor.u32 %v11262_v51, %v10072_v10  ;;  %v19962_v10 = vld [vmem:[#allocation48_spill] sm:$0xff] }
 0x52d   :  { %19957 = vst [vmem:[#allocation14_spill] sm:$0xff] %v15374_v33  ;;  %v2787_v50 = vadd.f32 %v19958_v48, %v2499_v44  ;;  %v19960_v48 = vld [vmem:[#allocation100_spill] sm:$0xff]  ;;  %v2216_v24 = vadd.f32 %v19963_v35, %v19962_v10 }
 0x52e   :  { %v2214_v33 = vadd.f32 %v19960_v48, %v19959_v12  ;;  %v9882_v12 = vld [vmem:[%s19603_s4 + $0x468] sm:$0xf] }
 0x52f   :  { %v3043_v28 = vadd.f32 %v2932_v45, %v2787_v50  ;;  %v15405_v58 = vpop.f32.mrf.mxu3  ;;  %v6853_v18 = vpop.f32.mrf.mxu2 }
 0x530   :  { %v15407_v1 = vadd.f32 %v6853_v18, %v6566_v27  ;;  %v3980_v50 = vpop.permute.xlu2 %3979 }
 0x531   :  { %v3154_v62 = vmax.f32 %v3043_v28, 0.0  ;;  %v6569_v55 = vadd.f32 %v14986_v53, %v3980_v50  ;;  %v11217_v50 = vld [vmem:[%s19603_s4 + $0x480] sm:$0xf0] }
 0x532   :  { %v7104_v30 = vpop.f32.mrf.mxu0  ;;  %v2501_v44 = vpop.f32.mrf.mxu1 }
 0x533   :  { %v15412_v20 = vadd.f32 %v7104_v30, %v14988_v11  ;;  %v15414_v45 = vpack.c.bf16 %v3154_v62, %v3153_v56  ;;  %v2502_v27 = vadd.f32 %v2501_v44, %v2214_v33  ;;  %v19964_v11 = vld [vmem:[#allocation161_spill] sm:$0xff]  ;;  %v19966_v62 = vld [vmem:[#allocation163_spill] sm:$0xff]  ;;  %v10100_v44 = vld [vmem:[%s19603_s4 + $0x63c] sm:$0xf0] }
 0x534   :  { %6647 = vmatmul.bf16.gmra.mxu3 %v10295_v26  ;;  %6895 = vmatmul.bf16.gmra.mxu2 %v10075_v25  ;;  %v2934_v26 = vld [vmem:[%s19602_s1 + $0x2d8] sm:$0xff]  ;;  %v10322_v25 = vld [vmem:[%s19603_s4 + $0x7e0] sm:$0xf] }
 0x535   :  { %19961 = vst [vmem:[#allocation69_spill] sm:$0xff] %v15412_v20  ;;  %7143 = vmatmul.bf16.gmra.mxu0 %v9855_v6  ;;  %2540 = vmatmul.bf16.gmra.mxu1 %v9239_v38  ;;  %v2790_v2 = vadd.f32 %v19964_v11, %v2502_v27  ;;  %v11328_v56 = vld [vmem:[%s19603_s4 + $0x7f8] sm:$0xf0]  ;;  %v3985_v6 = vpop.permute.xlu0 %3984  ;;  %v11070_v27 = vld [vmem:[%s19600_s2 + $0x514] sm:$0xf] }
 0x536   :  { %v6571_v48 = vadd.f32 %v15028_v43, %v3985_v6  ;;  %v10323_v11 = vor.u32 %v11328_v56, %v10322_v25 }
 0x537   :  { %v15417_v34 = vpop.f32.mrf.mxu3  ;;  %v6856_v16 = vpop.f32.mrf.mxu2  ;;  %v3044_v38 = vadd.f32 %v2933_v61, %v2790_v2  ;;  %v9883_v61 = vor.u32 %v11217_v50, %v9882_v12 }
 0x538   :  { %v15419_v51 = vadd.f32 %v6856_v16, %v6569_v55  ;;  %v9248_v55 = vld [vmem:[%s19600_s2 + $0x51c] sm:$0xf0] }
 0x539   :  { %v3155_v2 = vmax.f32 %v3044_v38, 0.0 }
 0x53a   :  { %v7106_v28 = vpop.f32.mrf.mxu0  ;;  %v2503_v33 = vpop.f32.mrf.mxu1 }
 0x53b   :  { %v15428_v18 = vadd.f32 %v7106_v28, %v15030_v21  ;;  %v2504_v53 = vadd.f32 %v2503_v33, %v2216_v24  ;;  %v11269_v21 = vld [vmem:[%s19603_s4 + $0x624] sm:$0xf]  ;;  %v9251_v28 = vor.u32 %v11070_v27, %v9248_v55 }
 0x53c   :  { %v10103_v43 = vor.u32 %v11269_v21, %v10100_v44  ;;  %v19970_v44 = vld [vmem:[#allocation49_spill] sm:$0xff]  ;;  %v2935_v27 = vld [vmem:[%s19602_s1 + $0x2e0] sm:$0xff] }
 0x53d   :  { %19965 = vst [vmem:[#allocation17_spill] sm:$0xff] %v15428_v18  ;;  %v2792_v30 = vadd.f32 %v19966_v62, %v2504_v53  ;;  %v19967_v62 = vld [vmem:[#allocation50_spill] sm:$0xff]  ;;  %v19968_v18 = vld [vmem:[#allocation104_spill] sm:$0xff] }
 0x53e   :  { %v2219_v20 = vadd.f32 %v19968_v18, %v19967_v62  ;;  %v19971_v18 = vld [vmem:[#allocation106_spill] sm:$0xff] }
 0x53f   :  { %v3045_v16 = vadd.f32 %v2934_v26, %v2792_v30  ;;  %v15459_v10 = vpop.f32.mrf.mxu3  ;;  %v6858_v35 = vpop.f32.mrf.mxu2  ;;  %v2221_v12 = vadd.f32 %v19971_v18, %v19970_v44 }
 0x540   :  { %v15461_v24 = vadd.f32 %v6858_v35, %v6571_v48  ;;  %v3990_v30 = vpop.permute.xlu1 %3989  ;;  %v2936_v35 = vld [vmem:[%s19602_s1 + $0x2e8] sm:$0xff] }
 0x541   :  { %v3156_v33 = vmax.f32 %v3045_v16, 0.0  ;;  %v6574_v25 = vadd.f32 %v15040_v9, %v3990_v30 }
 0x542   :  { %v7109_v53 = vpop.f32.mrf.mxu0  ;;  %v2506_v6 = vpop.f32.mrf.mxu1 }
 0x543   :  { %v15466_v3 = vadd.f32 %v7109_v53, %v15042_v47  ;;  %v15468_v26 = vpack.c.bf16 %v3156_v33, %v3155_v2  ;;  %v2507_v48 = vadd.f32 %v2506_v6, %v2219_v20  ;;  %v19972_v47 = vld [vmem:[#allocation166_spill] sm:$0xff]  ;;  %v11335_v33 = vld [vmem:[%s19603_s4 + $0x830] sm:$0xf0]  ;;  %v10128_v53 = vld [vmem:[%s19603_s4 + $0x674] sm:$0xf0] }
 0x544   :  { %6652 = vmatmul.bf16.gmra.mxu3 %v10323_v11  ;;  %6900 = vmatmul.bf16.gmra.mxu2 %v10103_v43  ;;  %v10350_v11 = vld [vmem:[%s19603_s4 + $0x818] sm:$0xf]  ;;  %v3995_v43 = vpop.permute.xlu2 %3994  ;;  %v11475_v6 = vld [vmem:[%s19600_s2 + $0x528] sm:$0xff] }
 0x545   :  { %19969 = vst [vmem:[#allocation40_spill] sm:$0xff] %v15466_v3  ;;  %7148 = vmatmul.bf16.gmra.mxu0 %v9883_v61  ;;  %2545 = vmatmul.bf16.gmra.mxu1 %v9251_v28  ;;  %v2795_v50 = vadd.f32 %v19972_v47, %v2507_v48  ;;  %v19974_v61 = vld [vmem:[#allocation169_spill] sm:$0xff]  ;;  %v1528_v62 = vunpack.c.h.b16 %v11475_v6  ;;  %v6576_v30 = vadd.f32 %v15082_v29, %v3995_v43  ;;  %v9910_v48 = vld [vmem:[%s19603_s4 + $0x4a0] sm:$0xf]  ;;  %v19976_v6 = vld [vmem:[#allocation108_spill] sm:$0xff] }
 0x546   :  { %v10351_v47 = vor.u32 %v11335_v33, %v10350_v11  ;;  %v19978_v11 = vld [vmem:[#allocation13_spill] sm:$0xff] }
 0x547   :  { %v15471_v56 = vpop.f32.mrf.mxu3  ;;  %v6861_v38 = vpop.f32.mrf.mxu2  ;;  %v3046_v2 = vadd.f32 %v2935_v27, %v2795_v50 }
 0x548   :  { %v15473_v21 = vadd.f32 %v6861_v38, %v6574_v25  ;;  %v11224_v25 = vld [vmem:[%s19603_s4 + $0x4b8] sm:$0xf0] }
 0x549   :  { %v3157_v27 = vmax.f32 %v3046_v2, 0.0 }
 0x54a   :  { %v7111_v55 = vpop.f32.mrf.mxu0  ;;  %v2508_v20 = vpop.f32.mrf.mxu1 }
 0x54b   :  { %v15482_v16 = vadd.f32 %v7111_v55, %v15084_v37  ;;  %v2509_v9 = vadd.f32 %v2508_v20, %v2221_v12  ;;  %v11276_v37 = vld [vmem:[%s19603_s4 + $0x65c] sm:$0xf]  ;;  %v9911_v55 = vor.u32 %v11224_v25, %v9910_v48  ;;  %v1696_v20 = vpack.c.b16 %v1528_v62, %v1528_v62  ;;  %v19980_v62 = vld [vmem:[#allocation47_spill] sm:$0xff] }
 0x54c   :  { %v10131_v50 = vor.u32 %v11276_v37, %v10128_v53  ;;  %v19981_v48 = vld [vmem:[#allocation111_spill] sm:$0xff] }
 0x54d   :  { %19973 = vst [vmem:[#allocation30_spill] sm:$0xff] %v15482_v16  ;;  %v2797_v28 = vadd.f32 %v19974_v61, %v2509_v9  ;;  %v19975_v61 = vld [vmem:[#allocation34_spill] sm:$0xff]  ;;  %v2226_v25 = vadd.f32 %v19981_v48, %v19980_v62  ;;  %v11074_v62 = vld [vmem:[%s19603_s4 + $0xc] sm:$0xf]  ;;  %v9324_v48 = vld [vmem:[%s19603_s4 + $0x24] sm:$0xf0] }
 0x54e   :  { %v2224_v16 = vadd.f32 %v19976_v6, %v19975_v61  ;;  %v19984_v61 = vld [vmem:[#allocation171_spill] sm:$0xff]  ;;  %v9327_v36 = vor.u32 %v11074_v62, %v9324_v48  ;;  %v11349_v48 = vld [vmem:[%s19603_s4 + $0x8a0] sm:$0xf0] }
 0x54f   :  { %v3047_v38 = vadd.f32 %v2936_v35, %v2797_v28  ;;  %v15510_v44 = vpop.f32.mrf.mxu3  ;;  %v6863_v18 = vpop.f32.mrf.mxu2  ;;  %v10406_v62 = vld [vmem:[%s19603_s4 + $0x888] sm:$0xf] }
 0x550   :  { %v15512_v12 = vadd.f32 %v6863_v18, %v6576_v30  ;;  %v4000_v28 = vpop.permute.xlu0 %3999  ;;  %v2937_v18 = vld [vmem:[%s19602_s1 + $0x2f0] sm:$0xff] }
 0x551   :  { %v3158_v29 = vmax.f32 %v3047_v38, 0.0  ;;  %v6579_v2 = vadd.f32 %v19978_v11, %v4000_v28  ;;  %v19982_v38 = vld [vmem:[#allocation170_spill] sm:$0xff]  ;;  %v10156_v28 = vld [vmem:[%s19603_s4 + $0x6ac] sm:$0xf0] }
 0x552   :  { %v7114_v9 = vpop.f32.mrf.mxu0  ;;  %v2511_v43 = vpop.f32.mrf.mxu1  ;;  %v19985_v11 = vld [vmem:[#allocation12_spill] sm:$0xff] }
 0x553   :  { %v15517_v3 = vadd.f32 %v7114_v9, %v15094_v60  ;;  %v3666_v35 = vpack.c.bf16 %v3158_v29, %v3157_v27  ;;  %v2512_v30 = vadd.f32 %v2511_v43, %v2224_v16  ;;  %v11342_v29 = vld [vmem:[%s19603_s4 + $0x868] sm:$0xf0]  ;;  %v4005_v9 = vpop.permute.xlu1 %4004 }
 0x554   :  { %6657 = vmatmul.bf16.gmra.mxu3 %v10351_v47  ;;  %6905 = vmatmul.bf16.gmra.mxu2 %v10131_v50 }
 0x555   :  { %19977 = vst [vmem:[#allocation59_spill] sm:$0xff] %v15517_v3  ;;  %7153 = vmatmul.bf16.gmra.mxu0 %v9911_v55  ;;  %2550 = vmatmul.bf16.gmra.mxu1 %v1696_v20  ;;  %v2800_v60 = vadd.f32 %v19982_v38, %v2512_v30  ;;  %v2938_v55 = vld [vmem:[%s19602_s1 + $0x2f8] sm:$0xff]  ;;  %v10378_v20 = vld [vmem:[%s19603_s4 + $0x850] sm:$0xf] }
 0x556   :  { %v9938_v30 = vld [vmem:[%s19603_s4 + $0x4d8] sm:$0xf] }
 0x557   :  { %v15520_v33 = vpop.f32.mrf.mxu3  ;;  %v6866_v37 = vpop.f32.mrf.mxu2  ;;  %v3048_v43 = vadd.f32 %v2937_v18, %v2800_v60  ;;  %v19987_v18 = vld [vmem:[#allocation157_spill] sm:$0xff] }
 0x558   :  { %19979 = vst [vmem:[#allocation27_spill] sm:$0xff] %v15520_v33  ;;  %v15522_v53 = vadd.f32 %v6866_v37, %v6579_v2  ;;  %v6581_v2 = vadd.f32 %v19985_v11, %v4005_v9  ;;  %v11231_v37 = vld [vmem:[%s19603_s4 + $0x4f0] sm:$0xf0]  ;;  %v10379_v9 = vor.u32 %v11342_v29, %v10378_v20 }
 0x559   :  { %v3159_v11 = vmax.f32 %v3048_v43, 0.0  ;;  %v9939_v3 = vor.u32 %v11231_v37, %v9938_v30  ;;  %v2940_v37 = vld [vmem:[%s19602_s1 + $0x308] sm:$0xff] }
 0x55a   :  { %v7116_v47 = vpop.f32.mrf.mxu0  ;;  %v2513_v16 = vpop.f32.mrf.mxu1 }
 0x55b   :  { %v15531_v50 = vadd.f32 %v7116_v47, %v15138_v23  ;;  %v2514_v27 = vadd.f32 %v2513_v16, %v2226_v25  ;;  %v11283_v23 = vld [vmem:[%s19603_s4 + $0x694] sm:$0xf]  ;;  %v19988_v47 = vld [vmem:[#allocation114_spill] sm:$0xff] }
 0x55c   :  { %v2229_v16 = vadd.f32 %v19988_v47, %v19987_v18  ;;  %v10184_v18 = vld [vmem:[%s19603_s4 + $0x6e4] sm:$0xf0]  ;;  %v9966_v47 = vld [vmem:[%s19603_s4 + $0x510] sm:$0xf] }
 0x55d   :  { %19983 = vst [vmem:[#allocation60_spill] sm:$0xff] %v15531_v50  ;;  %v2802_v6 = vadd.f32 %v19984_v61, %v2514_v27  ;;  %v10159_v61 = vor.u32 %v11283_v23, %v10156_v28  ;;  %v19989_v23 = vld [vmem:[#allocation10_spill] sm:$0xff]  ;;  %v19990_v28 = vld [vmem:[#allocation117_spill] sm:$0xff] }
 0x55e   :  { %v2231_v30 = vadd.f32 %v19990_v28, %v19989_v23 }
 0x55f   :  { %v3049_v25 = vadd.f32 %v2938_v55, %v2802_v6  ;;  %v15562_v38 = vpop.f32.mrf.mxu3  ;;  %v6868_v60 = vpop.f32.mrf.mxu2 }
 0x560   :  { %19986 = vst [vmem:[#allocation26_spill] sm:$0xff] %v15562_v38  ;;  %v15566_v27 = vadd.f32 %v6868_v60, %v6581_v2  ;;  %v4010_v38 = vpop.permute.xlu2 %4009 }
 0x561   :  { %v3160_v50 = vmax.f32 %v3049_v25, 0.0  ;;  %v6584_v2 = vadd.f32 %v15144_v13, %v4010_v38  ;;  %v4015_v25 = vpop.permute.xlu0 %4014 }
 0x562   :  { %v7119_v7 = vpop.f32.mrf.mxu0  ;;  %v2516_v4 = vpop.f32.mrf.mxu1 }
 0x563   :  { %v15569_v33 = vadd.f32 %v7119_v7, %v15146_v31  ;;  %v2517_v55 = vadd.f32 %v2516_v4, %v2229_v16  ;;  %v3667_v6 = vpack.c.bf16 %v3160_v50, %v3159_v11  ;;  %v19991_v31 = vld [vmem:[#allocation172_spill] sm:$0xff]  ;;  %v2939_v4 = vld [vmem:[%s19602_s1 + $0x300] sm:$0xff]  ;;  %v6586_v16 = vadd.f32 %v15187_v46, %v4015_v25  ;;  %v4020_v25 = vpop.permute.xlu1 %4019 }
 0x564   :  { %6662 = vmatmul.bf16.gmra.mxu3 %v10379_v9  ;;  %6910 = vmatmul.bf16.gmra.mxu2 %v10159_v61  ;;  %v11238_v9 = vld [vmem:[%s19603_s4 + $0x528] sm:$0xf0]  ;;  %v11081_v61 = vld [vmem:[%s19603_s4 + $0x44] sm:$0xf]  ;;  %v9352_v11 = vld [vmem:[%s19603_s4 + $0x5c] sm:$0xf0]  ;;  %v10407_v46 = vor.u32 %v11349_v48, %v10406_v62  ;;  %v6589_v62 = vadd.f32 %v15200_v15, %v4020_v25 }
 0x565   :  { %7158 = vmatmul.bf16.gmra.mxu0 %v9939_v3  ;;  %7336 = vmatmul.bf16.vlgmr.msra.gmra.mxu1 %v9327_v36  ;;  %v2805_v7 = vadd.f32 %v19991_v31, %v2517_v55  ;;  %v9967_v28 = vor.u32 %v11238_v9, %v9966_v47  ;;  %v2941_v47 = vld [vmem:[%s19602_s1 + $0x310] sm:$0xff] }
 0x566   :  { %7904 = vmatpush.bf16.msra.mxu2 %v3667_v6 }
 0x567   :  { %v15572_v20 = vpop.f32.mrf.mxu3  ;;  %v6871_v29 = vpop.f32.mrf.mxu2  ;;  %v3050_v38 = vadd.f32 %v2939_v4, %v2805_v7 }
 0x568   :  { %v15574_v43 = vadd.f32 %v6871_v29, %v6584_v2 }
 0x569   :  { %v3161_v23 = vmax.f32 %v3050_v38, 0.0 }
 0x56a   :  { %v7121_v50 = vpop.f32.mrf.mxu0  ;;  %7905 = vmatpush.bf16.msra.mxu2 %v3666_v35  ;;  %v2518_v36 = vpop.f32.mrf.mxu1  ;;  %v19993_v35 = vld [vmem:[#allocation173_spill] sm:$0xff] }
 0x56b   :  { %v15583_v13 = vadd.f32 %v7121_v50, %v15189_v22  ;;  %v2519_v3 = vadd.f32 %v2518_v36, %v2231_v30  ;;  %v11290_v22 = vld [vmem:[%s19603_s4 + $0x6cc] sm:$0xf]  ;;  %v9355_v30 = vor.u32 %v11081_v61, %v9352_v11  ;;  %v2942_v61 = vld [vmem:[%s19602_s1 + $0x318] sm:$0xff]  ;;  %v10434_v11 = vld [vmem:[%s19603_s4 + $0x8c0] sm:$0xf] }
 0x56c   :  { %v19995_v36 = vld [vmem:[#allocation119_spill] sm:$0xff] }
 0x56d   :  { %19992 = vst [vmem:[#allocation54_spill] sm:$0xff] %v15583_v13  ;;  %v2807_v60 = vadd.f32 %v19993_v35, %v2519_v3  ;;  %v19997_v35 = vld [vmem:[#allocation121_spill] sm:$0xff]  ;;  %v2953_v13 = vld [vmem:[%s19602_s1 + $0x370] sm:$0xff] }
 0x56e   :  { %7906 = vmatpush.bf16.msra.mxu2 %v15468_v26  ;;  %v10187_v26 = vor.u32 %v11290_v22, %v10184_v18  ;;  %v19998_v22 = vld [vmem:[#allocation174_spill] sm:$0xff] }
 0x56f   :  { %v3051_v55 = vadd.f32 %v2940_v37, %v2807_v60  ;;  %v15615_v6 = vpop.f32.mrf.mxu3  ;;  %v6873_v2 = vpop.f32.mrf.mxu2 }
 0x570   :  { %v15617_v29 = vadd.f32 %v6873_v2, %v6586_v16  ;;  %v4025_v2 = vpop.permute.xlu2 %4024 }
 0x571   :  { %v3162_v31 = vmax.f32 %v3051_v55, 0.0  ;;  %v11356_v55 = vld [vmem:[%s19603_s4 + $0x8d8] sm:$0xf0] }
 0x572   :  { %v7124_v7 = vpop.f32.mrf.mxu0  ;;  %7907 = vmatpush.bf16.msra.mxu2 %v15414_v45  ;;  %v2521_v4 = vpop.f32.mrf.mxu1 }
 0x573   :  { %v15621_v50 = vadd.f32 %v7124_v7, %v15202_v8  ;;  %v2522_v3 = vadd.f32 %v2521_v4, %v19995_v36  ;;  %v15624_v37 = vpack.c.bf16 %v3162_v31, %v3161_v23  ;;  %v19996_v8 = vld [vmem:[#allocation11_spill] sm:$0xff]  ;;  %v10212_v23 = vld [vmem:[%s19603_s4 + $0x71c] sm:$0xf0]  ;;  %v11245_v31 = vld [vmem:[%s19603_s4 + $0x560] sm:$0xf0] }
 0x574   :  { %6667 = vmatmul.bf16.gmra.mxu3 %v10407_v46  ;;  %6915 = vmatmul.bf16.gmra.mxu2 %v10187_v26  ;;  %v2236_v60 = vadd.f32 %v19997_v35, %v19996_v8  ;;  %v11088_v7 = vld [vmem:[%s19603_s4 + $0x7c] sm:$0xf]  ;;  %v9380_v4 = vld [vmem:[%s19603_s4 + $0x94] sm:$0xf0]  ;;  %v10435_v8 = vor.u32 %v11356_v55, %v10434_v11 }
 0x575   :  { %19994 = vst [vmem:[#allocation32_spill] sm:$0xff] %v15621_v50  ;;  %7163 = vmatmul.bf16.gmra.mxu0 %v9967_v28  ;;  %7341 = vmatmul.bf16.gmra.mxu1 %v9355_v30  ;;  %v2810_v18 = vadd.f32 %v19998_v22, %v2522_v3  ;;  %v9994_v28 = vld [vmem:[%s19603_s4 + $0x548] sm:$0xf]  ;;  %v6591_v30 = vadd.f32 %v15243_v40, %v4025_v2 }
 0x576   :  { %7908 = vmatpush.bf16.msra.mxu2 %v15360_v19  ;;  %v20002_v40 = vld [vmem:[#allocation123_spill] sm:$0xff]  ;;  %v9995_v22 = vor.u32 %v11245_v31, %v9994_v28 }
 0x577   :  { %v15628_v48 = vpop.f32.mrf.mxu3  ;;  %v6876_v45 = vpop.f32.mrf.mxu2  ;;  %v3052_v46 = vadd.f32 %v2941_v47, %v2810_v18  ;;  %v9383_v18 = vor.u32 %v11088_v7, %v9380_v4 }
 0x578   :  { %v15630_v38 = vadd.f32 %v6876_v45, %v6589_v62  ;;  %v20001_v62 = vld [vmem:[#allocation164_spill] sm:$0xff] }
 0x579   :  { %v2239_v45 = vadd.f32 %v20002_v40, %v20001_v62  ;;  %v11363_v62 = vld [vmem:[%s19603_s4 + $0x910] sm:$0xf0]  ;;  %v4035_v40 = vpop.permute.xlu1 %4034 }
 0x57a   :  { %v7126_v16 = vpop.f32.mrf.mxu0  ;;  %7909 = vmatpush.bf16.msra.mxu2 %v15306_v42  ;;  %v2523_v15 = vpop.f32.mrf.mxu1  ;;  %v20000_v42 = vld [vmem:[#allocation175_spill] sm:$0xff] }
 0x57b   :  { %v15640_v19 = vadd.f32 %v7126_v16, %v15245_v32  ;;  %v2524_v9 = vadd.f32 %v2523_v15, %v2236_v60  ;;  %v11297_v32 = vld [vmem:[%s19603_s4 + $0x704] sm:$0xf]  ;;  %v3163_v60 = vmax.f32 %v3052_v46, 0.0 }
 0x57c   :  { %v10215_v35 = vor.u32 %v11297_v32, %v10212_v23  ;;  %v20005_v32 = vld [vmem:[#allocation125_spill] sm:$0xff] }
 0x57d   :  { %19999 = vst [vmem:[#allocation72_spill] sm:$0xff] %v15640_v19  ;;  %v2812_v26 = vadd.f32 %v20000_v42, %v2524_v9  ;;  %v4030_v42 = vpop.permute.xlu0 %4029 }
 0x57e   :  { %7910 = vmatpush.bf16.msra.mxu2 %v15252_v17  ;;  %v6594_v11 = vadd.f32 %v15255_v39, %v4030_v42 }
 0x57f   :  { %v3053_v36 = vadd.f32 %v2942_v61, %v2812_v26  ;;  %v15672_v3 = vpop.f32.mrf.mxu3  ;;  %v6878_v25 = vpop.f32.mrf.mxu2 }
 0x580   :  { %v15676_v17 = vadd.f32 %v6878_v25, %v6591_v30  ;;  %v2943_v30 = vld [vmem:[%s19602_s1 + $0x320] sm:$0xff]  ;;  %v10462_v25 = vld [vmem:[%s19603_s4 + $0x8f8] sm:$0xf] }
 0x581   :  { %v3164_v47 = vmax.f32 %v3053_v36, 0.0  ;;  %v2944_v36 = vld [vmem:[%s19602_s1 + $0x328] sm:$0xff] }
 0x582   :  { %v7129_v16 = vpop.f32.mrf.mxu0  ;;  %7911 = vmatpush.bf16.msra.mxu2 %v15196_v5  ;;  %v2526_v15 = vpop.f32.mrf.mxu1  ;;  %v20004_v5 = vld [vmem:[#allocation162_spill] sm:$0xff] }
 0x583   :  { %v15680_v9 = vadd.f32 %v7129_v16, %v15257_v0  ;;  %v2527_v61 = vadd.f32 %v2526_v15, %v2239_v45  ;;  %v15682_v2 = vpack.c.bf16 %v3164_v47, %v3163_v60  ;;  %v2241_v23 = vadd.f32 %v20005_v32, %v20004_v5  ;;  %v20006_v0 = vld [vmem:[#allocation176_spill] sm:$0xff]  ;;  %v10240_v60 = vld [vmem:[%s19603_s4 + $0x754] sm:$0xf0]  ;;  %v11252_v47 = vld [vmem:[%s19603_s4 + $0x598] sm:$0xf0] }
 0x584   :  { %6672 = vmatmul.bf16.gmra.mxu3 %v10435_v8  ;;  %6920 = vmatmul.bf16.gmra.mxu2 %v10215_v35  ;;  %v20008_v8 = vld [vmem:[#allocation177_spill] sm:$0xff]  ;;  %v11095_v16 = vld [vmem:[%s19603_s4 + $0xb4] sm:$0xf]  ;;  %v9408_v15 = vld [vmem:[%s19603_s4 + $0xcc] sm:$0xf0] }
 0x585   :  { %20003 = vst [vmem:[#allocation23_spill] sm:$0xff] %v15680_v9  ;;  %7168 = vmatmul.bf16.gmra.mxu0 %v9995_v22  ;;  %7346 = vmatmul.bf16.gmra.mxu1 %v9383_v18  ;;  %v2815_v28 = vadd.f32 %v20006_v0, %v2527_v61  ;;  %v10022_v22 = vld [vmem:[%s19603_s4 + $0x580] sm:$0xf]  ;;  %v6596_v18 = vadd.f32 %v15297_v59, %v4035_v40  ;;  %v20010_v5 = vld [vmem:[#allocation127_spill] sm:$0xff] }
 0x587   :  { %v15685_v55 = vpop.f32.mrf.mxu3  ;;  %v6881_v46 = vpop.f32.mrf.mxu2  ;;  %v3054_v45 = vadd.f32 %v2943_v30, %v2815_v28  ;;  %v10023_v30 = vor.u32 %v11252_v47, %v10022_v22  ;;  %v20013_v22 = vld [vmem:[#allocation129_spill] sm:$0xff] }
 0x588   :  { %v15687_v26 = vadd.f32 %v6881_v46, %v6594_v11  ;;  %v20009_v46 = vld [vmem:[#allocation7_spill] sm:$0xff] }
 0x589   :  { %v2244_v32 = vadd.f32 %v20010_v5, %v20009_v46  ;;  %v3165_v28 = vmax.f32 %v3054_v45, 0.0  ;;  %v10490_v46 = vld [vmem:[%s19603_s4 + $0x930] sm:$0xf]  ;;  %v11370_v5 = vld [vmem:[%s19603_s4 + $0x948] sm:$0xf0] }
 0x58a   :  { %v7131_v31 = vpop.f32.mrf.mxu0  ;;  %v2528_v7 = vpop.f32.mrf.mxu1 }
 0x58b   :  { %v15696_v4 = vadd.f32 %v7131_v31, %v15301_v63  ;;  %v2529_v39 = vadd.f32 %v2528_v7, %v2241_v23  ;;  %v11304_v63 = vld [vmem:[%s19603_s4 + $0x73c] sm:$0xf]  ;;  %v10463_v23 = vor.u32 %v11363_v62, %v10462_v25  ;;  %v9411_v31 = vor.u32 %v11095_v16, %v9408_v15  ;;  %v2945_v16 = vld [vmem:[%s19602_s1 + $0x330] sm:$0xff] }
 0x58c   :  { %v10243_v0 = vor.u32 %v11304_v63, %v10240_v60  ;;  %v20012_v60 = vld [vmem:[#allocation89_spill] sm:$0xff] }
 0x58d   :  { %20007 = vst [vmem:[#allocation110_spill] sm:$0xff] %v15696_v4  ;;  %v2817_v35 = vadd.f32 %v20008_v8, %v2529_v39  ;;  %v4040_v4 = vpop.permute.xlu2 %4039 }
 0x58e   :  { %v6599_v25 = vadd.f32 %v15309_v52, %v4040_v4  ;;  %v2946_v4 = vld [vmem:[%s19602_s1 + $0x338] sm:$0xff] }
 0x58f   :  { %v3055_v61 = vadd.f32 %v2944_v36, %v2817_v35  ;;  %v15727_v42 = vpop.f32.mrf.mxu3  ;;  %v6883_v11 = vpop.f32.mrf.mxu2 }
 0x590   :  { %v15731_v59 = vadd.f32 %v6883_v11, %v6596_v18  ;;  %v2246_v18 = vadd.f32 %v20013_v22, %v20012_v60 }
 0x591   :  { %v3166_v7 = vmax.f32 %v3055_v61, 0.0 }
 0x592   :  { %v7134_v39 = vpop.f32.mrf.mxu0  ;;  %v2531_v40 = vpop.f32.mrf.mxu1 }
 0x593   :  { %v15734_v8 = vadd.f32 %v7134_v39, %v15311_v54  ;;  %v2532_v36 = vadd.f32 %v2531_v40, %v2244_v32  ;;  %v15736_v35 = vpack.c.bf16 %v3166_v7, %v3165_v28  ;;  %v20014_v54 = vld [vmem:[#allocation22_spill] sm:$0xff]  ;;  %v4045_v32 = vpop.permute.xlu0 %4044  ;;  %v11259_v39 = vld [vmem:[%s19603_s4 + $0x5d0] sm:$0xf0]  ;;  %v11102_v40 = vld [vmem:[%s19603_s4 + $0xec] sm:$0xf] }
 0x594   :  { %6677 = vmatmul.bf16.gmra.mxu3 %v10463_v23  ;;  %6925 = vmatmul.bf16.gmra.mxu2 %v10243_v0  ;;  %v20016_v0 = vld [vmem:[#allocation21_spill] sm:$0xff]  ;;  %v6601_v7 = vadd.f32 %v15351_v57, %v4045_v32 }
 0x595   :  { %20011 = vst [vmem:[#allocation58_spill] sm:$0xff] %v15734_v8  ;;  %7173 = vmatmul.bf16.gmra.mxu0 %v10023_v30  ;;  %7351 = vmatmul.bf16.gmra.mxu1 %v9411_v31  ;;  %v2820_v47 = vadd.f32 %v20014_v54, %v2532_v36  ;;  %v10268_v30 = vld [vmem:[%s19603_s4 + $0x78c] sm:$0xf0]  ;;  %v10050_v31 = vld [vmem:[%s19603_s4 + $0x5b8] sm:$0xf] }
 0x596   :  { %v9436_v36 = vld [vmem:[%s19603_s4 + $0x104] sm:$0xf0]  ;;  %v20017_v32 = vld [vmem:[#allocation81_spill] sm:$0xff] }
 0x597   :  { %v15739_v62 = vpop.f32.mrf.mxu3  ;;  %v6886_v45 = vpop.f32.mrf.mxu2  ;;  %v3056_v23 = vadd.f32 %v2945_v16, %v2820_v47  ;;  %v10051_v47 = vor.u32 %v11259_v39, %v10050_v31  ;;  %v9439_v16 = vor.u32 %v11102_v40, %v9436_v36  ;;  %v20021_v31 = vld [vmem:[#allocation133_spill] sm:$0xff]  ;;  %v2947_v36 = vld [vmem:[%s19602_s1 + $0x340] sm:$0xff] }
 0x598   :  { %v15741_v63 = vadd.f32 %v6886_v45, %v6599_v25 }
 0x599   :  { %v3167_v54 = vmax.f32 %v3056_v23, 0.0 }
 0x59a   :  { %v7136_v15 = vpop.f32.mrf.mxu0  ;;  %v2533_v61 = vpop.f32.mrf.mxu1 }
 0x59b   :  { %v15750_v11 = vadd.f32 %v7136_v15, %v15355_v41  ;;  %v2534_v52 = vadd.f32 %v2533_v61, %v2246_v18  ;;  %v11311_v41 = vld [vmem:[%s19603_s4 + $0x774] sm:$0xf]  ;;  %v10491_v18 = vor.u32 %v11370_v5, %v10490_v46 }
 0x59c   :  { %v10271_v57 = vor.u32 %v11311_v41, %v10268_v30  ;;  %v20020_v30 = vld [vmem:[#allocation82_spill] sm:$0xff] }
 0x59d   :  { %20015 = vst [vmem:[#allocation20_spill] sm:$0xff] %v15750_v11  ;;  %v2822_v28 = vadd.f32 %v20016_v0, %v2534_v52  ;;  %v20018_v0 = vld [vmem:[#allocation131_spill] sm:$0xff]  ;;  %v2251_v39 = vadd.f32 %v20021_v31, %v20020_v30 }
 0x59e   :  { %v2249_v11 = vadd.f32 %v20018_v0, %v20017_v32  ;;  %v10078_v32 = vld [vmem:[%s19603_s4 + $0x5f0] sm:$0xf] }
 0x59f   :  { %v3057_v25 = vadd.f32 %v2946_v4, %v2822_v28  ;;  %v15781_v45 = vpop.f32.mrf.mxu3  ;;  %v6888_v60 = vpop.f32.mrf.mxu2 }
 0x5a0   :  { %v15783_v22 = vadd.f32 %v6888_v60, %v6601_v7  ;;  %v4050_v28 = vpop.permute.xlu1 %4049 }
 0x5a1   :  { %v3168_v15 = vmax.f32 %v3057_v25, 0.0  ;;  %v6604_v46 = vadd.f32 %v15363_v49, %v4050_v28  ;;  %v11266_v28 = vld [vmem:[%s19603_s4 + $0x608] sm:$0xf0] }
 0x5a2   :  { %v7139_v61 = vpop.f32.mrf.mxu0  ;;  %v2536_v52 = vpop.f32.mrf.mxu1 }
 0x5a3   :  { %v15788_v8 = vadd.f32 %v7139_v61, %v15365_v14  ;;  %v15790_v4 = vpack.c.bf16 %v3168_v15, %v3167_v54  ;;  %v2537_v7 = vadd.f32 %v2536_v52, %v2249_v11  ;;  %v20022_v14 = vld [vmem:[#allocation151_spill] sm:$0xff]  ;;  %v11377_v54 = vld [vmem:[%s19603_s4 + $0x980] sm:$0xf0]  ;;  %v20024_v15 = vld [vmem:[#allocation165_spill] sm:$0xff] }
 0x5a4   :  { %6682 = vmatmul.bf16.gmra.mxu3 %v10491_v18  ;;  %6930 = vmatmul.bf16.gmra.mxu2 %v10271_v57  ;;  %v2948_v18 = vld [vmem:[%s19602_s1 + $0x348] sm:$0xff] }
 0x5a5   :  { %20019 = vst [vmem:[#allocation107_spill] sm:$0xff] %v15788_v8  ;;  %7178 = vmatmul.bf16.gmra.mxu0 %v10051_v47  ;;  %7356 = vmatmul.bf16.gmra.mxu1 %v9439_v16  ;;  %v2825_v40 = vadd.f32 %v20022_v14, %v2537_v7  ;;  %v10518_v57 = vld [vmem:[%s19603_s4 + $0x968] sm:$0xf]  ;;  %v4055_v47 = vpop.permute.xlu2 %4054  ;;  %v11109_v7 = vld [vmem:[%s19603_s4 + $0x124] sm:$0xf] }
 0x5a6   :  { %v10296_v52 = vld [vmem:[%s19603_s4 + $0x7c4] sm:$0xf0]  ;;  %v6606_v0 = vadd.f32 %v15405_v58, %v4055_v47  ;;  %v10519_v14 = vor.u32 %v11377_v54, %v10518_v57 }
 0x5a7   :  { %v15793_v5 = vpop.f32.mrf.mxu3  ;;  %v6891_v23 = vpop.f32.mrf.mxu2  ;;  %v3058_v16 = vadd.f32 %v2947_v36, %v2825_v40  ;;  %v10079_v36 = vor.u32 %v11266_v28, %v10078_v32 }
 0x5a8   :  { %v15795_v41 = vadd.f32 %v6891_v23, %v6604_v46  ;;  %v9464_v46 = vld [vmem:[%s19603_s4 + $0x13c] sm:$0xf0] }
 0x5a9   :  { %v3169_v40 = vmax.f32 %v3058_v16, 0.0 }
 0x5aa   :  { %v7141_v25 = vpop.f32.mrf.mxu0  ;;  %v2538_v11 = vpop.f32.mrf.mxu1 }
 0x5ab   :  { %v15804_v60 = vadd.f32 %v7141_v25, %v15407_v1  ;;  %v2539_v49 = vadd.f32 %v2538_v11, %v2251_v39  ;;  %v11318_v1 = vld [vmem:[%s19603_s4 + $0x7ac] sm:$0xf]  ;;  %v9467_v25 = vor.u32 %v11109_v7, %v9464_v46  ;;  %v2949_v7 = vld [vmem:[%s19602_s1 + $0x350] sm:$0xff] }
 0x5ac   :  { %v10299_v58 = vor.u32 %v11318_v1, %v10296_v52  ;;  %v20028_v52 = vld [vmem:[#allocation61_spill] sm:$0xff] }
 0x5ad   :  { %20023 = vst [vmem:[#allocation113_spill] sm:$0xff] %v15804_v60  ;;  %v2827_v61 = vadd.f32 %v20024_v15, %v2539_v49  ;;  %v20025_v15 = vld [vmem:[#allocation71_spill] sm:$0xff] }
 0x5ae   :  { %v20026_v60 = vld [vmem:[#allocation135_spill] sm:$0xff] }
 0x5af   :  { %v3059_v23 = vadd.f32 %v2948_v18, %v2827_v61  ;;  %v15835_v30 = vpop.f32.mrf.mxu3  ;;  %v6893_v31 = vpop.f32.mrf.mxu2  ;;  %v2254_v8 = vadd.f32 %v20026_v60, %v20025_v15  ;;  %v20029_v60 = vld [vmem:[#allocation137_spill] sm:$0xff] }
 0x5b0   :  { %v15837_v39 = vadd.f32 %v6893_v31, %v6606_v0  ;;  %v4060_v61 = vpop.permute.xlu0 %4059  ;;  %v2256_v32 = vadd.f32 %v20029_v60, %v20028_v52  ;;  %v2950_v31 = vld [vmem:[%s19602_s1 + $0x358] sm:$0xff] }
 0x5b1   :  { %v3170_v11 = vmax.f32 %v3059_v23, 0.0  ;;  %v6609_v57 = vadd.f32 %v15417_v34, %v4060_v61  ;;  %v11273_v61 = vld [vmem:[%s19603_s4 + $0x640] sm:$0xf0] }
 0x5b2   :  { %v7144_v49 = vpop.f32.mrf.mxu0  ;;  %v2541_v47 = vpop.f32.mrf.mxu1 }
 0x5b3   :  { %v15842_v9 = vadd.f32 %v7144_v49, %v15419_v51  ;;  %v15844_v18 = vpack.c.bf16 %v3170_v11, %v3169_v40  ;;  %v2542_v0 = vadd.f32 %v2541_v47, %v2254_v8  ;;  %v20030_v51 = vld [vmem:[#allocation167_spill] sm:$0xff]  ;;  %v4065_v40 = vpop.permute.xlu1 %4064  ;;  %v10324_v49 = vld [vmem:[%s19603_s4 + $0x7fc] sm:$0xf0] }
 0x5b4   :  { %6687 = vmatmul.bf16.gmra.mxu3 %v10519_v14  ;;  %6935 = vmatmul.bf16.gmra.mxu2 %v10299_v58  ;;  %v10546_v14 = vld [vmem:[%s19603_s4 + $0x9a0] sm:$0xf]  ;;  %v11384_v58 = vld [vmem:[%s19603_s4 + $0x9b8] sm:$0xf0]  ;;  %v10106_v47 = vld [vmem:[%s19603_s4 + $0x628] sm:$0xf]  ;;  %v6611_v15 = vadd.f32 %v15459_v10, %v4065_v40 }
 0x5b5   :  { %20027 = vst [vmem:[#allocation105_spill] sm:$0xff] %v15842_v9  ;;  %7183 = vmatmul.bf16.gmra.mxu0 %v10079_v36  ;;  %7361 = vmatmul.bf16.gmra.mxu1 %v9467_v25  ;;  %v2830_v28 = vadd.f32 %v20030_v51, %v2542_v0  ;;  %v20032_v25 = vld [vmem:[#allocation178_spill] sm:$0xff]  ;;  %v11116_v0 = vld [vmem:[%s19603_s4 + $0x15c] sm:$0xf]  ;;  %v10547_v51 = vor.u32 %v11384_v58, %v10546_v14 }
 0x5b7   :  { %v15847_v54 = vpop.f32.mrf.mxu3  ;;  %v6896_v16 = vpop.f32.mrf.mxu2  ;;  %v3060_v36 = vadd.f32 %v2949_v7, %v2830_v28  ;;  %v10107_v7 = vor.u32 %v11273_v61, %v10106_v47 }
 0x5b8   :  { %v15849_v1 = vadd.f32 %v6896_v16, %v6609_v57  ;;  %v9492_v57 = vld [vmem:[%s19603_s4 + $0x174] sm:$0xf0] }
 0x5b9   :  { %v3171_v28 = vmax.f32 %v3060_v36, 0.0 }
 0x5ba   :  { %v7146_v46 = vpop.f32.mrf.mxu0  ;;  %v2543_v8 = vpop.f32.mrf.mxu1 }
 0x5bb   :  { %v15858_v23 = vadd.f32 %v7146_v46, %v15461_v24  ;;  %v2544_v34 = vadd.f32 %v2543_v8, %v2256_v32  ;;  %v11325_v24 = vld [vmem:[%s19603_s4 + $0x7e4] sm:$0xf]  ;;  %v9495_v46 = vor.u32 %v11116_v0, %v9492_v57 }
 0x5bc   :  { %v10327_v10 = vor.u32 %v11325_v24, %v10324_v49  ;;  %v20036_v49 = vld [vmem:[#allocation64_spill] sm:$0xff]  ;;  %v2951_v0 = vld [vmem:[%s19602_s1 + $0x360] sm:$0xff] }
 0x5bd   :  { %20031 = vst [vmem:[#allocation112_spill] sm:$0xff] %v15858_v23  ;;  %v2832_v11 = vadd.f32 %v20032_v25, %v2544_v34  ;;  %v20033_v25 = vld [vmem:[#allocation51_spill] sm:$0xff] }
 0x5be   :  { %v20034_v23 = vld [vmem:[#allocation139_spill] sm:$0xff] }
 0x5bf   :  { %v3061_v16 = vadd.f32 %v2950_v31, %v2832_v11  ;;  %v15889_v52 = vpop.f32.mrf.mxu3  ;;  %v6898_v60 = vpop.f32.mrf.mxu2  ;;  %v2259_v9 = vadd.f32 %v20034_v23, %v20033_v25  ;;  %v20037_v23 = vld [vmem:[#allocation141_spill] sm:$0xff] }
 0x5c0   :  { %v15891_v32 = vadd.f32 %v6898_v60, %v6611_v15  ;;  %v4070_v11 = vpop.permute.xlu2 %4069  ;;  %v2261_v47 = vadd.f32 %v20037_v23, %v20036_v49  ;;  %v2952_v60 = vld [vmem:[%s19602_s1 + $0x368] sm:$0xff] }
 0x5c1   :  { %v3172_v8 = vmax.f32 %v3061_v16, 0.0  ;;  %v6614_v14 = vadd.f32 %v15471_v56, %v4070_v11  ;;  %v11280_v11 = vld [vmem:[%s19603_s4 + $0x678] sm:$0xf0] }
 0x5c2   :  { %v7149_v34 = vpop.f32.mrf.mxu0  ;;  %v2546_v40 = vpop.f32.mrf.mxu1 }
 0x5c3   :  { %v15896_v19 = vadd.f32 %v7149_v34, %v15473_v21  ;;  %v15898_v31 = vpack.c.bf16 %v3172_v8, %v3171_v28  ;;  %v2547_v15 = vadd.f32 %v2546_v40, %v2259_v9  ;;  %v20038_v21 = vld [vmem:[#allocation179_spill] sm:$0xff]  ;;  %v4075_v28 = vpop.permute.xlu0 %4074  ;;  %v10352_v34 = vld [vmem:[%s19603_s4 + $0x834] sm:$0xf0]  ;;  %v10134_v40 = vld [vmem:[%s19603_s4 + $0x660] sm:$0xf] }
 0x5c4   :  { %6692 = vmatmul.bf16.gmra.mxu3 %v10547_v51  ;;  %6940 = vmatmul.bf16.gmra.mxu2 %v10327_v10  ;;  %v10574_v51 = vld [vmem:[%s19603_s4 + $0x9d8] sm:$0xf]  ;;  %v11391_v10 = vld [vmem:[%s19603_s4 + $0x9f0] sm:$0xf0]  ;;  %v6616_v25 = vadd.f32 %v15510_v44, %v4075_v28 }
 0x5c5   :  { %20035 = vst [vmem:[#allocation35_spill] sm:$0xff] %v15896_v19  ;;  %7188 = vmatmul.bf16.gmra.mxu0 %v10107_v7  ;;  %7366 = vmatmul.bf16.gmra.mxu1 %v9495_v46  ;;  %v2835_v61 = vadd.f32 %v20038_v21, %v2547_v15  ;;  %v20040_v46 = vld [vmem:[#allocation180_spill] sm:$0xff]  ;;  %v20042_v21 = vld [vmem:[#allocation143_spill] sm:$0xff] }
 0x5c6   :  { %v11123_v15 = vld [vmem:[%s19603_s4 + $0x194] sm:$0xf] }
 0x5c7   :  { %v15901_v58 = vpop.f32.mrf.mxu3  ;;  %v6901_v36 = vpop.f32.mrf.mxu2  ;;  %v3062_v7 = vadd.f32 %v2951_v0, %v2835_v61  ;;  %v10575_v0 = vor.u32 %v11391_v10, %v10574_v51  ;;  %v20043_v51 = vld [vmem:[#allocation3_spill] sm:$0xff] }
 0x5c8   :  { %v15903_v24 = vadd.f32 %v6901_v36, %v6614_v14  ;;  %v9520_v14 = vld [vmem:[%s19603_s4 + $0x1ac] sm:$0xf0] }
 0x5c9   :  { %v9523_v28 = vor.u32 %v11123_v15, %v9520_v14 }
 0x5ca   :  { %v7151_v57 = vpop.f32.mrf.mxu0  ;;  %v2548_v9 = vpop.f32.mrf.mxu1 }
 0x5cb   :  { %v15912_v16 = vadd.f32 %v7151_v57, %v15512_v12  ;;  %v2549_v56 = vadd.f32 %v2548_v9, %v2261_v47  ;;  %v11332_v12 = vld [vmem:[%s19603_s4 + $0x81c] sm:$0xf]  ;;  %v3173_v9 = vmax.f32 %v3062_v7, 0.0  ;;  %v20044_v7 = vld [vmem:[#allocation27_spill] sm:$0xff] }
 0x5cc   :  { %v20041_v47 = vld [vmem:[#allocation53_spill] sm:$0xff]  ;;  %v10355_v57 = vor.u32 %v11332_v12, %v10352_v34 }
 0x5cd   :  { %20039 = vst [vmem:[#allocation103_spill] sm:$0xff] %v15912_v16  ;;  %v2837_v8 = vadd.f32 %v20040_v46, %v2549_v56  ;;  %v2264_v61 = vadd.f32 %v20042_v21, %v20041_v47  ;;  %v10135_v56 = vor.u32 %v11280_v11, %v10134_v40  ;;  %v11339_v47 = vld [vmem:[%s19603_s4 + $0x854] sm:$0xf]  ;;  %v4085_v21 = vpop.permute.xlu2 %4084 }
 0x5cf   :  { %v3063_v36 = vadd.f32 %v2952_v60, %v2837_v8  ;;  %v15943_v49 = vpop.f32.mrf.mxu3  ;;  %v6903_v23 = vpop.f32.mrf.mxu2 }
 0x5d0   :  { %v15947_v44 = vadd.f32 %v6903_v23, %v6616_v25  ;;  %v4080_v25 = vpop.permute.xlu1 %4079  ;;  %v10602_v23 = vld [vmem:[%s19603_s4 + $0xa10] sm:$0xf] }
 0x5d1   :  { %v3174_v46 = vmax.f32 %v3063_v36, 0.0  ;;  %v6619_v12 = vadd.f32 %v20044_v7, %v4080_v25 }
 0x5d2   :  { %v7154_v16 = vpop.f32.mrf.mxu0  ;;  %v2551_v19 = vpop.f32.mrf.mxu1 }
 0x5d3   :  { %v15950_v50 = vadd.f32 %v7154_v16, %v15522_v53  ;;  %v2552_v60 = vadd.f32 %v2551_v19, %v2264_v61  ;;  %v3674_v8 = vpack.c.bf16 %v3174_v46, %v3173_v9  ;;  %v9548_v46 = vld [vmem:[%s19603_s4 + $0x1e4] sm:$0xf0] }
 0x5d4   :  { %6697 = vmatmul.bf16.gmra.mxu3 %v10575_v0  ;;  %6945 = vmatmul.bf16.gmra.mxu2 %v10355_v57  ;;  %v10162_v0 = vld [vmem:[%s19603_s4 + $0x698] sm:$0xf]  ;;  %v20045_v57 = vld [vmem:[#allocation26_spill] sm:$0xff] }
 0x5d5   :  { %v2840_v10 = vadd.f32 %v20043_v51, %v2552_v60  ;;  %7193 = vmatmul.bf16.gmra.mxu0 %v10135_v56  ;;  %7371 = vmatmul.bf16.gmra.mxu1 %v9523_v28  ;;  %v6621_v9 = vadd.f32 %v20045_v57, %v4085_v21  ;;  %v11287_v56 = vld [vmem:[%s19603_s4 + $0x6b0] sm:$0xf0]  ;;  %v11130_v28 = vld [vmem:[%s19603_s4 + $0x1cc] sm:$0xf]  ;;  %v4090_v21 = vpop.permute.xlu0 %4089 }
 0x5d7   :  { %v3064_v34 = vadd.f32 %v2953_v13, %v2840_v10  ;;  %v15957_v40 = vpop.f32.mrf.mxu3  ;;  %v6906_v53 = vpop.f32.mrf.mxu2  ;;  %v11398_v13 = vld [vmem:[%s19603_s4 + $0xa28] sm:$0xf0] }
 0x5d8   :  { %v15959_v16 = vadd.f32 %v6906_v53, %v6619_v12  ;;  %v10603_v10 = vor.u32 %v11398_v13, %v10602_v23  ;;  %v10163_v12 = vor.u32 %v11287_v56, %v10162_v0  ;;  %v20049_v0 = vld [vmem:[#allocation15_spill] sm:$0xff] }
 0x5d9   :  { %v3175_v19 = vmax.f32 %v3064_v34, 0.0  ;;  %v9551_v34 = vor.u32 %v11130_v28, %v9548_v46  ;;  %v11346_v56 = vld [vmem:[%s19603_s4 + $0x88c] sm:$0xf] }
 0x5da   :  { %v7156_v11 = vpop.f32.mrf.mxu0  ;;  %v2553_v15 = vpop.f32.mrf.mxu1  ;;  %v11294_v46 = vld [vmem:[%s19603_s4 + $0x6e8] sm:$0xf0] }
 0x5db   :  { %v15962_v14 = vadd.f32 %v7156_v11, %v15566_v27  ;;  %v3675_v36 = vpack.c.bf16 %v3175_v19, %v3175_v19  ;;  %v10380_v27 = vld [vmem:[%s19603_s4 + $0x86c] sm:$0xf0]  ;;  %v20047_v15 = vld [vmem:[#allocation153_spill] sm:$0xff] }
 0x5dc   :  { %v10383_v7 = vor.u32 %v11339_v47, %v10380_v27 }
 0x5dd   :  { %v6462_v61 = vsel %vm6460_vm1, %v3675_v36, 0 }
 0x5de   :  { %8192 = vmatpush.bf16.msra.mxu0 %v6462_v61  ;;  %v6624_v61 = vadd.f32 %v15572_v20, %v4090_v21  ;;  %v10630_v20 = vld [vmem:[%s19603_s4 + $0xa48] sm:$0xf] }
 0x5df   :  { %v15989_v60 = vpop.f32.mrf.mxu3  ;;  %v6908_v25 = vpop.f32.mrf.mxu2 }
 0x5e0   :  { %v15991_v51 = vadd.f32 %v6908_v25, %v6621_v9  ;;  %v4095_v9 = vpop.permute.xlu1 %4094  ;;  %v11137_v25 = vld [vmem:[%s19603_s4 + $0x204] sm:$0xf] }
 0x5e1   :  { %v6626_v28 = vadd.f32 %v15615_v6, %v4095_v9 }
 0x5e2   :  { %v7159_v53 = vpop.f32.mrf.mxu0  ;;  %v7337_v19 = vpop.f32.mrf.mxu1  ;;  %8193 = vmatpush.bf16.msra.mxu0 %v3674_v8 }
 0x5e3   :  { %v15994_v11 = vadd.f32 %v7159_v53, %v15574_v43  ;;  %v15997_v36 = vadd.f32 %v7337_v19, %v20047_v15 }
 0x5e4   :  { %6702 = vmatmul.bf16.gmra.mxu3 %v10603_v10  ;;  %6950 = vmatmul.bf16.gmra.mxu2 %v10383_v7  ;;  %v9576_v10 = vld [vmem:[%s19603_s4 + $0x21c] sm:$0xf0] }
 0x5e5   :  { %20046 = vst [vmem:[#allocation101_spill] sm:$0xff] %v15994_v11  ;;  %7198 = vmatmul.bf16.gmra.mxu0 %v10163_v12  ;;  %7376 = vmatmul.bf16.gmra.mxu1 %v9551_v34  ;;  %v9579_v19 = vor.u32 %v11137_v25, %v9576_v10  ;;  %v11301_v10 = vld [vmem:[%s19603_s4 + $0x720] sm:$0xf0] }
 0x5e6   :  { %8194 = vmatpush.bf16.msra.mxu0 %v15898_v31  ;;  %v11405_v31 = vld [vmem:[%s19603_s4 + $0xa60] sm:$0xf0] }
 0x5e7   :  { %v16001_v23 = vpop.f32.mrf.mxu3  ;;  %v6911_v13 = vpop.f32.mrf.mxu2  ;;  %v10631_v6 = vor.u32 %v11405_v31, %v10630_v20 }
 0x5e8   :  { %v16003_v47 = vadd.f32 %v6911_v13, %v6624_v61  ;;  %v20051_v13 = vld [vmem:[#allocation155_spill] sm:$0xff] }
 0x5ea   :  { %v7161_v8 = vpop.f32.mrf.mxu0  ;;  %v7339_v43 = vpop.f32.mrf.mxu1  ;;  %8195 = vmatpush.bf16.msra.mxu0 %v15844_v18  ;;  %v10190_v18 = vld [vmem:[%s19603_s4 + $0x6d0] sm:$0xf] }
 0x5eb   :  { %v16007_v27 = vadd.f32 %v7161_v8, %v15617_v29  ;;  %v16010_v57 = vadd.f32 %v7339_v43, %v20049_v0  ;;  %v10408_v29 = vld [vmem:[%s19603_s4 + $0x8a4] sm:$0xf0]  ;;  %v4100_v43 = vpop.permute.xlu2 %4099 }
 0x5ec   :  { %v10411_v53 = vor.u32 %v11346_v56, %v10408_v29  ;;  %v6629_v0 = vadd.f32 %v15628_v48, %v4100_v43  ;;  %v20053_v29 = vld [vmem:[#allocation38_spill] sm:$0xff] }
 0x5ed   :  { %20048 = vst [vmem:[#allocation37_spill] sm:$0xff] %v16007_v27  ;;  %v10658_v48 = vld [vmem:[%s19603_s4 + $0xa80] sm:$0xf] }
 0x5ee   :  { %8196 = vmatpush.bf16.msra.mxu0 %v15790_v4  ;;  %v10191_v4 = vor.u32 %v11294_v46, %v10190_v18  ;;  %v11353_v46 = vld [vmem:[%s19603_s4 + $0x8c4] sm:$0xf] }
 0x5ef   :  { %v16038_v7 = vpop.f32.mrf.mxu3  ;;  %v6913_v12 = vpop.f32.mrf.mxu2 }
 0x5f0   :  { %v16040_v34 = vadd.f32 %v6913_v12, %v6626_v28  ;;  %v4105_v28 = vpop.permute.xlu0 %4104  ;;  %v11144_v12 = vld [vmem:[%s19603_s4 + $0x23c] sm:$0xf] }
 0x5f1   :  { %v6631_v25 = vadd.f32 %v15672_v3, %v4105_v28 }
 0x5f2   :  { %v7164_v15 = vpop.f32.mrf.mxu0  ;;  %v7342_v21 = vpop.f32.mrf.mxu1  ;;  %8197 = vmatpush.bf16.msra.mxu0 %v15736_v35 }
 0x5f3   :  { %v16044_v61 = vadd.f32 %v7164_v15, %v15630_v38  ;;  %v16047_v8 = vadd.f32 %v7342_v21, %v20051_v13 }
 0x5f4   :  { %6707 = vmatmul.bf16.gmra.mxu3 %v10631_v6  ;;  %6955 = vmatmul.bf16.gmra.mxu2 %v10411_v53  ;;  %v9604_v6 = vld [vmem:[%s19603_s4 + $0x254] sm:$0xf0] }
 0x5f5   :  { %20050 = vst [vmem:[#allocation116_spill] sm:$0xff] %v16044_v61  ;;  %7203 = vmatmul.bf16.gmra.mxu0 %v10191_v4  ;;  %7381 = vmatmul.bf16.gmra.mxu1 %v9579_v19  ;;  %v9607_v13 = vor.u32 %v11144_v12, %v9604_v6  ;;  %v10686_v12 = vld [vmem:[%s19603_s4 + $0xab8] sm:$0xf]  ;;  %v4115_v6 = vpop.permute.xlu2 %4114 }
 0x5f6   :  { %8198 = vmatpush.bf16.msra.mxu0 %v15682_v2  ;;  %v11412_v2 = vld [vmem:[%s19603_s4 + $0xa98] sm:$0xf0] }
 0x5f7   :  { %v16051_v20 = vpop.f32.mrf.mxu3  ;;  %v6916_v31 = vpop.f32.mrf.mxu2  ;;  %v10659_v15 = vor.u32 %v11412_v2, %v10658_v48 }
 0x5f8   :  { %v16053_v9 = vadd.f32 %v6916_v31, %v6629_v0 }
 0x5fa   :  { %v7166_v35 = vpop.f32.mrf.mxu0  ;;  %v7344_v38 = vpop.f32.mrf.mxu1  ;;  %8199 = vmatpush.bf16.msra.mxu0 %v15624_v37  ;;  %v10436_v37 = vld [vmem:[%s19603_s4 + $0x8dc] sm:$0xf0] }
 0x5fb   :  { %v16057_v56 = vadd.f32 %v7166_v35, %v15676_v17  ;;  %v16060_v18 = vadd.f32 %v7344_v38, %v20053_v29  ;;  %v10218_v17 = vld [vmem:[%s19603_s4 + $0x708] sm:$0xf]  ;;  %v10439_v21 = vor.u32 %v11353_v46, %v10436_v37  ;;  %v4110_v29 = vpop.permute.xlu1 %4109 }
 0x5fc   :  { %v10219_v3 = vor.u32 %v11301_v10, %v10218_v17  ;;  %v20055_v35 = vld [vmem:[#allocation31_spill] sm:$0xff]  ;;  %v6634_v28 = vadd.f32 %v15685_v55, %v4110_v29  ;;  %v20057_v17 = vld [vmem:[#allocation29_spill] sm:$0xff]  ;;  %v11419_v55 = vld [vmem:[%s19603_s4 + $0xad0] sm:$0xf0] }
 0x5fd   :  { %20052 = vst [vmem:[#allocation118_spill] sm:$0xff] %v16057_v56  ;;  %v4120_v56 = vpop.permute.xlu0 %4119  ;;  %v4130_v27 = vpop.permute.xlu2 %4129 }
 0x5ff   :  { %v16087_v53 = vpop.f32.mrf.mxu3  ;;  %v6918_v4 = vpop.f32.mrf.mxu2 }
 0x600   :  { %v16089_v19 = vadd.f32 %v6918_v4, %v6631_v25  ;;  %v11360_v4 = vld [vmem:[%s19603_s4 + $0x8fc] sm:$0xf] }
 0x602   :  { %v7169_v43 = vpop.f32.mrf.mxu0  ;;  %v7347_v0 = vpop.f32.mrf.mxu1 }
 0x603   :  { %v16092_v31 = vadd.f32 %v7169_v43, %v15687_v26  ;;  %v16095_v38 = vadd.f32 %v7347_v0, %v20055_v35  ;;  %v9632_v43 = vld [vmem:[%s19603_s4 + $0x28c] sm:$0xf0] }
 0x604   :  { %6712 = vmatmul.bf16.gmra.mxu3 %v10659_v15  ;;  %6960 = vmatmul.bf16.gmra.mxu2 %v10439_v21  ;;  %v10246_v15 = vld [vmem:[%s19603_s4 + $0x740] sm:$0xf]  ;;  %v6636_v21 = vadd.f32 %v15727_v42, %v4115_v6 }
 0x605   :  { %20054 = vst [vmem:[#allocation91_spill] sm:$0xff] %v16092_v31  ;;  %7208 = vmatmul.bf16.gmra.mxu0 %v10219_v3  ;;  %7386 = vmatmul.bf16.gmra.mxu1 %v9607_v13  ;;  %v11308_v3 = vld [vmem:[%s19603_s4 + $0x758] sm:$0xf0]  ;;  %v11151_v13 = vld [vmem:[%s19603_s4 + $0x274] sm:$0xf] }
 0x606   :  { %v10247_v42 = vor.u32 %v11308_v3, %v10246_v15  ;;  %v20061_v15 = vld [vmem:[#allocation25_spill] sm:$0xff]  ;;  %v10714_v3 = vld [vmem:[%s19603_s4 + $0xaf0] sm:$0xf] }
 0x607   :  { %v16098_v25 = vpop.f32.mrf.mxu3  ;;  %v6921_v48 = vpop.f32.mrf.mxu2 }
 0x608   :  { %v16100_v2 = vadd.f32 %v6921_v48, %v6634_v28  ;;  %v10687_v28 = vor.u32 %v11419_v55, %v10686_v12 }
 0x60a   :  { %v7171_v46 = vpop.f32.mrf.mxu0  ;;  %v7349_v37 = vpop.f32.mrf.mxu1 }
 0x60b   :  { %v16103_v26 = vadd.f32 %v7171_v46, %v15731_v59  ;;  %v16106_v10 = vadd.f32 %v7349_v37, %v20057_v17  ;;  %v10464_v59 = vld [vmem:[%s19603_s4 + $0x914] sm:$0xf0]  ;;  %v9635_v46 = vor.u32 %v11151_v13, %v9632_v43  ;;  %v11367_v13 = vld [vmem:[%s19603_s4 + $0x934] sm:$0xf] }
 0x60c   :  { %v10467_v48 = vor.u32 %v11360_v4, %v10464_v59  ;;  %v10274_v43 = vld [vmem:[%s19603_s4 + $0x778] sm:$0xf] }
 0x60d   :  { %20056 = vst [vmem:[#allocation41_spill] sm:$0xff] %v16103_v26  ;;  %v20059_v26 = vld [vmem:[#allocation39_spill] sm:$0xff] }
 0x60f   :  { %v16133_v0 = vpop.f32.mrf.mxu3  ;;  %v6923_v35 = vpop.f32.mrf.mxu2 }
 0x610   :  { %v16135_v29 = vadd.f32 %v6923_v35, %v6636_v21  ;;  %v6639_v21 = vadd.f32 %v15739_v62, %v4120_v56  ;;  %v11426_v62 = vld [vmem:[%s19603_s4 + $0xb08] sm:$0xf0]  ;;  %v4125_v56 = vpop.permute.xlu1 %4124 }
 0x612   :  { %v7174_v37 = vpop.f32.mrf.mxu0  ;;  %v7352_v17 = vpop.f32.mrf.mxu1 }
 0x613   :  { %v16138_v6 = vadd.f32 %v7174_v37, %v15741_v63  ;;  %v16141_v31 = vadd.f32 %v7352_v17, %v20059_v26 }
 0x614   :  { %6717 = vmatmul.bf16.gmra.mxu3 %v10687_v28  ;;  %6965 = vmatmul.bf16.gmra.mxu2 %v10467_v48  ;;  %v6641_v28 = vadd.f32 %v15781_v45, %v4125_v56  ;;  %v11315_v48 = vld [vmem:[%s19603_s4 + $0x790] sm:$0xf0] }
 0x615   :  { %20058 = vst [vmem:[#allocation45_spill] sm:$0xff] %v16138_v6  ;;  %7213 = vmatmul.bf16.gmra.mxu0 %v10247_v42  ;;  %7391 = vmatmul.bf16.gmra.mxu1 %v9635_v46  ;;  %v11158_v42 = vld [vmem:[%s19603_s4 + $0x2ac] sm:$0xf]  ;;  %v9660_v46 = vld [vmem:[%s19603_s4 + $0x2c4] sm:$0xf0]  ;;  %v10275_v45 = vor.u32 %v11315_v48, %v10274_v43  ;;  %v20063_v6 = vld [vmem:[#allocation33_spill] sm:$0xff] }
 0x616   :  { %v20066_v43 = vld [vmem:[#allocation19_spill] sm:$0xff] }
 0x617   :  { %v16144_v35 = vpop.f32.mrf.mxu3  ;;  %v6926_v12 = vpop.f32.mrf.mxu2  ;;  %v10742_v48 = vld [vmem:[%s19603_s4 + $0xb28] sm:$0xf] }
 0x618   :  { %v16146_v55 = vadd.f32 %v6926_v12, %v6639_v21  ;;  %v10715_v12 = vor.u32 %v11426_v62, %v10714_v3 }
 0x61a   :  { %v7176_v4 = vpop.f32.mrf.mxu0  ;;  %v7354_v59 = vpop.f32.mrf.mxu1 }
 0x61b   :  { %v16149_v63 = vadd.f32 %v7176_v4, %v15783_v22  ;;  %v16152_v26 = vadd.f32 %v7354_v59, %v20061_v15  ;;  %v10492_v22 = vld [vmem:[%s19603_s4 + $0x94c] sm:$0xf0]  ;;  %v9663_v59 = vor.u32 %v11158_v42, %v9660_v46  ;;  %v11374_v42 = vld [vmem:[%s19603_s4 + $0x96c] sm:$0xf] }
 0x61c   :  { %v10495_v4 = vor.u32 %v11367_v13, %v10492_v22  ;;  %v10302_v46 = vld [vmem:[%s19603_s4 + $0x7b0] sm:$0xf] }
 0x61d   :  { %20060 = vst [vmem:[#allocation120_spill] sm:$0xff] %v16149_v63 }
 0x61f   :  { %v16179_v37 = vpop.f32.mrf.mxu3  ;;  %v6928_v17 = vpop.f32.mrf.mxu2 }
 0x620   :  { %v16181_v21 = vadd.f32 %v6928_v17, %v6641_v28  ;;  %v6644_v28 = vadd.f32 %v15793_v5, %v4130_v27  ;;  %v11433_v5 = vld [vmem:[%s19603_s4 + $0xb40] sm:$0xf0]  ;;  %v4135_v27 = vpop.permute.xlu0 %4134 }
 0x622   :  { %v7179_v15 = vpop.f32.mrf.mxu0  ;;  %v7357_v56 = vpop.f32.mrf.mxu1 }
 0x623   :  { %v16184_v63 = vadd.f32 %v7179_v15, %v15795_v41  ;;  %v16187_v61 = vadd.f32 %v7357_v56, %v20063_v6 }
 0x624   :  { %6722 = vmatmul.bf16.gmra.mxu3 %v10715_v12  ;;  %6970 = vmatmul.bf16.gmra.mxu2 %v10495_v4  ;;  %v6646_v12 = vadd.f32 %v15835_v30, %v4135_v27  ;;  %v11322_v4 = vld [vmem:[%s19603_s4 + $0x7c8] sm:$0xf0] }
 0x625   :  { %20062 = vst [vmem:[#allocation122_spill] sm:$0xff] %v16184_v63  ;;  %7218 = vmatmul.bf16.gmra.mxu0 %v10275_v45  ;;  %7396 = vmatmul.bf16.gmra.mxu1 %v9663_v59  ;;  %v11165_v45 = vld [vmem:[%s19603_s4 + $0x2e4] sm:$0xf]  ;;  %v9688_v59 = vld [vmem:[%s19603_s4 + $0x2fc] sm:$0xf0]  ;;  %v10303_v30 = vor.u32 %v11322_v4, %v10302_v46  ;;  %v20069_v63 = vld [vmem:[#allocation28_spill] sm:$0xff] }
 0x626   :  { %20064 = vst [vmem:[#allocation73_spill] sm:$0xff] %v16187_v61  ;;  %v4140_v61 = vpop.permute.xlu1 %4139  ;;  %v20072_v46 = vld [vmem:[#allocation2_spill] sm:$0xff] }
 0x627   :  { %v16190_v17 = vpop.f32.mrf.mxu3  ;;  %v6931_v3 = vpop.f32.mrf.mxu2  ;;  %v10770_v4 = vld [vmem:[%s19603_s4 + $0xb60] sm:$0xf] }
 0x628   :  { %v16192_v62 = vadd.f32 %v6931_v3, %v6644_v28  ;;  %v10743_v3 = vor.u32 %v11433_v5, %v10742_v48 }
 0x62a   :  { %v7181_v13 = vpop.f32.mrf.mxu0  ;;  %v7359_v22 = vpop.f32.mrf.mxu1 }
 0x62b   :  { %v16195_v41 = vadd.f32 %v7181_v13, %v15837_v39  ;;  %v16198_v6 = vadd.f32 %v7359_v22, %v20066_v43  ;;  %v10520_v39 = vld [vmem:[%s19603_s4 + $0x984] sm:$0xf0]  ;;  %v9691_v22 = vor.u32 %v11165_v45, %v9688_v59  ;;  %v11381_v45 = vld [vmem:[%s19603_s4 + $0x9a4] sm:$0xf] }
 0x62c   :  { %v10523_v13 = vor.u32 %v11374_v42, %v10520_v39  ;;  %v10330_v59 = vld [vmem:[%s19603_s4 + $0x7e8] sm:$0xf] }
 0x62d   :  { %20065 = vst [vmem:[#allocation84_spill] sm:$0xff] %v16195_v41 }
 0x62e   :  { %20067 = vst [vmem:[#allocation52_spill] sm:$0xff] %v16198_v6 }
 0x62f   :  { %v16225_v15 = vpop.f32.mrf.mxu3  ;;  %v6933_v56 = vpop.f32.mrf.mxu2 }
 0x630   :  { %v16227_v28 = vadd.f32 %v6933_v56, %v6646_v12  ;;  %v6649_v12 = vadd.f32 %v15847_v54, %v4140_v61  ;;  %v11440_v54 = vld [vmem:[%s19603_s4 + $0xb78] sm:$0xf0]  ;;  %v4145_v61 = vpop.permute.xlu2 %4144 }
 0x632   :  { %v7184_v43 = vpop.f32.mrf.mxu0  ;;  %v7362_v27 = vpop.f32.mrf.mxu1 }
 0x633   :  { %v16230_v41 = vadd.f32 %v7184_v43, %v15849_v1  ;;  %v16233_v6 = vadd.f32 %v7362_v27, %v20069_v63 }
 0x634   :  { %6727 = vmatmul.bf16.gmra.mxu3 %v10743_v3  ;;  %6975 = vmatmul.bf16.gmra.mxu2 %v10523_v13  ;;  %v6651_v3 = vadd.f32 %v15889_v52, %v4145_v61  ;;  %v11329_v13 = vld [vmem:[%s19603_s4 + $0x800] sm:$0xf0] }
 0x635   :  { %20068 = vst [vmem:[#allocation124_spill] sm:$0xff] %v16230_v41  ;;  %7223 = vmatmul.bf16.gmra.mxu0 %v10303_v30  ;;  %7401 = vmatmul.bf16.gmra.mxu1 %v9691_v22  ;;  %v11172_v30 = vld [vmem:[%s19603_s4 + $0x31c] sm:$0xf]  ;;  %v9716_v22 = vld [vmem:[%s19603_s4 + $0x334] sm:$0xf0]  ;;  %v10331_v52 = vor.u32 %v11329_v13, %v10330_v59  ;;  %v20078_v59 = vld [vmem:[#allocation18_spill] sm:$0xff] }
 0x636   :  { %20070 = vst [vmem:[#allocation126_spill] sm:$0xff] %v16233_v6  ;;  %v20075_v41 = vld [vmem:[#allocation5_spill] sm:$0xff]  ;;  %v4150_v6 = vpop.permute.xlu0 %4149 }
 0x637   :  { %v16236_v56 = vpop.f32.mrf.mxu3  ;;  %v6936_v48 = vpop.f32.mrf.mxu2  ;;  %v10798_v13 = vld [vmem:[%s19603_s4 + $0xb98] sm:$0xf] }
 0x638   :  { %v16238_v5 = vadd.f32 %v6936_v48, %v6649_v12  ;;  %v10771_v48 = vor.u32 %v11440_v54, %v10770_v4 }
 0x63a   :  { %v7186_v42 = vpop.f32.mrf.mxu0  ;;  %v7364_v39 = vpop.f32.mrf.mxu1 }
 0x63b   :  { %v16241_v1 = vadd.f32 %v7186_v42, %v15891_v32  ;;  %v16244_v63 = vadd.f32 %v7364_v39, %v20072_v46  ;;  %v10548_v32 = vld [vmem:[%s19603_s4 + $0x9bc] sm:$0xf0]  ;;  %v9719_v39 = vor.u32 %v11172_v30, %v9716_v22  ;;  %v11388_v30 = vld [vmem:[%s19603_s4 + $0x9dc] sm:$0xf] }
 0x63c   :  { %v10551_v42 = vor.u32 %v11381_v45, %v10548_v32  ;;  %v10358_v22 = vld [vmem:[%s19603_s4 + $0x820] sm:$0xf] }
 0x63d   :  { %20071 = vst [vmem:[#allocation76_spill] sm:$0xff] %v16241_v1 }
 0x63e   :  { %20073 = vst [vmem:[#allocation128_spill] sm:$0xff] %v16244_v63 }
 0x63f   :  { %v16271_v43 = vpop.f32.mrf.mxu3  ;;  %v6938_v27 = vpop.f32.mrf.mxu2 }
 0x640   :  { %v16273_v12 = vadd.f32 %v6938_v27, %v6651_v3  ;;  %v6654_v3 = vadd.f32 %v15901_v58, %v4150_v6  ;;  %v11447_v58 = vld [vmem:[%s19603_s4 + $0xbb0] sm:$0xf0]  ;;  %v4155_v6 = vpop.permute.xlu1 %4154 }
 0x642   :  { %v7189_v46 = vpop.f32.mrf.mxu0  ;;  %v7367_v61 = vpop.f32.mrf.mxu1 }
 0x643   :  { %v16276_v1 = vadd.f32 %v7189_v46, %v15903_v24  ;;  %v16279_v63 = vadd.f32 %v7367_v61, %v20075_v41 }
 0x644   :  { %6732 = vmatmul.bf16.gmra.mxu3 %v10771_v48  ;;  %6980 = vmatmul.bf16.gmra.mxu2 %v10551_v42  ;;  %v6656_v48 = vadd.f32 %v15943_v49, %v4155_v6  ;;  %v11336_v42 = vld [vmem:[%s19603_s4 + $0x838] sm:$0xf0] }
 0x645   :  { %20074 = vst [vmem:[#allocation75_spill] sm:$0xff] %v16276_v1  ;;  %7228 = vmatmul.bf16.gmra.mxu0 %v10331_v52  ;;  %7406 = vmatmul.bf16.gmra.mxu1 %v9719_v39  ;;  %v11179_v52 = vld [vmem:[%s19603_s4 + $0x354] sm:$0xf]  ;;  %v9744_v39 = vld [vmem:[%s19603_s4 + $0x36c] sm:$0xf0]  ;;  %v10359_v49 = vor.u32 %v11336_v42, %v10358_v22  ;;  %v20084_v22 = vld [vmem:[#allocation9_spill] sm:$0xff] }
 0x646   :  { %20076 = vst [vmem:[#allocation130_spill] sm:$0xff] %v16279_v63  ;;  %v20081_v1 = vld [vmem:[#allocation8_spill] sm:$0xff]  ;;  %v4160_v63 = vpop.permute.xlu2 %4159 }
 0x647   :  { %v16282_v27 = vpop.f32.mrf.mxu3  ;;  %v6941_v4 = vpop.f32.mrf.mxu2  ;;  %v10826_v42 = vld [vmem:[%s19603_s4 + $0xbd0] sm:$0xf] }
 0x648   :  { %v16284_v54 = vadd.f32 %v6941_v4, %v6654_v3  ;;  %v10799_v4 = vor.u32 %v11447_v58, %v10798_v13 }
 0x64a   :  { %v7191_v45 = vpop.f32.mrf.mxu0  ;;  %v7369_v32 = vpop.f32.mrf.mxu1 }
 0x64b   :  { %v16287_v24 = vadd.f32 %v7191_v45, %v15947_v44  ;;  %v16290_v41 = vadd.f32 %v7369_v32, %v20078_v59  ;;  %v10576_v44 = vld [vmem:[%s19603_s4 + $0x9f4] sm:$0xf0]  ;;  %v9747_v32 = vor.u32 %v11179_v52, %v9744_v39  ;;  %v11395_v52 = vld [vmem:[%s19603_s4 + $0xa14] sm:$0xf] }
 0x64c   :  { %v10579_v45 = vor.u32 %v11388_v30, %v10576_v44  ;;  %v10386_v39 = vld [vmem:[%s19603_s4 + $0x858] sm:$0xf] }
 0x64d   :  { %20077 = vst [vmem:[#allocation63_spill] sm:$0xff] %v16287_v24 }
 0x64e   :  { %20079 = vst [vmem:[#allocation62_spill] sm:$0xff] %v16290_v41 }
 0x64f   :  { %v16317_v46 = vpop.f32.mrf.mxu3  ;;  %v6943_v61 = vpop.f32.mrf.mxu2 }
 0x650   :  { %v16319_v3 = vadd.f32 %v6943_v61, %v6656_v48  ;;  %v6659_v48 = vadd.f32 %v15957_v40, %v4160_v63  ;;  %v11454_v40 = vld [vmem:[%s19603_s4 + $0xbe8] sm:$0xf0]  ;;  %v4165_v63 = vpop.permute.xlu0 %4164 }
 0x652   :  { %v7194_v59 = vpop.f32.mrf.mxu0  ;;  %v7372_v6 = vpop.f32.mrf.mxu1 }
 0x653   :  { %v16322_v24 = vadd.f32 %v7194_v59, %v15959_v16  ;;  %v16325_v41 = vadd.f32 %v7372_v6, %v20081_v1 }
 0x654   :  { %6737 = vmatmul.bf16.gmra.mxu3 %v10799_v4  ;;  %6985 = vmatmul.bf16.gmra.mxu2 %v10579_v45  ;;  %v6661_v4 = vadd.f32 %v15989_v60, %v4165_v63  ;;  %v11343_v45 = vld [vmem:[%s19603_s4 + $0x870] sm:$0xf0] }
 0x655   :  { %20080 = vst [vmem:[#allocation55_spill] sm:$0xff] %v16322_v24  ;;  %7233 = vmatmul.bf16.gmra.mxu0 %v10359_v49  ;;  %7411 = vmatmul.bf16.gmra.mxu1 %v9747_v32  ;;  %v11186_v49 = vld [vmem:[%s19603_s4 + $0x38c] sm:$0xf]  ;;  %v9772_v32 = vld [vmem:[%s19603_s4 + $0x3a4] sm:$0xf0]  ;;  %v10387_v60 = vor.u32 %v11343_v45, %v10386_v39  ;;  %v20087_v24 = vld [vmem:[#allocation24_spill] sm:$0xff] }
 0x656   :  { %20082 = vst [vmem:[#allocation66_spill] sm:$0xff] %v16325_v41  ;;  %v4170_v41 = vpop.permute.xlu1 %4169  ;;  %v20090_v39 = vld [vmem:[#allocation109_spill] sm:$0xff] }
 0x657   :  { %v16328_v61 = vpop.f32.mrf.mxu3  ;;  %v6946_v13 = vpop.f32.mrf.mxu2 }
 0x658   :  { %v16330_v58 = vadd.f32 %v6946_v13, %v6659_v48  ;;  %v10827_v13 = vor.u32 %v11454_v40, %v10826_v42 }
 0x65a   :  { %v7196_v30 = vpop.f32.mrf.mxu0  ;;  %v7374_v44 = vpop.f32.mrf.mxu1 }
 0x65b   :  { %v16333_v16 = vadd.f32 %v7196_v30, %v15991_v51  ;;  %v16336_v1 = vadd.f32 %v7374_v44, %v20084_v22  ;;  %v10604_v51 = vld [vmem:[%s19603_s4 + $0xa2c] sm:$0xf0]  ;;  %v9775_v44 = vor.u32 %v11186_v49, %v9772_v32  ;;  %v11402_v49 = vld [vmem:[%s19603_s4 + $0xa4c] sm:$0xf]  ;;  %v10632_v32 = vld [vmem:[%s19603_s4 + $0xa64] sm:$0xf0] }
 0x65c   :  { %v10607_v30 = vor.u32 %v11395_v52, %v10604_v51 }
 0x65d   :  { %20083 = vst [vmem:[#allocation132_spill] sm:$0xff] %v16333_v16 }
 0x65e   :  { %20085 = vst [vmem:[#allocation134_spill] sm:$0xff] %v16336_v1 }
 0x65f   :  { %v16363_v59 = vpop.f32.mrf.mxu3  ;;  %v6948_v6 = vpop.f32.mrf.mxu2 }
 0x660   :  { %v16365_v48 = vadd.f32 %v6948_v6, %v6661_v4  ;;  %v6664_v4 = vadd.f32 %v16001_v23, %v4170_v41  ;;  %v4175_v41 = vpop.permute.xlu2 %4174 }
 0x662   :  { %v7199_v22 = vpop.f32.mrf.mxu0  ;;  %v7377_v63 = vpop.f32.mrf.mxu1 }
 0x663   :  { %v16368_v16 = vadd.f32 %v7199_v22, %v16003_v47  ;;  %v16371_v1 = vadd.f32 %v7377_v63, %v20087_v24  ;;  %v16381_v47 = vld [vmem:[%s19603_s4 + $0xc08] sm:$0xff] }
 0x664   :  { %6742 = vmatmul.bf16.gmra.mxu3 %v10827_v13  ;;  %6990 = vmatmul.bf16.gmra.mxu2 %v10607_v30  ;;  %v5556_v23 = vunpack.c.l.b16 %v16381_v47  ;;  %v10414_v13 = vld [vmem:[%s19603_s4 + $0x890] sm:$0xf]  ;;  %v11350_v30 = vld [vmem:[%s19603_s4 + $0x8a8] sm:$0xf0] }
 0x665   :  { %20086 = vst [vmem:[#allocation44_spill] sm:$0xff] %v16368_v16  ;;  %7238 = vmatmul.bf16.gmra.mxu0 %v10387_v60  ;;  %7416 = vmatmul.bf16.gmra.mxu1 %v9775_v44  ;;  %v11193_v60 = vld [vmem:[%s19603_s4 + $0x3c4] sm:$0xf]  ;;  %v9800_v44 = vld [vmem:[%s19603_s4 + $0x3dc] sm:$0xf0] }
 0x666   :  { %20088 = vst [vmem:[#allocation70_spill] sm:$0xff] %v16371_v1  ;;  %v20093_v16 = vld [vmem:[#allocation86_spill] sm:$0xff]  ;;  %v4180_v1 = vpop.permute.xlu0 %4179 }
 0x667   :  { %v16374_v6 = vpop.f32.mrf.mxu3  ;;  %v6951_v42 = vpop.f32.mrf.mxu2 }
 0x668   :  { %v16376_v40 = vadd.f32 %v6951_v42, %v6664_v4  ;;  %v5948_v42 = vpack.c.b16 %v5556_v23, %v5556_v23  ;;  %v4190_v11 = vpop.permute.xlu2 %4189 }
 0x66a   :  { %v7201_v52 = vpop.f32.mrf.mxu0  ;;  %v7379_v24 = vpop.f32.mrf.mxu1 }
 0x66b   :  { %v16384_v51 = vadd.f32 %v7201_v52, %v16040_v34  ;;  %v16387_v45 = vadd.f32 %v7379_v24, %v20090_v39  ;;  %v6666_v34 = vadd.f32 %v16038_v7, %v4175_v41  ;;  %v10635_v52 = vor.u32 %v11402_v49, %v10632_v32 }
 0x66c   :  { %v10415_v7 = vor.u32 %v11350_v30, %v10414_v13  ;;  %v9803_v24 = vor.u32 %v11193_v60, %v9800_v44  ;;  %v20096_v30 = vld [vmem:[#allocation88_spill] sm:$0xff]  ;;  %v11409_v60 = vld [vmem:[%s19603_s4 + $0xa84] sm:$0xf]  ;;  %v10442_v44 = vld [vmem:[%s19603_s4 + $0x8c8] sm:$0xf] }
 0x66d   :  { %20089 = vst [vmem:[#allocation57_spill] sm:$0xff] %v16384_v51 }
 0x66e   :  { %20091 = vst [vmem:[#allocation74_spill] sm:$0xff] %v16387_v45 }
 0x66f   :  { %v16409_v22 = vpop.f32.mrf.mxu3  ;;  %v6953_v63 = vpop.f32.mrf.mxu2 }
 0x670   :  { %v16411_v4 = vadd.f32 %v6953_v63, %v6666_v34  ;;  %v6669_v34 = vadd.f32 %v16051_v20, %v4180_v1  ;;  %v10660_v20 = vld [vmem:[%s19603_s4 + $0xa9c] sm:$0xf0]  ;;  %v4185_v1 = vpop.permute.xlu1 %4184 }
 0x672   :  { %v7204_v39 = vpop.f32.mrf.mxu0  ;;  %v7382_v41 = vpop.f32.mrf.mxu1 }
 0x673   :  { %v16414_v51 = vadd.f32 %v7204_v39, %v16053_v9  ;;  %v16417_v45 = vadd.f32 %v7382_v41, %v20093_v16  ;;  %v9828_v39 = vld [vmem:[%s19603_s4 + $0x414] sm:$0xf0] }
 0x674   :  { %6747 = vmatmul.bf16.gmra.mxu3 %v5948_v42  ;;  %6995 = vmatmul.bf16.gmra.mxu2 %v10635_v52  ;;  %v11078_v42 = vld [vmem:[%s19603_s4 + $0x28] sm:$0xf0]  ;;  %v6671_v52 = vadd.f32 %v16087_v53, %v4185_v1 }
 0x675   :  { %20092 = vst [vmem:[#allocation136_spill] sm:$0xff] %v16414_v51  ;;  %7243 = vmatmul.bf16.gmra.mxu0 %v10415_v7  ;;  %7421 = vmatmul.bf16.gmra.mxu1 %v9803_v24  ;;  %v11357_v7 = vld [vmem:[%s19603_s4 + $0x8e0] sm:$0xf0]  ;;  %v11200_v24 = vld [vmem:[%s19603_s4 + $0x3fc] sm:$0xf] }
 0x676   :  { %20094 = vst [vmem:[#allocation138_spill] sm:$0xff] %v16417_v45  ;;  %v10443_v53 = vor.u32 %v11357_v7, %v10442_v44  ;;  %v10470_v7 = vld [vmem:[%s19603_s4 + $0x900] sm:$0xf] }
 0x677   :  { %v16420_v63 = vpop.f32.mrf.mxu3  ;;  %v6956_v23 = vpop.f32.mrf.mxu2 }
 0x678   :  { %v16422_v49 = vadd.f32 %v6956_v23, %v6669_v34 }
 0x67a   :  { %v7206_v32 = vpop.f32.mrf.mxu0  ;;  %v7384_v13 = vpop.f32.mrf.mxu1 }
 0x67b   :  { %v16425_v9 = vadd.f32 %v7206_v32, %v16089_v19  ;;  %v16428_v16 = vadd.f32 %v7384_v13, %v20096_v30  ;;  %v9330_v19 = vld [vmem:[%s19603_s4 + $0x10] sm:$0xf]  ;;  %v10663_v32 = vor.u32 %v11409_v60, %v10660_v20  ;;  %v9831_v30 = vor.u32 %v11200_v24, %v9828_v39  ;;  %v11085_v24 = vld [vmem:[%s19603_s4 + $0x60] sm:$0xf0] }
 0x67c   :  { %v9331_v13 = vor.u32 %v11078_v42, %v9330_v19  ;;  %v20102_v42 = vld [vmem:[#allocation14_spill] sm:$0xff] }
 0x67d   :  { %20095 = vst [vmem:[#allocation46_spill] sm:$0xff] %v16425_v9 }
 0x67e   :  { %20097 = vst [vmem:[#allocation77_spill] sm:$0xff] %v16428_v16  ;;  %v20099_v16 = vld [vmem:[#allocation79_spill] sm:$0xff] }
 0x67f   :  { %v16455_v41 = vpop.f32.mrf.mxu3  ;;  %v6958_v34 = vpop.f32.mrf.mxu2 }
 0x680   :  { %v16457_v23 = vadd.f32 %v6958_v34, %v6671_v52  ;;  %v6674_v52 = vadd.f32 %v16098_v25, %v4190_v11  ;;  %v10688_v11 = vld [vmem:[%s19603_s4 + $0xad4] sm:$0xf0]  ;;  %v4195_v25 = vpop.permute.xlu0 %4194 }
 0x681   :  { %v6676_v39 = vadd.f32 %v16133_v0, %v4195_v25 }
 0x682   :  { %v7209_v1 = vpop.f32.mrf.mxu0  ;;  %v7387_v9 = vpop.f32.mrf.mxu1 }
 0x683   :  { %v16460_v51 = vadd.f32 %v7209_v1, %v16100_v2  ;;  %v16463_v45 = vadd.f32 %v7387_v9, %v20099_v16  ;;  %v11416_v16 = vld [vmem:[%s19603_s4 + $0xabc] sm:$0xf] }
 0x684   :  { %7000 = vmatmul.bf16.gmra.mxu2 %v10663_v32  ;;  %7624 = vmatmul.bf16.vlgmr.msra.gmra.mxu3 %v9331_v13  ;;  %v11364_v32 = vld [vmem:[%s19603_s4 + $0x918] sm:$0xf0]  ;;  %v11207_v13 = vld [vmem:[%s19603_s4 + $0x434] sm:$0xf] }
 0x685   :  { %20098 = vst [vmem:[#allocation36_spill] sm:$0xff] %v16460_v51  ;;  %7248 = vmatmul.bf16.gmra.mxu0 %v10443_v53  ;;  %7426 = vmatmul.bf16.gmra.mxu1 %v9831_v30  ;;  %v9856_v53 = vld [vmem:[%s19603_s4 + $0x44c] sm:$0xf0]  ;;  %v10471_v0 = vor.u32 %v11364_v32, %v10470_v7  ;;  %v20105_v51 = vld [vmem:[#allocation69_spill] sm:$0xff]  ;;  %v11423_v32 = vld [vmem:[%s19603_s4 + $0xaf4] sm:$0xf] }
 0x686   :  { %20100 = vst [vmem:[#allocation80_spill] sm:$0xff] %v16463_v45  ;;  %v4200_v45 = vpop.permute.xlu1 %4199 }
 0x687   :  { %v16466_v34 = vpop.f32.mrf.mxu3  ;;  %v6961_v60 = vpop.f32.mrf.mxu2 }
 0x688   :  { %v16468_v20 = vadd.f32 %v6961_v60, %v6674_v52  ;;  %v10691_v60 = vor.u32 %v11416_v16, %v10688_v11 }
 0x68a   :  { %v7211_v44 = vpop.f32.mrf.mxu0  ;;  %v7389_v19 = vpop.f32.mrf.mxu1 }
 0x68b   :  { %v16471_v2 = vadd.f32 %v7211_v44, %v16135_v29  ;;  %v16474_v9 = vadd.f32 %v7389_v19, %v20102_v42  ;;  %v9358_v29 = vld [vmem:[%s19603_s4 + $0x48] sm:$0xf]  ;;  %v9859_v19 = vor.u32 %v11207_v13, %v9856_v53  ;;  %v10498_v13 = vld [vmem:[%s19603_s4 + $0x938] sm:$0xf]  ;;  %v11092_v53 = vld [vmem:[%s19603_s4 + $0x98] sm:$0xf0] }
 0x68c   :  { %v9359_v44 = vor.u32 %v11085_v24, %v9358_v29  ;;  %v20108_v24 = vld [vmem:[#allocation17_spill] sm:$0xff] }
 0x68d   :  { %20101 = vst [vmem:[#allocation140_spill] sm:$0xff] %v16471_v2 }
 0x68e   :  { %20103 = vst [vmem:[#allocation142_spill] sm:$0xff] %v16474_v9 }
 0x68f   :  { %v16501_v30 = vpop.f32.mrf.mxu3  ;;  %v6963_v1 = vpop.f32.mrf.mxu2 }
 0x690   :  { %v16503_v52 = vadd.f32 %v6963_v1, %v6676_v39  ;;  %v6679_v39 = vadd.f32 %v16144_v35, %v4200_v45  ;;  %v10716_v35 = vld [vmem:[%s19603_s4 + $0xb0c] sm:$0xf0]  ;;  %v4205_v45 = vpop.permute.xlu2 %4204 }
 0x692   :  { %v7214_v42 = vpop.f32.mrf.mxu0  ;;  %v7392_v25 = vpop.f32.mrf.mxu1 }
 0x693   :  { %v16506_v2 = vadd.f32 %v7214_v42, %v16146_v55  ;;  %v16509_v9 = vadd.f32 %v7392_v25, %v20105_v51 }
 0x694   :  { %7005 = vmatmul.bf16.gmra.mxu2 %v10691_v60  ;;  %7629 = vmatmul.bf16.gmra.mxu3 %v9359_v44  ;;  %v6681_v60 = vadd.f32 %v16179_v37, %v4205_v45  ;;  %v11371_v44 = vld [vmem:[%s19603_s4 + $0x950] sm:$0xf0] }
 0x695   :  { %20104 = vst [vmem:[#allocation160_spill] sm:$0xff] %v16506_v2  ;;  %7253 = vmatmul.bf16.gmra.mxu0 %v10471_v0  ;;  %7431 = vmatmul.bf16.gmra.mxu1 %v9859_v19  ;;  %v11214_v0 = vld [vmem:[%s19603_s4 + $0x46c] sm:$0xf]  ;;  %v9884_v19 = vld [vmem:[%s19603_s4 + $0x484] sm:$0xf0]  ;;  %v10499_v37 = vor.u32 %v11371_v44, %v10498_v13  ;;  %v20111_v2 = vld [vmem:[#allocation40_spill] sm:$0xff] }
 0x696   :  { %20106 = vst [vmem:[#allocation43_spill] sm:$0xff] %v16509_v9  ;;  %v4210_v9 = vpop.permute.xlu0 %4209  ;;  %v11430_v44 = vld [vmem:[%s19603_s4 + $0xb2c] sm:$0xf] }
 0x697   :  { %v16512_v1 = vpop.f32.mrf.mxu3  ;;  %v6966_v16 = vpop.f32.mrf.mxu2 }
 0x698   :  { %v16514_v11 = vadd.f32 %v6966_v16, %v6679_v39  ;;  %v10719_v16 = vor.u32 %v11423_v32, %v10716_v35 }
 0x69a   :  { %v7216_v7 = vpop.f32.mrf.mxu0  ;;  %v7394_v29 = vpop.f32.mrf.mxu1 }
 0x69b   :  { %v16517_v55 = vadd.f32 %v7216_v7, %v16181_v21  ;;  %v16520_v51 = vadd.f32 %v7394_v29, %v20108_v24  ;;  %v9386_v21 = vld [vmem:[%s19603_s4 + $0x80] sm:$0xf]  ;;  %v9887_v29 = vor.u32 %v11214_v0, %v9884_v19  ;;  %v10526_v0 = vld [vmem:[%s19603_s4 + $0x970] sm:$0xf]  ;;  %v11099_v19 = vld [vmem:[%s19603_s4 + $0xd0] sm:$0xf0] }
 0x69c   :  { %v9387_v7 = vor.u32 %v11092_v53, %v9386_v21  ;;  %v20114_v53 = vld [vmem:[#allocation30_spill] sm:$0xff] }
 0x69d   :  { %20107 = vst [vmem:[#allocation83_spill] sm:$0xff] %v16517_v55 }
 0x69e   :  { %20109 = vst [vmem:[#allocation16_spill] sm:$0xff] %v16520_v51 }
 0x69f   :  { %v16547_v42 = vpop.f32.mrf.mxu3  ;;  %v6968_v25 = vpop.f32.mrf.mxu2 }
 0x6a0   :  { %v16549_v39 = vadd.f32 %v6968_v25, %v6681_v60  ;;  %v6684_v60 = vadd.f32 %v16190_v17, %v4210_v9  ;;  %v10744_v17 = vld [vmem:[%s19603_s4 + $0xb44] sm:$0xf0]  ;;  %v4215_v9 = vpop.permute.xlu1 %4214 }
 0x6a2   :  { %v7219_v24 = vpop.f32.mrf.mxu0  ;;  %v7397_v45 = vpop.f32.mrf.mxu1 }
 0x6a3   :  { %v16552_v55 = vadd.f32 %v7219_v24, %v16192_v62  ;;  %v16555_v51 = vadd.f32 %v7397_v45, %v20111_v2 }
 0x6a4   :  { %7010 = vmatmul.bf16.gmra.mxu2 %v10719_v16  ;;  %7634 = vmatmul.bf16.gmra.mxu3 %v9387_v7  ;;  %v6686_v16 = vadd.f32 %v16225_v15, %v4215_v9  ;;  %v11378_v7 = vld [vmem:[%s19603_s4 + $0x988] sm:$0xf0] }
 0x6a5   :  { %20110 = vst [vmem:[#allocation4_spill] sm:$0xff] %v16552_v55  ;;  %7258 = vmatmul.bf16.gmra.mxu0 %v10499_v37  ;;  %7436 = vmatmul.bf16.gmra.mxu1 %v9887_v29  ;;  %v11221_v37 = vld [vmem:[%s19603_s4 + $0x4a4] sm:$0xf]  ;;  %v9912_v29 = vld [vmem:[%s19603_s4 + $0x4bc] sm:$0xf0]  ;;  %v10527_v15 = vor.u32 %v11378_v7, %v10526_v0  ;;  %v20117_v55 = vld [vmem:[#allocation59_spill] sm:$0xff] }
 0x6a6   :  { %20112 = vst [vmem:[#allocation42_spill] sm:$0xff] %v16555_v51  ;;  %v4220_v51 = vpop.permute.xlu2 %4219  ;;  %v11437_v7 = vld [vmem:[%s19603_s4 + $0xb64] sm:$0xf] }
 0x6a7   :  { %v16558_v25 = vpop.f32.mrf.mxu3  ;;  %v6971_v32 = vpop.f32.mrf.mxu2 }
 0x6a8   :  { %v16560_v35 = vadd.f32 %v6971_v32, %v6684_v60  ;;  %v10747_v32 = vor.u32 %v11430_v44, %v10744_v17 }
 0x6aa   :  { %v7221_v13 = vpop.f32.mrf.mxu0  ;;  %v7399_v21 = vpop.f32.mrf.mxu1 }
 0x6ab   :  { %v16563_v62 = vadd.f32 %v7221_v13, %v16227_v28  ;;  %v16566_v2 = vadd.f32 %v7399_v21, %v20114_v53  ;;  %v9414_v28 = vld [vmem:[%s19603_s4 + $0xb8] sm:$0xf]  ;;  %v9915_v21 = vor.u32 %v11221_v37, %v9912_v29  ;;  %v10554_v37 = vld [vmem:[%s19603_s4 + $0x9a8] sm:$0xf]  ;;  %v11106_v29 = vld [vmem:[%s19603_s4 + $0x108] sm:$0xf0] }
 0x6ac   :  { %v9415_v13 = vor.u32 %v11099_v19, %v9414_v28  ;;  %v20119_v19 = vld [vmem:[#allocation60_spill] sm:$0xff] }
 0x6ad   :  { %20113 = vst [vmem:[#allocation85_spill] sm:$0xff] %v16563_v62 }
 0x6ae   :  { %20115 = vst [vmem:[#allocation144_spill] sm:$0xff] %v16566_v2 }
 0x6af   :  { %v16593_v24 = vpop.f32.mrf.mxu3  ;;  %v6973_v45 = vpop.f32.mrf.mxu2 }
 0x6b0   :  { %v16595_v60 = vadd.f32 %v6973_v45, %v6686_v16  ;;  %v6689_v16 = vadd.f32 %v16236_v56, %v4220_v51  ;;  %v10772_v56 = vld [vmem:[%s19603_s4 + $0xb7c] sm:$0xf0]  ;;  %v4225_v51 = vpop.permute.xlu0 %4224 }
 0x6b2   :  { %v7224_v53 = vpop.f32.mrf.mxu0  ;;  %v7402_v9 = vpop.f32.mrf.mxu1 }
 0x6b3   :  { %v16598_v62 = vadd.f32 %v7224_v53, %v16238_v5  ;;  %v16601_v2 = vadd.f32 %v7402_v9, %v20117_v55 }
 0x6b4   :  { %7015 = vmatmul.bf16.gmra.mxu2 %v10747_v32  ;;  %7639 = vmatmul.bf16.gmra.mxu3 %v9415_v13  ;;  %v6691_v32 = vadd.f32 %v16271_v43, %v4225_v51  ;;  %v11385_v13 = vld [vmem:[%s19603_s4 + $0x9c0] sm:$0xf0] }
 0x6b5   :  { %20116 = vst [vmem:[#allocation145_spill] sm:$0xff] %v16598_v62  ;;  %7263 = vmatmul.bf16.gmra.mxu0 %v10527_v15  ;;  %7441 = vmatmul.bf16.gmra.mxu1 %v9915_v21  ;;  %v11228_v15 = vld [vmem:[%s19603_s4 + $0x4dc] sm:$0xf]  ;;  %v9940_v21 = vld [vmem:[%s19603_s4 + $0x4f4] sm:$0xf0]  ;;  %v10555_v43 = vor.u32 %v11385_v13, %v10554_v37 }
 0x6b6   :  { %v11444_v13 = vld [vmem:[%s19603_s4 + $0xb9c] sm:$0xf] }
 0x6b7   :  { %v16604_v45 = vpop.f32.mrf.mxu3  ;;  %v6976_v44 = vpop.f32.mrf.mxu2 }
 0x6b8   :  { %v16606_v17 = vadd.f32 %v6976_v44, %v6689_v16  ;;  %v10775_v44 = vor.u32 %v11437_v7, %v10772_v56 }
 0x6ba   :  { %v7226_v0 = vpop.f32.mrf.mxu0  ;;  %v7404_v28 = vpop.f32.mrf.mxu1 }
 0x6bb   :  { %v16609_v5 = vadd.f32 %v7226_v0, %v16273_v12  ;;  %v16612_v55 = vadd.f32 %v7404_v28, %v20119_v19  ;;  %v9442_v12 = vld [vmem:[%s19603_s4 + $0xf0] sm:$0xf]  ;;  %v9943_v28 = vor.u32 %v11228_v15, %v9940_v21  ;;  %v10582_v15 = vld [vmem:[%s19603_s4 + $0x9e0] sm:$0xf]  ;;  %v11113_v21 = vld [vmem:[%s19603_s4 + $0x140] sm:$0xf0] }
 0x6bc   :  { %v9443_v0 = vor.u32 %v11106_v29, %v9442_v12  ;;  %v20124_v29 = vld [vmem:[#allocation54_spill] sm:$0xff] }
 0x6bd   :  { %20118 = vst [vmem:[#allocation6_spill] sm:$0xff] %v16609_v5 }
 0x6be   :  { %20120 = vst [vmem:[#allocation87_spill] sm:$0xff] %v16612_v55  ;;  %v4230_v55 = vpop.permute.xlu1 %4229 }
 0x6bf   :  { %v16639_v53 = vpop.f32.mrf.mxu3  ;;  %v6978_v9 = vpop.f32.mrf.mxu2 }
 0x6c0   :  { %v16641_v16 = vadd.f32 %v6978_v9, %v6691_v32  ;;  %v6694_v32 = vadd.f32 %v16282_v27, %v4230_v55  ;;  %v10800_v27 = vld [vmem:[%s19603_s4 + $0xbb4] sm:$0xf0]  ;;  %v4235_v55 = vpop.permute.xlu2 %4234 }
 0x6c2   :  { %v7229_v19 = vpop.f32.mrf.mxu0  ;;  %v7407_v51 = vpop.f32.mrf.mxu1 }
 0x6c3   :  { %v16644_v5 = vadd.f32 %v7229_v19, %v16284_v54  ;;  %v16647_v62 = vadd.f32 %v7407_v51, %v15569_v33 }
 0x6c4   :  { %7020 = vmatmul.bf16.gmra.mxu2 %v10775_v44  ;;  %7644 = vmatmul.bf16.gmra.mxu3 %v9443_v0  ;;  %v6696_v44 = vadd.f32 %v16317_v46, %v4235_v55  ;;  %v11392_v0 = vld [vmem:[%s19603_s4 + $0x9f8] sm:$0xf0] }
 0x6c5   :  { %20121 = vst [vmem:[#allocation115_spill] sm:$0xff] %v16644_v5  ;;  %7268 = vmatmul.bf16.gmra.mxu0 %v10555_v43  ;;  %7446 = vmatmul.bf16.gmra.mxu1 %v9943_v28  ;;  %v11235_v43 = vld [vmem:[%s19603_s4 + $0x514] sm:$0xf]  ;;  %v9968_v28 = vld [vmem:[%s19603_s4 + $0x52c] sm:$0xf0]  ;;  %v10583_v46 = vor.u32 %v11392_v0, %v10582_v15 }
 0x6c6   :  { %20122 = vst [vmem:[#allocation90_spill] sm:$0xff] %v16647_v62  ;;  %v20127_v5 = vld [vmem:[#allocation32_spill] sm:$0xff]  ;;  %v4240_v62 = vpop.permute.xlu0 %4239 }
 0x6c7   :  { %v16650_v9 = vpop.f32.mrf.mxu3  ;;  %v6981_v7 = vpop.f32.mrf.mxu2  ;;  %v11451_v0 = vld [vmem:[%s19603_s4 + $0xbd4] sm:$0xf] }
 0x6c8   :  { %v16652_v56 = vadd.f32 %v6981_v7, %v6694_v32  ;;  %v10803_v7 = vor.u32 %v11444_v13, %v10800_v27 }
 0x6ca   :  { %v7231_v37 = vpop.f32.mrf.mxu0  ;;  %v7409_v12 = vpop.f32.mrf.mxu1 }
 0x6cb   :  { %v16655_v54 = vadd.f32 %v7231_v37, %v16319_v3  ;;  %v16658_v33 = vadd.f32 %v7409_v12, %v20124_v29  ;;  %v9470_v3 = vld [vmem:[%s19603_s4 + $0x128] sm:$0xf]  ;;  %v9971_v12 = vor.u32 %v11235_v43, %v9968_v28  ;;  %v10610_v43 = vld [vmem:[%s19603_s4 + $0xa18] sm:$0xf]  ;;  %v11120_v28 = vld [vmem:[%s19603_s4 + $0x178] sm:$0xf0] }
 0x6cc   :  { %v9471_v37 = vor.u32 %v11113_v21, %v9470_v3  ;;  %v20130_v21 = vld [vmem:[#allocation72_spill] sm:$0xff] }
 0x6cd   :  { %20123 = vst [vmem:[#allocation146_spill] sm:$0xff] %v16655_v54 }
 0x6ce   :  { %20125 = vst [vmem:[#allocation147_spill] sm:$0xff] %v16658_v33 }
 0x6cf   :  { %v16685_v19 = vpop.f32.mrf.mxu3  ;;  %v6983_v51 = vpop.f32.mrf.mxu2 }
 0x6d0   :  { %v16687_v32 = vadd.f32 %v6983_v51, %v6696_v44  ;;  %v6699_v44 = vadd.f32 %v16328_v61, %v4240_v62  ;;  %v10828_v61 = vld [vmem:[%s19603_s4 + $0xbec] sm:$0xf0]  ;;  %v4245_v62 = vpop.permute.xlu1 %4244 }
 0x6d2   :  { %v7234_v29 = vpop.f32.mrf.mxu0  ;;  %v7412_v55 = vpop.f32.mrf.mxu1 }
 0x6d3   :  { %v16690_v54 = vadd.f32 %v7234_v29, %v16330_v58  ;;  %v16693_v33 = vadd.f32 %v7412_v55, %v20127_v5 }
 0x6d4   :  { %7025 = vmatmul.bf16.gmra.mxu2 %v10803_v7  ;;  %7649 = vmatmul.bf16.gmra.mxu3 %v9471_v37  ;;  %v6701_v7 = vadd.f32 %v16363_v59, %v4245_v62  ;;  %v11399_v37 = vld [vmem:[%s19603_s4 + $0xa30] sm:$0xf0] }
 0x6d5   :  { %20126 = vst [vmem:[#allocation92_spill] sm:$0xff] %v16690_v54  ;;  %7273 = vmatmul.bf16.gmra.mxu0 %v10583_v46  ;;  %7451 = vmatmul.bf16.gmra.mxu1 %v9971_v12  ;;  %v11242_v46 = vld [vmem:[%s19603_s4 + $0x54c] sm:$0xf]  ;;  %v9996_v12 = vld [vmem:[%s19603_s4 + $0x564] sm:$0xf0]  ;;  %v10611_v59 = vor.u32 %v11399_v37, %v10610_v43  ;;  %v5557_v37 = vunpack.c.h.b16 %v16381_v47 }
 0x6d6   :  { %20128 = vst [vmem:[#allocation148_spill] sm:$0xff] %v16693_v33  ;;  %v20133_v54 = vld [vmem:[#allocation23_spill] sm:$0xff]  ;;  %v4250_v33 = vpop.permute.xlu2 %4249  ;;  %v11249_v47 = vld [vmem:[%s19603_s4 + $0x584] sm:$0xf] }
 0x6d7   :  { %v16696_v51 = vpop.f32.mrf.mxu3  ;;  %v6986_v13 = vpop.f32.mrf.mxu2 }
 0x6d8   :  { %v16698_v27 = vadd.f32 %v6986_v13, %v6699_v44  ;;  %v10831_v13 = vor.u32 %v11451_v0, %v10828_v61 }
 0x6da   :  { %v7236_v15 = vpop.f32.mrf.mxu0  ;;  %v7414_v3 = vpop.f32.mrf.mxu1 }
 0x6db   :  { %v16701_v58 = vadd.f32 %v7236_v15, %v16365_v48  ;;  %v16704_v5 = vadd.f32 %v7414_v3, %v20130_v21  ;;  %v9498_v48 = vld [vmem:[%s19603_s4 + $0x160] sm:$0xf]  ;;  %v9999_v3 = vor.u32 %v11242_v46, %v9996_v12  ;;  %v4255_v46 = vpop.permute.xlu0 %4254  ;;  %v11127_v12 = vld [vmem:[%s19603_s4 + $0x1b0] sm:$0xf0] }
 0x6dc   :  { %v9499_v15 = vor.u32 %v11120_v28, %v9498_v48  ;;  %v20135_v28 = vld [vmem:[#allocation110_spill] sm:$0xff] }
 0x6dd   :  { %20129 = vst [vmem:[#allocation93_spill] sm:$0xff] %v16701_v58 }
 0x6de   :  { %20131 = vst [vmem:[#allocation149_spill] sm:$0xff] %v16704_v5 }
 0x6df   :  { %v16731_v29 = vpop.f32.mrf.mxu3  ;;  %v6988_v55 = vpop.f32.mrf.mxu2 }
 0x6e0   :  { %v16733_v44 = vadd.f32 %v6988_v55, %v6701_v7  ;;  %v6704_v7 = vadd.f32 %v16374_v6, %v4250_v33  ;;  %v10638_v6 = vld [vmem:[%s19603_s4 + $0xa50] sm:$0xf]  ;;  %v9526_v33 = vld [vmem:[%s19603_s4 + $0x198] sm:$0xf] }
 0x6e2   :  { %v7239_v21 = vpop.f32.mrf.mxu0  ;;  %v7417_v62 = vpop.f32.mrf.mxu1 }
 0x6e3   :  { %v16736_v58 = vadd.f32 %v7239_v21, %v16376_v40  ;;  %v16739_v5 = vadd.f32 %v7417_v62, %v20133_v54  ;;  %v5949_v62 = vpack.c.b16 %v5557_v37, %v5557_v37 }
 0x6e4   :  { %7030 = vmatmul.bf16.gmra.mxu2 %v10831_v13  ;;  %7654 = vmatmul.bf16.gmra.mxu3 %v9499_v15  ;;  %v11406_v13 = vld [vmem:[%s19603_s4 + $0xa68] sm:$0xf0]  ;;  %v10024_v15 = vld [vmem:[%s19603_s4 + $0x59c] sm:$0xf0] }
 0x6e5   :  { %20132 = vst [vmem:[#allocation94_spill] sm:$0xff] %v16736_v58  ;;  %7278 = vmatmul.bf16.gmra.mxu0 %v10611_v59  ;;  %7456 = vmatmul.bf16.gmra.mxu1 %v9999_v3  ;;  %v4260_v58 = vpop.permute.xlu1 %4259 }
 0x6e7   :  { %v16742_v55 = vpop.f32.mrf.mxu3  ;;  %v6991_v0 = vpop.f32.mrf.mxu2 }
 0x6e8   :  { %v16744_v61 = vadd.f32 %v6991_v0, %v6704_v7  ;;  %v9527_v7 = vor.u32 %v11127_v12, %v9526_v33  ;;  %v10027_v0 = vor.u32 %v11249_v47, %v10024_v15  ;;  %v10666_v15 = vld [vmem:[%s19603_s4 + $0xa88] sm:$0xf] }
 0x6ea   :  { %v7241_v43 = vpop.f32.mrf.mxu0  ;;  %v7419_v48 = vpop.f32.mrf.mxu1 }
 0x6eb   :  { %v16747_v40 = vadd.f32 %v7241_v43, %v16411_v4  ;;  %v16750_v54 = vadd.f32 %v7419_v48, %v20135_v28  ;;  %v6706_v4 = vadd.f32 %v16409_v22, %v4255_v46  ;;  %v10639_v22 = vor.u32 %v11406_v13, %v10638_v6  ;;  %v20138_v46 = vld [vmem:[#allocation58_spill] sm:$0xff]  ;;  %v20141_v13 = vld [vmem:[#allocation20_spill] sm:$0xff] }
 0x6ed   :  { %20134 = vst [vmem:[#allocation168_spill] sm:$0xff] %v16747_v40 }
 0x6ee   :  { %20136 = vst [vmem:[#allocation95_spill] sm:$0xff] %v16750_v54  ;;  %v4270_v54 = vpop.permute.xlu0 %4269 }
 0x6ef   :  { %v16772_v59 = vpop.f32.mrf.mxu3  ;;  %v6993_v3 = vpop.f32.mrf.mxu2 }
 0x6f0   :  { %v16774_v21 = vadd.f32 %v6993_v3, %v6706_v4  ;;  %v6709_v4 = vadd.f32 %v16420_v63, %v4260_v58  ;;  %v9554_v63 = vld [vmem:[%s19603_s4 + $0x1d0] sm:$0xf]  ;;  %v4265_v58 = vpop.permute.xlu2 %4264 }
 0x6f2   :  { %v7244_v43 = vpop.f32.mrf.mxu0  ;;  %v7422_v48 = vpop.f32.mrf.mxu1 }
 0x6f3   :  { %v16777_v28 = vadd.f32 %v7244_v43, %v16422_v49  ;;  %v16780_v40 = vadd.f32 %v7422_v48, %v20138_v46  ;;  %v11256_v43 = vld [vmem:[%s19603_s4 + $0x5bc] sm:$0xf]  ;;  %v10052_v48 = vld [vmem:[%s19603_s4 + $0x5d4] sm:$0xf0] }
 0x6f4   :  { %7035 = vmatmul.bf16.gmra.mxu2 %v5949_v62  ;;  %7659 = vmatmul.bf16.gmra.mxu3 %v9527_v7  ;;  %v11134_v62 = vld [vmem:[%s19603_s4 + $0x1e8] sm:$0xf0]  ;;  %v9332_v7 = vld [vmem:[%s19603_s4 + $0x2c] sm:$0xf0] }
 0x6f5   :  { %20137 = vst [vmem:[#allocation150_spill] sm:$0xff] %v16777_v28  ;;  %7283 = vmatmul.bf16.gmra.mxu0 %v10639_v22  ;;  %7461 = vmatmul.bf16.gmra.mxu1 %v10027_v0  ;;  %v6711_v22 = vadd.f32 %v16455_v41, %v4265_v58  ;;  %v11413_v0 = vld [vmem:[%s19603_s4 + $0xaa0] sm:$0xf0]  ;;  %v10055_v41 = vor.u32 %v11256_v43, %v10052_v48  ;;  %v9360_v43 = vld [vmem:[%s19603_s4 + $0x64] sm:$0xf0] }
 0x6f6   :  { %20139 = vst [vmem:[#allocation152_spill] sm:$0xff] %v16780_v40 }
 0x6f7   :  { %v16783_v3 = vpop.f32.mrf.mxu3  ;;  %v6996_v37 = vpop.f32.mrf.mxu2 }
 0x6f8   :  { %v16785_v6 = vadd.f32 %v6996_v37, %v6709_v4 }
 0x6fa   :  { %v7246_v33 = vpop.f32.mrf.mxu0  ;;  %v7424_v12 = vpop.f32.mrf.mxu1 }
 0x6fb   :  { %v16788_v49 = vadd.f32 %v7246_v33, %v16457_v23  ;;  %v16791_v47 = vadd.f32 %v7424_v12, %v20141_v13  ;;  %v11075_v23 = vld [vmem:[%s19603_s4 + $0x14] sm:$0xf]  ;;  %v9555_v33 = vor.u32 %v11134_v62, %v9554_v63  ;;  %v10667_v13 = vor.u32 %v11413_v0, %v10666_v15  ;;  %v10694_v0 = vld [vmem:[%s19603_s4 + $0xac0] sm:$0xf] }
 0x6fc   :  { %v9335_v12 = vor.u32 %v11075_v23, %v9332_v7 }
 0x6fd   :  { %20140 = vst [vmem:[#allocation65_spill] sm:$0xff] %v16788_v49 }
 0x6fe   :  { %20142 = vst [vmem:[#allocation96_spill] sm:$0xff] %v16791_v47  ;;  %v20144_v47 = vld [vmem:[#allocation107_spill] sm:$0xff] }
 0x6ff   :  { %v6750_v46 = vpop.f32.mrf.mxu3  ;;  %v6998_v4 = vpop.f32.mrf.mxu2 }
 0x700   :  { %v16818_v37 = vadd.f32 %v6998_v4, %v6711_v22  ;;  %v6714_v22 = vadd.f32 %v16466_v34, %v4270_v54  ;;  %v9582_v34 = vld [vmem:[%s19603_s4 + $0x208] sm:$0xf]  ;;  %v4275_v54 = vpop.permute.xlu1 %4274  ;;  %v11420_v4 = vld [vmem:[%s19603_s4 + $0xad8] sm:$0xf0] }
 0x701   :  { %v6716_v48 = vadd.f32 %v16501_v30, %v4275_v54 }
 0x702   :  { %v7249_v58 = vpop.f32.mrf.mxu0  ;;  %v7427_v49 = vpop.f32.mrf.mxu1 }
 0x703   :  { %v16821_v28 = vadd.f32 %v7249_v58, %v16468_v20  ;;  %v16824_v40 = vadd.f32 %v7427_v49, %v20144_v47  ;;  %v20146_v49 = vld [vmem:[#allocation113_spill] sm:$0xff] }
 0x704   :  { %7664 = vmatmul.bf16.gmra.mxu3 %v9555_v33  ;;  %7912 = vmatmul.bf16.vlgmr.msra.gmra.mxu2 %v9335_v12  ;;  %v11263_v33 = vld [vmem:[%s19603_s4 + $0x5f4] sm:$0xf]  ;;  %v10080_v12 = vld [vmem:[%s19603_s4 + $0x60c] sm:$0xf0] }
 0x705   :  { %20143 = vst [vmem:[#allocation78_spill] sm:$0xff] %v16821_v28  ;;  %7288 = vmatmul.bf16.gmra.mxu0 %v10667_v13  ;;  %7466 = vmatmul.bf16.gmra.mxu1 %v10055_v41 }
 0x707   :  { %v7001_v46 = vpop.f32.mrf.mxu2  ;;  %v7625_v63 = vpop.f32.mrf.mxu3 }
 0x708   :  { %v16827_v62 = vadd.f32 %v7001_v46, %v6714_v22  ;;  %v16830_v15 = vadd.f32 %v7625_v63, %v15997_v36  ;;  %v11141_v36 = vld [vmem:[%s19603_s4 + $0x220] sm:$0xf0]  ;;  %v10695_v63 = vor.u32 %v11420_v4, %v10694_v0 }
 0x709   :  { %v9583_v30 = vor.u32 %v11141_v36, %v9582_v34 }
 0x70a   :  { %v7251_v23 = vpop.f32.mrf.mxu0  ;;  %v7429_v20 = vpop.f32.mrf.mxu1 }
 0x70b   :  { %v16833_v7 = vadd.f32 %v7251_v23, %v16503_v52  ;;  %v16836_v47 = vadd.f32 %v7429_v20, %v20146_v49  ;;  %v11082_v52 = vld [vmem:[%s19603_s4 + $0x4c] sm:$0xf]  ;;  %v10083_v23 = vor.u32 %v11263_v33, %v10080_v12  ;;  %v10722_v33 = vld [vmem:[%s19603_s4 + $0xaf8] sm:$0xf]  ;;  %v9388_v12 = vld [vmem:[%s19603_s4 + $0x9c] sm:$0xf0] }
 0x70c   :  { %v9363_v46 = vor.u32 %v11082_v52, %v9360_v43 }
 0x70d   :  { %20145 = vst [vmem:[#allocation97_spill] sm:$0xff] %v16833_v7  ;;  %v20149_v7 = vld [vmem:[#allocation105_spill] sm:$0xff] }
 0x70e   :  { %20147 = vst [vmem:[#allocation154_spill] sm:$0xff] %v16836_v47  ;;  %v4280_v47 = vpop.permute.xlu2 %4279 }
 0x70f   :  { %v7003_v13 = vpop.f32.mrf.mxu2  ;;  %v7627_v41 = vpop.f32.mrf.mxu3 }
 0x710   :  { %v16863_v58 = vadd.f32 %v7003_v13, %v6716_v48  ;;  %v16866_v22 = vadd.f32 %v7627_v41, %v16010_v57  ;;  %v6719_v57 = vadd.f32 %v16512_v1, %v4280_v47  ;;  %v9610_v1 = vld [vmem:[%s19603_s4 + $0x240] sm:$0xf]  ;;  %v4285_v47 = vpop.permute.xlu0 %4284  ;;  %v11427_v41 = vld [vmem:[%s19603_s4 + $0xb10] sm:$0xf0] }
 0x711   :  { %v6721_v13 = vadd.f32 %v16547_v42, %v4285_v47  ;;  %v20153_v47 = vld [vmem:[#allocation35_spill] sm:$0xff] }
 0x712   :  { %v7254_v20 = vpop.f32.mrf.mxu0  ;;  %v7432_v49 = vpop.f32.mrf.mxu1 }
 0x713   :  { %v16869_v54 = vadd.f32 %v7254_v20, %v16514_v11  ;;  %v16872_v28 = vadd.f32 %v7432_v49, %v20149_v7  ;;  %v20151_v7 = vld [vmem:[#allocation112_spill] sm:$0xff] }
 0x714   :  { %7669 = vmatmul.bf16.gmra.mxu3 %v9583_v30  ;;  %7917 = vmatmul.bf16.gmra.mxu2 %v9363_v46  ;;  %v11270_v30 = vld [vmem:[%s19603_s4 + $0x62c] sm:$0xf]  ;;  %v10108_v46 = vld [vmem:[%s19603_s4 + $0x644] sm:$0xf0] }
 0x715   :  { %20148 = vst [vmem:[#allocation156_spill] sm:$0xff] %v16869_v54  ;;  %7293 = vmatmul.bf16.gmra.mxu0 %v10695_v63  ;;  %7471 = vmatmul.bf16.gmra.mxu1 %v10083_v23  ;;  %v4290_v54 = vpop.permute.xlu1 %4289 }
 0x717   :  { %v7006_v48 = vpop.f32.mrf.mxu2  ;;  %v7630_v34 = vpop.f32.mrf.mxu3 }
 0x718   :  { %v16875_v36 = vadd.f32 %v7006_v48, %v6719_v57  ;;  %v16878_v0 = vadd.f32 %v7630_v34, %v16047_v8  ;;  %v11148_v8 = vld [vmem:[%s19603_s4 + $0x258] sm:$0xf0]  ;;  %v10723_v48 = vor.u32 %v11427_v41, %v10722_v33  ;;  %v10111_v34 = vor.u32 %v11270_v30, %v10108_v46  ;;  %v20155_v41 = vld [vmem:[#allocation103_spill] sm:$0xff]  ;;  %v10750_v46 = vld [vmem:[%s19603_s4 + $0xb30] sm:$0xf] }
 0x719   :  { %v9611_v42 = vor.u32 %v11148_v8, %v9610_v1 }
 0x71a   :  { %v7256_v52 = vpop.f32.mrf.mxu0  ;;  %v7434_v11 = vpop.f32.mrf.mxu1 }
 0x71b   :  { %v16881_v43 = vadd.f32 %v7256_v52, %v16549_v39  ;;  %v16884_v4 = vadd.f32 %v7434_v11, %v20151_v7  ;;  %v11089_v39 = vld [vmem:[%s19603_s4 + $0x84] sm:$0xf] }
 0x71c   :  { %v9391_v57 = vor.u32 %v11089_v39, %v9388_v12 }
 0x71d   :  { %20150 = vst [vmem:[#allocation68_spill] sm:$0xff] %v16881_v43 }
 0x71f   :  { %v7008_v63 = vpop.f32.mrf.mxu2  ;;  %v7632_v23 = vpop.f32.mrf.mxu3 }
 0x720   :  { %v16911_v20 = vadd.f32 %v7008_v63, %v6721_v13  ;;  %v16914_v49 = vadd.f32 %v7632_v23, %v16060_v18  ;;  %v6724_v18 = vadd.f32 %v16558_v25, %v4290_v54  ;;  %v9638_v25 = vld [vmem:[%s19603_s4 + $0x278] sm:$0xf]  ;;  %v4295_v54 = vpop.permute.xlu2 %4294 }
 0x721   :  { %v9416_v63 = vld [vmem:[%s19603_s4 + $0xd4] sm:$0xf0]  ;;  %v6726_v23 = vadd.f32 %v16593_v24, %v4295_v54 }
 0x722   :  { %v7259_v52 = vpop.f32.mrf.mxu0  ;;  %v7437_v11 = vpop.f32.mrf.mxu1 }
 0x723   :  { %v16917_v7 = vadd.f32 %v7259_v52, %v16560_v35  ;;  %v16920_v43 = vadd.f32 %v7437_v11, %v20153_v47 }
 0x724   :  { %7674 = vmatmul.bf16.gmra.mxu3 %v9611_v42  ;;  %7922 = vmatmul.bf16.gmra.mxu2 %v9391_v57  ;;  %v11434_v42 = vld [vmem:[%s19603_s4 + $0xb48] sm:$0xf0]  ;;  %v11277_v57 = vld [vmem:[%s19603_s4 + $0x664] sm:$0xf] }
 0x725   :  { %20152 = vst [vmem:[#allocation98_spill] sm:$0xff] %v16917_v7  ;;  %7298 = vmatmul.bf16.gmra.mxu0 %v10723_v48  ;;  %7476 = vmatmul.bf16.gmra.mxu1 %v10111_v34  ;;  %v10136_v48 = vld [vmem:[%s19603_s4 + $0x67c] sm:$0xf0] }
 0x727   :  { %v7011_v13 = vpop.f32.mrf.mxu2  ;;  %v7635_v1 = vpop.f32.mrf.mxu3 }
 0x728   :  { %v16923_v8 = vadd.f32 %v7011_v13, %v6724_v18  ;;  %v16926_v33 = vadd.f32 %v7635_v1, %v16095_v38  ;;  %v11155_v38 = vld [vmem:[%s19603_s4 + $0x290] sm:$0xf0]  ;;  %v10751_v13 = vor.u32 %v11434_v42, %v10750_v46  ;;  %v10139_v1 = vor.u32 %v11277_v57, %v10136_v48  ;;  %v10778_v42 = vld [vmem:[%s19603_s4 + $0xb68] sm:$0xf]  ;;  %v11441_v48 = vld [vmem:[%s19603_s4 + $0xb80] sm:$0xf0] }
 0x729   :  { %v9639_v24 = vor.u32 %v11155_v38, %v9638_v25 }
 0x72a   :  { %v7261_v39 = vpop.f32.mrf.mxu0  ;;  %v7439_v35 = vpop.f32.mrf.mxu1 }
 0x72b   :  { %v16929_v12 = vadd.f32 %v7261_v39, %v16595_v60  ;;  %v16932_v30 = vadd.f32 %v7439_v35, %v20155_v41  ;;  %v11096_v60 = vld [vmem:[%s19603_s4 + $0xbc] sm:$0xf] }
 0x72c   :  { %v9419_v18 = vor.u32 %v11096_v60, %v9416_v63 }
 0x72d   :  { %20154 = vst [vmem:[#allocation67_spill] sm:$0xff] %v16929_v12  ;;  %v4300_v12 = vpop.permute.xlu0 %4299 }
 0x72f   :  { %v7013_v34 = vpop.f32.mrf.mxu2  ;;  %v7637_v52 = vpop.f32.mrf.mxu3 }
 0x730   :  { %v16959_v11 = vadd.f32 %v7013_v34, %v6726_v23  ;;  %v16962_v47 = vadd.f32 %v7637_v52, %v16106_v10  ;;  %v6729_v10 = vadd.f32 %v16604_v45, %v4300_v12  ;;  %v9666_v45 = vld [vmem:[%s19603_s4 + $0x2b0] sm:$0xf]  ;;  %v4305_v12 = vpop.permute.xlu1 %4304  ;;  %v11284_v34 = vld [vmem:[%s19603_s4 + $0x69c] sm:$0xf]  ;;  %v10164_v52 = vld [vmem:[%s19603_s4 + $0x6b4] sm:$0xf0] }
 0x731   :  { %v6731_v57 = vadd.f32 %v16639_v53, %v4305_v12 }
 0x732   :  { %v7264_v39 = vpop.f32.mrf.mxu0  ;;  %v7442_v35 = vpop.f32.mrf.mxu1 }
 0x733   :  { %v16965_v41 = vadd.f32 %v7264_v39, %v16606_v17  ;;  %v16968_v54 = vadd.f32 %v7442_v35, %v15950_v50  ;;  %v10779_v35 = vor.u32 %v11441_v48, %v10778_v42  ;;  %v20160_v42 = vld [vmem:[#allocation73_spill] sm:$0xff] }
 0x734   :  { %7679 = vmatmul.bf16.gmra.mxu3 %v9639_v24  ;;  %7927 = vmatmul.bf16.gmra.mxu2 %v9419_v18 }
 0x735   :  { %20156 = vst [vmem:[#allocation99_spill] sm:$0xff] %v16965_v41  ;;  %7303 = vmatmul.bf16.gmra.mxu0 %v10751_v13  ;;  %7481 = vmatmul.bf16.gmra.mxu1 %v10139_v1 }
 0x737   :  { %v7016_v23 = vpop.f32.mrf.mxu2  ;;  %v7640_v25 = vpop.f32.mrf.mxu3 }
 0x738   :  { %v16971_v38 = vadd.f32 %v7016_v23, %v6729_v10  ;;  %v16974_v46 = vadd.f32 %v7640_v25, %v16141_v31  ;;  %v11162_v31 = vld [vmem:[%s19603_s4 + $0x2c8] sm:$0xf0]  ;;  %v10167_v10 = vor.u32 %v11284_v34, %v10164_v52  ;;  %v20162_v34 = vld [vmem:[#allocation37_spill] sm:$0xff]  ;;  %v4320_v7 = vpop.permute.xlu1 %4319 }
 0x739   :  { %v9667_v53 = vor.u32 %v11162_v31, %v9666_v45 }
 0x73a   :  { %v7266_v60 = vpop.f32.mrf.mxu0  ;;  %v7444_v17 = vpop.f32.mrf.mxu1 }
 0x73b   :  { %v16977_v63 = vadd.f32 %v7266_v60, %v16641_v16  ;;  %v16980_v50 = vadd.f32 %v7444_v17, %v15962_v14  ;;  %v11103_v16 = vld [vmem:[%s19603_s4 + $0xf4] sm:$0xf]  ;;  %v9444_v14 = vld [vmem:[%s19603_s4 + $0x10c] sm:$0xf0]  ;;  %v20159_v17 = vld [vmem:[#allocation101_spill] sm:$0xff] }
 0x73c   :  { %v9447_v39 = vor.u32 %v11103_v16, %v9444_v14 }
 0x73d   :  { %20157 = vst [vmem:[#allocation158_spill] sm:$0xff] %v16977_v63  ;;  %v4310_v63 = vpop.permute.xlu2 %4309 }
 0x73f   :  { %v7018_v24 = vpop.f32.mrf.mxu2  ;;  %v7642_v18 = vpop.f32.mrf.mxu3 }
 0x740   :  { %v17007_v13 = vadd.f32 %v7018_v24, %v6731_v57  ;;  %v17010_v1 = vadd.f32 %v7642_v18, %v16152_v26  ;;  %v6734_v26 = vadd.f32 %v16650_v9, %v4310_v63  ;;  %v10806_v24 = vld [vmem:[%s19603_s4 + $0xba0] sm:$0xf]  ;;  %v9694_v9 = vld [vmem:[%s19603_s4 + $0x2e8] sm:$0xf]  ;;  %v4315_v63 = vpop.permute.xlu0 %4314  ;;  %v11169_v18 = vld [vmem:[%s19603_s4 + $0x300] sm:$0xf0] }
 0x742   :  { %v7269_v23 = vpop.f32.mrf.mxu0  ;;  %v7447_v25 = vpop.f32.mrf.mxu1 }
 0x743   :  { %v17013_v60 = vadd.f32 %v7269_v23, %v16652_v56  ;;  %v17016_v12 = vadd.f32 %v7447_v25, %v20159_v17  ;;  %v10192_v23 = vld [vmem:[%s19603_s4 + $0x6ec] sm:$0xf0] }
 0x744   :  { %7684 = vmatmul.bf16.gmra.mxu3 %v9667_v53  ;;  %7932 = vmatmul.bf16.gmra.mxu2 %v9447_v39  ;;  %v9472_v53 = vld [vmem:[%s19603_s4 + $0x144] sm:$0xf0]  ;;  %v6736_v39 = vadd.f32 %v16685_v19, %v4315_v63  ;;  %v9695_v19 = vor.u32 %v11169_v18, %v9694_v9 }
 0x745   :  { %20158 = vst [vmem:[#allocation159_spill] sm:$0xff] %v17013_v60  ;;  %7308 = vmatmul.bf16.gmra.mxu0 %v10779_v35  ;;  %7486 = vmatmul.bf16.gmra.mxu1 %v10167_v10  ;;  %v11448_v35 = vld [vmem:[%s19603_s4 + $0xbb8] sm:$0xf0]  ;;  %v11291_v10 = vld [vmem:[%s19603_s4 + $0x6d4] sm:$0xf] }
 0x746   :  { %v20165_v60 = vld [vmem:[#allocation116_spill] sm:$0xff] }
 0x747   :  { %v7021_v57 = vpop.f32.mrf.mxu2  ;;  %v7645_v45 = vpop.f32.mrf.mxu3 }
 0x748   :  { %v17019_v31 = vadd.f32 %v7021_v57, %v6734_v26  ;;  %v17022_v16 = vadd.f32 %v7645_v45, %v20160_v42  ;;  %v20163_v57 = vld [vmem:[#allocation52_spill] sm:$0xff] }
 0x74a   :  { %v7271_v14 = vpop.f32.mrf.mxu0  ;;  %v7449_v56 = vpop.f32.mrf.mxu1 }
 0x74b   :  { %v17025_v48 = vadd.f32 %v7271_v14, %v16687_v32  ;;  %v17028_v52 = vadd.f32 %v7449_v56, %v20162_v34  ;;  %v11110_v32 = vld [vmem:[%s19603_s4 + $0x12c] sm:$0xf]  ;;  %v10807_v14 = vor.u32 %v11448_v35, %v10806_v24  ;;  %v10195_v56 = vor.u32 %v11291_v10, %v10192_v23  ;;  %v20167_v24 = vld [vmem:[#allocation126_spill] sm:$0xff]  ;;  %v10834_v23 = vld [vmem:[%s19603_s4 + $0xbd8] sm:$0xf] }
 0x74c   :  { %v9475_v42 = vor.u32 %v11110_v32, %v9472_v53 }
 0x74d   :  { %20161 = vst [vmem:[#allocation56_spill] sm:$0xff] %v17025_v48 }
 0x74f   :  { %v7023_v25 = vpop.f32.mrf.mxu2  ;;  %v7647_v17 = vpop.f32.mrf.mxu3 }
 0x750   :  { %v17055_v26 = vadd.f32 %v7023_v25, %v6736_v39  ;;  %v17058_v45 = vadd.f32 %v7647_v17, %v20163_v57  ;;  %v6739_v39 = vadd.f32 %v16696_v51, %v4320_v7  ;;  %v9722_v51 = vld [vmem:[%s19603_s4 + $0x320] sm:$0xf]  ;;  %v4325_v7 = vpop.permute.xlu2 %4324  ;;  %v11176_v17 = vld [vmem:[%s19603_s4 + $0x338] sm:$0xf0] }
 0x751   :  { %v9500_v57 = vld [vmem:[%s19603_s4 + $0x17c] sm:$0xf0] }
 0x752   :  { %v7274_v34 = vpop.f32.mrf.mxu0  ;;  %v7452_v63 = vpop.f32.mrf.mxu1 }
 0x753   :  { %v17061_v48 = vadd.f32 %v7274_v34, %v16698_v27  ;;  %v17064_v41 = vadd.f32 %v7452_v63, %v20165_v60  ;;  %v20169_v60 = vld [vmem:[#allocation118_spill] sm:$0xff] }
 0x754   :  { %7689 = vmatmul.bf16.gmra.mxu3 %v9695_v19  ;;  %7937 = vmatmul.bf16.gmra.mxu2 %v9475_v42  ;;  %v6741_v19 = vadd.f32 %v16731_v29, %v4325_v7  ;;  %v11455_v42 = vld [vmem:[%s19603_s4 + $0xbf0] sm:$0xf0]  ;;  %v9723_v29 = vor.u32 %v11176_v17, %v9722_v51 }
 0x755   :  { %20164 = vst [vmem:[#allocation100_spill] sm:$0xff] %v17061_v48  ;;  %7313 = vmatmul.bf16.gmra.mxu0 %v10807_v14  ;;  %7491 = vmatmul.bf16.gmra.mxu1 %v10195_v56  ;;  %v11298_v14 = vld [vmem:[%s19603_s4 + $0x70c] sm:$0xf]  ;;  %v10220_v56 = vld [vmem:[%s19603_s4 + $0x724] sm:$0xf0] }
 0x756   :  { %20166 = vst [vmem:[#allocation48_spill] sm:$0xff] %v17064_v41  ;;  %v20173_v48 = vld [vmem:[#allocation91_spill] sm:$0xff]  ;;  %v4330_v41 = vpop.permute.xlu0 %4329 }
 0x757   :  { %v7026_v25 = vpop.f32.mrf.mxu2  ;;  %v7650_v9 = vpop.f32.mrf.mxu3 }
 0x758   :  { %v17067_v18 = vadd.f32 %v7026_v25, %v6739_v39  ;;  %v17070_v32 = vadd.f32 %v7650_v9, %v20167_v24  ;;  %v20171_v25 = vld [vmem:[#allocation128_spill] sm:$0xff] }
 0x75a   :  { %v7276_v53 = vpop.f32.mrf.mxu0  ;;  %v7454_v27 = vpop.f32.mrf.mxu1 }
 0x75b   :  { %v17073_v35 = vadd.f32 %v7276_v53, %v16733_v44  ;;  %v17076_v10 = vadd.f32 %v7454_v27, %v20169_v60  ;;  %v11117_v44 = vld [vmem:[%s19603_s4 + $0x164] sm:$0xf]  ;;  %v10835_v53 = vor.u32 %v11455_v42, %v10834_v23  ;;  %v10223_v27 = vor.u32 %v11298_v14, %v10220_v56  ;;  %v20176_v14 = vld [vmem:[#allocation41_spill] sm:$0xff] }
 0x75c   :  { %v9503_v24 = vor.u32 %v11117_v44, %v9500_v57  ;;  %v20174_v23 = vld [vmem:[#allocation130_spill] sm:$0xff] }
 0x75d   :  { %20168 = vst [vmem:[#allocation102_spill] sm:$0xff] %v17073_v35 }
 0x75e   :  { %20170 = vst [vmem:[#allocation161_spill] sm:$0xff] %v17076_v10 }
 0x75f   :  { %v7028_v34 = vpop.f32.mrf.mxu2  ;;  %v7652_v63 = vpop.f32.mrf.mxu3 }
 0x760   :  { %v17103_v39 = vadd.f32 %v7028_v34, %v6741_v19  ;;  %v17106_v9 = vadd.f32 %v7652_v63, %v20171_v25  ;;  %v6744_v19 = vadd.f32 %v16742_v55, %v4330_v41  ;;  %v9750_v55 = vld [vmem:[%s19603_s4 + $0x358] sm:$0xf]  ;;  %v4335_v41 = vpop.permute.xlu1 %4334  ;;  %v11183_v25 = vld [vmem:[%s19603_s4 + $0x370] sm:$0xf0] }
 0x762   :  { %v7279_v60 = vpop.f32.mrf.mxu0  ;;  %v7457_v7 = vpop.f32.mrf.mxu1 }
 0x763   :  { %v17109_v35 = vadd.f32 %v7279_v60, %v16744_v61  ;;  %v17112_v10 = vadd.f32 %v7457_v7, %v20173_v48  ;;  %v3617_v48 = vld [vmem:[%s19603_s4 + $0xc10] sm:$0xff] }
 0x764   :  { %7694 = vmatmul.bf16.gmra.mxu3 %v9723_v29  ;;  %7942 = vmatmul.bf16.gmra.mxu2 %v9503_v24  ;;  %v5558_v63 = vunpack.c.l.b16 %v3617_v48  ;;  %v11124_v29 = vld [vmem:[%s19603_s4 + $0x19c] sm:$0xf]  ;;  %v6746_v24 = vadd.f32 %v16772_v59, %v4335_v41 }
 0x765   :  { %20172 = vst [vmem:[#allocation163_spill] sm:$0xff] %v17109_v35  ;;  %7318 = vmatmul.bf16.gmra.mxu0 %v10835_v53  ;;  %7496 = vmatmul.bf16.gmra.mxu1 %v10223_v27  ;;  %v11305_v53 = vld [vmem:[%s19603_s4 + $0x744] sm:$0xf]  ;;  %v10248_v27 = vld [vmem:[%s19603_s4 + $0x75c] sm:$0xf0] }
 0x766   :  { %v10251_v48 = vor.u32 %v11305_v53, %v10248_v27 }
 0x767   :  { %v7031_v34 = vpop.f32.mrf.mxu2  ;;  %v7655_v51 = vpop.f32.mrf.mxu3 }
 0x768   :  { %v17115_v17 = vadd.f32 %v7031_v34, %v6744_v19  ;;  %v17118_v44 = vadd.f32 %v7655_v51, %v20174_v23  ;;  %v20178_v34 = vld [vmem:[#allocation62_spill] sm:$0xff]  ;;  %v9751_v23 = vor.u32 %v11183_v25, %v9750_v55 }
 0x76a   :  { %v7281_v57 = vpop.f32.mrf.mxu0  ;;  %v7459_v61 = vpop.f32.mrf.mxu1 }
 0x76b   :  { %v17124_v42 = vadd.f32 %v7281_v57, %v16774_v21  ;;  %v17127_v56 = vadd.f32 %v7459_v61, %v20176_v14  ;;  %v9528_v21 = vld [vmem:[%s19603_s4 + $0x1b4] sm:$0xf0]  ;;  %v5950_v61 = vpack.c.b16 %v5558_v63, %v5558_v63  ;;  %v20182_v63 = vld [vmem:[#allocation66_spill] sm:$0xff] }
 0x76c   :  { %v9531_v57 = vor.u32 %v11124_v29, %v9528_v21 }
 0x76d   :  { %20175 = vst [vmem:[#allocation50_spill] sm:$0xff] %v17124_v42  ;;  %v20180_v42 = vld [vmem:[#allocation45_spill] sm:$0xff] }
 0x76e   :  { %20177 = vst [vmem:[#allocation104_spill] sm:$0xff] %v17127_v56  ;;  %v4340_v56 = vpop.permute.xlu2 %4339 }
 0x76f   :  { %v7033_v60 = vpop.f32.mrf.mxu2  ;;  %v7657_v7 = vpop.f32.mrf.mxu3 }
 0x770   :  { %v17148_v19 = vadd.f32 %v7033_v60, %v6746_v24  ;;  %v17151_v51 = vadd.f32 %v7657_v7, %v20178_v34  ;;  %v6749_v24 = vadd.f32 %v16783_v3, %v4340_v56  ;;  %v9778_v7 = vld [vmem:[%s19603_s4 + $0x390] sm:$0xf]  ;;  %v11190_v3 = vld [vmem:[%s19603_s4 + $0x3a8] sm:$0xf0]  ;;  %v11131_v56 = vld [vmem:[%s19603_s4 + $0x1d4] sm:$0xf] }
 0x771   :  { %v9338_v34 = vld [vmem:[%s19603_s4 + $0x18] sm:$0xf] }
 0x772   :  { %v7284_v59 = vpop.f32.mrf.mxu0  ;;  %v7462_v14 = vpop.f32.mrf.mxu1 }
 0x773   :  { %v17154_v41 = vadd.f32 %v7284_v59, %v16785_v6  ;;  %v17157_v35 = vadd.f32 %v7462_v14, %v20180_v42  ;;  %v20184_v42 = vld [vmem:[#allocation120_spill] sm:$0xff]  ;;  %v20186_v14 = vld [vmem:[#allocation134_spill] sm:$0xff] }
 0x774   :  { %7699 = vmatmul.bf16.gmra.mxu3 %v9751_v23  ;;  %7947 = vmatmul.bf16.gmra.mxu2 %v9531_v57  ;;  %v11079_v23 = vld [vmem:[%s19603_s4 + $0x30] sm:$0xf0]  ;;  %v11312_v57 = vld [vmem:[%s19603_s4 + $0x77c] sm:$0xf] }
 0x775   :  { %20179 = vst [vmem:[#allocation49_spill] sm:$0xff] %v17154_v41  ;;  %7323 = vmatmul.bf16.gmra.mxu0 %v5950_v61  ;;  %7501 = vmatmul.bf16.gmra.mxu1 %v10251_v48  ;;  %v10276_v61 = vld [vmem:[%s19603_s4 + $0x794] sm:$0xf0]  ;;  %v20188_v41 = vld [vmem:[#allocation122_spill] sm:$0xff] }
 0x776   :  { %20181 = vst [vmem:[#allocation106_spill] sm:$0xff] %v17157_v35 }
 0x777   :  { %v7036_v60 = vpop.f32.mrf.mxu2  ;;  %v7660_v55 = vpop.f32.mrf.mxu3 }
 0x778   :  { %v17160_v25 = vadd.f32 %v7036_v60, %v6749_v24  ;;  %v17163_v29 = vadd.f32 %v7660_v55, %v20182_v63  ;;  %v9779_v60 = vor.u32 %v11190_v3, %v9778_v7  ;;  %v9339_v63 = vor.u32 %v11079_v23, %v9338_v34  ;;  %v20190_v7 = vld [vmem:[#allocation70_spill] sm:$0xff] }
 0x77a   :  { %v7286_v21 = vpop.f32.mrf.mxu0  ;;  %v7464_v6 = vpop.f32.mrf.mxu1 }
 0x77b   :  { %v17166_v53 = vadd.f32 %v7286_v21, %v16818_v37  ;;  %v17169_v27 = vadd.f32 %v7464_v6, %v20184_v42  ;;  %v9556_v37 = vld [vmem:[%s19603_s4 + $0x1ec] sm:$0xf0]  ;;  %v10279_v21 = vor.u32 %v11312_v57, %v10276_v61  ;;  %v9806_v57 = vld [vmem:[%s19603_s4 + $0x3c8] sm:$0xf]  ;;  %v11197_v61 = vld [vmem:[%s19603_s4 + $0x3e0] sm:$0xf0] }
 0x77c   :  { %v9559_v55 = vor.u32 %v11131_v56, %v9556_v37 }
 0x77d   :  { %20183 = vst [vmem:[#allocation166_spill] sm:$0xff] %v17166_v53 }
 0x77e   :  { %20185 = vst [vmem:[#allocation169_spill] sm:$0xff] %v17169_v27 }
 0x77f   :  { %v7038_v48 = vpop.f32.mrf.mxu2  ;;  %v7662_v59 = vpop.f32.mrf.mxu3 }
 0x780   :  { %v17196_v24 = vadd.f32 %v7662_v59, %v20186_v14  ;;  %v9366_v14 = vld [vmem:[%s19603_s4 + $0x50] sm:$0xf] }
 0x782   :  { %v7289_v6 = vpop.f32.mrf.mxu0  ;;  %v7467_v42 = vpop.f32.mrf.mxu1 }
 0x783   :  { %v17199_v53 = vadd.f32 %v7289_v6, %v16827_v62  ;;  %v17202_v27 = vadd.f32 %v7467_v42, %v20188_v41  ;;  %v20192_v41 = vld [vmem:[#allocation84_spill] sm:$0xff]  ;;  %v20194_v42 = vld [vmem:[#allocation74_spill] sm:$0xff] }
 0x784   :  { %7704 = vmatmul.bf16.gmra.mxu3 %v9779_v60  ;;  %7952 = vmatmul.bf16.gmra.mxu2 %v9559_v55  ;;  %v11086_v60 = vld [vmem:[%s19603_s4 + $0x68] sm:$0xf0]  ;;  %v11319_v55 = vld [vmem:[%s19603_s4 + $0x7b4] sm:$0xf] }
 0x785   :  { %20187 = vst [vmem:[#allocation34_spill] sm:$0xff] %v17199_v53  ;;  %10852 = vmatmul.msk.bf16.vlgmr.msra.gmra.mxu0 %vm6291_vm2, %v9339_v63  ;;  %7506 = vmatmul.bf16.gmra.mxu1 %v10279_v21  ;;  %v10304_v63 = vld [vmem:[%s19603_s4 + $0x7cc] sm:$0xf0] }
 0x786   :  { %20189 = vst [vmem:[#allocation108_spill] sm:$0xff] %v17202_v27  ;;  %v20196_v27 = vld [vmem:[#allocation124_spill] sm:$0xff] }
 0x787   :  { %v7665_v48 = vpop.f32.mrf.mxu3  ;;  %v7913_v59 = vpop.f32.mrf.mxu2 }
 0x788   :  { %v17206_v3 = vadd.f32 %v7665_v48, %v20190_v7  ;;  %v17209_v56 = vadd.f32 %v7913_v59, %v16830_v15  ;;  %v11138_v15 = vld [vmem:[%s19603_s4 + $0x20c] sm:$0xf]  ;;  %v9807_v7 = vor.u32 %v11197_v61, %v9806_v57 }
 0x78a   :  { %v7291_v37 = vpop.f32.mrf.mxu0  ;;  %v7469_v34 = vpop.f32.mrf.mxu1 }
 0x78b   :  { %v17212_v62 = vadd.f32 %v7291_v37, %v16863_v58  ;;  %v17215_v23 = vadd.f32 %v7469_v34, %v20192_v41  ;;  %v9584_v58 = vld [vmem:[%s19603_s4 + $0x224] sm:$0xf0]  ;;  %v9367_v34 = vor.u32 %v11086_v60, %v9366_v14  ;;  %v10307_v41 = vor.u32 %v11319_v55, %v10304_v63  ;;  %v11204_v14 = vld [vmem:[%s19603_s4 + $0x418] sm:$0xf0]  ;;  %v11093_v55 = vld [vmem:[%s19603_s4 + $0xa0] sm:$0xf0] }
 0x78c   :  { %v9587_v37 = vor.u32 %v11138_v15, %v9584_v58  ;;  %v9394_v60 = vld [vmem:[%s19603_s4 + $0x88] sm:$0xf]  ;;  %v11326_v63 = vld [vmem:[%s19603_s4 + $0x7ec] sm:$0xf] }
 0x78d   :  { %20191 = vst [vmem:[#allocation13_spill] sm:$0xff] %v17212_v62 }
 0x78e   :  { %20193 = vst [vmem:[#allocation47_spill] sm:$0xff] %v17215_v23 }
 0x78f   :  { %v7667_v21 = vpop.f32.mrf.mxu3  ;;  %v7915_v6 = vpop.f32.mrf.mxu2 }
 0x790   :  { %v17242_v48 = vadd.f32 %v7667_v21, %v20194_v42  ;;  %v17245_v59 = vadd.f32 %v7915_v6, %v16866_v22  ;;  %v20198_v6 = vld [vmem:[#allocation138_spill] sm:$0xff]  ;;  %v10332_v42 = vld [vmem:[%s19603_s4 + $0x804] sm:$0xf0] }
 0x792   :  { %v7294_v62 = vpop.f32.mrf.mxu0  ;;  %v7472_v53 = vpop.f32.mrf.mxu1 }
 0x793   :  { %v17248_v23 = vadd.f32 %v7294_v62, %v16875_v36  ;;  %v17251_v35 = vadd.f32 %v7472_v53, %v20196_v27  ;;  %v20200_v53 = vld [vmem:[#allocation76_spill] sm:$0xff]  ;;  %v9834_v62 = vld [vmem:[%s19603_s4 + $0x400] sm:$0xf] }
 0x794   :  { %7709 = vmatmul.bf16.gmra.mxu3 %v9807_v7  ;;  %7957 = vmatmul.bf16.gmra.mxu2 %v9587_v37 }
 0x795   :  { %20195 = vst [vmem:[#allocation111_spill] sm:$0xff] %v17248_v23  ;;  %10853 = vmatmul.msk.bf16.gmra.mxu0 %vm6291_vm2, %v9367_v34  ;;  %7511 = vmatmul.bf16.gmra.mxu1 %v10307_v41  ;;  %v20202_v34 = vld [vmem:[#allocation77_spill] sm:$0xff] }
 0x796   :  { %20197 = vst [vmem:[#allocation170_spill] sm:$0xff] %v17251_v35 }
 0x797   :  { %v7670_v21 = vpop.f32.mrf.mxu3  ;;  %v7918_v22 = vpop.f32.mrf.mxu2 }
 0x798   :  { %v17255_v57 = vadd.f32 %v7670_v21, %v20198_v6  ;;  %v17258_v61 = vadd.f32 %v7918_v22, %v16878_v0  ;;  %v11145_v0 = vld [vmem:[%s19603_s4 + $0x244] sm:$0xf]  ;;  %v9835_v22 = vor.u32 %v11204_v14, %v9834_v62 }
 0x79a   :  { %v7296_v15 = vpop.f32.mrf.mxu0  ;;  %v7474_v58 = vpop.f32.mrf.mxu1 }
 0x79b   :  { %v17261_v36 = vadd.f32 %v7296_v15, %v16911_v20  ;;  %v17264_v27 = vadd.f32 %v7474_v58, %v20200_v53  ;;  %v9612_v20 = vld [vmem:[%s19603_s4 + $0x25c] sm:$0xf0]  ;;  %v9395_v15 = vor.u32 %v11093_v55, %v9394_v60  ;;  %v10335_v58 = vor.u32 %v11326_v63, %v10332_v42  ;;  %v9862_v60 = vld [vmem:[%s19603_s4 + $0x438] sm:$0xf]  ;;  %v11211_v55 = vld [vmem:[%s19603_s4 + $0x450] sm:$0xf0] }
 0x79c   :  { %v9615_v6 = vor.u32 %v11145_v0, %v9612_v20  ;;  %v9422_v63 = vld [vmem:[%s19603_s4 + $0xc0] sm:$0xf]  ;;  %v11100_v42 = vld [vmem:[%s19603_s4 + $0xd8] sm:$0xf0] }
 0x79d   :  { %20199 = vst [vmem:[#allocation171_spill] sm:$0xff] %v17261_v36 }
 0x79e   :  { %20201 = vst [vmem:[#allocation12_spill] sm:$0xff] %v17264_v27  ;;  %v20204_v27 = vld [vmem:[#allocation75_spill] sm:$0xff] }
 0x79f   :  { %v7672_v7 = vpop.f32.mrf.mxu3  ;;  %v7920_v37 = vpop.f32.mrf.mxu2 }
 0x7a0   :  { %v17291_v41 = vadd.f32 %v7672_v7, %v20202_v34  ;;  %v17294_v21 = vadd.f32 %v7920_v37, %v16914_v49  ;;  %v20206_v37 = vld [vmem:[#allocation80_spill] sm:$0xff]  ;;  %v11333_v34 = vld [vmem:[%s19603_s4 + $0x824] sm:$0xf] }
 0x7a2   :  { %v7299_v53 = vpop.f32.mrf.mxu0  ;;  %v7477_v36 = vpop.f32.mrf.mxu1 }
 0x7a3   :  { %v17297_v23 = vadd.f32 %v7299_v53, %v16923_v8  ;;  %v17300_v35 = vadd.f32 %v7477_v36, %v20204_v27  ;;  %v20208_v36 = vld [vmem:[#allocation63_spill] sm:$0xff] }
 0x7a4   :  { %7714 = vmatmul.bf16.gmra.mxu3 %v9835_v22  ;;  %7962 = vmatmul.bf16.gmra.mxu2 %v9615_v6  ;;  %v10360_v22 = vld [vmem:[%s19603_s4 + $0x83c] sm:$0xf0] }
 0x7a5   :  { %20203 = vst [vmem:[#allocation157_spill] sm:$0xff] %v17297_v23  ;;  %10854 = vmatmul.msk.bf16.gmra.mxu0 %vm6291_vm2, %v9395_v15  ;;  %7516 = vmatmul.bf16.gmra.mxu1 %v10335_v58  ;;  %v20210_v58 = vld [vmem:[#allocation142_spill] sm:$0xff] }
 0x7a6   :  { %20205 = vst [vmem:[#allocation114_spill] sm:$0xff] %v17300_v35 }
 0x7a7   :  { %v7675_v7 = vpop.f32.mrf.mxu3  ;;  %v7923_v49 = vpop.f32.mrf.mxu2 }
 0x7a8   :  { %v17304_v62 = vadd.f32 %v7675_v7, %v20206_v37  ;;  %v17307_v14 = vadd.f32 %v7923_v49, %v16926_v33  ;;  %v11152_v33 = vld [vmem:[%s19603_s4 + $0x27c] sm:$0xf]  ;;  %v9863_v49 = vor.u32 %v11211_v55, %v9862_v60 }
 0x7aa   :  { %v7301_v0 = vpop.f32.mrf.mxu0  ;;  %v7479_v20 = vpop.f32.mrf.mxu1 }
 0x7ab   :  { %v17310_v8 = vadd.f32 %v7301_v0, %v16959_v11  ;;  %v17313_v27 = vadd.f32 %v7479_v20, %v20208_v36  ;;  %v9640_v11 = vld [vmem:[%s19603_s4 + $0x294] sm:$0xf0]  ;;  %v9423_v0 = vor.u32 %v11100_v42, %v9422_v63  ;;  %v10363_v20 = vor.u32 %v11333_v34, %v10360_v22  ;;  %v9890_v63 = vld [vmem:[%s19603_s4 + $0x470] sm:$0xf]  ;;  %v11218_v42 = vld [vmem:[%s19603_s4 + $0x488] sm:$0xf0] }
 0x7ac   :  { %v9643_v37 = vor.u32 %v11152_v33, %v9640_v11  ;;  %v9450_v34 = vld [vmem:[%s19603_s4 + $0xf8] sm:$0xf]  ;;  %v11107_v22 = vld [vmem:[%s19603_s4 + $0x110] sm:$0xf0] }
 0x7ad   :  { %20207 = vst [vmem:[#allocation10_spill] sm:$0xff] %v17310_v8 }
 0x7ae   :  { %20209 = vst [vmem:[#allocation117_spill] sm:$0xff] %v17313_v27  ;;  %v20212_v27 = vld [vmem:[#allocation55_spill] sm:$0xff] }
 0x7af   :  { %v7677_v6 = vpop.f32.mrf.mxu3  ;;  %v7925_v15 = vpop.f32.mrf.mxu2 }
 0x7b0   :  { %v17340_v53 = vadd.f32 %v7677_v6, %v20210_v58  ;;  %v17343_v7 = vadd.f32 %v7925_v15, %v16962_v47  ;;  %v20214_v15 = vld [vmem:[#allocation43_spill] sm:$0xff]  ;;  %v11340_v58 = vld [vmem:[%s19603_s4 + $0x85c] sm:$0xf] }
 0x7b2   :  { %v7304_v36 = vpop.f32.mrf.mxu0  ;;  %v7482_v8 = vpop.f32.mrf.mxu1 }
 0x7b3   :  { %v17346_v23 = vadd.f32 %v7304_v36, %v16971_v38  ;;  %v17349_v35 = vadd.f32 %v7482_v8, %v20212_v27  ;;  %v20216_v8 = vld [vmem:[#allocation132_spill] sm:$0xff] }
 0x7b4   :  { %7719 = vmatmul.bf16.gmra.mxu3 %v9863_v49  ;;  %7967 = vmatmul.bf16.gmra.mxu2 %v9643_v37  ;;  %v10388_v49 = vld [vmem:[%s19603_s4 + $0x874] sm:$0xf0] }
 0x7b5   :  { %20211 = vst [vmem:[#allocation172_spill] sm:$0xff] %v17346_v23  ;;  %10855 = vmatmul.msk.bf16.gmra.mxu0 %vm6291_vm2, %v9423_v0  ;;  %7521 = vmatmul.bf16.gmra.mxu1 %v10363_v20  ;;  %v20218_v20 = vld [vmem:[#allocation16_spill] sm:$0xff] }
 0x7b6   :  { %20213 = vst [vmem:[#allocation173_spill] sm:$0xff] %v17349_v35 }
 0x7b7   :  { %v7680_v6 = vpop.f32.mrf.mxu3  ;;  %v7928_v47 = vpop.f32.mrf.mxu2 }
 0x7b8   :  { %v17353_v60 = vadd.f32 %v7680_v6, %v20214_v15  ;;  %v17356_v55 = vadd.f32 %v7928_v47, %v16974_v46  ;;  %v11159_v46 = vld [vmem:[%s19603_s4 + $0x2b4] sm:$0xf]  ;;  %v9891_v47 = vor.u32 %v11218_v42, %v9890_v63 }
 0x7ba   :  { %v7306_v33 = vpop.f32.mrf.mxu0  ;;  %v7484_v11 = vpop.f32.mrf.mxu1 }
 0x7bb   :  { %v17359_v38 = vadd.f32 %v7306_v33, %v17007_v13  ;;  %v17362_v27 = vadd.f32 %v7484_v11, %v20216_v8  ;;  %v9668_v13 = vld [vmem:[%s19603_s4 + $0x2cc] sm:$0xf0]  ;;  %v9451_v33 = vor.u32 %v11107_v22, %v9450_v34  ;;  %v10391_v11 = vor.u32 %v11340_v58, %v10388_v49  ;;  %v9918_v34 = vld [vmem:[%s19603_s4 + $0x4a8] sm:$0xf]  ;;  %v11225_v22 = vld [vmem:[%s19603_s4 + $0x4c0] sm:$0xf0] }
 0x7bc   :  { %v9671_v15 = vor.u32 %v11159_v46, %v9668_v13  ;;  %v9478_v58 = vld [vmem:[%s19603_s4 + $0x130] sm:$0xf]  ;;  %v11114_v49 = vld [vmem:[%s19603_s4 + $0x148] sm:$0xf0] }
 0x7bd   :  { %20215 = vst [vmem:[#allocation119_spill] sm:$0xff] %v17359_v38 }
 0x7be   :  { %20217 = vst [vmem:[#allocation11_spill] sm:$0xff] %v17362_v27  ;;  %v20220_v27 = vld [vmem:[#allocation44_spill] sm:$0xff] }
 0x7bf   :  { %v7682_v37 = vpop.f32.mrf.mxu3  ;;  %v7930_v0 = vpop.f32.mrf.mxu2 }
 0x7c0   :  { %v17389_v36 = vadd.f32 %v7682_v37, %v20218_v20  ;;  %v17392_v6 = vadd.f32 %v7930_v0, %v17010_v1  ;;  %v20222_v0 = vld [vmem:[#allocation42_spill] sm:$0xff]  ;;  %v11347_v20 = vld [vmem:[%s19603_s4 + $0x894] sm:$0xf] }
 0x7c2   :  { %v7309_v8 = vpop.f32.mrf.mxu0  ;;  %v7487_v38 = vpop.f32.mrf.mxu1 }
 0x7c3   :  { %v17395_v23 = vadd.f32 %v7309_v8, %v17019_v31  ;;  %v17398_v35 = vadd.f32 %v7487_v38, %v20220_v27  ;;  %v20224_v38 = vld [vmem:[#allocation57_spill] sm:$0xff] }
 0x7c4   :  { %7724 = vmatmul.bf16.gmra.mxu3 %v9891_v47  ;;  %7972 = vmatmul.bf16.gmra.mxu2 %v9671_v15  ;;  %v10416_v47 = vld [vmem:[%s19603_s4 + $0x8ac] sm:$0xf0] }
 0x7c5   :  { %20219 = vst [vmem:[#allocation121_spill] sm:$0xff] %v17395_v23  ;;  %10856 = vmatmul.msk.bf16.gmra.mxu0 %vm6291_vm2, %v9451_v33  ;;  %7526 = vmatmul.bf16.gmra.mxu1 %v10391_v11  ;;  %v20226_v11 = vld [vmem:[#allocation144_spill] sm:$0xff] }
 0x7c6   :  { %20221 = vst [vmem:[#allocation174_spill] sm:$0xff] %v17398_v35 }
 0x7c7   :  { %v7685_v37 = vpop.f32.mrf.mxu3  ;;  %v7933_v1 = vpop.f32.mrf.mxu2 }
 0x7c8   :  { %v17402_v63 = vadd.f32 %v7685_v37, %v20222_v0  ;;  %v17405_v42 = vadd.f32 %v7933_v1, %v17022_v16  ;;  %v11166_v16 = vld [vmem:[%s19603_s4 + $0x2ec] sm:$0xf]  ;;  %v9919_v1 = vor.u32 %v11225_v22, %v9918_v34 }
 0x7ca   :  { %v7311_v46 = vpop.f32.mrf.mxu0  ;;  %v7489_v13 = vpop.f32.mrf.mxu1 }
 0x7cb   :  { %v17408_v31 = vadd.f32 %v7311_v46, %v17055_v26  ;;  %v17411_v27 = vadd.f32 %v7489_v13, %v20224_v38  ;;  %v9696_v26 = vld [vmem:[%s19603_s4 + $0x304] sm:$0xf0]  ;;  %v9479_v46 = vor.u32 %v11114_v49, %v9478_v58  ;;  %v10419_v13 = vor.u32 %v11347_v20, %v10416_v47  ;;  %v9946_v58 = vld [vmem:[%s19603_s4 + $0x4e0] sm:$0xf]  ;;  %v11121_v20 = vld [vmem:[%s19603_s4 + $0x180] sm:$0xf0] }
 0x7cc   :  { %v9699_v0 = vor.u32 %v11166_v16, %v9696_v26  ;;  %v9506_v49 = vld [vmem:[%s19603_s4 + $0x168] sm:$0xf]  ;;  %v11354_v47 = vld [vmem:[%s19603_s4 + $0x8cc] sm:$0xf] }
 0x7cd   :  { %20223 = vst [vmem:[#allocation175_spill] sm:$0xff] %v17408_v31 }
 0x7ce   :  { %20225 = vst [vmem:[#allocation164_spill] sm:$0xff] %v17411_v27  ;;  %v20228_v27 = vld [vmem:[#allocation136_spill] sm:$0xff] }
 0x7cf   :  { %v7687_v15 = vpop.f32.mrf.mxu3  ;;  %v7935_v33 = vpop.f32.mrf.mxu2 }
 0x7d0   :  { %v17438_v8 = vadd.f32 %v7687_v15, %v20226_v11  ;;  %v17441_v37 = vadd.f32 %v7935_v33, %v17058_v45  ;;  %v10444_v33 = vld [vmem:[%s19603_s4 + $0x8e4] sm:$0xf0] }
 0x7d2   :  { %v7314_v38 = vpop.f32.mrf.mxu0  ;;  %v7492_v31 = vpop.f32.mrf.mxu1 }
 0x7d3   :  { %v17444_v23 = vadd.f32 %v7314_v38, %v17067_v18  ;;  %v17447_v35 = vadd.f32 %v7492_v31, %v20228_v27  ;;  %v20231_v31 = vld [vmem:[#allocation46_spill] sm:$0xff] }
 0x7d4   :  { %7729 = vmatmul.bf16.gmra.mxu3 %v9919_v1  ;;  %7977 = vmatmul.bf16.gmra.mxu2 %v9699_v0  ;;  %v20233_v0 = vld [vmem:[#allocation87_spill] sm:$0xff] }
 0x7d5   :  { %20227 = vst [vmem:[#allocation123_spill] sm:$0xff] %v17444_v23  ;;  %10857 = vmatmul.msk.bf16.gmra.mxu0 %vm6291_vm2, %v9479_v46  ;;  %7531 = vmatmul.bf16.gmra.mxu1 %v10419_v13  ;;  %v20235_v23 = vld [vmem:[#allocation36_spill] sm:$0xff] }
 0x7d6   :  { %20229 = vst [vmem:[#allocation162_spill] sm:$0xff] %v17447_v35 }
 0x7d7   :  { %v7690_v15 = vpop.f32.mrf.mxu3  ;;  %v7938_v45 = vpop.f32.mrf.mxu2 }
 0x7d8   :  { %v17451_v34 = vadd.f32 %v7690_v15, %v16601_v2  ;;  %v17454_v22 = vadd.f32 %v7938_v45, %v17070_v32  ;;  %v11232_v2 = vld [vmem:[%s19603_s4 + $0x4f8] sm:$0xf0]  ;;  %v11173_v32 = vld [vmem:[%s19603_s4 + $0x324] sm:$0xf]  ;;  %v9507_v45 = vor.u32 %v11121_v20, %v9506_v49  ;;  %v9974_v20 = vld [vmem:[%s19603_s4 + $0x518] sm:$0xf] }
 0x7d9   :  { %v9947_v38 = vor.u32 %v11232_v2, %v9946_v58 }
 0x7da   :  { %v7316_v16 = vpop.f32.mrf.mxu0  ;;  %v7494_v26 = vpop.f32.mrf.mxu1 }
 0x7db   :  { %v17457_v18 = vadd.f32 %v7316_v16, %v17103_v39  ;;  %v17460_v27 = vadd.f32 %v7494_v26, %v20231_v31  ;;  %v9724_v39 = vld [vmem:[%s19603_s4 + $0x33c] sm:$0xf0]  ;;  %v10447_v16 = vor.u32 %v11354_v47, %v10444_v33  ;;  %v11239_v47 = vld [vmem:[%s19603_s4 + $0x530] sm:$0xf0] }
 0x7dc   :  { %v9727_v15 = vor.u32 %v11173_v32, %v9724_v39  ;;  %v9534_v33 = vld [vmem:[%s19603_s4 + $0x1a0] sm:$0xf] }
 0x7dd   :  { %20230 = vst [vmem:[#allocation125_spill] sm:$0xff] %v17457_v18 }
 0x7de   :  { %20232 = vst [vmem:[#allocation176_spill] sm:$0xff] %v17460_v27 }
 0x7df   :  { %v7692_v11 = vpop.f32.mrf.mxu3  ;;  %v7940_v1 = vpop.f32.mrf.mxu2 }
 0x7e0   :  { %v17487_v46 = vadd.f32 %v7692_v11, %v20233_v0  ;;  %v17490_v13 = vadd.f32 %v7940_v1, %v17106_v9  ;;  %v20237_v1 = vld [vmem:[#allocation90_spill] sm:$0xff]  ;;  %v11128_v0 = vld [vmem:[%s19603_s4 + $0x1b8] sm:$0xf0] }
 0x7e2   :  { %v7319_v26 = vpop.f32.mrf.mxu0  ;;  %v7497_v31 = vpop.f32.mrf.mxu1 }
 0x7e3   :  { %v17493_v18 = vadd.f32 %v7319_v26, %v17115_v17  ;;  %v17496_v27 = vadd.f32 %v7497_v31, %v20235_v23  ;;  %v20239_v23 = vld [vmem:[#allocation140_spill] sm:$0xff]  ;;  %v20241_v26 = vld [vmem:[#allocation147_spill] sm:$0xff] }
 0x7e4   :  { %7734 = vmatmul.bf16.gmra.mxu3 %v9947_v38  ;;  %7982 = vmatmul.bf16.gmra.mxu2 %v9727_v15  ;;  %v11361_v38 = vld [vmem:[%s19603_s4 + $0x904] sm:$0xf]  ;;  %v10472_v15 = vld [vmem:[%s19603_s4 + $0x91c] sm:$0xf0] }
 0x7e5   :  { %20234 = vst [vmem:[#allocation177_spill] sm:$0xff] %v17493_v18  ;;  %10858 = vmatmul.msk.bf16.gmra.mxu0 %vm6291_vm2, %v9507_v45  ;;  %7536 = vmatmul.bf16.gmra.mxu1 %v10447_v16 }
 0x7e6   :  { %20236 = vst [vmem:[#allocation7_spill] sm:$0xff] %v17496_v27 }
 0x7e7   :  { %v7695_v11 = vpop.f32.mrf.mxu3  ;;  %v7943_v9 = vpop.f32.mrf.mxu2 }
 0x7e8   :  { %v17500_v58 = vadd.f32 %v7695_v11, %v20237_v1  ;;  %v17503_v2 = vadd.f32 %v7943_v9, %v17118_v44  ;;  %v11180_v44 = vld [vmem:[%s19603_s4 + $0x35c] sm:$0xf]  ;;  %v9975_v9 = vor.u32 %v11239_v47, %v9974_v20 }
 0x7ea   :  { %v7321_v32 = vpop.f32.mrf.mxu0  ;;  %v7499_v39 = vpop.f32.mrf.mxu1 }
 0x7eb   :  { %v17506_v17 = vadd.f32 %v7321_v32, %v17148_v19  ;;  %v17509_v49 = vadd.f32 %v7499_v39, %v20239_v23  ;;  %v9752_v19 = vld [vmem:[%s19603_s4 + $0x374] sm:$0xf0]  ;;  %v9535_v32 = vor.u32 %v11128_v0, %v9534_v33  ;;  %v10475_v39 = vor.u32 %v11361_v38, %v10472_v15  ;;  %v11187_v0 = vld [vmem:[%s19603_s4 + $0x394] sm:$0xf] }
 0x7ec   :  { %v9755_v1 = vor.u32 %v11180_v44, %v9752_v19  ;;  %v9562_v38 = vld [vmem:[%s19603_s4 + $0x1d8] sm:$0xf]  ;;  %v11135_v15 = vld [vmem:[%s19603_s4 + $0x1f0] sm:$0xf0] }
 0x7ed   :  { %20238 = vst [vmem:[#allocation127_spill] sm:$0xff] %v17506_v17 }
 0x7ee   :  { %20240 = vst [vmem:[#allocation89_spill] sm:$0xff] %v17509_v49  ;;  %v20243_v49 = vld [vmem:[#allocation160_spill] sm:$0xff] }
 0x7ef   :  { %v7697_v45 = vpop.f32.mrf.mxu3  ;;  %v7945_v16 = vpop.f32.mrf.mxu2 }
 0x7f0   :  { %v17536_v31 = vadd.f32 %v7697_v45, %v20241_v26  ;;  %v17539_v11 = vadd.f32 %v7945_v16, %v17151_v51  ;;  %v20245_v16 = vld [vmem:[#allocation148_spill] sm:$0xff]  ;;  %v11368_v26 = vld [vmem:[%s19603_s4 + $0x93c] sm:$0xf] }
 0x7f2   :  { %v7324_v23 = vpop.f32.mrf.mxu0  ;;  %v7502_v17 = vpop.f32.mrf.mxu1 }
 0x7f3   :  { %v17542_v18 = vadd.f32 %v7324_v23, %v17160_v25  ;;  %v17545_v27 = vadd.f32 %v7502_v17, %v20243_v49  ;;  %v20246_v25 = vld [vmem:[#allocation83_spill] sm:$0xff]  ;;  %v10002_v17 = vld [vmem:[%s19603_s4 + $0x550] sm:$0xf] }
 0x7f4   :  { %7739 = vmatmul.bf16.gmra.mxu3 %v9975_v9  ;;  %7987 = vmatmul.bf16.gmra.mxu2 %v9755_v1  ;;  %v11246_v49 = vld [vmem:[%s19603_s4 + $0x568] sm:$0xf0]  ;;  %v10500_v9 = vld [vmem:[%s19603_s4 + $0x954] sm:$0xf0] }
 0x7f5   :  { %20242 = vst [vmem:[#allocation129_spill] sm:$0xff] %v17542_v18  ;;  %10859 = vmatmul.msk.bf16.gmra.mxu0 %vm6291_vm2, %v9535_v32  ;;  %7541 = vmatmul.bf16.gmra.mxu1 %v10475_v39  ;;  %v20248_v39 = vld [vmem:[#allocation149_spill] sm:$0xff] }
 0x7f6   :  { %20244 = vst [vmem:[#allocation22_spill] sm:$0xff] %v17545_v27  ;;  %v20249_v27 = vld [vmem:[#allocation4_spill] sm:$0xff] }
 0x7f7   :  { %v7700_v45 = vpop.f32.mrf.mxu3  ;;  %v7948_v51 = vpop.f32.mrf.mxu2 }
 0x7f8   :  { %v17549_v20 = vadd.f32 %v7700_v45, %v20245_v16  ;;  %v17552_v47 = vadd.f32 %v7948_v51, %v17163_v29  ;;  %v9780_v29 = vld [vmem:[%s19603_s4 + $0x3ac] sm:$0xf0]  ;;  %v10003_v51 = vor.u32 %v11246_v49, %v10002_v17 }
 0x7f9   :  { %v9783_v16 = vor.u32 %v11187_v0, %v9780_v29  ;;  %v20250_v29 = vld [vmem:[#allocation85_spill] sm:$0xff] }
 0x7fa   :  { %v7326_v44 = vpop.f32.mrf.mxu0  ;;  %v7504_v19 = vpop.f32.mrf.mxu1 }
 0x7fb   :  { %v17555_v33 = vadd.f32 %v7504_v19, %v20246_v25  ;;  %v9563_v44 = vor.u32 %v11135_v15, %v9562_v38  ;;  %v10503_v19 = vor.u32 %v11368_v26, %v10500_v9  ;;  %v11253_v15 = vld [vmem:[%s19603_s4 + $0x5a0] sm:$0xf0]  ;;  %v11142_v26 = vld [vmem:[%s19603_s4 + $0x228] sm:$0xf0]  ;;  %v11375_v9 = vld [vmem:[%s19603_s4 + $0x974] sm:$0xf] }
 0x7fd   :  { %20247 = vst [vmem:[#allocation21_spill] sm:$0xff] %v17555_v33 }
 0x7ff   :  { %v7702_v1 = vpop.f32.mrf.mxu3  ;;  %v7950_v32 = vpop.f32.mrf.mxu2 }
 0x800   :  { %v17582_v23 = vadd.f32 %v7702_v1, %v20248_v39  ;;  %v17585_v45 = vadd.f32 %v7950_v32, %v17196_v24  ;;  %v10528_v1 = vld [vmem:[%s19603_s4 + $0x98c] sm:$0xf0] }
 0x802   :  { %v8201_v25 = vpop.f32.mrf.mxu0  ;;  %v7507_v18 = vpop.f32.mrf.mxu1 }
 0x803   :  { %v8202_v33 = vadd.f32 %v8201_v25, %v17209_v56  ;;  %v17589_v35 = vadd.f32 %v7507_v18, %v20249_v27 }
 0x804   :  { %7744 = vmatmul.bf16.gmra.mxu3 %v10003_v51  ;;  %7992 = vmatmul.bf16.gmra.mxu2 %v9783_v16  ;;  %v20252_v51 = vld [vmem:[#allocation95_spill] sm:$0xff] }
 0x805   :  { %8481 = vst.msk [vmem:[%s19604_s6] sm:$0xff] %vm8480_vm3, %v8202_v33  ;;  %10860 = vmatmul.msk.bf16.gmra.mxu0 %vm6291_vm2, %v9563_v44  ;;  %7546 = vmatmul.bf16.gmra.mxu1 %v10503_v19  ;;  %v10030_v33 = vld [vmem:[%s19603_s4 + $0x588] sm:$0xf] }
 0x806   :  { %v10031_v19 = vor.u32 %v11253_v15, %v10030_v33  ;;  %v20255_v15 = vld [vmem:[#allocation152_spill] sm:$0xff] }
 0x807   :  { %v7705_v24 = vpop.f32.mrf.mxu3  ;;  %v7953_v17 = vpop.f32.mrf.mxu2 }
 0x808   :  { %v17597_v49 = vadd.f32 %v7705_v24, %v16739_v5  ;;  %v17600_v56 = vadd.f32 %v7953_v17, %v17206_v3  ;;  %v11194_v5 = vld [vmem:[%s19603_s4 + $0x3cc] sm:$0xf]  ;;  %v9808_v3 = vld [vmem:[%s19603_s4 + $0x3e4] sm:$0xf0]  ;;  %v10531_v17 = vor.u32 %v11375_v9, %v10528_v1  ;;  %v20256_v9 = vld [vmem:[#allocation6_spill] sm:$0xff] }
 0x809   :  { %v9811_v25 = vor.u32 %v11194_v5, %v9808_v3 }
 0x80a   :  { %v8203_v18 = vpop.f32.mrf.mxu0  ;;  %v7509_v27 = vpop.f32.mrf.mxu1 }
 0x80b   :  { %v8204_v0 = vadd.f32 %v8203_v18, %v17245_v59  ;;  %v17604_v38 = vadd.f32 %v7509_v27, %v20250_v29  ;;  %v9590_v59 = vld [vmem:[%s19603_s4 + $0x210] sm:$0xf]  ;;  %v20253_v29 = vld [vmem:[#allocation145_spill] sm:$0xff] }
 0x80c   :  { %v9591_v24 = vor.u32 %v11142_v26, %v9590_v59 }
 0x80d   :  { %20251 = vst [vmem:[#allocation81_spill] sm:$0xff] %v17604_v38 }
 0x80e   :  { %8482 = vst.msk [vmem:[%s19604_s6 + $0x8] sm:$0xff] %vm8480_vm3, %v8204_v0 }
 0x80f   :  { %v7707_v32 = vpop.f32.mrf.mxu3  ;;  %v7955_v39 = vpop.f32.mrf.mxu2 }
 0x810   :  { %v17635_v16 = vadd.f32 %v7707_v32, %v20252_v51  ;;  %v17638_v44 = vadd.f32 %v7955_v39, %v17242_v48  ;;  %v10058_v32 = vld [vmem:[%s19603_s4 + $0x5c0] sm:$0xf]  ;;  %v11260_v39 = vld [vmem:[%s19603_s4 + $0x5d8] sm:$0xf0]  ;;  %v9618_v51 = vld [vmem:[%s19603_s4 + $0x248] sm:$0xf] }
 0x812   :  { %v8206_v18 = vpop.f32.mrf.mxu0  ;;  %v7512_v27 = vpop.f32.mrf.mxu1 }
 0x813   :  { %v8207_v0 = vadd.f32 %v8206_v18, %v17258_v61  ;;  %v17642_v38 = vadd.f32 %v7512_v27, %v20253_v29  ;;  %v20258_v27 = vld [vmem:[#allocation96_spill] sm:$0xff] }
 0x814   :  { %7749 = vmatmul.bf16.gmra.mxu3 %v10031_v19  ;;  %7997 = vmatmul.bf16.gmra.mxu2 %v9811_v25  ;;  %v11149_v19 = vld [vmem:[%s19603_s4 + $0x260] sm:$0xf0]  ;;  %v11382_v25 = vld [vmem:[%s19603_s4 + $0x9ac] sm:$0xf] }
 0x815   :  { %20254 = vst [vmem:[#allocation131_spill] sm:$0xff] %v17642_v38  ;;  %10861 = vmatmul.msk.bf16.gmra.mxu0 %vm6291_vm2, %v9591_v24  ;;  %7551 = vmatmul.bf16.gmra.mxu1 %v10531_v17  ;;  %v10556_v24 = vld [vmem:[%s19603_s4 + $0x9c4] sm:$0xf0] }
 0x816   :  { %8483 = vst.msk [vmem:[%s19604_s6 + $0x10] sm:$0xff] %vm8480_vm3, %v8207_v0 }
 0x817   :  { %v7710_v48 = vpop.f32.mrf.mxu3  ;;  %v7958_v33 = vpop.f32.mrf.mxu2 }
 0x818   :  { %v17650_v5 = vadd.f32 %v7710_v48, %v20255_v15  ;;  %v17653_v61 = vadd.f32 %v7958_v33, %v17255_v57  ;;  %v11201_v57 = vld [vmem:[%s19603_s4 + $0x404] sm:$0xf]  ;;  %v10059_v48 = vor.u32 %v11260_v39, %v10058_v32  ;;  %v9619_v15 = vor.u32 %v11149_v19, %v9618_v51 }
 0x819   :  { %v20260_v51 = vld [vmem:[#allocation146_spill] sm:$0xff] }
 0x81a   :  { %v8208_v3 = vpop.f32.mrf.mxu0  ;;  %v7514_v59 = vpop.f32.mrf.mxu1 }
 0x81b   :  { %v8209_v26 = vadd.f32 %v8208_v3, %v17294_v21  ;;  %v17657_v1 = vadd.f32 %v7514_v59, %v20256_v9  ;;  %v9836_v21 = vld [vmem:[%s19603_s4 + $0x41c] sm:$0xf0]  ;;  %v10559_v3 = vor.u32 %v11382_v25, %v10556_v24  ;;  %v10086_v25 = vld [vmem:[%s19603_s4 + $0x5f8] sm:$0xf]  ;;  %v11267_v24 = vld [vmem:[%s19603_s4 + $0x610] sm:$0xf0] }
 0x81c   :  { %v9839_v33 = vor.u32 %v11201_v57, %v9836_v21 }
 0x81d   :  { %20257 = vst [vmem:[#allocation82_spill] sm:$0xff] %v17657_v1  ;;  %v20259_v1 = vld [vmem:[#allocation115_spill] sm:$0xff] }
 0x81e   :  { %8484 = vst.msk [vmem:[%s19604_s6 + $0x18] sm:$0xff] %vm8480_vm3, %v8209_v26 }
 0x81f   :  { %v7712_v17 = vpop.f32.mrf.mxu3  ;;  %v7960_v18 = vpop.f32.mrf.mxu2 }
 0x820   :  { %v17688_v0 = vadd.f32 %v7712_v17, %v20258_v27  ;;  %v17691_v29 = vadd.f32 %v7960_v18, %v17291_v41  ;;  %v11156_v17 = vld [vmem:[%s19603_s4 + $0x298] sm:$0xf0]  ;;  %v11389_v18 = vld [vmem:[%s19603_s4 + $0x9e4] sm:$0xf]  ;;  %v10584_v27 = vld [vmem:[%s19603_s4 + $0x9fc] sm:$0xf0] }
 0x822   :  { %v8211_v59 = vpop.f32.mrf.mxu0  ;;  %v7517_v26 = vpop.f32.mrf.mxu1 }
 0x823   :  { %v8212_v9 = vadd.f32 %v8211_v59, %v17307_v14  ;;  %v17695_v38 = vadd.f32 %v7517_v26, %v20259_v1  ;;  %v10087_v26 = vor.u32 %v11267_v24, %v10086_v25 }
 0x824   :  { %7754 = vmatmul.bf16.gmra.mxu3 %v10059_v48  ;;  %8002 = vmatmul.bf16.gmra.mxu2 %v9839_v33 }
 0x825   :  { %8485 = vst.msk [vmem:[%s19604_s6 + $0x20] sm:$0xff] %vm8480_vm3, %v8212_v9  ;;  %10862 = vmatmul.msk.bf16.gmra.mxu0 %vm6291_vm2, %v9619_v15  ;;  %7556 = vmatmul.bf16.gmra.mxu1 %v10559_v3  ;;  %v20262_v15 = vld [vmem:[#allocation154_spill] sm:$0xff] }
 0x827   :  { %v7715_v41 = vpop.f32.mrf.mxu3  ;;  %v7963_v32 = vpop.f32.mrf.mxu2 }
 0x828   :  { %v17703_v39 = vadd.f32 %v7715_v41, %v16824_v40  ;;  %v17706_v14 = vadd.f32 %v7963_v32, %v17304_v62  ;;  %v11208_v40 = vld [vmem:[%s19603_s4 + $0x43c] sm:$0xf]  ;;  %v9864_v62 = vld [vmem:[%s19603_s4 + $0x454] sm:$0xf0]  ;;  %v10587_v32 = vor.u32 %v11389_v18, %v10584_v27  ;;  %v10114_v27 = vld [vmem:[%s19603_s4 + $0x630] sm:$0xf] }
 0x829   :  { %v9867_v9 = vor.u32 %v11208_v40, %v9864_v62 }
 0x82a   :  { %v8213_v1 = vpop.f32.mrf.mxu0  ;;  %v7519_v57 = vpop.f32.mrf.mxu1 }
 0x82b   :  { %v8214_v21 = vadd.f32 %v8213_v1, %v17343_v7  ;;  %v17710_v19 = vadd.f32 %v7519_v57, %v20260_v51  ;;  %v9646_v7 = vld [vmem:[%s19603_s4 + $0x280] sm:$0xf]  ;;  %v20263_v51 = vld [vmem:[#allocation92_spill] sm:$0xff] }
 0x82c   :  { %v9647_v41 = vor.u32 %v11156_v17, %v9646_v7  ;;  %v20264_v17 = vld [vmem:[#allocation93_spill] sm:$0xff] }
 0x82d   :  { %20261 = vst [vmem:[#allocation133_spill] sm:$0xff] %v17710_v19 }
 0x82e   :  { %8486 = vst.msk [vmem:[%s19604_s6 + $0x28] sm:$0xff] %vm8480_vm3, %v8214_v21 }
 0x82f   :  { %v7717_v48 = vpop.f32.mrf.mxu3  ;;  %v7965_v33 = vpop.f32.mrf.mxu2 }
 0x830   :  { %v17741_v3 = vadd.f32 %v7717_v48, %v20262_v15  ;;  %v17744_v59 = vadd.f32 %v7965_v33, %v17340_v53  ;;  %v11274_v48 = vld [vmem:[%s19603_s4 + $0x648] sm:$0xf0]  ;;  %v11163_v33 = vld [vmem:[%s19603_s4 + $0x2d0] sm:$0xf0]  ;;  %v11396_v15 = vld [vmem:[%s19603_s4 + $0xa1c] sm:$0xf] }
 0x832   :  { %v8216_v1 = vpop.f32.mrf.mxu0  ;;  %v7522_v57 = vpop.f32.mrf.mxu1 }
 0x833   :  { %v8217_v21 = vadd.f32 %v8216_v1, %v17356_v55  ;;  %v17748_v19 = vadd.f32 %v7522_v57, %v20263_v51  ;;  %v10115_v57 = vor.u32 %v11274_v48, %v10114_v27 }
 0x834   :  { %7759 = vmatmul.bf16.gmra.mxu3 %v10087_v26  ;;  %8007 = vmatmul.bf16.gmra.mxu2 %v9867_v9  ;;  %v10612_v26 = vld [vmem:[%s19603_s4 + $0xa34] sm:$0xf0] }
 0x835   :  { %8487 = vst.msk [vmem:[%s19604_s6 + $0x30] sm:$0xff] %vm8480_vm3, %v8217_v21  ;;  %10863 = vmatmul.msk.bf16.gmra.mxu0 %vm6291_vm2, %v9647_v41  ;;  %7561 = vmatmul.bf16.gmra.mxu1 %v10587_v32 }
 0x837   :  { %v7720_v53 = vpop.f32.mrf.mxu3  ;;  %v7968_v25 = vpop.f32.mrf.mxu2 }
 0x838   :  { %v17756_v24 = vadd.f32 %v7720_v53, %v16872_v28  ;;  %v17759_v55 = vadd.f32 %v7968_v25, %v17353_v60  ;;  %v11215_v28 = vld [vmem:[%s19603_s4 + $0x474] sm:$0xf]  ;;  %v9892_v60 = vld [vmem:[%s19603_s4 + $0x48c] sm:$0xf0]  ;;  %v10615_v53 = vor.u32 %v11396_v15, %v10612_v26  ;;  %v10142_v15 = vld [vmem:[%s19603_s4 + $0x668] sm:$0xf] }
 0x839   :  { %v9895_v21 = vor.u32 %v11215_v28, %v9892_v60  ;;  %v11281_v26 = vld [vmem:[%s19603_s4 + $0x680] sm:$0xf0] }
 0x83a   :  { %v8218_v40 = vpop.f32.mrf.mxu0  ;;  %v7524_v62 = vpop.f32.mrf.mxu1 }
 0x83b   :  { %v8219_v7 = vadd.f32 %v8218_v40, %v17392_v6  ;;  %v17763_v18 = vadd.f32 %v7524_v62, %v20264_v17  ;;  %v9674_v6 = vld [vmem:[%s19603_s4 + $0x2b8] sm:$0xf] }
 0x83c   :  { %v9675_v51 = vor.u32 %v11163_v33, %v9674_v6  ;;  %v20266_v6 = vld [vmem:[#allocation168_spill] sm:$0xff] }
 0x83d   :  { %8488 = vst.msk [vmem:[%s19604_s6 + $0x38] sm:$0xff] %vm8480_vm3, %v8219_v7  ;;  %v20265_v7 = vld [vmem:[#allocation94_spill] sm:$0xff] }
 0x83f   :  { %v7722_v9 = vpop.f32.mrf.mxu3  ;;  %v7970_v41 = vpop.f32.mrf.mxu2 }
 0x840   :  { %v17794_v32 = vadd.f32 %v7722_v9, %v16884_v4  ;;  %v17797_v1 = vadd.f32 %v7970_v41, %v17389_v36  ;;  %v11170_v9 = vld [vmem:[%s19603_s4 + $0x308] sm:$0xf0]  ;;  %v11403_v41 = vld [vmem:[%s19603_s4 + $0xa54] sm:$0xf] }
 0x842   :  { %v8221_v25 = vpop.f32.mrf.mxu0  ;;  %v7527_v40 = vpop.f32.mrf.mxu1 }
 0x843   :  { %v8222_v62 = vadd.f32 %v8221_v25, %v17405_v42  ;;  %v17801_v17 = vadd.f32 %v7527_v40, %v20265_v7  ;;  %v10143_v40 = vor.u32 %v11281_v26, %v10142_v15 }
 0x844   :  { %7764 = vmatmul.bf16.gmra.mxu3 %v10115_v57  ;;  %8012 = vmatmul.bf16.gmra.mxu2 %v9895_v21  ;;  %v10640_v57 = vld [vmem:[%s19603_s4 + $0xa6c] sm:$0xf0] }
 0x845   :  { %8489 = vst.msk [vmem:[%s19604_s6 + $0x40] sm:$0xff] %vm8480_vm3, %v8222_v62  ;;  %10864 = vmatmul.msk.bf16.gmra.mxu0 %vm6291_vm2, %v9675_v51  ;;  %7566 = vmatmul.bf16.gmra.mxu1 %v10615_v53 }
 0x847   :  { %v7725_v4 = vpop.f32.mrf.mxu3  ;;  %v7973_v36 = vpop.f32.mrf.mxu2 }
 0x848   :  { %v17809_v27 = vadd.f32 %v7725_v4, %v16920_v43  ;;  %v17812_v42 = vadd.f32 %v7973_v36, %v17402_v63  ;;  %v11222_v43 = vld [vmem:[%s19603_s4 + $0x4ac] sm:$0xf]  ;;  %v9920_v63 = vld [vmem:[%s19603_s4 + $0x4c4] sm:$0xf0]  ;;  %v10643_v4 = vor.u32 %v11403_v41, %v10640_v57  ;;  %v10170_v41 = vld [vmem:[%s19603_s4 + $0x6a0] sm:$0xf] }
 0x849   :  { %v9923_v62 = vor.u32 %v11222_v43, %v9920_v63  ;;  %v11288_v57 = vld [vmem:[%s19603_s4 + $0x6b8] sm:$0xf0] }
 0x84a   :  { %v8223_v48 = vpop.f32.mrf.mxu0  ;;  %v7529_v28 = vpop.f32.mrf.mxu1 }
 0x84b   :  { %v8224_v60 = vadd.f32 %v8223_v48, %v17441_v37  ;;  %v17816_v33 = vadd.f32 %v7529_v28, %v20266_v6  ;;  %v9702_v37 = vld [vmem:[%s19603_s4 + $0x2f0] sm:$0xf] }
 0x84c   :  { %v9703_v7 = vor.u32 %v11170_v9, %v9702_v37  ;;  %v20268_v37 = vld [vmem:[#allocation65_spill] sm:$0xff] }
 0x84d   :  { %8490 = vst.msk [vmem:[%s19604_s6 + $0x48] sm:$0xff] %vm8480_vm3, %v8224_v60  ;;  %v20267_v60 = vld [vmem:[#allocation150_spill] sm:$0xff] }
 0x84f   :  { %v7727_v21 = vpop.f32.mrf.mxu3  ;;  %v7975_v51 = vpop.f32.mrf.mxu2 }
 0x850   :  { %v17847_v53 = vadd.f32 %v7727_v21, %v16932_v30  ;;  %v17850_v25 = vadd.f32 %v7975_v51, %v17438_v8  ;;  %v11177_v21 = vld [vmem:[%s19603_s4 + $0x340] sm:$0xf0]  ;;  %v11410_v51 = vld [vmem:[%s19603_s4 + $0xa8c] sm:$0xf] }
 0x852   :  { %v8226_v36 = vpop.f32.mrf.mxu0  ;;  %v7532_v48 = vpop.f32.mrf.mxu1 }
 0x853   :  { %v8227_v28 = vadd.f32 %v8226_v36, %v17454_v22  ;;  %v17854_v6 = vadd.f32 %v7532_v48, %v20267_v60  ;;  %v10171_v48 = vor.u32 %v11288_v57, %v10170_v41 }
 0x854   :  { %7769 = vmatmul.bf16.gmra.mxu3 %v10143_v40  ;;  %8017 = vmatmul.bf16.gmra.mxu2 %v9923_v62  ;;  %v10668_v40 = vld [vmem:[%s19603_s4 + $0xaa4] sm:$0xf0] }
 0x855   :  { %8491 = vst.msk [vmem:[%s19604_s6 + $0x50] sm:$0xff] %vm8480_vm3, %v8227_v28  ;;  %10865 = vmatmul.msk.bf16.gmra.mxu0 %vm6291_vm2, %v9703_v7  ;;  %7571 = vmatmul.bf16.gmra.mxu1 %v10643_v4 }
 0x857   :  { %v7730_v30 = vpop.f32.mrf.mxu3  ;;  %v7978_v8 = vpop.f32.mrf.mxu2 }
 0x858   :  { %v17862_v15 = vadd.f32 %v7730_v30, %v16968_v54  ;;  %v17865_v22 = vadd.f32 %v7978_v8, %v17451_v34  ;;  %v11229_v54 = vld [vmem:[%s19603_s4 + $0x4e4] sm:$0xf]  ;;  %v9948_v34 = vld [vmem:[%s19603_s4 + $0x4fc] sm:$0xf0]  ;;  %v10671_v30 = vor.u32 %v11410_v51, %v10668_v40  ;;  %v10198_v51 = vld [vmem:[%s19603_s4 + $0x6d8] sm:$0xf] }
 0x859   :  { %v9951_v28 = vor.u32 %v11229_v54, %v9948_v34  ;;  %v11295_v40 = vld [vmem:[%s19603_s4 + $0x6f0] sm:$0xf0] }
 0x85a   :  { %v8228_v26 = vpop.f32.mrf.mxu0  ;;  %v7534_v43 = vpop.f32.mrf.mxu1 }
 0x85b   :  { %v8229_v63 = vadd.f32 %v8228_v26, %v17490_v13  ;;  %v17869_v9 = vadd.f32 %v7534_v43, %v20268_v37  ;;  %v9730_v13 = vld [vmem:[%s19603_s4 + $0x328] sm:$0xf] }
 0x85c   :  { %v9731_v60 = vor.u32 %v11177_v21, %v9730_v13  ;;  %v20270_v13 = vld [vmem:[#allocation97_spill] sm:$0xff] }
 0x85d   :  { %8492 = vst.msk [vmem:[%s19604_s6 + $0x58] sm:$0xff] %vm8480_vm3, %v8229_v63  ;;  %v20269_v63 = vld [vmem:[#allocation78_spill] sm:$0xff] }
 0x85f   :  { %v7732_v62 = vpop.f32.mrf.mxu3  ;;  %v7980_v7 = vpop.f32.mrf.mxu2 }
 0x860   :  { %v17900_v4 = vadd.f32 %v7732_v62, %v16980_v50  ;;  %v17903_v36 = vadd.f32 %v7980_v7, %v17487_v46  ;;  %v11184_v62 = vld [vmem:[%s19603_s4 + $0x378] sm:$0xf0]  ;;  %v11417_v7 = vld [vmem:[%s19603_s4 + $0xac4] sm:$0xf] }
 0x862   :  { %v8231_v8 = vpop.f32.mrf.mxu0  ;;  %v7537_v26 = vpop.f32.mrf.mxu1 }
 0x863   :  { %v8232_v43 = vadd.f32 %v8231_v8, %v17503_v2  ;;  %v17907_v37 = vadd.f32 %v7537_v26, %v20269_v63  ;;  %v10199_v26 = vor.u32 %v11295_v40, %v10198_v51  ;;  %v20273_v51 = vld [vmem:[#allocation48_spill] sm:$0xff] }
 0x864   :  { %7774 = vmatmul.bf16.gmra.mxu3 %v10171_v48  ;;  %8022 = vmatmul.bf16.gmra.mxu2 %v9951_v28  ;;  %v10696_v48 = vld [vmem:[%s19603_s4 + $0xadc] sm:$0xf0] }
 0x865   :  { %8493 = vst.msk [vmem:[%s19604_s6 + $0x60] sm:$0xff] %vm8480_vm3, %v8232_v43  ;;  %10866 = vmatmul.msk.bf16.gmra.mxu0 %vm6291_vm2, %v9731_v60  ;;  %7576 = vmatmul.bf16.gmra.mxu1 %v10671_v30 }
 0x867   :  { %v7735_v50 = vpop.f32.mrf.mxu3  ;;  %v7983_v46 = vpop.f32.mrf.mxu2 }
 0x868   :  { %v17915_v41 = vadd.f32 %v7735_v50, %v17016_v12  ;;  %v17918_v2 = vadd.f32 %v7983_v46, %v17500_v58  ;;  %v11236_v12 = vld [vmem:[%s19603_s4 + $0x51c] sm:$0xf]  ;;  %v9976_v58 = vld [vmem:[%s19603_s4 + $0x534] sm:$0xf0]  ;;  %v10699_v50 = vor.u32 %v11417_v7, %v10696_v48  ;;  %v10226_v48 = vld [vmem:[%s19603_s4 + $0x710] sm:$0xf] }
 0x869   :  { %v9979_v43 = vor.u32 %v11236_v12, %v9976_v58 }
 0x86a   :  { %v8233_v57 = vpop.f32.mrf.mxu0  ;;  %v7539_v54 = vpop.f32.mrf.mxu1 }
 0x86b   :  { %v8234_v34 = vadd.f32 %v8233_v57, %v17539_v11  ;;  %v17922_v21 = vadd.f32 %v7539_v54, %v20270_v13  ;;  %v9758_v11 = vld [vmem:[%s19603_s4 + $0x360] sm:$0xf] }
 0x86c   :  { %v9759_v63 = vor.u32 %v11184_v62, %v9758_v11  ;;  %v20274_v62 = vld [vmem:[#allocation68_spill] sm:$0xff] }
 0x86d   :  { %8494 = vst.msk [vmem:[%s19604_s6 + $0x68] sm:$0xff] %vm8480_vm3, %v8234_v34  ;;  %v20271_v34 = vld [vmem:[#allocation156_spill] sm:$0xff] }
 0x86f   :  { %v7737_v28 = vpop.f32.mrf.mxu3  ;;  %v7985_v60 = vpop.f32.mrf.mxu2 }
 0x870   :  { %v17953_v30 = vadd.f32 %v7737_v28, %v17028_v52  ;;  %v17956_v8 = vadd.f32 %v7985_v60, %v17536_v31  ;;  %v11302_v28 = vld [vmem:[%s19603_s4 + $0x728] sm:$0xf0]  ;;  %v9786_v60 = vld [vmem:[%s19603_s4 + $0x398] sm:$0xf] }
 0x872   :  { %v8236_v46 = vpop.f32.mrf.mxu0  ;;  %v7542_v57 = vpop.f32.mrf.mxu1 }
 0x873   :  { %v8237_v54 = vadd.f32 %v8236_v46, %v17552_v47  ;;  %v17960_v13 = vadd.f32 %v7542_v57, %v20271_v34  ;;  %v20276_v57 = vld [vmem:[#allocation161_spill] sm:$0xff] }
 0x874   :  { %7779 = vmatmul.bf16.gmra.mxu3 %v10199_v26  ;;  %8027 = vmatmul.bf16.gmra.mxu2 %v9979_v43  ;;  %v11191_v26 = vld [vmem:[%s19603_s4 + $0x3b0] sm:$0xf0]  ;;  %v11424_v43 = vld [vmem:[%s19603_s4 + $0xafc] sm:$0xf] }
 0x875   :  { %20272 = vst [vmem:[#allocation151_spill] sm:$0xff] %v17960_v13  ;;  %10867 = vmatmul.msk.bf16.gmra.mxu0 %vm6291_vm2, %v9759_v63  ;;  %7581 = vmatmul.bf16.gmra.mxu1 %v10699_v50  ;;  %v10724_v63 = vld [vmem:[%s19603_s4 + $0xb14] sm:$0xf0] }
 0x876   :  { %8495 = vst.msk [vmem:[%s19604_s6 + $0x70] sm:$0xff] %vm8480_vm3, %v8237_v54 }
 0x877   :  { %v7740_v52 = vpop.f32.mrf.mxu3  ;;  %v7988_v31 = vpop.f32.mrf.mxu2 }
 0x878   :  { %v17968_v40 = vadd.f32 %v7740_v52, %v20273_v51  ;;  %v17971_v47 = vadd.f32 %v7988_v31, %v17549_v20  ;;  %v11243_v20 = vld [vmem:[%s19603_s4 + $0x554] sm:$0xf]  ;;  %v10227_v52 = vor.u32 %v11302_v28, %v10226_v48  ;;  %v9787_v51 = vor.u32 %v11191_v26, %v9786_v60  ;;  %v20278_v60 = vld [vmem:[#allocation67_spill] sm:$0xff] }
 0x87a   :  { %v8238_v12 = vpop.f32.mrf.mxu0  ;;  %v7544_v58 = vpop.f32.mrf.mxu1 }
 0x87b   :  { %v8239_v11 = vadd.f32 %v8238_v12, %v17585_v45  ;;  %v17975_v7 = vadd.f32 %v7544_v58, %v20274_v62  ;;  %v10004_v45 = vld [vmem:[%s19603_s4 + $0x56c] sm:$0xf0]  ;;  %v10727_v12 = vor.u32 %v11424_v43, %v10724_v63  ;;  %v10254_v43 = vld [vmem:[%s19603_s4 + $0x748] sm:$0xf]  ;;  %v11309_v63 = vld [vmem:[%s19603_s4 + $0x760] sm:$0xf0] }
 0x87c   :  { %v10007_v31 = vor.u32 %v11243_v20, %v10004_v45 }
 0x87d   :  { %20275 = vst [vmem:[#allocation165_spill] sm:$0xff] %v17975_v7  ;;  %v20277_v7 = vld [vmem:[#allocation98_spill] sm:$0xff] }
 0x87e   :  { %8496 = vst.msk [vmem:[%s19604_s6 + $0x78] sm:$0xff] %vm8480_vm3, %v8239_v11 }
 0x87f   :  { %v7742_v50 = vpop.f32.mrf.mxu3  ;;  %v7990_v46 = vpop.f32.mrf.mxu2 }
 0x880   :  { %v18006_v54 = vadd.f32 %v7742_v50, %v20276_v57  ;;  %v18009_v34 = vadd.f32 %v7990_v46, %v17582_v23  ;;  %v11198_v50 = vld [vmem:[%s19603_s4 + $0x3e8] sm:$0xf0]  ;;  %v11431_v46 = vld [vmem:[%s19603_s4 + $0xb34] sm:$0xf]  ;;  %v10752_v57 = vld [vmem:[%s19603_s4 + $0xb4c] sm:$0xf0] }
 0x882   :  { %v8241_v58 = vpop.f32.mrf.mxu0  ;;  %v7547_v11 = vpop.f32.mrf.mxu1 }
 0x883   :  { %v8242_v62 = vadd.f32 %v8241_v58, %v17600_v56  ;;  %v18013_v13 = vadd.f32 %v7547_v11, %v20277_v7  ;;  %v10255_v11 = vor.u32 %v11309_v63, %v10254_v43  ;;  %v20283_v63 = vld [vmem:[#allocation106_spill] sm:$0xff] }
 0x884   :  { %7784 = vmatmul.bf16.gmra.mxu3 %v10227_v52  ;;  %8032 = vmatmul.bf16.gmra.mxu2 %v10007_v31 }
 0x885   :  { %8497 = vst.msk [vmem:[%s19604_s6 + $0x80] sm:$0xff] %vm8480_vm3, %v8242_v62  ;;  %10868 = vmatmul.msk.bf16.gmra.mxu0 %vm6291_vm2, %v9787_v51  ;;  %7586 = vmatmul.bf16.gmra.mxu1 %v10727_v12  ;;  %v20280_v51 = vld [vmem:[#allocation104_spill] sm:$0xff] }
 0x887   :  { %v7745_v23 = vpop.f32.mrf.mxu3  ;;  %v7993_v48 = vpop.f32.mrf.mxu2 }
 0x888   :  { %v18021_v28 = vadd.f32 %v7745_v23, %v17112_v10  ;;  %v18024_v56 = vadd.f32 %v7993_v48, %v17597_v49  ;;  %v11250_v10 = vld [vmem:[%s19603_s4 + $0x58c] sm:$0xf]  ;;  %v10032_v49 = vld [vmem:[%s19603_s4 + $0x5a4] sm:$0xf0]  ;;  %v10755_v48 = vor.u32 %v11431_v46, %v10752_v57  ;;  %v20284_v46 = vld [vmem:[#allocation158_spill] sm:$0xff] }
 0x889   :  { %v10035_v62 = vor.u32 %v11250_v10, %v10032_v49 }
 0x88a   :  { %v8243_v7 = vpop.f32.mrf.mxu0  ;;  %v7549_v20 = vpop.f32.mrf.mxu1 }
 0x88b   :  { %v8244_v45 = vadd.f32 %v8243_v7, %v17638_v44  ;;  %v18028_v26 = vadd.f32 %v7549_v20, %v20278_v60  ;;  %v9814_v44 = vld [vmem:[%s19603_s4 + $0x3d0] sm:$0xf]  ;;  %v20281_v60 = vld [vmem:[#allocation99_spill] sm:$0xff] }
 0x88c   :  { %v9815_v23 = vor.u32 %v11198_v50, %v9814_v44 }
 0x88d   :  { %20279 = vst [vmem:[#allocation71_spill] sm:$0xff] %v18028_v26 }
 0x88e   :  { %8498 = vst.msk [vmem:[%s19604_s6 + $0x88] sm:$0xff] %vm8480_vm3, %v8244_v45 }
 0x88f   :  { %v7747_v52 = vpop.f32.mrf.mxu3  ;;  %v7995_v31 = vpop.f32.mrf.mxu2 }
 0x890   :  { %v18059_v12 = vadd.f32 %v7747_v52, %v20280_v51  ;;  %v18062_v58 = vadd.f32 %v7995_v31, %v17635_v16  ;;  %v10282_v52 = vld [vmem:[%s19603_s4 + $0x780] sm:$0xf]  ;;  %v11316_v31 = vld [vmem:[%s19603_s4 + $0x798] sm:$0xf0]  ;;  %v9842_v51 = vld [vmem:[%s19603_s4 + $0x408] sm:$0xf] }
 0x892   :  { %v8246_v7 = vpop.f32.mrf.mxu0  ;;  %v7552_v20 = vpop.f32.mrf.mxu1 }
 0x893   :  { %v8247_v45 = vadd.f32 %v8246_v7, %v17653_v61  ;;  %v18066_v26 = vadd.f32 %v7552_v20, %v20281_v60  ;;  %v20286_v20 = vld [vmem:[#allocation169_spill] sm:$0xff] }
 0x894   :  { %7789 = vmatmul.bf16.gmra.mxu3 %v10255_v11  ;;  %8037 = vmatmul.bf16.gmra.mxu2 %v10035_v62  ;;  %v11205_v11 = vld [vmem:[%s19603_s4 + $0x420] sm:$0xf0]  ;;  %v11438_v62 = vld [vmem:[%s19603_s4 + $0xb6c] sm:$0xf] }
 0x895   :  { %20282 = vst [vmem:[#allocation135_spill] sm:$0xff] %v18066_v26  ;;  %10869 = vmatmul.msk.bf16.gmra.mxu0 %vm6291_vm2, %v9815_v23  ;;  %7591 = vmatmul.bf16.gmra.mxu1 %v10755_v48  ;;  %v10780_v23 = vld [vmem:[%s19603_s4 + $0xb84] sm:$0xf0] }
 0x896   :  { %8499 = vst.msk [vmem:[%s19604_s6 + $0x90] sm:$0xff] %vm8480_vm3, %v8247_v45 }
 0x897   :  { %v7750_v16 = vpop.f32.mrf.mxu3  ;;  %v7998_v43 = vpop.f32.mrf.mxu2 }
 0x898   :  { %v18074_v10 = vadd.f32 %v7750_v16, %v20283_v63  ;;  %v18077_v61 = vadd.f32 %v7998_v43, %v17650_v5  ;;  %v11257_v5 = vld [vmem:[%s19603_s4 + $0x5c4] sm:$0xf]  ;;  %v10283_v16 = vor.u32 %v11316_v31, %v10282_v52  ;;  %v9843_v63 = vor.u32 %v11205_v11, %v9842_v51  ;;  %v20289_v31 = vld [vmem:[#allocation108_spill] sm:$0xff] }
 0x899   :  { %v20290_v11 = vld [vmem:[#allocation56_spill] sm:$0xff] }
 0x89a   :  { %v8248_v49 = vpop.f32.mrf.mxu0  ;;  %v7554_v44 = vpop.f32.mrf.mxu1 }
 0x89b   :  { %v8249_v50 = vadd.f32 %v8248_v49, %v17691_v29  ;;  %v18081_v57 = vadd.f32 %v7554_v44, %v20284_v46  ;;  %v10060_v29 = vld [vmem:[%s19603_s4 + $0x5dc] sm:$0xf0]  ;;  %v10783_v49 = vor.u32 %v11438_v62, %v10780_v23  ;;  %v10310_v23 = vld [vmem:[%s19603_s4 + $0x7b8] sm:$0xf] }
 0x89c   :  { %v10063_v43 = vor.u32 %v11257_v5, %v10060_v29 }
 0x89d   :  { %20285 = vst [vmem:[#allocation61_spill] sm:$0xff] %v18081_v57  ;;  %v20287_v57 = vld [vmem:[#allocation159_spill] sm:$0xff] }
 0x89e   :  { %8500 = vst.msk [vmem:[%s19604_s6 + $0x98] sm:$0xff] %vm8480_vm3, %v8249_v50 }
 0x89f   :  { %v7752_v48 = vpop.f32.mrf.mxu3  ;;  %v8000_v7 = vpop.f32.mrf.mxu2 }
 0x8a0   :  { %v18112_v45 = vadd.f32 %v7752_v48, %v20286_v20  ;;  %v18115_v60 = vadd.f32 %v8000_v7, %v17688_v0  ;;  %v11323_v48 = vld [vmem:[%s19603_s4 + $0x7d0] sm:$0xf0]  ;;  %v9870_v7 = vld [vmem:[%s19603_s4 + $0x440] sm:$0xf]  ;;  %v11212_v20 = vld [vmem:[%s19603_s4 + $0x458] sm:$0xf0] }
 0x8a2   :  { %v8251_v44 = vpop.f32.mrf.mxu0  ;;  %v7557_v50 = vpop.f32.mrf.mxu1 }
 0x8a3   :  { %v8252_v46 = vadd.f32 %v8251_v44, %v17706_v14  ;;  %v18119_v26 = vadd.f32 %v7557_v50, %v20287_v57  ;;  %v20292_v44 = vld [vmem:[#allocation47_spill] sm:$0xff] }
 0x8a4   :  { %7794 = vmatmul.bf16.gmra.mxu3 %v10283_v16  ;;  %8042 = vmatmul.bf16.gmra.mxu2 %v10063_v43  ;;  %v11445_v16 = vld [vmem:[%s19603_s4 + $0xba4] sm:$0xf]  ;;  %v10808_v43 = vld [vmem:[%s19603_s4 + $0xbbc] sm:$0xf0] }
 0x8a5   :  { %20288 = vst [vmem:[#allocation137_spill] sm:$0xff] %v18119_v26  ;;  %10870 = vmatmul.msk.bf16.gmra.mxu0 %vm6291_vm2, %v9843_v63  ;;  %7596 = vmatmul.bf16.gmra.mxu1 %v10783_v49 }
 0x8a6   :  { %8501 = vst.msk [vmem:[%s19604_s6 + $0xa0] sm:$0xff] %vm8480_vm3, %v8252_v46 }
 0x8a7   :  { %v7755_v0 = vpop.f32.mrf.mxu3  ;;  %v8003_v52 = vpop.f32.mrf.mxu2 }
 0x8a8   :  { %v18127_v5 = vadd.f32 %v7755_v0, %v20289_v31  ;;  %v18130_v14 = vadd.f32 %v8003_v52, %v17703_v39  ;;  %v11264_v39 = vld [vmem:[%s19603_s4 + $0x5fc] sm:$0xf]  ;;  %v10311_v0 = vor.u32 %v11323_v48, %v10310_v23  ;;  %v9871_v31 = vor.u32 %v11212_v20, %v9870_v7  ;;  %v20295_v48 = vld [vmem:[#allocation170_spill] sm:$0xff] }
 0x8a9   :  { %v20296_v20 = vld [vmem:[#allocation102_spill] sm:$0xff] }
 0x8aa   :  { %v8253_v57 = vpop.f32.mrf.mxu0  ;;  %v7559_v29 = vpop.f32.mrf.mxu1 }
 0x8ab   :  { %v8254_v51 = vadd.f32 %v8253_v57, %v17744_v59  ;;  %v18134_v62 = vadd.f32 %v7559_v29, %v20290_v11  ;;  %v10088_v59 = vld [vmem:[%s19603_s4 + $0x614] sm:$0xf0]  ;;  %v10811_v57 = vor.u32 %v11445_v16, %v10808_v43  ;;  %v10338_v43 = vld [vmem:[%s19603_s4 + $0x7f0] sm:$0xf] }
 0x8ac   :  { %v10091_v52 = vor.u32 %v11264_v39, %v10088_v59 }
 0x8ad   :  { %20291 = vst [vmem:[#allocation167_spill] sm:$0xff] %v18134_v62  ;;  %v20293_v62 = vld [vmem:[#allocation100_spill] sm:$0xff] }
 0x8ae   :  { %8502 = vst.msk [vmem:[%s19604_s6 + $0xa8] sm:$0xff] %vm8480_vm3, %v8254_v51 }
 0x8af   :  { %v7757_v63 = vpop.f32.mrf.mxu3  ;;  %v8005_v49 = vpop.f32.mrf.mxu2 }
 0x8b0   :  { %v18165_v50 = vadd.f32 %v7757_v63, %v20292_v44  ;;  %v18168_v46 = vadd.f32 %v8005_v49, %v17741_v3  ;;  %v11330_v63 = vld [vmem:[%s19603_s4 + $0x808] sm:$0xf0]  ;;  %v9898_v49 = vld [vmem:[%s19603_s4 + $0x478] sm:$0xf]  ;;  %v11219_v44 = vld [vmem:[%s19603_s4 + $0x490] sm:$0xf0] }
 0x8b2   :  { %v8256_v29 = vpop.f32.mrf.mxu0  ;;  %v7562_v51 = vpop.f32.mrf.mxu1 }
 0x8b3   :  { %v8257_v11 = vadd.f32 %v8256_v29, %v17759_v55  ;;  %v18172_v26 = vadd.f32 %v7562_v51, %v20293_v62  ;;  %v20298_v29 = vld [vmem:[#allocation12_spill] sm:$0xff] }
 0x8b4   :  { %7799 = vmatmul.bf16.gmra.mxu3 %v10311_v0  ;;  %8047 = vmatmul.bf16.gmra.mxu2 %v10091_v52  ;;  %v11452_v0 = vld [vmem:[%s19603_s4 + $0xbdc] sm:$0xf]  ;;  %v10836_v52 = vld [vmem:[%s19603_s4 + $0xbf4] sm:$0xf0] }
 0x8b5   :  { %20294 = vst [vmem:[#allocation178_spill] sm:$0xff] %v18172_v26  ;;  %10871 = vmatmul.msk.bf16.gmra.mxu0 %vm6291_vm2, %v9871_v31  ;;  %7601 = vmatmul.bf16.gmra.mxu1 %v10811_v57 }
 0x8b6   :  { %8503 = vst.msk [vmem:[%s19604_s6 + $0xb0] sm:$0xff] %vm8480_vm3, %v8257_v11 }
 0x8b7   :  { %v7760_v3 = vpop.f32.mrf.mxu3  ;;  %v8008_v23 = vpop.f32.mrf.mxu2 }
 0x8b8   :  { %v18180_v39 = vadd.f32 %v7760_v3, %v20295_v48  ;;  %v18183_v55 = vadd.f32 %v8008_v23, %v17756_v24  ;;  %v11271_v24 = vld [vmem:[%s19603_s4 + $0x634] sm:$0xf]  ;;  %v10339_v3 = vor.u32 %v11330_v63, %v10338_v43  ;;  %v9899_v48 = vor.u32 %v11219_v44, %v9898_v49  ;;  %v20300_v63 = vld [vmem:[#allocation114_spill] sm:$0xff] }
 0x8b9   :  { %v20301_v44 = vld [vmem:[#allocation50_spill] sm:$0xff] }
 0x8ba   :  { %v8258_v62 = vpop.f32.mrf.mxu0  ;;  %v7564_v59 = vpop.f32.mrf.mxu1 }
 0x8bb   :  { %v8259_v7 = vadd.f32 %v8258_v62, %v17797_v1  ;;  %v18187_v16 = vadd.f32 %v7564_v59, %v20296_v20  ;;  %v10116_v1 = vld [vmem:[%s19603_s4 + $0x64c] sm:$0xf0]  ;;  %v10839_v62 = vor.u32 %v11452_v0, %v10836_v52  ;;  %v10366_v52 = vld [vmem:[%s19603_s4 + $0x828] sm:$0xf] }
 0x8bc   :  { %v10119_v23 = vor.u32 %v11271_v24, %v10116_v1 }
 0x8bd   :  { %20297 = vst [vmem:[#allocation51_spill] sm:$0xff] %v18187_v16  ;;  %v20299_v16 = vld [vmem:[#allocation163_spill] sm:$0xff] }
 0x8be   :  { %8504 = vst.msk [vmem:[%s19604_s6 + $0xb8] sm:$0xff] %vm8480_vm3, %v8259_v7 }
 0x8bf   :  { %v7762_v31 = vpop.f32.mrf.mxu3  ;;  %v8010_v57 = vpop.f32.mrf.mxu2 }
 0x8c0   :  { %v18218_v51 = vadd.f32 %v7762_v31, %v20298_v29  ;;  %v18221_v11 = vadd.f32 %v8010_v57, %v17794_v32  ;;  %v11337_v31 = vld [vmem:[%s19603_s4 + $0x840] sm:$0xf0]  ;;  %v11476_v57 = vld [vmem:[%s19603_s4 + $0xc10] sm:$0xff] }
 0x8c1   :  { %v5559_v29 = vunpack.c.h.b16 %v11476_v57  ;;  %v20304_v57 = vld [vmem:[#allocation49_spill] sm:$0xff] }
 0x8c2   :  { %v8261_v59 = vpop.f32.mrf.mxu0  ;;  %v7567_v7 = vpop.f32.mrf.mxu1 }
 0x8c3   :  { %v8262_v20 = vadd.f32 %v8261_v59, %v17812_v42  ;;  %v18225_v26 = vadd.f32 %v7567_v7, %v20299_v16  ;;  %v20303_v59 = vld [vmem:[#allocation117_spill] sm:$0xff] }
 0x8c4   :  { %7804 = vmatmul.bf16.gmra.mxu3 %v10339_v3  ;;  %8052 = vmatmul.bf16.gmra.mxu2 %v10119_v23  ;;  %v9926_v3 = vld [vmem:[%s19603_s4 + $0x4b0] sm:$0xf]  ;;  %v11226_v23 = vld [vmem:[%s19603_s4 + $0x4c8] sm:$0xf0] }
 0x8c5   :  { %8505 = vst.msk [vmem:[%s19604_s6 + $0xc0] sm:$0xff] %vm8480_vm3, %v8262_v20  ;;  %10872 = vmatmul.msk.bf16.gmra.mxu0 %vm6291_vm2, %v9899_v48  ;;  %7606 = vmatmul.bf16.gmra.mxu1 %v10839_v62 }
 0x8c7   :  { %v7765_v32 = vpop.f32.mrf.mxu3  ;;  %v8013_v43 = vpop.f32.mrf.mxu2 }
 0x8c8   :  { %v18233_v24 = vadd.f32 %v7765_v32, %v20300_v63  ;;  %v18236_v42 = vadd.f32 %v8013_v43, %v17809_v27  ;;  %v11278_v27 = vld [vmem:[%s19603_s4 + $0x66c] sm:$0xf]  ;;  %v10367_v32 = vor.u32 %v11337_v31, %v10366_v52  ;;  %v9927_v63 = vor.u32 %v11226_v23, %v9926_v3  ;;  %v20305_v31 = vld [vmem:[#allocation173_spill] sm:$0xff]  ;;  %v20306_v23 = vld [vmem:[#allocation166_spill] sm:$0xff] }
 0x8ca   :  { %v8263_v16 = vpop.f32.mrf.mxu0  ;;  %v7569_v1 = vpop.f32.mrf.mxu1 }
 0x8cb   :  { %v8264_v49 = vadd.f32 %v8263_v16, %v17850_v25  ;;  %v18240_v0 = vadd.f32 %v7569_v1, %v20301_v44  ;;  %v10144_v25 = vld [vmem:[%s19603_s4 + $0x684] sm:$0xf0]  ;;  %v5951_v16 = vpack.c.b16 %v5559_v29, %v5559_v29 }
 0x8cc   :  { %v10147_v43 = vor.u32 %v11278_v27, %v10144_v25 }
 0x8cd   :  { %20302 = vst [vmem:[#allocation139_spill] sm:$0xff] %v18240_v0 }
 0x8ce   :  { %8506 = vst.msk [vmem:[%s19604_s6 + $0xc8] sm:$0xff] %vm8480_vm3, %v8264_v49 }
 0x8cf   :  { %v7767_v48 = vpop.f32.mrf.mxu3  ;;  %v8015_v62 = vpop.f32.mrf.mxu2 }
 0x8d0   :  { %v18268_v7 = vadd.f32 %v7767_v48, %v20303_v59  ;;  %v18271_v20 = vadd.f32 %v8015_v62, %v17847_v53  ;;  %v10394_v62 = vld [vmem:[%s19603_s4 + $0x860] sm:$0xf]  ;;  %v11344_v59 = vld [vmem:[%s19603_s4 + $0x878] sm:$0xf0] }
 0x8d2   :  { %v8266_v1 = vpop.f32.mrf.mxu0  ;;  %v7572_v49 = vpop.f32.mrf.mxu1 }
 0x8d3   :  { %v8267_v44 = vadd.f32 %v8266_v1, %v17865_v22  ;;  %v18275_v0 = vadd.f32 %v7572_v49, %v20304_v57  ;;  %v20307_v1 = vld [vmem:[#allocation11_spill] sm:$0xff]  ;;  %v10395_v57 = vor.u32 %v11344_v59, %v10394_v62  ;;  %v20310_v59 = vld [vmem:[#allocation174_spill] sm:$0xff] }
 0x8d4   :  { %7809 = vmatmul.bf16.gmra.mxu3 %v10367_v32  ;;  %8057 = vmatmul.bf16.gmra.mxu2 %v10147_v43  ;;  %v9954_v32 = vld [vmem:[%s19603_s4 + $0x4e8] sm:$0xf]  ;;  %v11233_v43 = vld [vmem:[%s19603_s4 + $0x500] sm:$0xf0] }
 0x8d5   :  { %8507 = vst.msk [vmem:[%s19604_s6 + $0xd0] sm:$0xff] %vm8480_vm3, %v8267_v44  ;;  %10873 = vmatmul.msk.bf16.gmra.mxu0 %vm6291_vm2, %v9927_v63  ;;  %7611 = vmatmul.bf16.gmra.mxu1 %v5951_v16 }
 0x8d7   :  { %v7770_v53 = vpop.f32.mrf.mxu3  ;;  %v8018_v52 = vpop.f32.mrf.mxu2 }
 0x8d8   :  { %v18283_v27 = vadd.f32 %v7770_v53, %v20305_v31  ;;  %v18286_v22 = vadd.f32 %v8018_v52, %v17862_v15  ;;  %v11285_v15 = vld [vmem:[%s19603_s4 + $0x6a4] sm:$0xf]  ;;  %v9955_v52 = vor.u32 %v11233_v43, %v9954_v32 }
 0x8da   :  { %v8268_v25 = vpop.f32.mrf.mxu0  ;;  %v7574_v29 = vpop.f32.mrf.mxu1 }
 0x8db   :  { %v8269_v3 = vadd.f32 %v8268_v25, %v17903_v36  ;;  %v18290_v48 = vadd.f32 %v7574_v29, %v20306_v23  ;;  %v10172_v36 = vld [vmem:[%s19603_s4 + $0x6bc] sm:$0xf0] }
 0x8dc   :  { %v10175_v53 = vor.u32 %v11285_v15, %v10172_v36 }
 0x8dd   :  { %8508 = vst.msk [vmem:[%s19604_s6 + $0xd8] sm:$0xff] %vm8480_vm3, %v8269_v3  ;;  %v20308_v3 = vld [vmem:[#allocation34_spill] sm:$0xff] }
 0x8df   :  { %v7772_v63 = vpop.f32.mrf.mxu3  ;;  %v8020_v16 = vpop.f32.mrf.mxu2 }
 0x8e0   :  { %v18315_v49 = vadd.f32 %v7772_v63, %v20307_v1  ;;  %v18318_v44 = vadd.f32 %v8020_v16, %v17900_v4  ;;  %v20311_v63 = vld [vmem:[#allocation13_spill] sm:$0xff] }
 0x8e1   :  { %v10422_v1 = vld [vmem:[%s19603_s4 + $0x898] sm:$0xf] }
 0x8e2   :  { %v8271_v31 = vpop.f32.mrf.mxu0  ;;  %v7577_v25 = vpop.f32.mrf.mxu1 }
 0x8e3   :  { %v8272_v29 = vadd.f32 %v8271_v31, %v17918_v2  ;;  %v18322_v23 = vadd.f32 %v7577_v25, %v20308_v3 }
 0x8e4   :  { %7814 = vmatmul.bf16.gmra.mxu3 %v10395_v57  ;;  %8062 = vmatmul.bf16.gmra.mxu2 %v10175_v53  ;;  %v11351_v57 = vld [vmem:[%s19603_s4 + $0x8b0] sm:$0xf0]  ;;  %v9982_v53 = vld [vmem:[%s19603_s4 + $0x520] sm:$0xf] }
 0x8e5   :  { %20309 = vst [vmem:[#allocation64_spill] sm:$0xff] %v18322_v23  ;;  %10874 = vmatmul.msk.bf16.gmra.mxu0 %vm6291_vm2, %v9955_v52  ;;  %v11240_v52 = vld [vmem:[%s19603_s4 + $0x538] sm:$0xf0] }
 0x8e6   :  { %8509 = vst.msk [vmem:[%s19604_s6 + $0xe0] sm:$0xff] %vm8480_vm3, %v8272_v29  ;;  %v20313_v29 = vld [vmem:[#allocation164_spill] sm:$0xff] }
 0x8e7   :  { %v7775_v4 = vpop.f32.mrf.mxu3  ;;  %v8023_v62 = vpop.f32.mrf.mxu2 }
 0x8e8   :  { %v18330_v15 = vadd.f32 %v7775_v4, %v20310_v59  ;;  %v18333_v36 = vadd.f32 %v8023_v62, %v17915_v41  ;;  %v11292_v41 = vld [vmem:[%s19603_s4 + $0x6dc] sm:$0xf]  ;;  %v10423_v62 = vor.u32 %v11351_v57, %v10422_v1  ;;  %v20316_v57 = vld [vmem:[#allocation162_spill] sm:$0xff] }
 0x8ea   :  { %v8273_v2 = vpop.f32.mrf.mxu0  ;;  %v7579_v32 = vpop.f32.mrf.mxu1 }
 0x8eb   :  { %v8274_v43 = vadd.f32 %v8273_v2, %v17956_v8  ;;  %v18337_v16 = vadd.f32 %v7579_v32, %v20311_v63  ;;  %v10200_v8 = vld [vmem:[%s19603_s4 + $0x6f4] sm:$0xf0]  ;;  %v9983_v2 = vor.u32 %v11240_v52, %v9982_v53  ;;  %v20317_v52 = vld [vmem:[#allocation171_spill] sm:$0xff] }
 0x8ec   :  { %v10203_v59 = vor.u32 %v11292_v41, %v10200_v8 }
 0x8ed   :  { %20312 = vst [vmem:[#allocation141_spill] sm:$0xff] %v18337_v16  ;;  %v20314_v16 = vld [vmem:[#allocation111_spill] sm:$0xff] }
 0x8ee   :  { %8510 = vst.msk [vmem:[%s19604_s6 + $0xe8] sm:$0xff] %vm8480_vm3, %v8274_v43 }
 0x8ef   :  { %v7777_v31 = vpop.f32.mrf.mxu3  ;;  %v8025_v25 = vpop.f32.mrf.mxu2 }
 0x8f0   :  { %v18362_v3 = vadd.f32 %v7777_v31, %v20313_v29  ;;  %v18365_v4 = vadd.f32 %v8025_v25, %v17953_v30  ;;  %v10450_v25 = vld [vmem:[%s19603_s4 + $0x8d0] sm:$0xf]  ;;  %v11358_v29 = vld [vmem:[%s19603_s4 + $0x8e8] sm:$0xf0] }
 0x8f2   :  { %v8276_v32 = vpop.f32.mrf.mxu0  ;;  %v7582_v43 = vpop.f32.mrf.mxu1 }
 0x8f3   :  { %v8277_v63 = vadd.f32 %v8276_v32, %v17971_v47  ;;  %v18369_v23 = vadd.f32 %v7582_v43, %v20314_v16  ;;  %v20319_v43 = vld [vmem:[#allocation176_spill] sm:$0xff] }
 0x8f4   :  { %7819 = vmatmul.bf16.gmra.mxu3 %v10423_v62  ;;  %8067 = vmatmul.bf16.gmra.mxu2 %v10203_v59  ;;  %v10010_v62 = vld [vmem:[%s19603_s4 + $0x558] sm:$0xf]  ;;  %v11247_v59 = vld [vmem:[%s19603_s4 + $0x570] sm:$0xf0] }
 0x8f5   :  { %20315 = vst [vmem:[#allocation179_spill] sm:$0xff] %v18369_v23  ;;  %10875 = vmatmul.msk.bf16.gmra.mxu0 %vm6291_vm2, %v9983_v2 }
 0x8f6   :  { %8511 = vst.msk [vmem:[%s19604_s6 + $0xf0] sm:$0xff] %vm8480_vm3, %v8277_v63 }
 0x8f7   :  { %v7780_v30 = vpop.f32.mrf.mxu3  ;;  %v8028_v1 = vpop.f32.mrf.mxu2 }
 0x8f8   :  { %v18377_v41 = vadd.f32 %v7780_v30, %v20316_v57  ;;  %v18380_v8 = vadd.f32 %v8028_v1, %v17968_v40  ;;  %v11299_v40 = vld [vmem:[%s19603_s4 + $0x714] sm:$0xf]  ;;  %v10451_v1 = vor.u32 %v11358_v29, %v10450_v25  ;;  %v20322_v29 = vld [vmem:[#allocation7_spill] sm:$0xff] }
 0x8fa   :  { %v8278_v47 = vpop.f32.mrf.mxu0  ;;  %v7584_v16 = vpop.f32.mrf.mxu1 }
 0x8fb   :  { %v8279_v53 = vadd.f32 %v8278_v47, %v18009_v34  ;;  %v18384_v31 = vadd.f32 %v7584_v16, %v20317_v52  ;;  %v10228_v34 = vld [vmem:[%s19603_s4 + $0x72c] sm:$0xf0]  ;;  %v10011_v47 = vor.u32 %v11247_v59, %v10010_v62  ;;  %v20323_v59 = vld [vmem:[#allocation10_spill] sm:$0xff] }
 0x8fc   :  { %v10231_v57 = vor.u32 %v11299_v40, %v10228_v34 }
 0x8fd   :  { %20318 = vst [vmem:[#allocation180_spill] sm:$0xff] %v18384_v31  ;;  %v20320_v31 = vld [vmem:[#allocation157_spill] sm:$0xff] }
 0x8fe   :  { %8512 = vst.msk [vmem:[%s19604_s6 + $0xf8] sm:$0xff] %vm8480_vm3, %v8279_v53 }
 0x8ff   :  { %v7782_v2 = vpop.f32.mrf.mxu3  ;;  %v8030_v32 = vpop.f32.mrf.mxu2 }
 0x900   :  { %v18409_v63 = vadd.f32 %v7782_v2, %v20319_v43  ;;  %v18412_v30 = vadd.f32 %v8030_v32, %v18006_v54  ;;  %v10478_v32 = vld [vmem:[%s19603_s4 + $0x908] sm:$0xf]  ;;  %v11365_v43 = vld [vmem:[%s19603_s4 + $0x920] sm:$0xf0] }
 0x902   :  { %v8281_v16 = vpop.f32.mrf.mxu0  ;;  %v7587_v53 = vpop.f32.mrf.mxu1 }
 0x903   :  { %v8282_v52 = vadd.f32 %v8281_v16, %v18024_v56  ;;  %v18416_v23 = vadd.f32 %v7587_v53, %v20320_v31  ;;  %v20325_v53 = vld [vmem:[#allocation89_spill] sm:$0xff] }
 0x904   :  { %7824 = vmatmul.bf16.gmra.mxu3 %v10451_v1  ;;  %8072 = vmatmul.bf16.gmra.mxu2 %v10231_v57  ;;  %v10038_v1 = vld [vmem:[%s19603_s4 + $0x590] sm:$0xf]  ;;  %v11254_v57 = vld [vmem:[%s19603_s4 + $0x5a8] sm:$0xf0] }
 0x905   :  { %20321 = vst [vmem:[#allocation53_spill] sm:$0xff] %v18416_v23  ;;  %10876 = vmatmul.msk.bf16.gmra.mxu0 %vm6291_vm2, %v10011_v47 }
 0x906   :  { %8513 = vst.msk [vmem:[%s19604_s6 + $0x100] sm:$0xff] %vm8480_vm3, %v8282_v52 }
 0x907   :  { %v7785_v54 = vpop.f32.mrf.mxu3  ;;  %v8033_v25 = vpop.f32.mrf.mxu2 }
 0x908   :  { %v18424_v40 = vadd.f32 %v7785_v54, %v20322_v29  ;;  %v18427_v34 = vadd.f32 %v8033_v25, %v18021_v28  ;;  %v11306_v28 = vld [vmem:[%s19603_s4 + $0x74c] sm:$0xf]  ;;  %v10479_v25 = vor.u32 %v11365_v43, %v10478_v32  ;;  %v20328_v43 = vld [vmem:[#allocation22_spill] sm:$0xff] }
 0x90a   :  { %v8283_v56 = vpop.f32.mrf.mxu0  ;;  %v7589_v31 = vpop.f32.mrf.mxu1 }
 0x90b   :  { %v8284_v62 = vadd.f32 %v8283_v56, %v18062_v58  ;;  %v18431_v2 = vadd.f32 %v7589_v31, %v20323_v59  ;;  %v10256_v58 = vld [vmem:[%s19603_s4 + $0x764] sm:$0xf0]  ;;  %v10039_v56 = vor.u32 %v11254_v57, %v10038_v1 }
 0x90c   :  { %v10259_v29 = vor.u32 %v11306_v28, %v10256_v58  ;;  %v20329_v57 = vld [vmem:[#allocation119_spill] sm:$0xff] }
 0x90d   :  { %20324 = vst [vmem:[#allocation143_spill] sm:$0xff] %v18431_v2  ;;  %v20326_v2 = vld [vmem:[#allocation172_spill] sm:$0xff] }
 0x90e   :  { %8514 = vst.msk [vmem:[%s19604_s6 + $0x108] sm:$0xff] %vm8480_vm3, %v8284_v62 }
 0x90f   :  { %v7787_v47 = vpop.f32.mrf.mxu3  ;;  %v8035_v16 = vpop.f32.mrf.mxu2 }
 0x910   :  { %v18456_v52 = vadd.f32 %v7787_v47, %v20325_v53  ;;  %v18459_v54 = vadd.f32 %v8035_v16, %v18059_v12  ;;  %v10506_v16 = vld [vmem:[%s19603_s4 + $0x940] sm:$0xf]  ;;  %v11372_v53 = vld [vmem:[%s19603_s4 + $0x958] sm:$0xf0] }
 0x912   :  { %v8286_v31 = vpop.f32.mrf.mxu0  ;;  %v7592_v62 = vpop.f32.mrf.mxu1 }
 0x913   :  { %v8287_v59 = vadd.f32 %v8286_v31, %v18077_v61  ;;  %v18463_v23 = vadd.f32 %v7592_v62, %v20326_v2  ;;  %v20331_v62 = vld [vmem:[#allocation21_spill] sm:$0xff] }
 0x914   :  { %7829 = vmatmul.bf16.gmra.mxu3 %v10479_v25  ;;  %8077 = vmatmul.bf16.gmra.mxu2 %v10259_v29  ;;  %v10066_v25 = vld [vmem:[%s19603_s4 + $0x5c8] sm:$0xf]  ;;  %v11261_v29 = vld [vmem:[%s19603_s4 + $0x5e0] sm:$0xf0] }
 0x915   :  { %20327 = vst [vmem:[#allocation3_spill] sm:$0xff] %v18463_v23  ;;  %10877 = vmatmul.msk.bf16.gmra.mxu0 %vm6291_vm2, %v10039_v56 }
 0x916   :  { %8515 = vst.msk [vmem:[%s19604_s6 + $0x110] sm:$0xff] %vm8480_vm3, %v8287_v59 }
 0x917   :  { %v7790_v12 = vpop.f32.mrf.mxu3  ;;  %v8038_v32 = vpop.f32.mrf.mxu2 }
 0x918   :  { %v18471_v28 = vadd.f32 %v7790_v12, %v20328_v43  ;;  %v18474_v58 = vadd.f32 %v8038_v32, %v18074_v10  ;;  %v11313_v10 = vld [vmem:[%s19603_s4 + $0x784] sm:$0xf]  ;;  %v10507_v32 = vor.u32 %v11372_v53, %v10506_v16 }
 0x91a   :  { %v8288_v61 = vpop.f32.mrf.mxu0  ;;  %v7594_v2 = vpop.f32.mrf.mxu1 }
 0x91b   :  { %v8289_v1 = vadd.f32 %v8288_v61, %v18115_v60  ;;  %v18478_v47 = vadd.f32 %v7594_v2, %v20329_v57  ;;  %v10284_v60 = vld [vmem:[%s19603_s4 + $0x79c] sm:$0xf0]  ;;  %v10067_v61 = vor.u32 %v11261_v29, %v10066_v25  ;;  %v20333_v25 = vld [vmem:[#allocation175_spill] sm:$0xff] }
 0x91c   :  { %v10287_v43 = vor.u32 %v11313_v10, %v10284_v60 }
 0x91d   :  { %20330 = vst [vmem:[#allocation27_spill] sm:$0xff] %v18478_v47  ;;  %v20332_v47 = vld [vmem:[#allocation121_spill] sm:$0xff] }
 0x91e   :  { %8516 = vst.msk [vmem:[%s19604_s6 + $0x118] sm:$0xff] %vm8480_vm3, %v8289_v1 }
 0x91f   :  { %v7792_v56 = vpop.f32.mrf.mxu3  ;;  %v8040_v31 = vpop.f32.mrf.mxu2 }
 0x920   :  { %v18503_v59 = vadd.f32 %v7792_v56, %v20331_v62  ;;  %v18506_v12 = vadd.f32 %v8040_v31, %v18112_v45  ;;  %v10534_v56 = vld [vmem:[%s19603_s4 + $0x978] sm:$0xf]  ;;  %v11379_v31 = vld [vmem:[%s19603_s4 + $0x990] sm:$0xf0]  ;;  %v11268_v62 = vld [vmem:[%s19603_s4 + $0x618] sm:$0xf0] }
 0x922   :  { %v8291_v2 = vpop.f32.mrf.mxu0  ;;  %v7597_v1 = vpop.f32.mrf.mxu1 }
 0x923   :  { %v8292_v57 = vadd.f32 %v8291_v2, %v18130_v14  ;;  %v18510_v23 = vadd.f32 %v7597_v1, %v20332_v47 }
 0x924   :  { %7834 = vmatmul.bf16.gmra.mxu3 %v10507_v32  ;;  %8082 = vmatmul.bf16.gmra.mxu2 %v10287_v43 }
 0x925   :  { %8517 = vst.msk [vmem:[%s19604_s6 + $0x120] sm:$0xff] %vm8480_vm3, %v8292_v57  ;;  %10878 = vmatmul.msk.bf16.gmra.mxu0 %vm6291_vm2, %v10067_v61  ;;  %v20335_v61 = vld [vmem:[#allocation81_spill] sm:$0xff]  ;;  %v10535_v57 = vor.u32 %v11379_v31, %v10534_v56  ;;  %v20338_v31 = vld [vmem:[#allocation131_spill] sm:$0xff] }
 0x927   :  { %v7795_v45 = vpop.f32.mrf.mxu3  ;;  %v8043_v16 = vpop.f32.mrf.mxu2 }
 0x928   :  { %v18518_v53 = vadd.f32 %v7795_v45, %v17589_v35  ;;  %v18521_v10 = vadd.f32 %v8043_v16, %v18127_v5  ;;  %v11320_v35 = vld [vmem:[%s19603_s4 + $0x7bc] sm:$0xf]  ;;  %v10312_v5 = vld [vmem:[%s19603_s4 + $0x7d4] sm:$0xf0] }
 0x929   :  { %v10315_v45 = vor.u32 %v11320_v35, %v10312_v5 }
 0x92a   :  { %v8293_v14 = vpop.f32.mrf.mxu0  ;;  %v7599_v47 = vpop.f32.mrf.mxu1 }
 0x92b   :  { %v8294_v60 = vadd.f32 %v8293_v14, %v18168_v46  ;;  %v18525_v29 = vadd.f32 %v7599_v47, %v20333_v25  ;;  %v10094_v46 = vld [vmem:[%s19603_s4 + $0x600] sm:$0xf]  ;;  %v20336_v25 = vld [vmem:[#allocation123_spill] sm:$0xff] }
 0x92c   :  { %v10095_v16 = vor.u32 %v11268_v62, %v10094_v46 }
 0x92d   :  { %20334 = vst [vmem:[#allocation26_spill] sm:$0xff] %v18525_v29 }
 0x92e   :  { %8518 = vst.msk [vmem:[%s19604_s6 + $0x128] sm:$0xff] %vm8480_vm3, %v8294_v60 }
 0x92f   :  { %v7797_v32 = vpop.f32.mrf.mxu3  ;;  %v8045_v43 = vpop.f32.mrf.mxu2 }
 0x930   :  { %v18550_v2 = vadd.f32 %v7797_v32, %v20335_v61  ;;  %v18553_v1 = vadd.f32 %v8045_v43, %v18165_v50  ;;  %v20339_v32 = vld [vmem:[#allocation125_spill] sm:$0xff]  ;;  %v10562_v61 = vld [vmem:[%s19603_s4 + $0x9b0] sm:$0xf] }
 0x932   :  { %v8296_v14 = vpop.f32.mrf.mxu0  ;;  %v7602_v47 = vpop.f32.mrf.mxu1 }
 0x933   :  { %v8297_v60 = vadd.f32 %v8296_v14, %v18183_v55  ;;  %v18557_v29 = vadd.f32 %v7602_v47, %v20336_v25 }
 0x934   :  { %7839 = vmatmul.bf16.gmra.mxu3 %v10535_v57  ;;  %8087 = vmatmul.bf16.gmra.mxu2 %v10315_v45  ;;  %v11386_v57 = vld [vmem:[%s19603_s4 + $0x9c8] sm:$0xf0]  ;;  %v10122_v45 = vld [vmem:[%s19603_s4 + $0x638] sm:$0xf] }
 0x935   :  { %20337 = vst [vmem:[#allocation153_spill] sm:$0xff] %v18557_v29  ;;  %10879 = vmatmul.msk.bf16.gmra.mxu0 %vm6291_vm2, %v10095_v16  ;;  %v11275_v16 = vld [vmem:[%s19603_s4 + $0x650] sm:$0xf0] }
 0x936   :  { %8519 = vst.msk [vmem:[%s19604_s6 + $0x130] sm:$0xff] %vm8480_vm3, %v8297_v60  ;;  %v20341_v60 = vld [vmem:[#allocation82_spill] sm:$0xff] }
 0x937   :  { %v7800_v50 = vpop.f32.mrf.mxu3  ;;  %v8048_v56 = vpop.f32.mrf.mxu2 }
 0x938   :  { %v18565_v35 = vadd.f32 %v7800_v50, %v20338_v31  ;;  %v18568_v5 = vadd.f32 %v8048_v56, %v18180_v39  ;;  %v11327_v39 = vld [vmem:[%s19603_s4 + $0x7f4] sm:$0xf]  ;;  %v10563_v56 = vor.u32 %v11386_v57, %v10562_v61 }
 0x93a   :  { %v8298_v55 = vpop.f32.mrf.mxu0  ;;  %v7604_v46 = vpop.f32.mrf.mxu1 }
 0x93b   :  { %v8299_v62 = vadd.f32 %v8298_v55, %v18221_v11  ;;  %v18572_v43 = vadd.f32 %v7604_v46, %v20339_v32  ;;  %v10340_v11 = vld [vmem:[%s19603_s4 + $0x80c] sm:$0xf0]  ;;  %v10123_v55 = vor.u32 %v11275_v16, %v10122_v45  ;;  %v20343_v45 = vld [vmem:[#allocation127_spill] sm:$0xff] }
 0x93c   :  { %v10343_v31 = vor.u32 %v11327_v39, %v10340_v11 }
 0x93d   :  { %20340 = vst [vmem:[#allocation15_spill] sm:$0xff] %v18572_v43  ;;  %v20342_v43 = vld [vmem:[#allocation177_spill] sm:$0xff] }
 0x93e   :  { %8520 = vst.msk [vmem:[%s19604_s6 + $0x138] sm:$0xff] %vm8480_vm3, %v8299_v62 }
 0x93f   :  { %v7802_v14 = vpop.f32.mrf.mxu3  ;;  %v8050_v47 = vpop.f32.mrf.mxu2 }
 0x940   :  { %v18597_v25 = vadd.f32 %v7802_v14, %v20341_v60  ;;  %v18600_v50 = vadd.f32 %v8050_v47, %v18218_v51  ;;  %v10590_v14 = vld [vmem:[%s19603_s4 + $0x9e8] sm:$0xf]  ;;  %v11393_v47 = vld [vmem:[%s19603_s4 + $0xa00] sm:$0xf0]  ;;  %v11282_v60 = vld [vmem:[%s19603_s4 + $0x688] sm:$0xf0] }
 0x942   :  { %v8301_v46 = vpop.f32.mrf.mxu0  ;;  %v7607_v62 = vpop.f32.mrf.mxu1 }
 0x943   :  { %v8302_v32 = vadd.f32 %v8301_v46, %v18236_v42  ;;  %v18604_v29 = vadd.f32 %v7607_v62, %v20342_v43 }
 0x944   :  { %7844 = vmatmul.bf16.gmra.mxu3 %v10563_v56  ;;  %8092 = vmatmul.bf16.gmra.mxu2 %v10343_v31 }
 0x945   :  { %8521 = vst.msk [vmem:[%s19604_s6 + $0x140] sm:$0xff] %vm8480_vm3, %v8302_v32  ;;  %10880 = vmatmul.msk.bf16.gmra.mxu0 %vm6291_vm2, %v10123_v55  ;;  %v20345_v55 = vld [vmem:[#allocation133_spill] sm:$0xff]  ;;  %v10591_v32 = vor.u32 %v11393_v47, %v10590_v14 }
 0x947   :  { %v7805_v51 = vpop.f32.mrf.mxu3  ;;  %v8053_v61 = vpop.f32.mrf.mxu2 }
 0x948   :  { %v18612_v57 = vadd.f32 %v7805_v51, %v17695_v38  ;;  %v18615_v39 = vadd.f32 %v8053_v61, %v18233_v24  ;;  %v11334_v38 = vld [vmem:[%s19603_s4 + $0x82c] sm:$0xf]  ;;  %v10368_v24 = vld [vmem:[%s19603_s4 + $0x844] sm:$0xf0] }
 0x949   :  { %v10371_v51 = vor.u32 %v11334_v38, %v10368_v24 }
 0x94a   :  { %v8303_v42 = vpop.f32.mrf.mxu0  ;;  %v7609_v43 = vpop.f32.mrf.mxu1 }
 0x94b   :  { %v8304_v11 = vadd.f32 %v8303_v42, %v18271_v20  ;;  %v18619_v16 = vadd.f32 %v7609_v43, %v20343_v45  ;;  %v10150_v20 = vld [vmem:[%s19603_s4 + $0x670] sm:$0xf]  ;;  %v20346_v45 = vld [vmem:[#allocation129_spill] sm:$0xff] }
 0x94c   :  { %v10151_v61 = vor.u32 %v11282_v60, %v10150_v20  ;;  %v10618_v60 = vld [vmem:[%s19603_s4 + $0xa20] sm:$0xf] }
 0x94d   :  { %20344 = vst [vmem:[#allocation155_spill] sm:$0xff] %v18619_v16 }
 0x94e   :  { %8522 = vst.msk [vmem:[%s19604_s6 + $0x148] sm:$0xff] %vm8480_vm3, %v8304_v11 }
 0x94f   :  { %v7807_v56 = vpop.f32.mrf.mxu3  ;;  %v8055_v31 = vpop.f32.mrf.mxu2 }
 0x950   :  { %v18644_v46 = vadd.f32 %v7807_v56, %v20345_v55  ;;  %v18647_v62 = vadd.f32 %v8055_v31, %v18268_v7  ;;  %v11400_v56 = vld [vmem:[%s19603_s4 + $0xa38] sm:$0xf0]  ;;  %v11289_v31 = vld [vmem:[%s19603_s4 + $0x6c0] sm:$0xf0] }
 0x952   :  { %v8306_v42 = vpop.f32.mrf.mxu0  ;;  %v7612_v43 = vpop.f32.mrf.mxu1 }
 0x953   :  { %v8307_v11 = vadd.f32 %v8306_v42, %v18286_v22  ;;  %v18651_v16 = vadd.f32 %v7612_v43, %v20346_v45  ;;  %v10619_v42 = vor.u32 %v11400_v56, %v10618_v60  ;;  %v11407_v60 = vld [vmem:[%s19603_s4 + $0xa70] sm:$0xf0]  ;;  %v11296_v56 = vld [vmem:[%s19603_s4 + $0x6f8] sm:$0xf0] }
 0x954   :  { %7849 = vmatmul.bf16.gmra.mxu3 %v10591_v32  ;;  %8097 = vmatmul.bf16.gmra.mxu2 %v10371_v51 }
 0x955   :  { %8523 = vst.msk [vmem:[%s19604_s6 + $0x150] sm:$0xff] %vm8480_vm3, %v8307_v11  ;;  %10881 = vmatmul.msk.bf16.gmra.mxu0 %vm6291_vm2, %v10151_v61 }
 0x957   :  { %v7810_v7 = vpop.f32.mrf.mxu3  ;;  %v8058_v14 = vpop.f32.mrf.mxu2 }
 0x958   :  { %v18659_v47 = vadd.f32 %v7810_v7, %v17748_v19  ;;  %v18662_v38 = vadd.f32 %v8058_v14, %v18283_v27  ;;  %v11341_v19 = vld [vmem:[%s19603_s4 + $0x864] sm:$0xf]  ;;  %v10396_v27 = vld [vmem:[%s19603_s4 + $0x87c] sm:$0xf0] }
 0x959   :  { %v10399_v43 = vor.u32 %v11341_v19, %v10396_v27 }
 0x95a   :  { %v8308_v22 = vpop.f32.mrf.mxu0  ;;  %v7614_v24 = vpop.f32.mrf.mxu1 }
 0x95b   :  { %v8309_v20 = vadd.f32 %v8308_v22, %v18318_v44  ;;  %v10178_v44 = vld [vmem:[%s19603_s4 + $0x6a8] sm:$0xf] }
 0x95c   :  { %v10179_v11 = vor.u32 %v11289_v31, %v10178_v44 }
 0x95d   :  { %8524 = vst.msk [vmem:[%s19604_s6 + $0x158] sm:$0xff] %vm8480_vm3, %v8309_v20  ;;  %v10646_v20 = vld [vmem:[%s19603_s4 + $0xa58] sm:$0xf] }
 0x95f   :  { %v7812_v55 = vpop.f32.mrf.mxu3  ;;  %v8060_v32 = vpop.f32.mrf.mxu2 }
 0x960   :  { %v18688_v51 = vadd.f32 %v7812_v55, %v17763_v18  ;;  %v18691_v61 = vadd.f32 %v8060_v32, %v18315_v49  ;;  %v10647_v55 = vor.u32 %v11407_v60, %v10646_v20 }
 0x962   :  { %v8311_v45 = vpop.f32.mrf.mxu0 }
 0x963   :  { %v8312_v7 = vadd.f32 %v8311_v45, %v18333_v36 }
 0x964   :  { %7854 = vmatmul.bf16.gmra.mxu3 %v10619_v42  ;;  %8102 = vmatmul.bf16.gmra.mxu2 %v10399_v43 }
 0x965   :  { %8525 = vst.msk [vmem:[%s19604_s6 + $0x160] sm:$0xff] %vm8480_vm3, %v8312_v7  ;;  %10882 = vmatmul.msk.bf16.gmra.mxu0 %vm6291_vm2, %v10179_v11 }
 0x967   :  { %v7815_v18 = vpop.f32.mrf.mxu3  ;;  %v8063_v14 = vpop.f32.mrf.mxu2 }
 0x968   :  { %v18700_v49 = vadd.f32 %v7815_v18, %v17801_v17  ;;  %v18703_v22 = vadd.f32 %v8063_v14, %v18330_v15  ;;  %v11348_v17 = vld [vmem:[%s19603_s4 + $0x89c] sm:$0xf]  ;;  %v10424_v15 = vld [vmem:[%s19603_s4 + $0x8b4] sm:$0xf0]  ;;  %v10674_v14 = vld [vmem:[%s19603_s4 + $0xa90] sm:$0xf] }
 0x969   :  { %v10427_v32 = vor.u32 %v11348_v17, %v10424_v15 }
 0x96a   :  { %v8313_v24 = vpop.f32.mrf.mxu0 }
 0x96b   :  { %v8314_v36 = vadd.f32 %v8313_v24, %v18365_v4  ;;  %v10206_v4 = vld [vmem:[%s19603_s4 + $0x6e0] sm:$0xf]  ;;  %v11414_v24 = vld [vmem:[%s19603_s4 + $0xaa8] sm:$0xf0] }
 0x96c   :  { %v10207_v42 = vor.u32 %v11296_v56, %v10206_v4  ;;  %v10675_v4 = vor.u32 %v11414_v24, %v10674_v14 }
 0x96d   :  { %8526 = vst.msk [vmem:[%s19604_s6 + $0x168] sm:$0xff] %vm8480_vm3, %v8314_v36  ;;  %v11303_v36 = vld [vmem:[%s19603_s4 + $0x730] sm:$0xf0] }
 0x96f   :  { %v7817_v19 = vpop.f32.mrf.mxu3  ;;  %v8065_v27 = vpop.f32.mrf.mxu2 }
 0x970   :  { %v18729_v44 = vadd.f32 %v7817_v19, %v17816_v33  ;;  %v18732_v31 = vadd.f32 %v8065_v27, %v18362_v3 }
 0x972   :  { %v8316_v43 = vpop.f32.mrf.mxu0 }
 0x973   :  { %v8317_v11 = vadd.f32 %v8316_v43, %v18380_v8 }
 0x974   :  { %7859 = vmatmul.bf16.gmra.mxu3 %v10647_v55  ;;  %8107 = vmatmul.bf16.gmra.mxu2 %v10427_v32 }
 0x975   :  { %8527 = vst.msk [vmem:[%s19604_s6 + $0x170] sm:$0xff] %vm8480_vm3, %v8317_v11  ;;  %10883 = vmatmul.msk.bf16.gmra.mxu0 %vm6291_vm2, %v10207_v42  ;;  %v10702_v11 = vld [vmem:[%s19603_s4 + $0xac8] sm:$0xf] }
 0x977   :  { %v7820_v33 = vpop.f32.mrf.mxu3  ;;  %v8068_v45 = vpop.f32.mrf.mxu2 }
 0x978   :  { %v18741_v3 = vadd.f32 %v7820_v33, %v17854_v6  ;;  %v18744_v7 = vadd.f32 %v8068_v45, %v18377_v41  ;;  %v11355_v6 = vld [vmem:[%s19603_s4 + $0x8d4] sm:$0xf]  ;;  %v10452_v41 = vld [vmem:[%s19603_s4 + $0x8ec] sm:$0xf0]  ;;  %v11421_v33 = vld [vmem:[%s19603_s4 + $0xae0] sm:$0xf0] }
 0x979   :  { %v10455_v56 = vor.u32 %v11355_v6, %v10452_v41  ;;  %v11310_v45 = vld [vmem:[%s19603_s4 + $0x768] sm:$0xf0]  ;;  %v10703_v6 = vor.u32 %v11421_v33, %v10702_v11  ;;  %v20348_v11 = vld [vmem:[#allocation165_spill] sm:$0xff] }
 0x97a   :  { %v8318_v18 = vpop.f32.mrf.mxu0 }
 0x97b   :  { %v8319_v8 = vadd.f32 %v8318_v18, %v18412_v30  ;;  %v10234_v30 = vld [vmem:[%s19603_s4 + $0x718] sm:$0xf] }
 0x97c   :  { %v10235_v19 = vor.u32 %v11303_v36, %v10234_v30 }
 0x97d   :  { %8528 = vst.msk [vmem:[%s19604_s6 + $0x178] sm:$0xff] %vm8480_vm3, %v8319_v8 }
 0x97f   :  { %v7822_v20 = vpop.f32.mrf.mxu3  ;;  %v8070_v60 = vpop.f32.mrf.mxu2 }
 0x980   :  { %v18770_v17 = vadd.f32 %v7822_v20, %v17869_v9  ;;  %v18773_v15 = vadd.f32 %v8070_v60, %v18409_v63 }
 0x982   :  { %v8321_v27 = vpop.f32.mrf.mxu0 }
 0x983   :  { %v8322_v55 = vadd.f32 %v8321_v27, %v18427_v34  ;;  %v10730_v27 = vld [vmem:[%s19603_s4 + $0xb00] sm:$0xf] }
 0x984   :  { %7864 = vmatmul.bf16.gmra.mxu3 %v10675_v4  ;;  %8112 = vmatmul.bf16.gmra.mxu2 %v10455_v56  ;;  %v20347_v4 = vld [vmem:[#allocation151_spill] sm:$0xff] }
 0x985   :  { %8529 = vst.msk [vmem:[%s19604_s6 + $0x180] sm:$0xff] %vm8480_vm3, %v8322_v55  ;;  %10884 = vmatmul.msk.bf16.gmra.mxu0 %vm6291_vm2, %v10235_v19  ;;  %v11428_v55 = vld [vmem:[%s19603_s4 + $0xb18] sm:$0xf0] }
 0x987   :  { %v7825_v9 = vpop.f32.mrf.mxu3  ;;  %v8073_v32 = vpop.f32.mrf.mxu2 }
 0x988   :  { %v18782_v63 = vadd.f32 %v7825_v9, %v17907_v37  ;;  %v18785_v42 = vadd.f32 %v8073_v32, %v18424_v40  ;;  %v11362_v37 = vld [vmem:[%s19603_s4 + $0x90c] sm:$0xf]  ;;  %v10480_v40 = vld [vmem:[%s19603_s4 + $0x924] sm:$0xf0]  ;;  %v11317_v32 = vld [vmem:[%s19603_s4 + $0x7a0] sm:$0xf0] }
 0x989   :  { %v10483_v41 = vor.u32 %v11362_v37, %v10480_v40  ;;  %v10290_v9 = vld [vmem:[%s19603_s4 + $0x788] sm:$0xf]  ;;  %v10731_v40 = vor.u32 %v11428_v55, %v10730_v27 }
 0x98a   :  { %v8323_v43 = vpop.f32.mrf.mxu0 }
 0x98b   :  { %v8324_v34 = vadd.f32 %v8323_v43, %v18459_v54  ;;  %v10262_v54 = vld [vmem:[%s19603_s4 + $0x750] sm:$0xf] }
 0x98c   :  { %v10263_v30 = vor.u32 %v11310_v45, %v10262_v54  ;;  %v10291_v45 = vor.u32 %v11317_v32, %v10290_v9 }
 0x98d   :  { %8530 = vst.msk [vmem:[%s19604_s6 + $0x188] sm:$0xff] %vm8480_vm3, %v8324_v34 }
 0x98f   :  { %v7827_v18 = vpop.f32.mrf.mxu3  ;;  %v8075_v8 = vpop.f32.mrf.mxu2 }
 0x990   :  { %v18811_v14 = vadd.f32 %v7827_v18, %v17922_v21  ;;  %v18814_v24 = vadd.f32 %v8075_v8, %v18456_v52 }
 0x992   :  { %v8326_v36 = vpop.f32.mrf.mxu0 }
 0x993   :  { %v8327_v20 = vadd.f32 %v8326_v36, %v18474_v58 }
 0x994   :  { %7869 = vmatmul.bf16.gmra.mxu3 %v10703_v6  ;;  %8117 = vmatmul.bf16.gmra.mxu2 %v10483_v41 }
 0x995   :  { %8531 = vst.msk [vmem:[%s19604_s6 + $0x190] sm:$0xff] %vm8480_vm3, %v8327_v20  ;;  %10885 = vmatmul.msk.bf16.gmra.mxu0 %vm6291_vm2, %v10263_v30  ;;  %v10758_v20 = vld [vmem:[%s19603_s4 + $0xb38] sm:$0xf] }
 0x997   :  { %v7830_v21 = vpop.f32.mrf.mxu3  ;;  %v8078_v60 = vpop.f32.mrf.mxu2 }
 0x998   :  { %v18823_v52 = vadd.f32 %v7830_v21, %v20347_v4  ;;  %v18826_v56 = vadd.f32 %v8078_v60, %v18471_v28  ;;  %v11369_v28 = vld [vmem:[%s19603_s4 + $0x944] sm:$0xf]  ;;  %v11435_v21 = vld [vmem:[%s19603_s4 + $0xb50] sm:$0xf0]  ;;  %v11324_v60 = vld [vmem:[%s19603_s4 + $0x7d8] sm:$0xf0] }
 0x99a   :  { %v8328_v19 = vpop.f32.mrf.mxu0 }
 0x99b   :  { %v8329_v58 = vadd.f32 %v8328_v19, %v18506_v12  ;;  %v10508_v12 = vld [vmem:[%s19603_s4 + $0x95c] sm:$0xf0] }
 0x99c   :  { %v10511_v54 = vor.u32 %v11369_v28, %v10508_v12  ;;  %v10759_v28 = vor.u32 %v11435_v21, %v10758_v20  ;;  %v20351_v20 = vld [vmem:[#allocation61_spill] sm:$0xff] }
 0x99d   :  { %8532 = vst.msk [vmem:[%s19604_s6 + $0x198] sm:$0xff] %vm8480_vm3, %v8329_v58  ;;  %v20349_v58 = vld [vmem:[#allocation71_spill] sm:$0xff] }
 0x99f   :  { %v7832_v43 = vpop.f32.mrf.mxu3  ;;  %v8080_v34 = vpop.f32.mrf.mxu2 }
 0x9a0   :  { %v18852_v33 = vadd.f32 %v7832_v43, %v20348_v11  ;;  %v18855_v37 = vadd.f32 %v8080_v34, %v18503_v59 }
 0x9a2   :  { %v8331_v18 = vpop.f32.mrf.mxu0 }
 0x9a3   :  { %v8332_v8 = vadd.f32 %v8331_v18, %v18521_v10  ;;  %v10786_v18 = vld [vmem:[%s19603_s4 + $0xb70] sm:$0xf] }
 0x9a4   :  { %7874 = vmatmul.bf16.gmra.mxu3 %v10731_v40  ;;  %8122 = vmatmul.bf16.gmra.mxu2 %v10511_v54  ;;  %v20350_v40 = vld [vmem:[#allocation135_spill] sm:$0xff] }
 0x9a5   :  { %8533 = vst.msk [vmem:[%s19604_s6 + $0x1a0] sm:$0xff] %vm8480_vm3, %v8332_v8  ;;  %10886 = vmatmul.msk.bf16.gmra.mxu0 %vm6291_vm2, %v10291_v45  ;;  %v11442_v8 = vld [vmem:[%s19603_s4 + $0xb88] sm:$0xf0] }
 0x9a7   :  { %v7835_v6 = vpop.f32.mrf.mxu3  ;;  %v8083_v41 = vpop.f32.mrf.mxu2 }
 0x9a8   :  { %v18864_v59 = vadd.f32 %v7835_v6, %v18013_v13  ;;  %v18867_v30 = vadd.f32 %v8083_v41, %v18518_v53  ;;  %v11376_v13 = vld [vmem:[%s19603_s4 + $0x97c] sm:$0xf]  ;;  %v10536_v53 = vld [vmem:[%s19603_s4 + $0x994] sm:$0xf0]  ;;  %v11331_v41 = vld [vmem:[%s19603_s4 + $0x810] sm:$0xf0] }
 0x9a9   :  { %v10539_v12 = vor.u32 %v11376_v13, %v10536_v53  ;;  %v10346_v6 = vld [vmem:[%s19603_s4 + $0x7f8] sm:$0xf]  ;;  %v10787_v53 = vor.u32 %v11442_v8, %v10786_v18  ;;  %v20353_v18 = vld [vmem:[#allocation167_spill] sm:$0xff] }
 0x9aa   :  { %v8333_v36 = vpop.f32.mrf.mxu0 }
 0x9ab   :  { %v8334_v10 = vadd.f32 %v8333_v36, %v18553_v1  ;;  %v10318_v1 = vld [vmem:[%s19603_s4 + $0x7c0] sm:$0xf] }
 0x9ac   :  { %v10319_v9 = vor.u32 %v11324_v60, %v10318_v1  ;;  %v10347_v60 = vor.u32 %v11331_v41, %v10346_v6 }
 0x9ad   :  { %8534 = vst.msk [vmem:[%s19604_s6 + $0x1a8] sm:$0xff] %vm8480_vm3, %v8334_v10 }
 0x9af   :  { %v7837_v4 = vpop.f32.mrf.mxu3  ;;  %v8085_v19 = vpop.f32.mrf.mxu2 }
 0x9b0   :  { %v18893_v27 = vadd.f32 %v7837_v4, %v20349_v58  ;;  %v18896_v55 = vadd.f32 %v8085_v19, %v18550_v2 }
 0x9b2   :  { %v8336_v32 = vpop.f32.mrf.mxu0 }
 0x9b3   :  { %v8337_v43 = vadd.f32 %v8336_v32, %v18568_v5 }
 0x9b4   :  { %7879 = vmatmul.bf16.gmra.mxu3 %v10759_v28  ;;  %8127 = vmatmul.bf16.gmra.mxu2 %v10539_v12  ;;  %v20352_v12 = vld [vmem:[#allocation137_spill] sm:$0xff] }
 0x9b5   :  { %8535 = vst.msk [vmem:[%s19604_s6 + $0x1b0] sm:$0xff] %vm8480_vm3, %v8337_v43  ;;  %10887 = vmatmul.msk.bf16.gmra.mxu0 %vm6291_vm2, %v10319_v9  ;;  %v10814_v43 = vld [vmem:[%s19603_s4 + $0xba8] sm:$0xf] }
 0x9b7   :  { %v7840_v34 = vpop.f32.mrf.mxu3  ;;  %v8088_v11 = vpop.f32.mrf.mxu2 }
 0x9b8   :  { %v18905_v2 = vadd.f32 %v7840_v34, %v20350_v40  ;;  %v18908_v54 = vadd.f32 %v8088_v11, %v18565_v35  ;;  %v11383_v35 = vld [vmem:[%s19603_s4 + $0x9b4] sm:$0xf]  ;;  %v11449_v34 = vld [vmem:[%s19603_s4 + $0xbc0] sm:$0xf0]  ;;  %v10374_v11 = vld [vmem:[%s19603_s4 + $0x830] sm:$0xf] }
 0x9b9   :  { %v11338_v40 = vld [vmem:[%s19603_s4 + $0x848] sm:$0xf0] }
 0x9ba   :  { %v8338_v45 = vpop.f32.mrf.mxu0  ;;  %v10375_v41 = vor.u32 %v11338_v40, %v10374_v11 }
 0x9bb   :  { %v8339_v5 = vadd.f32 %v8338_v45, %v18600_v50  ;;  %v10564_v50 = vld [vmem:[%s19603_s4 + $0x9cc] sm:$0xf0] }
 0x9bc   :  { %v10567_v1 = vor.u32 %v11383_v35, %v10564_v50  ;;  %v10815_v50 = vor.u32 %v11449_v34, %v10814_v43  ;;  %v20355_v43 = vld [vmem:[#allocation51_spill] sm:$0xff] }
 0x9bd   :  { %8536 = vst.msk [vmem:[%s19604_s6 + $0x1b8] sm:$0xff] %vm8480_vm3, %v8339_v5 }
 0x9bf   :  { %v7842_v36 = vpop.f32.mrf.mxu3  ;;  %v8090_v10 = vpop.f32.mrf.mxu2 }
 0x9c0   :  { %v18934_v21 = vadd.f32 %v7842_v36, %v20351_v20  ;;  %v18937_v13 = vadd.f32 %v8090_v10, %v18597_v25 }
 0x9c2   :  { %v8341_v4 = vpop.f32.mrf.mxu0 }
 0x9c3   :  { %v8342_v19 = vadd.f32 %v8341_v4, %v18615_v39 }
 0x9c4   :  { %7884 = vmatmul.bf16.gmra.mxu3 %v10787_v53  ;;  %8132 = vmatmul.bf16.gmra.mxu2 %v10567_v1  ;;  %v20354_v1 = vld [vmem:[#allocation178_spill] sm:$0xff] }
 0x9c5   :  { %8537 = vst.msk [vmem:[%s19604_s6 + $0x1c0] sm:$0xff] %vm8480_vm3, %v8342_v19  ;;  %10888 = vmatmul.msk.bf16.gmra.mxu0 %vm6291_vm2, %v10347_v60  ;;  %v10842_v19 = vld [vmem:[%s19603_s4 + $0xbe0] sm:$0xf] }
 0x9c7   :  { %v7845_v58 = vpop.f32.mrf.mxu3  ;;  %v8093_v28 = vpop.f32.mrf.mxu2 }
 0x9c8   :  { %v18946_v25 = vadd.f32 %v7845_v58, %v20352_v12  ;;  %v18949_v9 = vadd.f32 %v8093_v28, %v18612_v57  ;;  %v11390_v57 = vld [vmem:[%s19603_s4 + $0x9ec] sm:$0xf]  ;;  %v11456_v58 = vld [vmem:[%s19603_s4 + $0xbf8] sm:$0xf0]  ;;  %v10402_v28 = vld [vmem:[%s19603_s4 + $0x868] sm:$0xf] }
 0x9c9   :  { %v11345_v12 = vld [vmem:[%s19603_s4 + $0x880] sm:$0xf0] }
 0x9ca   :  { %v8343_v32 = vpop.f32.mrf.mxu0  ;;  %v10403_v40 = vor.u32 %v11345_v12, %v10402_v28 }
 0x9cb   :  { %v8344_v39 = vadd.f32 %v8343_v32, %v18647_v62  ;;  %v10592_v62 = vld [vmem:[%s19603_s4 + $0xa04] sm:$0xf0] }
 0x9cc   :  { %v10595_v6 = vor.u32 %v11390_v57, %v10592_v62  ;;  %v10843_v62 = vor.u32 %v11456_v58, %v10842_v19 }
 0x9cd   :  { %8538 = vst.msk [vmem:[%s19604_s6 + $0x1c8] sm:$0xff] %vm8480_vm3, %v8344_v39 }
 0x9cf   :  { %v7847_v45 = vpop.f32.mrf.mxu3  ;;  %v8095_v5 = vpop.f32.mrf.mxu2 }
 0x9d0   :  { %v18975_v8 = vadd.f32 %v7847_v45, %v20353_v18  ;;  %v18978_v35 = vadd.f32 %v8095_v5, %v18644_v46 }
 0x9d2   :  { %v8346_v36 = vpop.f32.mrf.mxu0 }
 0x9d3   :  { %v8347_v10 = vadd.f32 %v8346_v36, %v18662_v38 }
 0x9d4   :  { %7889 = vmatmul.bf16.gmra.mxu3 %v10815_v50  ;;  %8137 = vmatmul.bf16.gmra.mxu2 %v10595_v6 }
 0x9d5   :  { %8539 = vst.msk [vmem:[%s19604_s6 + $0x1d0] sm:$0xff] %vm8480_vm3, %v8347_v10  ;;  %10889 = vmatmul.msk.bf16.gmra.mxu0 %vm6291_vm2, %v10375_v41 }
 0x9d7   :  { %v7850_v20 = vpop.f32.mrf.mxu3  ;;  %v8098_v53 = vpop.f32.mrf.mxu2 }
 0x9d8   :  { %v18987_v46 = vadd.f32 %v7850_v20, %v20354_v1  ;;  %v18990_v60 = vadd.f32 %v8098_v53, %v18659_v47  ;;  %v11397_v47 = vld [vmem:[%s19603_s4 + $0xa24] sm:$0xf]  ;;  %v10430_v20 = vld [vmem:[%s19603_s4 + $0x8a0] sm:$0xf] }
 0x9da   :  { %v8348_v4 = vpop.f32.mrf.mxu0 }
 0x9db   :  { %v8349_v38 = vadd.f32 %v8348_v4, %v18691_v61  ;;  %v10620_v61 = vld [vmem:[%s19603_s4 + $0xa3c] sm:$0xf0]  ;;  %v20356_v4 = vld [vmem:[#allocation139_spill] sm:$0xff] }
 0x9dc   :  { %v10623_v11 = vor.u32 %v11397_v47, %v10620_v61 }
 0x9dd   :  { %8540 = vst.msk [vmem:[%s19604_s6 + $0x1d8] sm:$0xff] %vm8480_vm3, %v8349_v38 }
 0x9df   :  { %v7852_v32 = vpop.f32.mrf.mxu3  ;;  %v8100_v39 = vpop.f32.mrf.mxu2 }
 0x9e0   :  { %v19016_v34 = vadd.f32 %v7852_v32, %v20355_v43  ;;  %v19019_v57 = vadd.f32 %v8100_v39, %v18688_v51 }
 0x9e2   :  { %v8351_v45 = vpop.f32.mrf.mxu0 }
 0x9e3   :  { %v8352_v5 = vadd.f32 %v8351_v45, %v18703_v22  ;;  %v19036_v22 = vld [vmem:[%s19603_s4 + $0xc18] sm:$0xff] }
 0x9e4   :  { %7894 = vmatmul.bf16.gmra.mxu3 %v10843_v62  ;;  %8142 = vmatmul.bf16.gmra.mxu2 %v10623_v11  ;;  %v5560_v10 = vunpack.c.l.b16 %v19036_v22  ;;  %v11411_v11 = vld [vmem:[%s19603_s4 + $0xa94] sm:$0xf] }
 0x9e5   :  { %8541 = vst.msk [vmem:[%s19604_s6 + $0x1e0] sm:$0xff] %vm8480_vm3, %v8352_v5  ;;  %10890 = vmatmul.msk.bf16.gmra.mxu0 %vm6291_vm2, %v10403_v40 }
 0x9e6   :  { %v5952_v58 = vpack.c.b16 %v5560_v10, %v5560_v10 }
 0x9e7   :  { %v7855_v18 = vpop.f32.mrf.mxu3  ;;  %v8103_v50 = vpop.f32.mrf.mxu2 }
 0x9e8   :  { %v19028_v51 = vadd.f32 %v7855_v18, %v18225_v26  ;;  %v19031_v6 = vadd.f32 %v8103_v50, %v18700_v49  ;;  %v11404_v26 = vld [vmem:[%s19603_s4 + $0xa5c] sm:$0xf]  ;;  %v10648_v49 = vld [vmem:[%s19603_s4 + $0xa74] sm:$0xf0] }
 0x9e9   :  { %v10651_v47 = vor.u32 %v11404_v26, %v10648_v49 }
 0x9ea   :  { %v8353_v41 = vpop.f32.mrf.mxu0 }
 0x9eb   :  { %v8354_v36 = vadd.f32 %v8353_v41, %v18732_v31  ;;  %v11352_v31 = vld [vmem:[%s19603_s4 + $0x8b8] sm:$0xf0] }
 0x9ec   :  { %v10431_v61 = vor.u32 %v11352_v31, %v10430_v20 }
 0x9ed   :  { %8542 = vst.msk [vmem:[%s19604_s6 + $0x1e8] sm:$0xff] %vm8480_vm3, %v8354_v36 }
 0x9ef   :  { %v7857_v53 = vpop.f32.mrf.mxu3  ;;  %v8105_v1 = vpop.f32.mrf.mxu2 }
 0x9f0   :  { %v19057_v38 = vadd.f32 %v7857_v53, %v20356_v4  ;;  %v19060_v19 = vadd.f32 %v8105_v1, %v18729_v44  ;;  %v10704_v1 = vld [vmem:[%s19603_s4 + $0xae4] sm:$0xf0] }
 0x9f2   :  { %v8356_v28 = vpop.f32.mrf.mxu0 }
 0x9f3   :  { %v8357_v12 = vadd.f32 %v8356_v28, %v18744_v7 }
 0x9f4   :  { %7899 = vmatmul.bf16.gmra.mxu3 %v5952_v58  ;;  %8147 = vmatmul.bf16.gmra.mxu2 %v10651_v47  ;;  %v20358_v47 = vld [vmem:[#allocation141_spill] sm:$0xff] }
 0x9f5   :  { %8543 = vst.msk [vmem:[%s19604_s6 + $0x1f0] sm:$0xff] %vm8480_vm3, %v8357_v12  ;;  %10891 = vmatmul.msk.bf16.gmra.mxu0 %vm6291_vm2, %v10431_v61 }
 0x9f7   :  { %v7860_v32 = vpop.f32.mrf.mxu3  ;;  %v8108_v39 = vpop.f32.mrf.mxu2 }
 0x9f8   :  { %v19069_v44 = vadd.f32 %v7860_v32, %v18275_v0  ;;  %v19072_v43 = vadd.f32 %v8108_v39, %v18741_v3  ;;  %v10676_v0 = vld [vmem:[%s19603_s4 + $0xaac] sm:$0xf0]  ;;  %v10458_v3 = vld [vmem:[%s19603_s4 + $0x8d8] sm:$0xf] }
 0x9f9   :  { %v10679_v50 = vor.u32 %v11411_v11, %v10676_v0  ;;  %v20359_v0 = vld [vmem:[#allocation179_spill] sm:$0xff] }
 0x9fa   :  { %v8358_v62 = vpop.f32.mrf.mxu0 }
 0x9fb   :  { %v8359_v7 = vadd.f32 %v8358_v62, %v18773_v15  ;;  %v11359_v15 = vld [vmem:[%s19603_s4 + $0x8f0] sm:$0xf0] }
 0x9fc   :  { %v10459_v41 = vor.u32 %v11359_v15, %v10458_v3 }
 0x9fd   :  { %8544 = vst.msk [vmem:[%s19604_s6 + $0x1f8] sm:$0xff] %vm8480_vm3, %v8359_v7 }
 0x9ff   :  { %v7862_v40 = vpop.f32.mrf.mxu3  ;;  %v8110_v45 = vpop.f32.mrf.mxu2 }
 0xa00   :  { %v19092_v5 = vadd.f32 %v7862_v40, %v18290_v48  ;;  %v19095_v18 = vadd.f32 %v8110_v45, %v18770_v17  ;;  %v20357_v48 = vld [vmem:[#allocation64_spill] sm:$0xff]  ;;  %v10732_v45 = vld [vmem:[%s19603_s4 + $0xb1c] sm:$0xf0] }
 0xa02   :  { %v8361_v36 = vpop.f32.mrf.mxu0 }
 0xa03   :  { %v8362_v10 = vadd.f32 %v8361_v36, %v18785_v42  ;;  %v11418_v42 = vld [vmem:[%s19603_s4 + $0xacc] sm:$0xf]  ;;  %v20360_v36 = vld [vmem:[#allocation180_spill] sm:$0xff] }
 0xa04   :  { %8152 = vmatmul.bf16.gmra.mxu2 %v10679_v50  ;;  %v10707_v12 = vor.u32 %v11418_v42, %v10704_v1 }
 0xa05   :  { %8545 = vst.msk [vmem:[%s19604_s6 + $0x200] sm:$0xff] %vm8480_vm3, %v8362_v10  ;;  %10892 = vmatmul.msk.bf16.gmra.mxu0 %vm6291_vm2, %v10459_v41 }
 0xa07   :  { %v7865_v26 = vpop.f32.mrf.mxu3  ;;  %v8113_v49 = vpop.f32.mrf.mxu2 }
 0xa08   :  { %v19104_v20 = vadd.f32 %v7865_v26, %v20357_v48  ;;  %v19107_v17 = vadd.f32 %v8113_v49, %v18782_v63  ;;  %v10486_v63 = vld [vmem:[%s19603_s4 + $0x910] sm:$0xf] }
 0xa0a   :  { %v8363_v31 = vpop.f32.mrf.mxu0 }
 0xa0b   :  { %v8364_v53 = vadd.f32 %v8363_v31, %v18814_v24  ;;  %v11366_v24 = vld [vmem:[%s19603_s4 + $0x928] sm:$0xf0] }
 0xa0c   :  { %v10487_v32 = vor.u32 %v11366_v24, %v10486_v63  ;;  %v20361_v63 = vld [vmem:[#allocation53_spill] sm:$0xff] }
 0xa0d   :  { %8546 = vst.msk [vmem:[%s19604_s6 + $0x208] sm:$0xff] %vm8480_vm3, %v8364_v53 }
 0xa0f   :  { %v7867_v4 = vpop.f32.mrf.mxu3  ;;  %v8115_v58 = vpop.f32.mrf.mxu2 }
 0xa10   :  { %v19127_v61 = vadd.f32 %v7867_v4, %v20358_v47  ;;  %v19130_v28 = vadd.f32 %v8115_v58, %v18811_v14  ;;  %v10760_v47 = vld [vmem:[%s19603_s4 + $0xb54] sm:$0xf0] }
 0xa12   :  { %v8366_v39 = vpop.f32.mrf.mxu0 }
 0xa13   :  { %v8367_v62 = vadd.f32 %v8366_v39, %v18826_v56  ;;  %v11425_v56 = vld [vmem:[%s19603_s4 + $0xb04] sm:$0xf]  ;;  %v20362_v39 = vld [vmem:[#allocation143_spill] sm:$0xff] }
 0xa14   :  { %8157 = vmatmul.bf16.gmra.mxu2 %v10707_v12  ;;  %v10735_v49 = vor.u32 %v11425_v56, %v10732_v45 }
 0xa15   :  { %8547 = vst.msk [vmem:[%s19604_s6 + $0x210] sm:$0xff] %vm8480_vm3, %v8367_v62  ;;  %10893 = vmatmul.msk.bf16.gmra.mxu0 %vm6291_vm2, %v10487_v32 }
 0xa17   :  { %v7870_v7 = vpop.f32.mrf.mxu3  ;;  %v8118_v11 = vpop.f32.mrf.mxu2 }
 0xa18   :  { %v19139_v3 = vadd.f32 %v7870_v7, %v20359_v0  ;;  %v19142_v14 = vadd.f32 %v8118_v11, %v18823_v52  ;;  %v10514_v52 = vld [vmem:[%s19603_s4 + $0x948] sm:$0xf] }
 0xa1a   :  { %v8368_v15 = vpop.f32.mrf.mxu0 }
 0xa1b   :  { %v8369_v40 = vadd.f32 %v8368_v15, %v18855_v37  ;;  %v11373_v37 = vld [vmem:[%s19603_s4 + $0x960] sm:$0xf0] }
 0xa1c   :  { %v10515_v48 = vor.u32 %v11373_v37, %v10514_v52  ;;  %v20363_v52 = vld [vmem:[#allocation3_spill] sm:$0xff] }
 0xa1d   :  { %8548 = vst.msk [vmem:[%s19604_s6 + $0x218] sm:$0xff] %vm8480_vm3, %v8369_v40 }
 0xa1f   :  { %v7872_v50 = vpop.f32.mrf.mxu3  ;;  %v8120_v41 = vpop.f32.mrf.mxu2 }
 0xa20   :  { %v19162_v10 = vadd.f32 %v7872_v50, %v20360_v36  ;;  %v19165_v26 = vadd.f32 %v8120_v41, %v18852_v33  ;;  %v10788_v36 = vld [vmem:[%s19603_s4 + $0xb8c] sm:$0xf0] }
 0xa22   :  { %v8371_v31 = vpop.f32.mrf.mxu0 }
 0xa23   :  { %v8372_v53 = vadd.f32 %v8371_v31, %v18867_v30  ;;  %v11432_v30 = vld [vmem:[%s19603_s4 + $0xb3c] sm:$0xf]  ;;  %v20364_v31 = vld [vmem:[#allocation27_spill] sm:$0xff] }
 0xa24   :  { %8162 = vmatmul.bf16.gmra.mxu2 %v10735_v49  ;;  %v10763_v11 = vor.u32 %v11432_v30, %v10760_v47 }
 0xa25   :  { %8549 = vst.msk [vmem:[%s19604_s6 + $0x220] sm:$0xff] %vm8480_vm3, %v8372_v53  ;;  %10894 = vmatmul.msk.bf16.gmra.mxu0 %vm6291_vm2, %v10515_v48 }
 0xa27   :  { %v7875_v42 = vpop.f32.mrf.mxu3  ;;  %v8123_v1 = vpop.f32.mrf.mxu2 }
 0xa28   :  { %v19174_v24 = vadd.f32 %v7875_v42, %v20361_v63  ;;  %v19177_v33 = vadd.f32 %v8123_v1, %v18864_v59  ;;  %v10542_v59 = vld [vmem:[%s19603_s4 + $0x980] sm:$0xf] }
 0xa2a   :  { %v8373_v4 = vpop.f32.mrf.mxu0 }
 0xa2b   :  { %v8374_v58 = vadd.f32 %v8373_v4, %v18896_v55  ;;  %v11380_v55 = vld [vmem:[%s19603_s4 + $0x998] sm:$0xf0] }
 0xa2c   :  { %v10543_v0 = vor.u32 %v11380_v55, %v10542_v59 }
 0xa2d   :  { %8550 = vst.msk [vmem:[%s19604_s6 + $0x228] sm:$0xff] %vm8480_vm3, %v8374_v58 }
 0xa2f   :  { %v7877_v12 = vpop.f32.mrf.mxu3  ;;  %v8125_v32 = vpop.f32.mrf.mxu2 }
 0xa30   :  { %v19197_v62 = vadd.f32 %v7877_v12, %v20362_v39  ;;  %v19200_v7 = vadd.f32 %v8125_v32, %v18893_v27 }
 0xa32   :  { %v8376_v15 = vpop.f32.mrf.mxu0 }
 0xa33   :  { %v8377_v40 = vadd.f32 %v8376_v15, %v18908_v54  ;;  %v11439_v54 = vld [vmem:[%s19603_s4 + $0xb74] sm:$0xf] }
 0xa34   :  { %8167 = vmatmul.bf16.gmra.mxu2 %v10763_v11  ;;  %v10791_v1 = vor.u32 %v11439_v54, %v10788_v36  ;;  %v20365_v11 = vld [vmem:[#allocation26_spill] sm:$0xff]  ;;  %v20366_v54 = vld [vmem:[#allocation153_spill] sm:$0xff] }
 0xa35   :  { %8551 = vst.msk [vmem:[%s19604_s6 + $0x230] sm:$0xff] %vm8480_vm3, %v8377_v40  ;;  %10895 = vmatmul.msk.bf16.gmra.mxu0 %vm6291_vm2, %v10543_v0 }
 0xa37   :  { %v7880_v56 = vpop.f32.mrf.mxu3  ;;  %v8128_v45 = vpop.f32.mrf.mxu2 }
 0xa38   :  { %v19209_v37 = vadd.f32 %v7880_v56, %v20363_v52  ;;  %v19212_v27 = vadd.f32 %v8128_v45, %v18905_v2  ;;  %v10570_v2 = vld [vmem:[%s19603_s4 + $0x9b8] sm:$0xf] }
 0xa3a   :  { %v8378_v50 = vpop.f32.mrf.mxu0 }
 0xa3b   :  { %v8379_v41 = vadd.f32 %v8378_v50, %v18937_v13  ;;  %v11387_v13 = vld [vmem:[%s19603_s4 + $0x9d0] sm:$0xf0] }
 0xa3c   :  { %v10571_v63 = vor.u32 %v11387_v13, %v10570_v2 }
 0xa3d   :  { %8552 = vst.msk [vmem:[%s19604_s6 + $0x238] sm:$0xff] %vm8480_vm3, %v8379_v41 }
 0xa3f   :  { %v7882_v49 = vpop.f32.mrf.mxu3  ;;  %v8130_v48 = vpop.f32.mrf.mxu2 }
 0xa40   :  { %v19232_v53 = vadd.f32 %v7882_v49, %v20364_v31  ;;  %v19235_v42 = vadd.f32 %v8130_v48, %v18934_v21  ;;  %v10844_v49 = vld [vmem:[%s19603_s4 + $0xbfc] sm:$0xf0] }
 0xa42   :  { %v8381_v4 = vpop.f32.mrf.mxu0 }
 0xa43   :  { %v8382_v58 = vadd.f32 %v8381_v4, %v18949_v9  ;;  %v11446_v9 = vld [vmem:[%s19603_s4 + $0xbac] sm:$0xf] }
 0xa44   :  { %8172 = vmatmul.bf16.gmra.mxu2 %v10791_v1  ;;  %v20367_v1 = vld [vmem:[#allocation15_spill] sm:$0xff] }
 0xa45   :  { %8553 = vst.msk [vmem:[%s19604_s6 + $0x240] sm:$0xff] %vm8480_vm3, %v8382_v58  ;;  %10896 = vmatmul.msk.bf16.gmra.mxu0 %vm6291_vm2, %v10571_v63 }
 0xa47   :  { %v7885_v30 = vpop.f32.mrf.mxu3  ;;  %v8133_v47 = vpop.f32.mrf.mxu2 }
 0xa48   :  { %v19244_v59 = vadd.f32 %v7885_v30, %v18510_v23  ;;  %v19247_v21 = vadd.f32 %v8133_v47, %v18946_v25  ;;  %v10816_v23 = vld [vmem:[%s19603_s4 + $0xbc4] sm:$0xf0]  ;;  %v10598_v25 = vld [vmem:[%s19603_s4 + $0x9f0] sm:$0xf] }
 0xa49   :  { %v10819_v40 = vor.u32 %v11446_v9, %v10816_v23 }
 0xa4a   :  { %v8383_v55 = vpop.f32.mrf.mxu0 }
 0xa4b   :  { %v8384_v12 = vadd.f32 %v8383_v55, %v18978_v35  ;;  %v11394_v35 = vld [vmem:[%s19603_s4 + $0xa08] sm:$0xf0] }
 0xa4c   :  { %v10599_v56 = vor.u32 %v11394_v35, %v10598_v25 }
 0xa4d   :  { %8554 = vst.msk [vmem:[%s19604_s6 + $0x248] sm:$0xff] %vm8480_vm3, %v8384_v12 }
 0xa4f   :  { %v7887_v32 = vpop.f32.mrf.mxu3  ;;  %v8135_v39 = vpop.f32.mrf.mxu2 }
 0xa50   :  { %v19267_v0 = vadd.f32 %v7887_v32, %v20365_v11  ;;  %v19270_v15 = vadd.f32 %v8135_v39, %v18975_v8  ;;  %v10654_v32 = vld [vmem:[%s19603_s4 + $0xa60] sm:$0xf]  ;;  %v20368_v11 = vld [vmem:[#allocation155_spill] sm:$0xff] }
 0xa52   :  { %v8386_v45 = vpop.f32.mrf.mxu0 }
 0xa53   :  { %v8387_v52 = vadd.f32 %v8386_v45, %v18990_v60  ;;  %v11453_v60 = vld [vmem:[%s19603_s4 + $0xbe4] sm:$0xf] }
 0xa54   :  { %8177 = vmatmul.bf16.gmra.mxu2 %v10819_v40  ;;  %v10847_v58 = vor.u32 %v11453_v60, %v10844_v49 }
 0xa55   :  { %8555 = vst.msk [vmem:[%s19604_s6 + $0x250] sm:$0xff] %vm8480_vm3, %v8387_v52  ;;  %10897 = vmatmul.msk.bf16.gmra.mxu0 %vm6291_vm2, %v10599_v56 }
 0xa57   :  { %v7890_v50 = vpop.f32.mrf.mxu3  ;;  %v8138_v41 = vpop.f32.mrf.mxu2 }
 0xa58   :  { %v19279_v36 = vadd.f32 %v7890_v50, %v20366_v54  ;;  %v19282_v8 = vadd.f32 %v8138_v41, %v18987_v46  ;;  %v10626_v46 = vld [vmem:[%s19603_s4 + $0xa28] sm:$0xf] }
 0xa5a   :  { %v8388_v2 = vpop.f32.mrf.mxu0 }
 0xa5b   :  { %v8389_v13 = vadd.f32 %v8388_v2, %v19019_v57  ;;  %v11401_v57 = vld [vmem:[%s19603_s4 + $0xa40] sm:$0xf0] }
 0xa5c   :  { %v10627_v30 = vor.u32 %v11401_v57, %v10626_v46 }
 0xa5d   :  { %8556 = vst.msk [vmem:[%s19604_s6 + $0x258] sm:$0xff] %vm8480_vm3, %v8389_v13 }
 0xa5f   :  { %v7892_v48 = vpop.f32.mrf.mxu3  ;;  %v8140_v31 = vpop.f32.mrf.mxu2 }
 0xa60   :  { %v19302_v63 = vadd.f32 %v7892_v48, %v20367_v1  ;;  %v19305_v4 = vadd.f32 %v8140_v31, %v19016_v34 }
 0xa62   :  { %v8391_v47 = vpop.f32.mrf.mxu0 }
 0xa63   :  { %v8392_v55 = vadd.f32 %v8391_v47, %v19031_v6  ;;  %v5561_v6 = vunpack.c.h.b16 %v19036_v22 }
 0xa64   :  { %8182 = vmatmul.bf16.gmra.mxu2 %v10847_v58 }
 0xa65   :  { %8557 = vst.msk [vmem:[%s19604_s6 + $0x260] sm:$0xff] %vm8480_vm3, %v8392_v55  ;;  %10898 = vmatmul.msk.bf16.gmra.mxu0 %vm6291_vm2, %v10627_v30 }
 0xa67   :  { %v7895_v12 = vpop.f32.mrf.mxu3  ;;  %v8143_v9 = vpop.f32.mrf.mxu2 }
 0xa68   :  { %v19314_v23 = vadd.f32 %v7895_v12, %v18604_v29  ;;  %v19317_v34 = vadd.f32 %v8143_v9, %v19028_v51  ;;  %v11408_v29 = vld [vmem:[%s19603_s4 + $0xa78] sm:$0xf0] }
 0xa69   :  { %v10655_v56 = vor.u32 %v11408_v29, %v10654_v32 }
 0xa6a   :  { %v8393_v25 = vpop.f32.mrf.mxu0 }
 0xa6b   :  { %v8394_v35 = vadd.f32 %v8393_v25, %v19060_v19  ;;  %v5953_v19 = vpack.c.b16 %v5561_v6, %v5561_v6 }
 0xa6d   :  { %8558 = vst.msk [vmem:[%s19604_s6 + $0x268] sm:$0xff] %vm8480_vm3, %v8394_v35 }
 0xa6f   :  { %v7897_v51 = vpop.f32.mrf.mxu3  ;;  %v8145_v39 = vpop.f32.mrf.mxu2 }
 0xa70   :  { %v19332_v40 = vadd.f32 %v7897_v51, %v20368_v11  ;;  %v19335_v22 = vadd.f32 %v8145_v39, %v19057_v38 }
 0xa72   :  { %v8396_v45 = vpop.f32.mrf.mxu0 }
 0xa73   :  { %v8397_v52 = vadd.f32 %v8396_v45, %v19072_v43  ;;  %v10682_v43 = vld [vmem:[%s19603_s4 + $0xa98] sm:$0xf] }
 0xa74   :  { %8187 = vmatmul.bf16.gmra.mxu2 %v5953_v19 }
 0xa75   :  { %8559 = vst.msk [vmem:[%s19604_s6 + $0x270] sm:$0xff] %vm8480_vm3, %v8397_v52  ;;  %10899 = vmatmul.msk.bf16.gmra.mxu0 %vm6291_vm2, %v10655_v56 }
 0xa77   :  { %v7900_v50 = vpop.f32.mrf.mxu3  ;;  %v8148_v41 = vpop.f32.mrf.mxu2 }
 0xa78   :  { %v19344_v54 = vadd.f32 %v7900_v50, %v18651_v16  ;;  %v19347_v38 = vadd.f32 %v8148_v41, %v19069_v44  ;;  %v11415_v16 = vld [vmem:[%s19603_s4 + $0xab0] sm:$0xf0] }
 0xa79   :  { %v10683_v46 = vor.u32 %v11415_v16, %v10682_v43 }
 0xa7a   :  { %v8398_v2 = vpop.f32.mrf.mxu0 }
 0xa7b   :  { %v8399_v13 = vadd.f32 %v8398_v2, %v19095_v18 }
 0xa7d   :  { %8560 = vst.msk [vmem:[%s19604_s6 + $0x278] sm:$0xff] %vm8480_vm3, %v8399_v13 }
 0xa7f   :  { %v8150_v60 = vpop.f32.mrf.mxu2  ;;  %v7902_v49 = vpop.f32.mrf.mxu3 }
 0xa80   :  { %v19361_v44 = vadd.f32 %v8150_v60, %v19092_v5  ;;  %v10710_v5 = vld [vmem:[%s19603_s4 + $0xad0] sm:$0xf] }
 0xa82   :  { %v8401_v18 = vpop.f32.mrf.mxu0 }
 0xa83   :  { %v8402_v57 = vadd.f32 %v8401_v18, %v19107_v17  ;;  %v11422_v17 = vld [vmem:[%s19603_s4 + $0xae8] sm:$0xf0] }
 0xa84   :  { %v10711_v47 = vor.u32 %v11422_v17, %v10710_v5 }
 0xa85   :  { %8561 = vst.msk [vmem:[%s19604_s6 + $0x280] sm:$0xff] %vm8480_vm3, %v8402_v57  ;;  %10900 = vmatmul.msk.bf16.gmra.mxu0 %vm6291_vm2, %v10683_v46 }
 0xa87   :  { %v8153_v48 = vpop.f32.mrf.mxu2 }
 0xa88   :  { %v19370_v31 = vadd.f32 %v8153_v48, %v19104_v20 }
 0xa8a   :  { %v8403_v1 = vpop.f32.mrf.mxu0 }
 0xa8b   :  { %v8404_v58 = vadd.f32 %v8403_v1, %v19130_v28 }
 0xa8d   :  { %8562 = vst.msk [vmem:[%s19604_s6 + $0x288] sm:$0xff] %vm8480_vm3, %v8404_v58 }
 0xa8f   :  { %v8155_v30 = vpop.f32.mrf.mxu2 }
 0xa90   :  { %v19384_v20 = vadd.f32 %v8155_v30, %v19127_v61  ;;  %v10738_v61 = vld [vmem:[%s19603_s4 + $0xb08] sm:$0xf] }
 0xa92   :  { %v8406_v55 = vpop.f32.mrf.mxu0 }
 0xa93   :  { %v8407_v28 = vadd.f32 %v8406_v55, %v19142_v14  ;;  %v11429_v14 = vld [vmem:[%s19603_s4 + $0xb20] sm:$0xf0] }
 0xa94   :  { %v10739_v32 = vor.u32 %v11429_v14, %v10738_v61  ;;  %v3619_v14 = vld [vmem:[%s19603_s4 + $0xc20] sm:$0xf] }
 0xa95   :  { %8563 = vst.msk [vmem:[%s19604_s6 + $0x290] sm:$0xff] %vm8480_vm3, %v8407_v28  ;;  %10901 = vmatmul.msk.bf16.gmra.mxu0 %vm6291_vm2, %v10711_v47 }
 0xa97   :  { %v8158_v12 = vpop.f32.mrf.mxu2 }
 0xa98   :  { %v19393_v9 = vadd.f32 %v8158_v12, %v19139_v3 }
 0xa9a   :  { %v8408_v25 = vpop.f32.mrf.mxu0 }
 0xa9b   :  { %v8409_v35 = vadd.f32 %v8408_v25, %v19165_v26 }
 0xa9d   :  { %8564 = vst.msk [vmem:[%s19604_s6 + $0x298] sm:$0xff] %vm8480_vm3, %v8409_v35 }
 0xa9f   :  { %v8160_v6 = vpop.f32.mrf.mxu2 }
 0xaa0   :  { %v19407_v3 = vadd.f32 %v8160_v6, %v19162_v10  ;;  %v10766_v10 = vld [vmem:[%s19603_s4 + $0xb40] sm:$0xf] }
 0xaa2   :  { %v8411_v29 = vpop.f32.mrf.mxu0 }
 0xaa3   :  { %v8412_v26 = vadd.f32 %v8411_v29, %v19177_v33  ;;  %v11436_v33 = vld [vmem:[%s19603_s4 + $0xb58] sm:$0xf0] }
 0xaa4   :  { %v10767_v45 = vor.u32 %v11436_v33, %v10766_v10 }
 0xaa5   :  { %8565 = vst.msk [vmem:[%s19604_s6 + $0x2a0] sm:$0xff] %vm8480_vm3, %v8412_v26  ;;  %10902 = vmatmul.msk.bf16.gmra.mxu0 %vm6291_vm2, %v10739_v32 }
 0xaa7   :  { %v8163_v51 = vpop.f32.mrf.mxu2 }
 0xaa8   :  { %v19416_v39 = vadd.f32 %v8163_v51, %v19174_v24 }
 0xaaa   :  { %v8413_v11 = vpop.f32.mrf.mxu0 }
 0xaab   :  { %v8414_v19 = vadd.f32 %v8413_v11, %v19200_v7 }
 0xaad   :  { %8566 = vst.msk [vmem:[%s19604_s6 + $0x2a8] sm:$0xff] %vm8480_vm3, %v8414_v19 }
 0xaaf   :  { %v8165_v56 = vpop.f32.mrf.mxu2 }
 0xab0   :  { %v19430_v24 = vadd.f32 %v8165_v56, %v19197_v62  ;;  %v10794_v62 = vld [vmem:[%s19603_s4 + $0xb78] sm:$0xf] }
 0xab2   :  { %v8416_v52 = vpop.f32.mrf.mxu0 }
 0xab3   :  { %v8417_v7 = vadd.f32 %v8416_v52, %v19212_v27  ;;  %v11443_v27 = vld [vmem:[%s19603_s4 + $0xb90] sm:$0xf0] }
 0xab4   :  { %v10795_v16 = vor.u32 %v11443_v27, %v10794_v62 }
 0xab5   :  { %8567 = vst.msk [vmem:[%s19604_s6 + $0x2b0] sm:$0xff] %vm8480_vm3, %v8417_v7  ;;  %10903 = vmatmul.msk.bf16.gmra.mxu0 %vm6291_vm2, %v10767_v45 }
 0xab7   :  { %v8168_v50 = vpop.f32.mrf.mxu2 }
 0xab8   :  { %v19439_v41 = vadd.f32 %v8168_v50, %v19209_v37 }
 0xaba   :  { %v8418_v2 = vpop.f32.mrf.mxu0 }
 0xabb   :  { %v8419_v13 = vadd.f32 %v8418_v2, %v19235_v42 }
 0xabd   :  { %8568 = vst.msk [vmem:[%s19604_s6 + $0x2b8] sm:$0xff] %vm8480_vm3, %v8419_v13 }
 0xabf   :  { %v8170_v43 = vpop.f32.mrf.mxu2 }
 0xac0   :  { %v19453_v37 = vadd.f32 %v8170_v43, %v19232_v53  ;;  %v10822_v53 = vld [vmem:[%s19603_s4 + $0xbb0] sm:$0xf] }
 0xac2   :  { %v8421_v60 = vpop.f32.mrf.mxu0 }
 0xac3   :  { %v8422_v42 = vadd.f32 %v8421_v60, %v19247_v21  ;;  %v11450_v21 = vld [vmem:[%s19603_s4 + $0xbc8] sm:$0xf0] }
 0xac4   :  { %v10823_v1 = vor.u32 %v11450_v21, %v10822_v53 }
 0xac5   :  { %8569 = vst.msk [vmem:[%s19604_s6 + $0x2c0] sm:$0xff] %vm8480_vm3, %v8422_v42  ;;  %10904 = vmatmul.msk.bf16.gmra.mxu0 %vm6291_vm2, %v10795_v16 }
 0xac7   :  { %v8173_v49 = vpop.f32.mrf.mxu2 }
 0xac8   :  { %v19462_v46 = vadd.f32 %v8173_v49, %v19244_v59 }
 0xaca   :  { %v8423_v18 = vpop.f32.mrf.mxu0 }
 0xacb   :  { %v8424_v57 = vadd.f32 %v8423_v18, %v19270_v15 }
 0xacd   :  { %8570 = vst.msk [vmem:[%s19604_s6 + $0x2c8] sm:$0xff] %vm8480_vm3, %v8424_v57 }
 0xacf   :  { %v8175_v48 = vpop.f32.mrf.mxu2 }
 0xad0   :  { %v19476_v59 = vadd.f32 %v8175_v48, %v19267_v0  ;;  %v10850_v0 = vld [vmem:[%s19603_s4 + $0xbe8] sm:$0xf] }
 0xad2   :  { %v8426_v58 = vpop.f32.mrf.mxu0 }
 0xad3   :  { %v8427_v15 = vadd.f32 %v8426_v58, %v19282_v8  ;;  %v11457_v8 = vld [vmem:[%s19603_s4 + $0xc00] sm:$0xf0] }
 0xad4   :  { %v10851_v28 = vor.u32 %v11457_v8, %v10850_v0 }
 0xad5   :  { %8571 = vst.msk [vmem:[%s19604_s6 + $0x2d0] sm:$0xff] %vm8480_vm3, %v8427_v15  ;;  %10905 = vmatmul.msk.bf16.gmra.mxu0 %vm6291_vm2, %v10823_v1 }
 0xad7   :  { %v8178_v5 = vpop.f32.mrf.mxu2 }
 0xad8   :  { %v19485_v17 = vadd.f32 %v8178_v5, %v19279_v36 }
 0xada   :  { %v8428_v30 = vpop.f32.mrf.mxu0 }
 0xadb   :  { %v8429_v47 = vadd.f32 %v8428_v30, %v19305_v4 }
 0xadd   :  { %8572 = vst.msk [vmem:[%s19604_s6 + $0x2d8] sm:$0xff] %vm8480_vm3, %v8429_v47 }
 0xadf   :  { %v8180_v55 = vpop.f32.mrf.mxu2 }
 0xae0   :  { %v8181_v36 = vadd.f32 %v8180_v55, %v19302_v63 }
 0xae2   :  { %v8431_v12 = vpop.f32.mrf.mxu0 }
 0xae3   :  { %v8432_v4 = vadd.f32 %v8431_v12, %v19317_v34  ;;  %v5562_v34 = vunpack.c.l.b16 %v3619_v14 }
 0xae5   :  { %8573 = vst.msk [vmem:[%s19604_s6 + $0x2e0] sm:$0xff] %vm8480_vm3, %v8432_v4  ;;  %10906 = vmatmul.msk.bf16.gmra.mxu0 %vm6291_vm2, %v10851_v28  ;;  %v5954_v29 = vpack.c.b16 %v5562_v34, %v5562_v34 }
 0xae7   :  { %v8183_v25 = vpop.f32.mrf.mxu2 }
 0xae8   :  { %v8184_v35 = vadd.f32 %v8183_v25, %v19314_v23 }
 0xaea   :  { %v8433_v61 = vpop.f32.mrf.mxu0 }
 0xaeb   :  { %v8434_v63 = vadd.f32 %v8433_v61, %v19335_v22 }
 0xaed   :  { %8574 = vst.msk [vmem:[%s19604_s6 + $0x2e8] sm:$0xff] %vm8480_vm3, %v8434_v63 }
 0xaef   :  { %v8185_v6 = vpop.f32.mrf.mxu2 }
 0xaf0   :  { %v8186_v32 = vadd.f32 %v8185_v6, %v19332_v40 }
 0xaf2   :  { %v8436_v26 = vpop.f32.mrf.mxu0 }
 0xaf3   :  { %v8437_v23 = vadd.f32 %v8436_v26, %v19347_v38 }
 0xaf5   :  { %8575 = vst.msk [vmem:[%s19604_s6 + $0x2f0] sm:$0xff] %vm8480_vm3, %v8437_v23  ;;  %10907 = vmatmul.msk.bf16.gmra.mxu0 %vm6291_vm2, %v5954_v29 }
 0xaf7   :  { %v8188_v22 = vpop.f32.mrf.mxu2 }
 0xaf8   :  { %v8189_v51 = vadd.f32 %v8188_v22, %v19344_v54 }
 0xafa   :  { %v8438_v11 = vpop.f32.mrf.mxu0 }
 0xafb   :  { %v8439_v19 = vadd.f32 %v8438_v11, %v19361_v44 }
 0xafd   :  { %8576 = vst.msk [vmem:[%s19604_s6 + $0x2f8] sm:$0xff] %vm8480_vm3, %v8439_v19 }
 0xaff   :  { %v8190_v40 = vpop.f32.mrf.mxu2 }
 0xb02   :  { %v8441_v38 = vpop.f32.mrf.mxu0 }
 0xb03   :  { %v8442_v10 = vadd.f32 %v8441_v38, %v19370_v31 }
 0xb05   :  { %8577 = vst.msk [vmem:[%s19604_s6 + $0x300] sm:$0xff] %vm8480_vm3, %v8442_v10 }
 0xb0a   :  { %v8443_v33 = vpop.f32.mrf.mxu0 }
 0xb0b   :  { %v8444_v54 = vadd.f32 %v8443_v33, %v19384_v20 }
 0xb0d   :  { %8578 = vst.msk [vmem:[%s19604_s6 + $0x308] sm:$0xff] %vm8480_vm3, %v8444_v54 }
 0xb12   :  { %v8446_v44 = vpop.f32.mrf.mxu0 }
 0xb13   :  { %v8447_v56 = vadd.f32 %v8446_v44, %v19393_v9 }
 0xb15   :  { %8579 = vst.msk [vmem:[%s19604_s6 + $0x310] sm:$0xff] %vm8480_vm3, %v8447_v56 }
 0xb1a   :  { %v8448_v31 = vpop.f32.mrf.mxu0 }
 0xb1b   :  { %v8449_v45 = vadd.f32 %v8448_v31, %v19407_v3 }
 0xb1d   :  { %8580 = vst.msk [vmem:[%s19604_s6 + $0x318] sm:$0xff] %vm8480_vm3, %v8449_v45 }
 0xb22   :  { %v8451_v20 = vpop.f32.mrf.mxu0 }
 0xb23   :  { %v8452_v52 = vadd.f32 %v8451_v20, %v19416_v39 }
 0xb25   :  { %8581 = vst.msk [vmem:[%s19604_s6 + $0x320] sm:$0xff] %vm8480_vm3, %v8452_v52 }
 0xb2a   :  { %v8453_v9 = vpop.f32.mrf.mxu0 }
 0xb2b   :  { %v8454_v7 = vadd.f32 %v8453_v9, %v19430_v24 }
 0xb2d   :  { %8582 = vst.msk [vmem:[%s19604_s6 + $0x328] sm:$0xff] %vm8480_vm3, %v8454_v7 }
 0xb32   :  { %v8456_v3 = vpop.f32.mrf.mxu0 }
 0xb33   :  { %v8457_v50 = vadd.f32 %v8456_v3, %v19439_v41 }
 0xb35   :  { %8583 = vst.msk [vmem:[%s19604_s6 + $0x330] sm:$0xff] %vm8480_vm3, %v8457_v50 }
 0xb3a   :  { %v8458_v39 = vpop.f32.mrf.mxu0 }
 0xb3b   :  { %v8459_v2 = vadd.f32 %v8458_v39, %v19453_v37 }
 0xb3d   :  { %8584 = vst.msk [vmem:[%s19604_s6 + $0x338] sm:$0xff] %vm8480_vm3, %v8459_v2 }
 0xb42   :  { %v8461_v24 = vpop.f32.mrf.mxu0 }
 0xb43   :  { %v8462_v13 = vadd.f32 %v8461_v24, %v19462_v46 }
 0xb45   :  { %8585 = vst.msk [vmem:[%s19604_s6 + $0x340] sm:$0xff] %vm8480_vm3, %v8462_v13 }
 0xb4a   :  { %v8463_v41 = vpop.f32.mrf.mxu0 }
 0xb4b   :  { %v8464_v62 = vadd.f32 %v8463_v41, %v19476_v59 }
 0xb4d   :  { %8586 = vst.msk [vmem:[%s19604_s6 + $0x348] sm:$0xff] %vm8480_vm3, %v8464_v62 }
 0xb52   :  { %v8466_v27 = vpop.f32.mrf.mxu0 }
 0xb53   :  { %v8467_v43 = vadd.f32 %v8466_v27, %v19485_v17 }
 0xb55   :  { %8587 = vst.msk [vmem:[%s19604_s6 + $0x350] sm:$0xff] %vm8480_vm3, %v8467_v43 }
 0xb5a   :  { %v8468_v37 = vpop.f32.mrf.mxu0 }
 0xb5b   :  { %v8469_v16 = vadd.f32 %v8468_v37, %v8181_v36 }
 0xb5d   :  { %8588 = vst.msk [vmem:[%s19604_s6 + $0x358] sm:$0xff] %vm8480_vm3, %v8469_v16 }
 0xb62   :  { %v8471_v60 = vpop.f32.mrf.mxu0 }
 0xb63   :  { %v8472_v42 = vadd.f32 %v8471_v60, %v8184_v35 }
 0xb65   :  { %8589 = vst.msk [vmem:[%s19604_s6 + $0x360] sm:$0xff] %vm8480_vm3, %v8472_v42 }
 0xb6a   :  { %v8473_v49 = vpop.f32.mrf.mxu0 }
 0xb6b   :  { %v8474_v46 = vadd.f32 %v8473_v49, %v8186_v32 }
 0xb6d   :  { %8590 = vst.msk [vmem:[%s19604_s6 + $0x368] sm:$0xff] %vm8480_vm3, %v8474_v46 }
 0xb72   :  { %v8476_v18 = vpop.f32.mrf.mxu0 }
 0xb73   :  { %v8477_v57 = vadd.f32 %v8476_v18, %v8189_v51 }
 0xb75   :  { %8591 = vst.msk [vmem:[%s19604_s6 + $0x370] sm:$0xff] %vm8480_vm3, %v8477_v57 }
 0xb7a   :  { %v8478_v53 = vpop.f32.mrf.mxu0 }

</bundles_post_ra>
